<compile_context>
chip_gen: v6e
topology: v6e:2x2x1
jax: 0.10.0
libtpu: 0.0.40
codegen_flags: <defaults>
</compile_context>

<pallas_src>
import functools
import math

import jax
import jax.numpy as jnp
from jax.experimental import pallas as pl
from jax.experimental.pallas import tpu as pltpu


_NT_DIMS = (((1,), (1,)), ((), ()))   # A @ B^T   (q . k contraction over d_k)
_NN_DIMS = (((1,), (0,)), ((), ()))   # A @ B     (p . v contraction over tk)


# ---------------------------------------------------------------------------
# Kernel 1: fused Q/K/V input projections, lane-dense bf16 output.
# ---------------------------------------------------------------------------
def _qkv_proj_kernel(q_ref, k_ref, v_ref, wq_ref, wk_ref, wv_ref,
                     qo_ref, ko_ref, vo_ref, *, scale):
    # x refs: (1, tm, E) f32; w refs: (E, E) bf16 (already (in, out) layout);
    # outputs: (1, tm, E) bf16, lane-dense (heads concatenated along E).
    xq = q_ref[0].astype(jnp.bfloat16)
    xk = k_ref[0].astype(jnp.bfloat16)
    xv = v_ref[0].astype(jnp.bfloat16)

    # Full-width matmuls: contraction depth E, output width E.  The 1/sqrt(d_k)
    # softmax scale is folded into Q here instead of scaling the (S, S) scores.
    qp = jnp.dot(xq, wq_ref[...], preferred_element_type=jnp.float32) * scale
    kp = jnp.dot(xk, wk_ref[...], preferred_element_type=jnp.float32)
    vp = jnp.dot(xv, wv_ref[...], preferred_element_type=jnp.float32)

    qo_ref[0] = qp.astype(jnp.bfloat16)
    ko_ref[0] = kp.astype(jnp.bfloat16)
    vo_ref[0] = vp.astype(jnp.bfloat16)


# ---------------------------------------------------------------------------
# Kernel 2: flash attention over kv tiles + fused output projection.
# ---------------------------------------------------------------------------
def _flash_attn_kernel(q_ref, k_ref, v_ref, wo_ref, o_ref,
                       m_sc, l_sc, acc_sc, *, num_heads, d_k, single_kv):
    q = q_ref[0]                    # (tq, E) bf16, pre-scaled, heads along lanes
    k = k_ref[0]                    # (tk, E) bf16
    v = v_ref[0]                    # (tk, E) bf16

    # TODO(synk): optional attention mask (mask=None path here) and attention
    # dropout (identity in eval mode) would be applied to the probabilities p.

    if single_kv:
        # Whole kv sequence in one tile: plain per-head softmax, no online
        # rescale work.  Only one (tq, tk) f32 score tile is live at a time.
        for h in range(num_heads):
            sl = slice(h * d_k, (h + 1) * d_k)
            s = jax.lax.dot_general(q[:, sl], k[:, sl], _NT_DIMS,
                                    preferred_element_type=jnp.float32)
            m = jnp.max(s, axis=-1, keepdims=True)
            p = jnp.exp(s - m)
            l = jnp.sum(p, axis=-1, keepdims=True)
            pv = jax.lax.dot_general(p.astype(jnp.bfloat16), v[:, sl], _NN_DIMS,
                                     preferred_element_type=jnp.float32)
            acc_sc[:, sl] = pv * pl.reciprocal(l, approx=True)
        # Fused output projection: single (tq, E) @ (E, E) matmul (K = E),
        # stored into a lane-dense (tq, E) output block.
        o_ref[0] = jnp.dot(acc_sc[...].astype(jnp.bfloat16), wo_ref[...],
                           preferred_element_type=jnp.float32).astype(o_ref.dtype)
    else:
        ki = pl.program_id(2)

        @pl.when(ki == 0)
        def _():
            m_sc[...] = jnp.full_like(m_sc, -jnp.inf)
            l_sc[...] = jnp.zeros_like(l_sc)
            acc_sc[...] = jnp.zeros_like(acc_sc)

        for h in range(num_heads):
            sl = slice(h * d_k, (h + 1) * d_k)
            s = jax.lax.dot_general(q[:, sl], k[:, sl], _NT_DIMS,
                                    preferred_element_type=jnp.float32)
            m_prev = m_sc[h]                                   # (tq, 1)
            m_new = jnp.maximum(m_prev, jnp.max(s, axis=-1, keepdims=True))
            alpha = jnp.exp(m_prev - m_new)
            p = jnp.exp(s - m_new)
            l_sc[h] = alpha * l_sc[h] + jnp.sum(p, axis=-1, keepdims=True)
            pv = jax.lax.dot_general(p.astype(jnp.bfloat16), v[:, sl], _NN_DIMS,
                                     preferred_element_type=jnp.float32)
            acc_sc[:, sl] = alpha * acc_sc[:, sl] + pv
            m_sc[h] = m_new

        @pl.when(ki == pl.num_programs(2) - 1)
        def _():
            # Normalize each head's lane chunk, then one full-depth matmul with
            # W_o into the lane-dense (tq, E) output block.
            for h in range(num_heads):
                sl = slice(h * d_k, (h + 1) * d_k)
                acc_sc[:, sl] = acc_sc[:, sl] * pl.reciprocal(l_sc[h], approx=True)
            o_ref[0] = jnp.dot(acc_sc[...].astype(jnp.bfloat16), wo_ref[...],
                               preferred_element_type=jnp.float32).astype(o_ref.dtype)


# ---------------------------------------------------------------------------
# Tile selection (kept modest so per-step footprint fits v5e/v6e/v7x VMEM).
# ---------------------------------------------------------------------------
def _pick_seq_tile(s, candidates=(256, 128)):
    for t in candidates:
        if s % t == 0:
            return t
    return s  # TODO(synk): pad ragged sequence lengths instead of one full-S block


def _pick_attn_tiles(s, e):
    tq = _pick_seq_tile(s, (256, 128))
    budget = 10 * 1024 * 1024
    for tk in (s, 2048, 1024, 512, 256, 128):
        if tk <= s and s % tk == 0:
            foot = (tq * tk * 4          # live f32 score tile (one head at a time)
                    + 4 * tk * e * 2     # double-buffered bf16 K and V blocks
                    + 2 * tq * e * 2     # double-buffered bf16 Q block
                    + 2 * tq * e * 4     # double-buffered f32 output block
                    + tq * e * 4         # f32 accumulator scratch
                    + e * e * 2)         # resident bf16 W_o
            if foot <= budget:
                return tq, tk
    return tq, _pick_seq_tile(s, (128,))


# ---------------------------------------------------------------------------
# Wrapper
# ---------------------------------------------------------------------------
@functools.partial(jax.jit, static_argnames=("num_heads",))
def multi_head_attention(q, k, v, wq_t, wk_t, wv_t, wo_t, *, num_heads):
    """q, k, v: (B, S, E) f32.  w*_t: (E, E) transposed PyTorch Linear weights,
    i.e. y = x @ w_t matches PyTorch y = x @ W.T.  mask=None, eval mode."""
    B, S, E = q.shape
    # TODO(synk): cross-attention with different q / kv sequence lengths.
    assert k.shape == q.shape and v.shape == q.shape
    assert E % num_heads == 0
    H = num_heads
    d_k = E // H
    scale = 1.0 / math.sqrt(d_k)

    # Pre-cast all weights to bf16 once in the wrapper (halves weight DMA bytes,
    # no per-step casts inside the kernels).
    wq_b = wq_t.astype(jnp.bfloat16)
    wk_b = wk_t.astype(jnp.bfloat16)
    wv_b = wv_t.astype(jnp.bfloat16)
    wo_b = wo_t.astype(jnp.bfloat16)

    # ----- projections: (B, S, E) f32 -> (B, S, E) bf16, lane-dense ----------
    tm = _pick_seq_tile(S)
    n_s = S // tm

    x_spec = pl.BlockSpec((1, tm, E), lambda b, i: (b, i, 0))
    w_spec = pl.BlockSpec((E, E), lambda b, i: (0, 0))       # constant -> fetched once
    p_spec = pl.BlockSpec((1, tm, E), lambda b, i: (b, i, 0))
    proj_shape = jax.ShapeDtypeStruct((B, S, E), jnp.bfloat16)

    qp, kp, vp = pl.pallas_call(
        functools.partial(_qkv_proj_kernel, scale=scale),
        out_shape=(proj_shape, proj_shape, proj_shape),
        grid_spec=pltpu.PrefetchScalarGridSpec(
            num_scalar_prefetch=0,
            grid=(B, n_s),
            in_specs=[x_spec, x_spec, x_spec, w_spec, w_spec, w_spec],
            out_specs=(p_spec, p_spec, p_spec),
        ),
        compiler_params=pltpu.CompilerParams(
            dimension_semantics=("parallel", "parallel"),
            vmem_limit_bytes=48 * 1024 * 1024),
    )(q, k, v, wq_b, wk_b, wv_b)

    # ----- flash attention + fused output projection --------------------------
    tq, tk = _pick_attn_tiles(S, E)
    n_q = S // tq
    n_k = S // tk

    q_spec = pl.BlockSpec((1, tq, E), lambda b, qi, ki: (b, qi, 0))
    kv_spec = pl.BlockSpec((1, tk, E), lambda b, qi, ki: (b, ki, 0))
    wo_spec = pl.BlockSpec((E, E), lambda b, qi, ki: (0, 0))
    o_spec = pl.BlockSpec((1, tq, E), lambda b, qi, ki: (b, qi, 0))

    out = pl.pallas_call(
        functools.partial(_flash_attn_kernel, num_heads=H, d_k=d_k,
                          single_kv=(n_k == 1)),
        out_shape=jax.ShapeDtypeStruct((B, S, E), q.dtype),
        grid_spec=pltpu.PrefetchScalarGridSpec(
            num_scalar_prefetch=0,
            grid=(B, n_q, n_k),
            in_specs=[q_spec, kv_spec, kv_spec, wo_spec],
            out_specs=o_spec,
            scratch_shapes=[
                pltpu.VMEM((H, tq, 1), jnp.float32),   # running max m (per head)
                pltpu.VMEM((H, tq, 1), jnp.float32),   # running denom l (per head)
                pltpu.VMEM((tq, E), jnp.float32),      # running numerator, lane-dense
            ],
        ),
        compiler_params=pltpu.CompilerParams(
            dimension_semantics=("parallel", "parallel", "arbitrary"),
            vmem_limit_bytes=48 * 1024 * 1024),
    )(qp, kp, vp, wo_b)
    return out


# ---------------------------------------------------------------------------
# Pure-JAX f32 reference mirroring the PyTorch forward (mask=None, eval mode).
# ---------------------------------------------------------------------------
def _reference(q, k, v, wq_t, wk_t, wv_t, wo_t, num_heads):
    B, S, E = q.shape
    d_k = E // num_heads
    Q = (q @ wq_t).reshape(B, S, num_heads, d_k).transpose(0, 2, 1, 3)
    K = (k @ wk_t).reshape(B, S, num_heads, d_k).transpose(0, 2, 1, 3)
    V = (v @ wv_t).reshape(B, S, num_heads, d_k).transpose(0, 2, 1, 3)
    scores = jnp.einsum("bhqd,bhkd->bhqk", Q, K) / math.sqrt(d_k)
    p = jax.nn.softmax(scores, axis=-1)
    x = jnp.einsum("bhqk,bhkd->bhqd", p, V)
    x = x.transpose(0, 2, 1, 3).reshape(B, S, E)
    return x @ wo_t


if __name__ == "__main__":
    # batch=2, seq=256, embed_dim=128, heads=4 (d_k=32): lane-dense everywhere,
    # projection grid (2,1), attention grid (2,1,1) with a single kv tile.
    B, S, E, H = 2, 256, 128, 4

    key = jax.random.PRNGKey(0)
    kq, kk, kv, k1, k2, k3, k4 = jax.random.split(key, 7)

    q = jax.random.normal(kq, (B, S, E), jnp.float32)
    k = jax.random.normal(kk, (B, S, E), jnp.float32)
    v = jax.random.normal(kv, (B, S, E), jnp.float32)

    # PyTorch nn.Linear weights are (out, in); build those, then transpose to
    # (in, out) for the kernel (y = x @ W.T).
    bound = 1.0 / math.sqrt(E)
    wq = jax.random.uniform(k1, (E, E), jnp.float32, -bound, bound)
    wk = jax.random.uniform(k2, (E, E), jnp.float32, -bound, bound)
    wv = jax.random.uniform(k3, (E, E), jnp.float32, -bound, bound)
    wo = jax.random.uniform(k4, (E, E), jnp.float32, -bound, bound)
    wq_t, wk_t, wv_t, wo_t = wq.T, wk.T, wv.T, wo.T

    out = multi_head_attention(q, k, v, wq_t, wk_t, wv_t, wo_t, num_heads=H)
    out = jax.block_until_ready(out)

    ref = _reference(q, k, v, wq_t, wk_t, wv_t, wo_t, H)
    assert out.shape == (B, S, E)
    max_err = float(jnp.max(jnp.abs(out - ref)))
    # Kernel feeds the MXU bf16 (f32 accumulate) and uses the EUP approx
    # reciprocal, so compare against the f32 reference at bf16-level tolerance.
    assert jnp.allclose(out, ref, atol=2e-2, rtol=2e-2), (
        f"mismatch vs reference (max abs err {max_err})")
    print("KERNEL_OK")
</pallas_src>

<mosaic_0001>
module attributes {stable_mosaic.version = 11 : i64} {
  func.func @_qkv_proj_kernel(%arg0: i32, %arg1: i32, %arg2: memref<1x256x128xf32, #tpu.memory_space<vmem>>, %arg3: memref<1x256x128xf32, #tpu.memory_space<vmem>>, %arg4: memref<1x256x128xf32, #tpu.memory_space<vmem>>, %arg5: memref<128x128xbf16, #tpu.memory_space<vmem>>, %arg6: memref<128x128xbf16, #tpu.memory_space<vmem>>, %arg7: memref<128x128xbf16, #tpu.memory_space<vmem>>, %arg8: memref<1x256x128xbf16, #tpu.memory_space<vmem>>, %arg9: memref<1x256x128xbf16, #tpu.memory_space<vmem>>, %arg10: memref<1x256x128xbf16, #tpu.memory_space<vmem>>) attributes {dimension_semantics = [#tpu.dimension_semantics<parallel>, #tpu.dimension_semantics<parallel>], iteration_bounds = array<i64: 2, 1>, scalar_prefetch = 0 : i64, scratch_operands = 0 : i64, tpu.core_type = #tpu.core_type<tc>, window_params = [{transform_indices = @transform_0, window_bounds = array<i64: 1, 256, 128>}, {transform_indices = @transform_1, window_bounds = array<i64: 1, 256, 128>}, {transform_indices = @transform_2, window_bounds = array<i64: 1, 256, 128>}, {pipeline_mode = #tpu.pipeline_mode<synchronous>, transform_indices = @transform_3, window_bounds = array<i64: 128, 128>}, {pipeline_mode = #tpu.pipeline_mode<synchronous>, transform_indices = @transform_4, window_bounds = array<i64: 128, 128>}, {pipeline_mode = #tpu.pipeline_mode<synchronous>, transform_indices = @transform_5, window_bounds = array<i64: 128, 128>}, {transform_indices = @transform_6, window_bounds = array<i64: 1, 256, 128>}, {transform_indices = @transform_7, window_bounds = array<i64: 1, 256, 128>}, {transform_indices = @transform_8, window_bounds = array<i64: 1, 256, 128>}]} {
    %c0 = arith.constant 0 : index
    %c0_0 = arith.constant 0 : index
    %c0_1 = arith.constant 0 : index
    %0 = vector.load %arg2[%c0, %c0_0, %c0_1] : memref<1x256x128xf32, #tpu.memory_space<vmem>>, vector<1x256x128xf32>
    %1 = vector.shape_cast %0 : vector<1x256x128xf32> to vector<256x128xf32>
    %2 = arith.truncf %1 : vector<256x128xf32> to vector<256x128xbf16>
    %c0_2 = arith.constant 0 : index
    %c0_3 = arith.constant 0 : index
    %c0_4 = arith.constant 0 : index
    %3 = vector.load %arg3[%c0_2, %c0_3, %c0_4] : memref<1x256x128xf32, #tpu.memory_space<vmem>>, vector<1x256x128xf32>
    %4 = vector.shape_cast %3 : vector<1x256x128xf32> to vector<256x128xf32>
    %5 = arith.truncf %4 : vector<256x128xf32> to vector<256x128xbf16>
    %c0_5 = arith.constant 0 : index
    %c0_6 = arith.constant 0 : index
    %c0_7 = arith.constant 0 : index
    %6 = vector.load %arg4[%c0_5, %c0_6, %c0_7] : memref<1x256x128xf32, #tpu.memory_space<vmem>>, vector<1x256x128xf32>
    %7 = vector.shape_cast %6 : vector<1x256x128xf32> to vector<256x128xf32>
    %8 = arith.truncf %7 : vector<256x128xf32> to vector<256x128xbf16>
    %c0_8 = arith.constant 0 : index
    %c0_9 = arith.constant 0 : index
    %9 = vector.load %arg5[%c0_8, %c0_9] : memref<128x128xbf16, #tpu.memory_space<vmem>>, vector<128x128xbf16>
    %cst = arith.constant dense<0.000000e+00> : vector<256x128xf32>
    %10 = tpu.matmul %2, %9, %cst {dimension_numbers = #tpu.dot_dimension_numbers<[1], [0], [0], [1], [0, 0, 1, 1], [], []>} : vector<256x128xbf16>, vector<128x128xbf16>, vector<256x128xf32> -> vector<256x128xf32>
    %cst_10 = arith.constant 0.176776692 : f32
    %11 = vector.broadcast %cst_10 : f32 to vector<256x128xf32>
    %12 = arith.mulf %10, %11 : vector<256x128xf32>
    %c0_11 = arith.constant 0 : index
    %c0_12 = arith.constant 0 : index
    %13 = vector.load %arg6[%c0_11, %c0_12] : memref<128x128xbf16, #tpu.memory_space<vmem>>, vector<128x128xbf16>
    %cst_13 = arith.constant dense<0.000000e+00> : vector<256x128xf32>
    %14 = tpu.matmul %5, %13, %cst_13 {dimension_numbers = #tpu.dot_dimension_numbers<[1], [0], [0], [1], [0, 0, 1, 1], [], []>} : vector<256x128xbf16>, vector<128x128xbf16>, vector<256x128xf32> -> vector<256x128xf32>
    %c0_14 = arith.constant 0 : index
    %c0_15 = arith.constant 0 : index
    %15 = vector.load %arg7[%c0_14, %c0_15] : memref<128x128xbf16, #tpu.memory_space<vmem>>, vector<128x128xbf16>
    %cst_16 = arith.constant dense<0.000000e+00> : vector<256x128xf32>
    %16 = tpu.matmul %8, %15, %cst_16 {dimension_numbers = #tpu.dot_dimension_numbers<[1], [0], [0], [1], [0, 0, 1, 1], [], []>} : vector<256x128xbf16>, vector<128x128xbf16>, vector<256x128xf32> -> vector<256x128xf32>
    %17 = arith.truncf %12 : vector<256x128xf32> to vector<256x128xbf16>
    %c0_17 = arith.constant 0 : index
    %c0_18 = arith.constant 0 : index
    %c0_19 = arith.constant 0 : index
    %18 = vector.load %arg8[%c0_17, %c0_18, %c0_19] : memref<1x256x128xbf16, #tpu.memory_space<vmem>>, vector<1x256x128xbf16>
    %19 = vector.shape_cast %18 : vector<1x256x128xbf16> to vector<256x128xbf16>
    %20 = vector.shape_cast %17 : vector<256x128xbf16> to vector<1x256x128xbf16>
    tpu.vector_store %arg8[%c0_17, %c0_18, %c0_19], %20 {strides = array<i32>} : memref<1x256x128xbf16, #tpu.memory_space<vmem>>, vector<1x256x128xbf16>,
    %21 = arith.truncf %14 : vector<256x128xf32> to vector<256x128xbf16>
    %c0_20 = arith.constant 0 : index
    %c0_21 = arith.constant 0 : index
    %c0_22 = arith.constant 0 : index
    %22 = vector.load %arg9[%c0_20, %c0_21, %c0_22] : memref<1x256x128xbf16, #tpu.memory_space<vmem>>, vector<1x256x128xbf16>
    %23 = vector.shape_cast %22 : vector<1x256x128xbf16> to vector<256x128xbf16>
    %24 = vector.shape_cast %21 : vector<256x128xbf16> to vector<1x256x128xbf16>
    tpu.vector_store %arg9[%c0_20, %c0_21, %c0_22], %24 {strides = array<i32>} : memref<1x256x128xbf16, #tpu.memory_space<vmem>>, vector<1x256x128xbf16>,
    %25 = arith.truncf %16 : vector<256x128xf32> to vector<256x128xbf16>
    %c0_23 = arith.constant 0 : index
    %c0_24 = arith.constant 0 : index
    %c0_25 = arith.constant 0 : index
    %26 = vector.load %arg10[%c0_23, %c0_24, %c0_25] : memref<1x256x128xbf16, #tpu.memory_space<vmem>>, vector<1x256x128xbf16>
    %27 = vector.shape_cast %26 : vector<1x256x128xbf16> to vector<256x128xbf16>
    %28 = vector.shape_cast %25 : vector<256x128xbf16> to vector<1x256x128xbf16>
    tpu.vector_store %arg10[%c0_23, %c0_24, %c0_25], %28 {strides = array<i32>} : memref<1x256x128xbf16, #tpu.memory_space<vmem>>, vector<1x256x128xbf16>,
    return
  }
  func.func @transform_0(%arg0: i32, %arg1: i32) -> (i32, i32, i32) {
    %c0_i32 = arith.constant 0 : i32
    %c0_i32_0 = arith.constant 0 : i32
    return %arg0, %arg1, %c0_i32 : i32, i32, i32
  }
  func.func @transform_1(%arg0: i32, %arg1: i32) -> (i32, i32, i32) {
    %c0_i32 = arith.constant 0 : i32
    %c0_i32_0 = arith.constant 0 : i32
    return %arg0, %arg1, %c0_i32 : i32, i32, i32
  }
  func.func @transform_2(%arg0: i32, %arg1: i32) -> (i32, i32, i32) {
    %c0_i32 = arith.constant 0 : i32
    %c0_i32_0 = arith.constant 0 : i32
    return %arg0, %arg1, %c0_i32 : i32, i32, i32
  }
  func.func @transform_3(%arg0: i32, %arg1: i32) -> (i32, i32) {
    %c0_i32 = arith.constant 0 : i32
    %c0_i32_0 = arith.constant 0 : i32
    %c0_i32_1 = arith.constant 0 : i32
    return %c0_i32, %c0_i32_0 : i32, i32
  }
  func.func @transform_4(%arg0: i32, %arg1: i32) -> (i32, i32) {
    %c0_i32 = arith.constant 0 : i32
    %c0_i32_0 = arith.constant 0 : i32
    %c0_i32_1 = arith.constant 0 : i32
    return %c0_i32, %c0_i32_0 : i32, i32
  }
  func.func @transform_5(%arg0: i32, %arg1: i32) -> (i32, i32) {
    %c0_i32 = arith.constant 0 : i32
    %c0_i32_0 = arith.constant 0 : i32
    %c0_i32_1 = arith.constant 0 : i32
    return %c0_i32, %c0_i32_0 : i32, i32
  }
  func.func @transform_6(%arg0: i32, %arg1: i32) -> (i32, i32, i32) {
    %c0_i32 = arith.constant 0 : i32
    %c0_i32_0 = arith.constant 0 : i32
    return %arg0, %arg1, %c0_i32 : i32, i32, i32
  }
  func.func @transform_7(%arg0: i32, %arg1: i32) -> (i32, i32, i32) {
    %c0_i32 = arith.constant 0 : i32
    %c0_i32_0 = arith.constant 0 : i32
    return %arg0, %arg1, %c0_i32 : i32, i32, i32
  }
  func.func @transform_8(%arg0: i32, %arg1: i32) -> (i32, i32, i32) {
    %c0_i32 = arith.constant 0 : i32
    %c0_i32_0 = arith.constant 0 : i32
    return %arg0, %arg1, %c0_i32 : i32, i32, i32
  }
}

module attributes {stable_mosaic.version = 11 : i64} {
  func.func @_flash_attn_kernel(%arg0: i32, %arg1: i32, %arg2: i32, %arg3: memref<1x256x128xbf16, #tpu.memory_space<vmem>>, %arg4: memref<1x256x128xbf16, #tpu.memory_space<vmem>>, %arg5: memref<1x256x128xbf16, #tpu.memory_space<vmem>>, %arg6: memref<128x128xbf16, #tpu.memory_space<vmem>>, %arg7: memref<1x256x128xf32, #tpu.memory_space<vmem>>, %arg8: memref<4x256x1xf32, #tpu.memory_space<vmem>>, %arg9: memref<4x256x1xf32, #tpu.memory_space<vmem>>, %arg10: memref<256x128xf32, #tpu.memory_space<vmem>>) attributes {dimension_semantics = [#tpu.dimension_semantics<parallel>, #tpu.dimension_semantics<parallel>, #tpu.dimension_semantics<arbitrary>], iteration_bounds = array<i64: 2, 1, 1>, scalar_prefetch = 0 : i64, scratch_operands = 3 : i64, tpu.core_type = #tpu.core_type<tc>, window_params = [{transform_indices = @transform_0, window_bounds = array<i64: 1, 256, 128>}, {transform_indices = @transform_1, window_bounds = array<i64: 1, 256, 128>}, {transform_indices = @transform_2, window_bounds = array<i64: 1, 256, 128>}, {pipeline_mode = #tpu.pipeline_mode<synchronous>, transform_indices = @transform_3, window_bounds = array<i64: 128, 128>}, {transform_indices = @transform_4, window_bounds = array<i64: 1, 256, 128>}]} {
    %c0 = arith.constant 0 : index
    %c0_0 = arith.constant 0 : index
    %c0_1 = arith.constant 0 : index
    %0 = vector.load %arg3[%c0, %c0_0, %c0_1] : memref<1x256x128xbf16, #tpu.memory_space<vmem>>, vector<1x256x128xbf16>
    %1 = vector.shape_cast %0 : vector<1x256x128xbf16> to vector<256x128xbf16>
    %c0_2 = arith.constant 0 : index
    %c0_3 = arith.constant 0 : index
    %c0_4 = arith.constant 0 : index
    %2 = vector.load %arg4[%c0_2, %c0_3, %c0_4] : memref<1x256x128xbf16, #tpu.memory_space<vmem>>, vector<1x256x128xbf16>
    %3 = vector.shape_cast %2 : vector<1x256x128xbf16> to vector<256x128xbf16>
    %c0_5 = arith.constant 0 : index
    %c0_6 = arith.constant 0 : index
    %c0_7 = arith.constant 0 : index
    %4 = vector.load %arg5[%c0_5, %c0_6, %c0_7] : memref<1x256x128xbf16, #tpu.memory_space<vmem>>, vector<1x256x128xbf16>
    %5 = vector.shape_cast %4 : vector<1x256x128xbf16> to vector<256x128xbf16>
    %6 = vector.extract_strided_slice %1 {offsets = [0, 0], sizes = [256, 32], strides = [1, 1]} : vector<256x128xbf16> to vector<256x32xbf16>
    %7 = vector.extract_strided_slice %3 {offsets = [0, 0], sizes = [256, 32], strides = [1, 1]} : vector<256x128xbf16> to vector<256x32xbf16>
    %cst = arith.constant dense<0.000000e+00> : vector<256x256xf32>
    %8 = tpu.matmul %6, %7, %cst {dimension_numbers = #tpu.dot_dimension_numbers<[1], [1], [0], [0], [0, 0, 1, 0], [], []>} : vector<256x32xbf16>, vector<256x32xbf16>, vector<256x256xf32> -> vector<256x256xf32>
    %cst_8 = arith.constant dense<0xFF800000> : vector<256xf32>
    %9 = vector.multi_reduction <maximumf>, %8, %cst_8 [1] : vector<256x256xf32> to vector<256xf32>
    %10 = vector.shape_cast %9 : vector<256xf32> to vector<256x1xf32>
    %11 = vector.broadcast %10 : vector<256x1xf32> to vector<256x256xf32>
    %12 = arith.subf %8, %11 : vector<256x256xf32>
    %13 = math.exp %12 : vector<256x256xf32>
    %cst_9 = arith.constant dense<0.000000e+00> : vector<256xf32>
    %14 = vector.multi_reduction <add>, %13, %cst_9 [1] : vector<256x256xf32> to vector<256xf32>
    %15 = vector.shape_cast %14 : vector<256xf32> to vector<256x1xf32>
    %16 = arith.truncf %13 : vector<256x256xf32> to vector<256x256xbf16>
    %17 = vector.extract_strided_slice %5 {offsets = [0, 0], sizes = [256, 32], strides = [1, 1]} : vector<256x128xbf16> to vector<256x32xbf16>
    %cst_10 = arith.constant dense<0.000000e+00> : vector<256x32xf32>
    %18 = tpu.matmul %16, %17, %cst_10 {dimension_numbers = #tpu.dot_dimension_numbers<[1], [0], [0], [1], [0, 0, 1, 1], [], []>} : vector<256x256xbf16>, vector<256x32xbf16>, vector<256x32xf32> -> vector<256x32xf32>
    %19 = tpu.reciprocal %15 {approx = true} : vector<256x1xf32> -> vector<256x1xf32>
    %20 = vector.broadcast %19 : vector<256x1xf32> to vector<256x32xf32>
    %21 = arith.mulf %18, %20 : vector<256x32xf32>
    %c0_11 = arith.constant 0 : index
    %c0_12 = arith.constant 0 : index
    %22 = vector.load %arg10[%c0_11, %c0_12] : memref<256x128xf32, #tpu.memory_space<vmem>>, vector<256x32xf32>
    tpu.vector_store %arg10[%c0_11, %c0_12], %21 {strides = array<i32>} : memref<256x128xf32, #tpu.memory_space<vmem>>, vector<256x32xf32>,
    %23 = vector.extract_strided_slice %1 {offsets = [0, 32], sizes = [256, 32], strides = [1, 1]} : vector<256x128xbf16> to vector<256x32xbf16>
    %24 = vector.extract_strided_slice %3 {offsets = [0, 32], sizes = [256, 32], strides = [1, 1]} : vector<256x128xbf16> to vector<256x32xbf16>
    %cst_13 = arith.constant dense<0.000000e+00> : vector<256x256xf32>
    %25 = tpu.matmul %23, %24, %cst_13 {dimension_numbers = #tpu.dot_dimension_numbers<[1], [1], [0], [0], [0, 0, 1, 0], [], []>} : vector<256x32xbf16>, vector<256x32xbf16>, vector<256x256xf32> -> vector<256x256xf32>
    %cst_14 = arith.constant dense<0xFF800000> : vector<256xf32>
    %26 = vector.multi_reduction <maximumf>, %25, %cst_14 [1] : vector<256x256xf32> to vector<256xf32>
    %27 = vector.shape_cast %26 : vector<256xf32> to vector<256x1xf32>
    %28 = vector.broadcast %27 : vector<256x1xf32> to vector<256x256xf32>
    %29 = arith.subf %25, %28 : vector<256x256xf32>
    %30 = math.exp %29 : vector<256x256xf32>
    %cst_15 = arith.constant dense<0.000000e+00> : vector<256xf32>
    %31 = vector.multi_reduction <add>, %30, %cst_15 [1] : vector<256x256xf32> to vector<256xf32>
    %32 = vector.shape_cast %31 : vector<256xf32> to vector<256x1xf32>
    %33 = arith.truncf %30 : vector<256x256xf32> to vector<256x256xbf16>
    %34 = vector.extract_strided_slice %5 {offsets = [0, 32], sizes = [256, 32], strides = [1, 1]} : vector<256x128xbf16> to vector<256x32xbf16>
    %cst_16 = arith.constant dense<0.000000e+00> : vector<256x32xf32>
    %35 = tpu.matmul %33, %34, %cst_16 {dimension_numbers = #tpu.dot_dimension_numbers<[1], [0], [0], [1], [0, 0, 1, 1], [], []>} : vector<256x256xbf16>, vector<256x32xbf16>, vector<256x32xf32> -> vector<256x32xf32>
    %36 = tpu.reciprocal %32 {approx = true} : vector<256x1xf32> -> vector<256x1xf32>
    %37 = vector.broadcast %36 : vector<256x1xf32> to vector<256x32xf32>
    %38 = arith.mulf %35, %37 : vector<256x32xf32>
    %c0_17 = arith.constant 0 : index
    %c32 = arith.constant 32 : index
    %39 = vector.load %arg10[%c0_17, %c32] : memref<256x128xf32, #tpu.memory_space<vmem>>, vector<256x32xf32>
    tpu.vector_store %arg10[%c0_17, %c32], %38 {strides = array<i32>} : memref<256x128xf32, #tpu.memory_space<vmem>>, vector<256x32xf32>,
    %40 = vector.extract_strided_slice %1 {offsets = [0, 64], sizes = [256, 32], strides = [1, 1]} : vector<256x128xbf16> to vector<256x32xbf16>
    %41 = vector.extract_strided_slice %3 {offsets = [0, 64], sizes = [256, 32], strides = [1, 1]} : vector<256x128xbf16> to vector<256x32xbf16>
    %cst_18 = arith.constant dense<0.000000e+00> : vector<256x256xf32>
    %42 = tpu.matmul %40, %41, %cst_18 {dimension_numbers = #tpu.dot_dimension_numbers<[1], [1], [0], [0], [0, 0, 1, 0], [], []>} : vector<256x32xbf16>, vector<256x32xbf16>, vector<256x256xf32> -> vector<256x256xf32>
    %cst_19 = arith.constant dense<0xFF800000> : vector<256xf32>
    %43 = vector.multi_reduction <maximumf>, %42, %cst_19 [1] : vector<256x256xf32> to vector<256xf32>
    %44 = vector.shape_cast %43 : vector<256xf32> to vector<256x1xf32>
    %45 = vector.broadcast %44 : vector<256x1xf32> to vector<256x256xf32>
    %46 = arith.subf %42, %45 : vector<256x256xf32>
    %47 = math.exp %46 : vector<256x256xf32>
    %cst_20 = arith.constant dense<0.000000e+00> : vector<256xf32>
    %48 = vector.multi_reduction <add>, %47, %cst_20 [1] : vector<256x256xf32> to vector<256xf32>
    %49 = vector.shape_cast %48 : vector<256xf32> to vector<256x1xf32>
    %50 = arith.truncf %47 : vector<256x256xf32> to vector<256x256xbf16>
    %51 = vector.extract_strided_slice %5 {offsets = [0, 64], sizes = [256, 32], strides = [1, 1]} : vector<256x128xbf16> to vector<256x32xbf16>
    %cst_21 = arith.constant dense<0.000000e+00> : vector<256x32xf32>
    %52 = tpu.matmul %50, %51, %cst_21 {dimension_numbers = #tpu.dot_dimension_numbers<[1], [0], [0], [1], [0, 0, 1, 1], [], []>} : vector<256x256xbf16>, vector<256x32xbf16>, vector<256x32xf32> -> vector<256x32xf32>
    %53 = tpu.reciprocal %49 {approx = true} : vector<256x1xf32> -> vector<256x1xf32>
    %54 = vector.broadcast %53 : vector<256x1xf32> to vector<256x32xf32>
    %55 = arith.mulf %52, %54 : vector<256x32xf32>
    %c0_22 = arith.constant 0 : index
    %c64 = arith.constant 64 : index
    %56 = vector.load %arg10[%c0_22, %c64] : memref<256x128xf32, #tpu.memory_space<vmem>>, vector<256x32xf32>
    tpu.vector_store %arg10[%c0_22, %c64], %55 {strides = array<i32>} : memref<256x128xf32, #tpu.memory_space<vmem>>, vector<256x32xf32>,
    %57 = vector.extract_strided_slice %1 {offsets = [0, 96], sizes = [256, 32], strides = [1, 1]} : vector<256x128xbf16> to vector<256x32xbf16>
    %58 = vector.extract_strided_slice %3 {offsets = [0, 96], sizes = [256, 32], strides = [1, 1]} : vector<256x128xbf16> to vector<256x32xbf16>
    %cst_23 = arith.constant dense<0.000000e+00> : vector<256x256xf32>
    %59 = tpu.matmul %57, %58, %cst_23 {dimension_numbers = #tpu.dot_dimension_numbers<[1], [1], [0], [0], [0, 0, 1, 0], [], []>} : vector<256x32xbf16>, vector<256x32xbf16>, vector<256x256xf32> -> vector<256x256xf32>
    %cst_24 = arith.constant dense<0xFF800000> : vector<256xf32>
    %60 = vector.multi_reduction <maximumf>, %59, %cst_24 [1] : vector<256x256xf32> to vector<256xf32>
    %61 = vector.shape_cast %60 : vector<256xf32> to vector<256x1xf32>
    %62 = vector.broadcast %61 : vector<256x1xf32> to vector<256x256xf32>
    %63 = arith.subf %59, %62 : vector<256x256xf32>
    %64 = math.exp %63 : vector<256x256xf32>
    %cst_25 = arith.constant dense<0.000000e+00> : vector<256xf32>
    %65 = vector.multi_reduction <add>, %64, %cst_25 [1] : vector<256x256xf32> to vector<256xf32>
    %66 = vector.shape_cast %65 : vector<256xf32> to vector<256x1xf32>
    %67 = arith.truncf %64 : vector<256x256xf32> to vector<256x256xbf16>
    %68 = vector.extract_strided_slice %5 {offsets = [0, 96], sizes = [256, 32], strides = [1, 1]} : vector<256x128xbf16> to vector<256x32xbf16>
    %cst_26 = arith.constant dense<0.000000e+00> : vector<256x32xf32>
    %69 = tpu.matmul %67, %68, %cst_26 {dimension_numbers = #tpu.dot_dimension_numbers<[1], [0], [0], [1], [0, 0, 1, 1], [], []>} : vector<256x256xbf16>, vector<256x32xbf16>, vector<256x32xf32> -> vector<256x32xf32>
    %70 = tpu.reciprocal %66 {approx = true} : vector<256x1xf32> -> vector<256x1xf32>
    %71 = vector.broadcast %70 : vector<256x1xf32> to vector<256x32xf32>
    %72 = arith.mulf %69, %71 : vector<256x32xf32>
    %c0_27 = arith.constant 0 : index
    %c96 = arith.constant 96 : index
    %73 = vector.load %arg10[%c0_27, %c96] : memref<256x128xf32, #tpu.memory_space<vmem>>, vector<256x32xf32>
    tpu.vector_store %arg10[%c0_27, %c96], %72 {strides = array<i32>} : memref<256x128xf32, #tpu.memory_space<vmem>>, vector<256x32xf32>,
    %c0_28 = arith.constant 0 : index
    %c0_29 = arith.constant 0 : index
    %74 = vector.load %arg10[%c0_28, %c0_29] : memref<256x128xf32, #tpu.memory_space<vmem>>, vector<256x128xf32>
    %75 = arith.truncf %74 : vector<256x128xf32> to vector<256x128xbf16>
    %c0_30 = arith.constant 0 : index
    %c0_31 = arith.constant 0 : index
    %76 = vector.load %arg6[%c0_30, %c0_31] : memref<128x128xbf16, #tpu.memory_space<vmem>>, vector<128x128xbf16>
    %cst_32 = arith.constant dense<0.000000e+00> : vector<256x128xf32>
    %77 = tpu.matmul %75, %76, %cst_32 {dimension_numbers = #tpu.dot_dimension_numbers<[1], [0], [0], [1], [0, 0, 1, 1], [], []>} : vector<256x128xbf16>, vector<128x128xbf16>, vector<256x128xf32> -> vector<256x128xf32>
    %c0_33 = arith.constant 0 : index
    %c0_34 = arith.constant 0 : index
    %c0_35 = arith.constant 0 : index
    %78 = vector.load %arg7[%c0_33, %c0_34, %c0_35] : memref<1x256x128xf32, #tpu.memory_space<vmem>>, vector<1x256x128xf32>
    %79 = vector.shape_cast %78 : vector<1x256x128xf32> to vector<256x128xf32>
    %80 = vector.shape_cast %77 : vector<256x128xf32> to vector<1x256x128xf32>
    tpu.vector_store %arg7[%c0_33, %c0_34, %c0_35], %80 {strides = array<i32>} : memref<1x256x128xf32, #tpu.memory_space<vmem>>, vector<1x256x128xf32>,
    return
  }
  func.func @transform_0(%arg0: i32, %arg1: i32, %arg2: i32) -> (i32, i32, i32) {
    %c0_i32 = arith.constant 0 : i32
    %c0_i32_0 = arith.constant 0 : i32
    return %arg0, %arg1, %c0_i32 : i32, i32, i32
  }
  func.func @transform_1(%arg0: i32, %arg1: i32, %arg2: i32) -> (i32, i32, i32) {
    %c0_i32 = arith.constant 0 : i32
    %c0_i32_0 = arith.constant 0 : i32
    return %arg0, %arg2, %c0_i32 : i32, i32, i32
  }
  func.func @transform_2(%arg0: i32, %arg1: i32, %arg2: i32) -> (i32, i32, i32) {
    %c0_i32 = arith.constant 0 : i32
    %c0_i32_0 = arith.constant 0 : i32
    return %arg0, %arg2, %c0_i32 : i32, i32, i32
  }
  func.func @transform_3(%arg0: i32, %arg1: i32, %arg2: i32) -> (i32, i32) {
    %c0_i32 = arith.constant 0 : i32
    %c0_i32_0 = arith.constant 0 : i32
    %c0_i32_1 = arith.constant 0 : i32
    return %c0_i32, %c0_i32_0 : i32, i32
  }
  func.func @transform_4(%arg0: i32, %arg1: i32, %arg2: i32) -> (i32, i32, i32) {
    %c0_i32 = arith.constant 0 : i32
    %c0_i32_0 = arith.constant 0 : i32
    return %arg0, %arg1, %c0_i32 : i32, i32, i32
  }
}

</mosaic_0001>

<bundles_post_ra>
// kernel: multi_head_attention.2
= control target key start
LH: loop header
LB: loop body
LE: loop exit
PB: predicated region body
PF: predicated region fallthrough
CT: control target
= control target key end

     0   :  { %s3434_s0 = inlined_call_operand.vmem [shape: f32[2,256,128], index: 0, kind: input, shape index: {}]   ;;  %s3435_s1 = inlined_call_operand.hbm [shape: f32[2,256,128], index: 1, kind: input, shape index: {}]   ;;  %s3436_s2 = inlined_call_operand.hbm [shape: f32[2,256,128], index: 2, kind: input, shape index: {}]   ;;  %s3437_s3 = inlined_call_operand.vmem [shape: bf16[128,128], index: 3, kind: input, shape index: {}]   ;;  %s3438_s4 = inlined_call_operand.vmem [shape: bf16[128,128], index: 4, kind: input, shape index: {}]   ;;  %s3439_s5 = inlined_call_operand.vmem [shape: bf16[128,128], index: 5, kind: input, shape index: {}]   ;;  %s3440_s6 = inlined_call_operand.vmem [shape: bf16[2,256,128], index: 6, kind: output, shape index: {0}]   ;;  %s3441_s7 = inlined_call_operand.vmem [shape: bf16[2,256,128], index: 7, kind: output, shape index: {1}]   ;;  %s3442_s8 = inlined_call_operand.vmem [shape: bf16[2,256,128], index: 8, kind: output, shape index: {2}]  }
   0x1   :  { %3444 = sst [smem:[#allocation10_spill]] %s3435_s1 }
   0x2   :  { %14 = vsyncpa [#allocation3], 0 }
   0x3   :  { %16 = vsyncpa [#allocation3 + $0x1], 0 }
   0x4   :  { %17 = vsyncpa [#allocation5], 0 }
   0x5   :  { %19 = vsyncpa [#allocation5 + $0x1], 0  ;;  %s3062_s27 = smov 0   ;;  %s3064_s28 = smov 0  }
   0x6   :  { %s3066_s29 = smov 0   ;;  %s3068_s30 = smov 0  }
   0x7   :  { %s3070_s9 = smov 0   ;;  %s3072_s10 = smov 0  }
   0x8 LB: > { %s2053_s11 = sadd.s32 4294967295, %s3011_s10   ;;  %s37_s12 = sadd.s32 1, %s3007_s9  ;;  %s3011_s10 = sphi %s3072_s10, %s25_s10   ;;  %s3007_s9 = sphi %s3070_s9, %s3458_s9   ;;  %s3003_s30 = sphi %s3068_s30, %s3457_s30   ;;  %s2999_s29 = sphi %s3066_s29, %s3456_s29   ;;  %s2995_s28 = sphi %s3064_s28, %s3455_s28   ;;  %s2991_s27 = sphi %s3062_s27, %s3454_s27  }
   0x9   : > { %p39_p0 = scmp.ge.s32.totalorder %s37_s12, 2  ;;  %s74_s13 = sadd.s32 1, %s2999_s29 }
   0xa   : > { %p81_p1 = scmp.ne.s32.totalorder %s2999_s29, %s2995_s28  ;;  %p82_p2 = scmp.eq.s32.totalorder %s3011_s10, 0 }
   0xb   : > { %s3460_s12 = smov (%p39_p0, %s37_s12), 0  ;;  %p87_p4 = scmp.ne.s32.totalorder %s2995_s28, %s2991_s27 }
   0xc   : > { %3445 = sst [smem:[#allocation8_spill]] %s3460_s12  ;;  %p3098_p3 = por %p82_p2, %p81_p1 }
   0xd   : > { %s69_s15 = ssub.s32 %s3007_s9, %s3460_s12  ;;  %p88_p5 = scmp.eq.s32.totalorder %s2053_s11, 0 }
   0xe   : > { %p72_p6 = scmp.eq.s32.totalorder %s69_s15, 0  ;;  %p2826_p8 = scmp.lt.s32.totalorder %s3011_s10, 2 }
   0xf   : > { %p3105_p7 = por %p88_p5, %p87_p4  ;;  %s3114_s18 = sand.u32 1, %s2999_s29  }
  0x10   : > { %s3111_s17 = scalar_select %p72_p6, %s2999_s29, %s74_s13  }
  0x11   : > { %s2196_s19 = sshll.u32 %s3007_s9, 12  ;;  %s2057_s20 = sshll.u32 %s3114_s18, 8 }
  0x12   : > { %3448 = sst [smem:[#allocation9_spill]] %s3111_s17  ;;  %s312_s24 = scalar_lea.vmem [#allocation2], %s2057_s20 }
  0x13   : > { %s3449_s1 = sld [smem:[#allocation10_spill]]  ;;  %s321_s25 = sshll.u32 %s312_s24, 4  ;;  %s322_s25 = int_to_ptr.vmem [resolvable:$true] %s321_s25 }
  0x14   : > { %p3125_p9 = pnand %p2826_p8, %p3098_p3  ;;  %s309_s27 = scalar_lea.sflag [#allocation3], %s3114_s18 }
  0x15   : > { %s2914_s11 = scalar_lea.vmem %s322_s25, 4096  ;;  %s3013_s13 = smov [#allocation2]  }
  0x16   : > { %p2903_p10 = pneg %p3125_p9  ;;  %p2915_p11 = scmp.ne.s32.totalorder %s322_s25, %s2914_s11 }
  0x17   : > { %s2919_s15 = sshll.u32 %s3013_s13, 4  ;;  %s2920_s15 = int_to_ptr.vmem [resolvable:$false] %s2919_s15 }
  0x18   : > { %p2917_p12 = pnand %p2915_p11, %p2903_p10  ;;  %s2921_s14 = scalar_lea.vmem %s2920_s15, 8192 }
  0x19   : > { %s320_s23 = scalar_lea.hbm %s3449_s1, %s2196_s19  ;;  %p2922_p0 = scmp.lt.s32.totalorder %s322_s25, %s2920_s15 }
  0x1a   : > { %p2918_p13 = pneg %p2917_p12  ;;  %p2923_p1 = scmp.lt.s32.totalorder %s2921_s14, %s2914_s11 }
  0x1c   : > { %p2924_p2 = por %p2923_p1, %p2922_p0 }
  0x1e   : > { %p2925_p3 = pnand %p2924_p2, %p2918_p13 }
  0x20   : > { %2928 = shalt.err (!%p2925_p3)
}
  0x21   : > { %s3014_s21 = smov 128   ;;  %s3015_s22 = smov 8  }
  0x22   : > { %2822 = dma.hbm_to_vmem [thread:$0]  (!%p3125_p9), %s320_s23, 4096, %s322_s25, %s309_s27, %s3014_s21, %s3014_s21, %s3015_s22  }
  0x23   : > { %p2063_p4 = scmp.ge.s32.totalorder %s3011_s10, 1  ;;  %p352_p5 = scmp.lt.s32.totalorder %s3011_s10, 3 }
  0x24   : > { %s343_s15 = scalar_lea.hbm %s3436_s2, %s2196_s19  ;;  %s335_s14 = scalar_lea.vmem [#allocation4], %s2057_s20 }
  0x25   : > { %p3139_p6 = pnand %p2063_p4, %p352_p5  ;;  %s344_s1 = sshll.u32 %s335_s14, 4  ;;  %s345_s1 = int_to_ptr.vmem [resolvable:$true] %s344_s1 }
  0x26   : > { %s332_s12 = scalar_lea.sflag [#allocation5], %s3114_s18  ;;  %s2942_s17 = scalar_lea.vmem %s345_s1, 4096 }
  0x27   : > { %p2943_p8 = scmp.ne.s32.totalorder %s345_s1, %s2942_s17  ;;  %s3016_s23 = smov [#allocation4]  }
  0x28   : > { %s2947_s25 = sshll.u32 %s3016_s23, 4  ;;  %s2948_s25 = int_to_ptr.vmem [resolvable:$false] %s2947_s25 }
  0x29   : > { %p2945_p11 = pnand %p2943_p8, %p2903_p10  ;;  %s2949_s27 = scalar_lea.vmem %s2948_s25, 8192 }
  0x2a   : > { %p2950_p13 = scmp.lt.s32.totalorder %s345_s1, %s2948_s25  ;;  %p2951_p0 = scmp.lt.s32.totalorder %s2949_s27, %s2942_s17 }
  0x2b   : > { %p2946_p12 = pneg %p2945_p11 }
  0x2c   : > { %p2952_p1 = por %p2951_p0, %p2950_p13 }
  0x2e   : > { %p2953_p2 = pnand %p2952_p1, %p2946_p12 }
  0x30   : > { %2956 = shalt.err (!%p2953_p2)
}
  0x31   : > { %2825 = dma.hbm_to_vmem [thread:$0]  (!%p3125_p9), %s343_s15, 4096, %s345_s1, %s332_s12, %s3014_s21, %s3014_s21, %s3015_s22  }
  0x32   : > { %356 = sbr.rel (%p3139_p6) target bundleno = 381 (0x17d), region = 44  ;;  %s358_s18 = sand.u32 (!%p3139_p6), 1, %s2995_s28  }
  0x33   : > { %s2064_s19 = sshll.u32 (!%p3139_p6), %s358_s18, 8  ;;  %s359_s20 = scalar_lea.sflag (!%p3139_p6), [#allocation3], %s358_s18 }
  0x34   : > { %s3157_s11 = scalar_lea.vmem (!%p3139_p6), [#allocation2], %s2064_s19 }
  0x37   : > { %2982 = dma.done.wait (%p3105_p7), %s359_s20, 4096  }
  0x38   : > { %2984 = vsyncadd (%p3105_p7), %s359_s20, 4294963200  ;;  %s368_s17 = scalar_lea.sflag [#allocation5], %s358_s18  ;;  %s3163_s13 = scalar_lea.vmem [#allocation4], %s2064_s19 }
  0x39   : > { %2986 = dma.done.wait (%p3105_p7), %s368_s17, 4096  }
  0x3a   : > { %2988 = vsyncadd (%p3105_p7), %s368_s17, 4294963200  ;;  %p441_p9 = scmp.lt.s32.totalorder %s3003_s30, 1  ;;  %v2877_v0 = vld [vmem:[%s3437_s3 + $0x38] sm:$0xff]   ;;  %v2878_v1 = vld [vmem:[%s3437_s3 + $0x30] sm:$0xff]  }
  0x3b   : > { %2655 = vmatprep.subr.bf16.mxu0 %v2877_v0  ;;  %2799 = vmatprep.subr.bf16.mxu1 %v2877_v0  ;;  %v2879_v2 = vld [vmem:[%s3437_s3 + $0x28] sm:$0xff]   ;;  %v2880_v3 = vld [vmem:[%s3437_s3 + $0x20] sm:$0xff]   ;;  %v2881_v10 = vld [vmem:[%s3437_s3 + $0x18] sm:$0xff]  }
  0x3c   : > { %s3462_s30 = smov (!%p441_p9, %s3003_s30), 1  ;;  %2656 = vmatpush3.bf16.msra.mxu0 %v2877_v0  ;;  %2807 = vmatpush3.bf16.msra.mxu1 %v2877_v0  ;;  %v2882_v11 = vld [vmem:[%s3437_s3 + $0x10] sm:$0xff]   ;;  %v2883_v12 = vld [vmem:[%s3437_s3 + $0x8] sm:$0xff]   ;;  %v2884_v13 = vld [vmem:[%s3437_s3] sm:$0xff]  }
  0x3d   : > { %s2198_s22 = sshll.u32 %s3462_s30, 8  ;;  %2657 = vmatprep.subr.bf16.mxu0 %v2878_v1  ;;  %2800 = vmatprep.subr.bf16.mxu1 %v2878_v1  ;;  %v2885_v18 = vld [vmem:[%s3438_s4 + $0x38] sm:$0xff]   ;;  %v2887_v26 = vld [vmem:[%s3438_s4 + $0x30] sm:$0xff]   ;;  %v2889_v34 = vld [vmem:[%s3438_s4 + $0x28] sm:$0xff]   ;;  %s3348_s16 = sshll.u32 %s3462_s30, 7 }
  0x3e   : > { %s3186_s23 = scalar_lea.vmem %s3434_s0, %s2198_s22  ;;  %v2886_v19 = vld [vmem:[%s3439_s5 + $0x38] sm:$0xff]   ;;  %v2888_v27 = vld [vmem:[%s3439_s5 + $0x30] sm:$0xff]   ;;  %v2890_v35 = vld [vmem:[%s3439_s5 + $0x28] sm:$0xff]   ;;  %s3354_s24 = scalar_lea.vmem %s3440_s6, %s3348_s16 }
  0x3f   : > { %v483_v4 = vld [vmem:[%s3186_s23] sm:$0xff]  ;;  %v484_v5 = vld [vmem:[%s3186_s23 + $0x8] sm:$0xff]  ;;  %v485_v14 = vld [vmem:[%s3186_s23 + $0x10] sm:$0xff]  ;;  %s3376_s14 = scalar_lea.vmem %s3441_s7, %s3348_s16  ;;  %s3382_s18 = scalar_lea.vmem %s3442_s8, %s3348_s16 }
  0x40   : > { %2658 = vmatpush3.bf16.msra.mxu0 %v2878_v1  ;;  %2808 = vmatpush3.bf16.msra.mxu1 %v2878_v1  ;;  %v499_v6 = vld [vmem:[%s3186_s23 + $0x80] sm:$0xff]  ;;  %v515_v7 = vpack.c.bf16 %v484_v5, %v483_v4  ;;  %v500_v8 = vld [vmem:[%s3186_s23 + $0x88] sm:$0xff]  ;;  %v486_v15 = vld [vmem:[%s3186_s23 + $0x18] sm:$0xff] }
  0x41   : > { %2659 = vmatprep.subr.bf16.mxu0 %v2879_v2  ;;  %2801 = vmatprep.subr.bf16.mxu1 %v2879_v2  ;;  %v523_v9 = vpack.c.bf16 %v500_v8, %v499_v6  ;;  %v501_v16 = vld [vmem:[%s3186_s23 + $0x90] sm:$0xff]  ;;  %v502_v17 = vld [vmem:[%s3186_s23 + $0x98] sm:$0xff]  ;;  %v487_v20 = vld [vmem:[%s3186_s23 + $0x20] sm:$0xff]  ;;  %v516_v22 = vpack.c.bf16 %v486_v15, %v485_v14 }
  0x42   : > { %2671 = vmatprep.mubr.bf16.mxu0 %v515_v7  ;;  %v488_v21 = vld [vmem:[%s3186_s23 + $0x28] sm:$0xff]  ;;  %v524_v23 = vpack.c.bf16 %v502_v17, %v501_v16  ;;  %v503_v24 = vld [vmem:[%s3186_s23 + $0xa0] sm:$0xff]  ;;  %v489_v30 = vld [vmem:[%s3186_s23 + $0x30] sm:$0xff] }
  0x43   : > { %2687 = vmatprep.mubr.bf16.mxu1 %v523_v9  ;;  %v504_v25 = vld [vmem:[%s3186_s23 + $0xa8] sm:$0xff]  ;;  %v517_v28 = vpack.c.bf16 %v488_v21, %v487_v20  ;;  %v490_v31 = vld [vmem:[%s3186_s23 + $0x38] sm:$0xff]  ;;  %v505_v32 = vld [vmem:[%s3186_s23 + $0xb0] sm:$0xff] }
  0x44   : > { %2660 = vmatpush3.bf16.msra.mxu0 %v2879_v2  ;;  %2809 = vmatpush3.bf16.msra.mxu1 %v2879_v2  ;;  %v525_v29 = vpack.c.bf16 %v504_v25, %v503_v24  ;;  %v506_v33 = vld [vmem:[%s3186_s23 + $0xb8] sm:$0xff]  ;;  %v491_v36 = vld [vmem:[%s3186_s23 + $0x40] sm:$0xff]  ;;  %v518_v37 = vpack.c.bf16 %v490_v31, %v489_v30  ;;  %v492_v39 = vld [vmem:[%s3186_s23 + $0x48] sm:$0xff] }
  0x45   : > { %2661 = vmatprep.subr.bf16.mxu0 %v2880_v3  ;;  %2802 = vmatprep.subr.bf16.mxu1 %v2880_v3  ;;  %v526_v38 = vpack.c.bf16 %v506_v33, %v505_v32  ;;  %v507_v40 = vld [vmem:[%s3186_s23 + $0xc0] sm:$0xff]  ;;  %v508_v41 = vld [vmem:[%s3186_s23 + $0xc8] sm:$0xff]  ;;  %v519_v44 = vpack.c.bf16 %v492_v39, %v491_v36  ;;  %v493_v46 = vld [vmem:[%s3186_s23 + $0x50] sm:$0xff] }
  0x46   : > { %v2891_v42 = vld [vmem:[%s3438_s4 + $0x20] sm:$0xff]   ;;  %v527_v45 = vpack.c.bf16 %v508_v41, %v507_v40  ;;  %v494_v47 = vld [vmem:[%s3186_s23 + $0x58] sm:$0xff]  ;;  %v509_v48 = vld [vmem:[%s3186_s23 + $0xd0] sm:$0xff] }
  0x47   : > { %v2892_v43 = vld [vmem:[%s3439_s5 + $0x20] sm:$0xff]   ;;  %v510_v49 = vld [vmem:[%s3186_s23 + $0xd8] sm:$0xff]  ;;  %v520_v53 = vpack.c.bf16 %v494_v47, %v493_v46  ;;  %v496_v55 = vld [vmem:[%s3186_s23 + $0x68] sm:$0xff] }
  0x48   : > { %2662 = vmatpush3.bf16.msra.mxu0 %v2880_v3  ;;  %2810 = vmatpush3.bf16.msra.mxu1 %v2880_v3  ;;  %v2893_v50 = vld [vmem:[%s3438_s4 + $0x18] sm:$0xff]   ;;  %v495_v52 = vld [vmem:[%s3186_s23 + $0x60] sm:$0xff]  ;;  %v528_v54 = vpack.c.bf16 %v510_v49, %v509_v48  ;;  %v512_v57 = vld [vmem:[%s3186_s23 + $0xe8] sm:$0xff] }
  0x49   : > { %2663 = vmatprep.subr.bf16.mxu0 %v2881_v10  ;;  %2803 = vmatprep.subr.bf16.mxu1 %v2881_v10  ;;  %v2894_v51 = vld [vmem:[%s3439_s5 + $0x18] sm:$0xff]   ;;  %v511_v56 = vld [vmem:[%s3186_s23 + $0xe0] sm:$0xff]  ;;  %v2895_v58 = vld [vmem:[%s3438_s4 + $0x10] sm:$0xff]   ;;  %v521_v60 = vpack.c.bf16 %v496_v55, %v495_v52 }
  0x4a   : > { %v2896_v59 = vld [vmem:[%s3439_s5 + $0x10] sm:$0xff]   ;;  %v529_v61 = vpack.c.bf16 %v512_v57, %v511_v56  ;;  %v498_v63 = vld [vmem:[%s3186_s23 + $0x78] sm:$0xff]  ;;  %v2897_v2 = vld [vmem:[%s3438_s4 + $0x8] sm:$0xff]  }
  0x4b   : > { %v497_v62 = vld [vmem:[%s3186_s23 + $0x70] sm:$0xff]  ;;  %v514_v1 = vld [vmem:[%s3186_s23 + $0xf8] sm:$0xff]  ;;  %v2898_v3 = vld [vmem:[%s3439_s5 + $0x8] sm:$0xff]  }
  0x4c   : > { %2664 = vmatpush3.bf16.msra.mxu0 %v2881_v10  ;;  %2811 = vmatpush3.bf16.msra.mxu1 %v2881_v10  ;;  %v513_v0 = vld [vmem:[%s3186_s23 + $0xf0] sm:$0xff]  ;;  %v531_v4 = vld [vmem:[%s3157_s11] sm:$0xff]  ;;  %v522_v5 = vpack.c.bf16 %v498_v63, %v497_v62  ;;  %v532_v7 = vld [vmem:[%s3157_s11 + $0x8] sm:$0xff] }
  0x4d   : > { %2665 = vmatprep.subr.bf16.mxu0 %v2882_v11  ;;  %2804 = vmatprep.subr.bf16.mxu1 %v2882_v11  ;;  %v530_v6 = vpack.c.bf16 %v514_v1, %v513_v0  ;;  %v579_v8 = vld [vmem:[%s3163_s13] sm:$0xff]  ;;  %v580_v9 = vld [vmem:[%s3163_s13 + $0x8] sm:$0xff]  ;;  %v533_v14 = vld [vmem:[%s3157_s11 + $0x10] sm:$0xff] }
  0x4e   : > { %v2899_v10 = vld [vmem:[%s3438_s4] sm:$0xff]   ;;  %v534_v15 = vld [vmem:[%s3157_s11 + $0x18] sm:$0xff]  ;;  %v581_v16 = vld [vmem:[%s3163_s13 + $0x10] sm:$0xff] }
  0x4f   : > { %v582_v17 = vld [vmem:[%s3163_s13 + $0x18] sm:$0xff]  ;;  %v583_v20 = vld [vmem:[%s3163_s13 + $0x20] sm:$0xff]  ;;  %v584_v21 = vld [vmem:[%s3163_s13 + $0x28] sm:$0xff] }
  0x50   : > { %2666 = vmatpush3.bf16.msra.mxu0 %v2882_v11  ;;  %2812 = vmatpush3.bf16.msra.mxu1 %v2882_v11  ;;  %v2900_v11 = vld [vmem:[%s3439_s5] sm:$0xff]   ;;  %v613_v25 = vpack.c.bf16 %v584_v21, %v583_v20  ;;  %v540_v31 = vld [vmem:[%s3157_s11 + $0x48] sm:$0xff]  ;;  %v542_v39 = vld [vmem:[%s3157_s11 + $0x58] sm:$0xff] }
  0x51   : > { %2667 = vmatprep.subr.bf16.mxu0 %v2883_v12  ;;  %2805 = vmatprep.subr.bf16.mxu1 %v2883_v12  ;;  %v539_v30 = vld [vmem:[%s3157_s11 + $0x40] sm:$0xff]  ;;  %v588_v33 = vld [vmem:[%s3163_s13 + $0x48] sm:$0xff]  ;;  %v589_v40 = vld [vmem:[%s3163_s13 + $0x50] sm:$0xff] }
  0x52   : > { %v587_v32 = vld [vmem:[%s3163_s13 + $0x40] sm:$0xff]  ;;  %v567_v36 = vpack.c.bf16 %v540_v31, %v539_v30  ;;  %v590_v41 = vld [vmem:[%s3163_s13 + $0x58] sm:$0xff]  ;;  %v593_v52 = vld [vmem:[%s3163_s13 + $0x70] sm:$0xff] }
  0x53   : > { %v616_v47 = vpack.c.bf16 %v590_v41, %v589_v40  ;;  %v548_v55 = vld [vmem:[%s3157_s11 + $0x88] sm:$0xff]  ;;  %v595_v56 = vld [vmem:[%s3163_s13 + $0x80] sm:$0xff]  ;;  %v549_v62 = vld [vmem:[%s3157_s11 + $0x90] sm:$0xff] }
  0x54   : > { %2668 = vmatpush3.bf16.msra.mxu0 %v2883_v12  ;;  %2813 = vmatpush3.bf16.msra.mxu1 %v2883_v12  ;;  %v563_v12 = vpack.c.bf16 %v532_v7, %v531_v4  ;;  %v596_v57 = vld [vmem:[%s3163_s13 + $0x88] sm:$0xff]  ;;  %v550_v63 = vld [vmem:[%s3157_s11 + $0x98] sm:$0xff]  ;;  %v597_v0 = vld [vmem:[%s3163_s13 + $0x90] sm:$0xff] }
  0x55   : > { %2669 = vmatprep.subr.bf16.mxu0 %v2884_v13  ;;  %2806 = vmatprep.subr.bf16.mxu1 %v2884_v13  ;;  %v598_v1 = vld [vmem:[%s3163_s13 + $0x98] sm:$0xff]  ;;  %v599_v4 = vld [vmem:[%s3163_s13 + $0xa0] sm:$0xff] }
  0x56   : > { %v620_v7 = vpack.c.bf16 %v598_v1, %v597_v0 }
  0x58   : > { %2670 = vmatpush3.bf16.msra.mxu0 %v2884_v13  ;;  %2814 = vmatpush3.bf16.msra.mxu1 %v2884_v13  ;;  %v611_v13 = vpack.c.bf16 %v580_v9, %v579_v8 }
  0x59   : > { %2703 = vmatprep.subr.bf16.mxu1 %v2885_v18  ;;  %2751 = vmatprep.subr.bf16.mxu0 %v2886_v19 }
  0x5b   : > { %2672 = vmatmul.mubr.bf16.vlgmr.msra.gmra.mxu0 %v516_v22  ;;  %2688 = vmatmul.mubr.bf16.vlgmr.msra.gmra.mxu1 %v524_v23  ;;  %v564_v22 = vpack.c.bf16 %v534_v15, %v533_v14  ;;  %v612_v23 = vpack.c.bf16 %v582_v17, %v581_v16  ;;  %v555_v14 = vld [vmem:[%s3157_s11 + $0xc0] sm:$0xff]  ;;  %v556_v15 = vld [vmem:[%s3157_s11 + $0xc8] sm:$0xff] }
  0x5c   : > { %2704 = vmatpush3.bf16.msra.mxu1 %v2885_v18  ;;  %2752 = vmatpush3.bf16.msra.mxu0 %v2886_v19  ;;  %v535_v18 = vld [vmem:[%s3157_s11 + $0x20] sm:$0xff]  ;;  %v536_v19 = vld [vmem:[%s3157_s11 + $0x28] sm:$0xff]  ;;  %v575_v20 = vpack.c.bf16 %v556_v15, %v555_v14 }
  0x5d   : > { %2705 = vmatprep.subr.bf16.mxu1 %v2887_v26  ;;  %2753 = vmatprep.subr.bf16.mxu0 %v2888_v27  ;;  %v565_v24 = vpack.c.bf16 %v536_v19, %v535_v18  ;;  %v603_v16 = vld [vmem:[%s3163_s13 + $0xc0] sm:$0xff]  ;;  %v604_v17 = vld [vmem:[%s3163_s13 + $0xc8] sm:$0xff] }
  0x5e   : > { %2675 = vmatprep.mubr.bf16.mxu0 %v517_v28  ;;  %2691 = vmatprep.mubr.bf16.mxu1 %v525_v29  ;;  %v585_v28 = vld [vmem:[%s3163_s13 + $0x30] sm:$0xff]  ;;  %v586_v29 = vld [vmem:[%s3163_s13 + $0x38] sm:$0xff]  ;;  %v623_v21 = vpack.c.bf16 %v604_v17, %v603_v16 }
  0x60   : > { %2706 = vmatpush3.bf16.msra.mxu1 %v2887_v26  ;;  %2754 = vmatpush3.bf16.msra.mxu0 %v2888_v27  ;;  %v537_v26 = vld [vmem:[%s3157_s11 + $0x30] sm:$0xff]  ;;  %v538_v27 = vld [vmem:[%s3157_s11 + $0x38] sm:$0xff] }
  0x61   : > { %2707 = vmatprep.subr.bf16.mxu1 %v2889_v34  ;;  %2755 = vmatprep.subr.bf16.mxu0 %v2890_v35 }
  0x63   : > { %2676 = vmatmul.mubr.bf16.gmra.mxu0 %v518_v37  ;;  %2692 = vmatmul.mubr.bf16.gmra.mxu1 %v526_v38  ;;  %v615_v37 = vpack.c.bf16 %v588_v33, %v587_v32  ;;  %v541_v38 = vld [vmem:[%s3157_s11 + $0x50] sm:$0xff] }
  0x64   : > { %2708 = vmatpush3.bf16.msra.mxu1 %v2889_v34  ;;  %2756 = vmatpush3.bf16.msra.mxu0 %v2890_v35  ;;  %v566_v34 = vpack.c.bf16 %v538_v27, %v537_v26  ;;  %v614_v35 = vpack.c.bf16 %v586_v29, %v585_v28  ;;  %v568_v46 = vpack.c.bf16 %v542_v39, %v541_v38  ;;  %v559_v26 = vld [vmem:[%s3157_s11 + $0xe0] sm:$0xff]  ;;  %v560_v27 = vld [vmem:[%s3157_s11 + $0xe8] sm:$0xff] }
  0x65   : > { %2709 = vmatprep.subr.bf16.mxu1 %v2891_v42  ;;  %2757 = vmatprep.subr.bf16.mxu0 %v2892_v43  ;;  %v607_v28 = vld [vmem:[%s3163_s13 + $0xe0] sm:$0xff]  ;;  %v608_v29 = vld [vmem:[%s3163_s13 + $0xe8] sm:$0xff]  ;;  %v577_v32 = vpack.c.bf16 %v560_v27, %v559_v26 }
  0x66   : > { %2679 = vmatprep.mubr.bf16.mxu0 %v519_v44  ;;  %2695 = vmatprep.mubr.bf16.mxu1 %v527_v45  ;;  %v591_v44 = vld [vmem:[%s3163_s13 + $0x60] sm:$0xff]  ;;  %v592_v45 = vld [vmem:[%s3163_s13 + $0x68] sm:$0xff]  ;;  %v625_v33 = vpack.c.bf16 %v608_v29, %v607_v28 }
  0x67   : > { %v617_v49 = vpack.c.bf16 %v592_v45, %v591_v44 }
  0x68   : > { %2710 = vmatpush3.bf16.msra.mxu1 %v2891_v42  ;;  %2758 = vmatpush3.bf16.msra.mxu0 %v2892_v43  ;;  %v543_v42 = vld [vmem:[%s3157_s11 + $0x60] sm:$0xff]  ;;  %v544_v43 = vld [vmem:[%s3157_s11 + $0x68] sm:$0xff] }
  0x69   : > { %2711 = vmatprep.subr.bf16.mxu1 %v2893_v50  ;;  %2759 = vmatprep.subr.bf16.mxu0 %v2894_v51  ;;  %v569_v48 = vpack.c.bf16 %v544_v43, %v543_v42 }
  0x6b   : > { %2680 = vmatmul.mubr.bf16.gmra.mxu0 %v520_v53  ;;  %2696 = vmatmul.mubr.bf16.gmra.mxu1 %v528_v54  ;;  %v594_v53 = vld [vmem:[%s3163_s13 + $0x78] sm:$0xff]  ;;  %v547_v54 = vld [vmem:[%s3157_s11 + $0x80] sm:$0xff] }
  0x6c   : > { %2712 = vmatpush3.bf16.msra.mxu1 %v2893_v50  ;;  %2760 = vmatpush3.bf16.msra.mxu0 %v2894_v51  ;;  %v545_v50 = vld [vmem:[%s3157_s11 + $0x70] sm:$0xff]  ;;  %v546_v51 = vld [vmem:[%s3157_s11 + $0x78] sm:$0xff] }
  0x6d   : > { %2713 = vmatprep.subr.bf16.mxu1 %v2895_v58  ;;  %2761 = vmatprep.subr.bf16.mxu0 %v2896_v59 }
  0x6e   : > { %2683 = vmatprep.mubr.bf16.mxu0 %v521_v60  ;;  %2699 = vmatprep.mubr.bf16.mxu1 %v529_v61  ;;  %v571_v60 = vpack.c.bf16 %v548_v55, %v547_v54  ;;  %v619_v61 = vpack.c.bf16 %v596_v57, %v595_v56 }
  0x70   : > { %2714 = vmatpush3.bf16.msra.mxu1 %v2895_v58  ;;  %2762 = vmatpush3.bf16.msra.mxu0 %v2896_v59  ;;  %v570_v58 = vpack.c.bf16 %v546_v51, %v545_v50  ;;  %v618_v59 = vpack.c.bf16 %v594_v53, %v593_v52 }
  0x71   : > { %2715 = vmatprep.subr.bf16.mxu1 %v2897_v2  ;;  %2763 = vmatprep.subr.bf16.mxu0 %v2898_v3 }
  0x73   : > { %2684 = vmatmul.mubr.bf16.gmra.mxu0 %v522_v5  ;;  %2700 = vmatmul.mubr.bf16.gmra.mxu1 %v530_v6  ;;  %v600_v5 = vld [vmem:[%s3163_s13 + $0xa8] sm:$0xff]  ;;  %v572_v6 = vpack.c.bf16 %v550_v63, %v549_v62 }
  0x74   : > { %2716 = vmatpush3.bf16.msra.mxu1 %v2897_v2  ;;  %2764 = vmatpush3.bf16.msra.mxu0 %v2898_v3  ;;  %v551_v2 = vld [vmem:[%s3157_s11 + $0xa0] sm:$0xff]  ;;  %v552_v3 = vld [vmem:[%s3157_s11 + $0xa8] sm:$0xff]  ;;  %v621_v9 = vpack.c.bf16 %v600_v5, %v599_v4 }
  0x75   : > { %2717 = vmatprep.subr.bf16.mxu1 %v2899_v10  ;;  %2765 = vmatprep.subr.bf16.mxu0 %v2900_v11  ;;  %v573_v8 = vpack.c.bf16 %v552_v3, %v551_v2 }
  0x76   : > { %2719 = vmatprep.mubr.bf16.mxu1 %v563_v12  ;;  %2767 = vmatprep.mubr.bf16.mxu0 %v611_v13  ;;  %v601_v12 = vld [vmem:[%s3163_s13 + $0xb0] sm:$0xff]  ;;  %v602_v13 = vld [vmem:[%s3163_s13 + $0xb8] sm:$0xff] }
  0x77   : > { %v622_v19 = vpack.c.bf16 %v602_v13, %v601_v12 }
  0x78   : > { %2718 = vmatpush3.bf16.msra.mxu1 %v2899_v10  ;;  %2766 = vmatpush3.bf16.msra.mxu0 %v2900_v11  ;;  %v553_v10 = vld [vmem:[%s3157_s11 + $0xb0] sm:$0xff]  ;;  %v554_v11 = vld [vmem:[%s3157_s11 + $0xb8] sm:$0xff] }
  0x79   : > { %v574_v18 = vpack.c.bf16 %v554_v11, %v553_v10 }
  0x7b   : > { %2720 = vmatmul.mubr.bf16.vlgmr.msra.gmra.mxu1 %v564_v22  ;;  %2768 = vmatmul.mubr.bf16.vlgmr.msra.gmra.mxu0 %v612_v23  ;;  %v557_v22 = vld [vmem:[%s3157_s11 + $0xd0] sm:$0xff]  ;;  %v558_v23 = vld [vmem:[%s3157_s11 + $0xd8] sm:$0xff] }
  0x7c   : > { %2723 = vmatprep.mubr.bf16.mxu1 %v565_v24  ;;  %2771 = vmatprep.mubr.bf16.mxu0 %v613_v25  ;;  %v605_v24 = vld [vmem:[%s3163_s13 + $0xd0] sm:$0xff]  ;;  %v606_v25 = vld [vmem:[%s3163_s13 + $0xd8] sm:$0xff]  ;;  %v576_v30 = vpack.c.bf16 %v558_v23, %v557_v22 }
  0x7d   : > { %v624_v31 = vpack.c.bf16 %v606_v25, %v605_v24 }
  0x83   : > { %2724 = vmatmul.mubr.bf16.gmra.mxu1 %v566_v34  ;;  %2772 = vmatmul.mubr.bf16.gmra.mxu0 %v614_v35  ;;  %v561_v34 = vld [vmem:[%s3157_s11 + $0xf0] sm:$0xff]  ;;  %v562_v35 = vld [vmem:[%s3157_s11 + $0xf8] sm:$0xff] }
  0x84   : > { %2727 = vmatprep.mubr.bf16.mxu1 %v567_v36  ;;  %2775 = vmatprep.mubr.bf16.mxu0 %v615_v37  ;;  %v609_v36 = vld [vmem:[%s3163_s13 + $0xf0] sm:$0xff]  ;;  %v610_v37 = vld [vmem:[%s3163_s13 + $0xf8] sm:$0xff]  ;;  %v578_v38 = vpack.c.bf16 %v562_v35, %v561_v34 }
  0x85   : > { %v626_v39 = vpack.c.bf16 %v610_v37, %v609_v36 }
  0x8b   : > { %2728 = vmatmul.mubr.bf16.gmra.mxu1 %v568_v46  ;;  %2776 = vmatmul.mubr.bf16.gmra.mxu0 %v616_v47 }
  0x8c   : > { %2731 = vmatprep.mubr.bf16.mxu1 %v569_v48  ;;  %2779 = vmatprep.mubr.bf16.mxu0 %v617_v49 }
  0x93   : > { %2732 = vmatmul.mubr.bf16.gmra.mxu1 %v570_v58  ;;  %2780 = vmatmul.mubr.bf16.gmra.mxu0 %v618_v59 }
  0x94   : > { %2735 = vmatprep.mubr.bf16.mxu1 %v571_v60  ;;  %2783 = vmatprep.mubr.bf16.mxu0 %v619_v61 }
  0x9b   : > { %2736 = vmatmul.mubr.bf16.gmra.mxu1 %v572_v6  ;;  %2784 = vmatmul.mubr.bf16.gmra.mxu0 %v620_v7 }
  0x9c   : > { %2739 = vmatprep.mubr.bf16.mxu1 %v573_v8  ;;  %2787 = vmatprep.mubr.bf16.mxu0 %v621_v9 }
  0xa3   : > { %2740 = vmatmul.mubr.bf16.gmra.mxu1 %v574_v18  ;;  %2788 = vmatmul.mubr.bf16.gmra.mxu0 %v622_v19 }
  0xa4   : > { %2743 = vmatprep.mubr.bf16.mxu1 %v575_v20  ;;  %2791 = vmatprep.mubr.bf16.mxu0 %v623_v21 }
  0xab   : > { %2744 = vmatmul.mubr.bf16.gmra.mxu1 %v576_v30  ;;  %2792 = vmatmul.mubr.bf16.gmra.mxu0 %v624_v31 }
  0xac   : > { %2747 = vmatprep.mubr.bf16.mxu1 %v577_v32  ;;  %2795 = vmatprep.mubr.bf16.mxu0 %v625_v33 }
  0xb3   : > { %2748 = vmatmul.mubr.bf16.gmra.mxu1 %v578_v38  ;;  %2796 = vmatmul.mubr.bf16.gmra.mxu0 %v626_v39 }
 0x11b   : > { %v2673_v40 = vpop.f32.mrf.mxu0  ;;  %v2689_v41 = vpop.f32.mrf.mxu1 }
 0x11c   : > { %v854_v44 = vmul.f32 0.17677669, %v2673_v40  ;;  %v870_v47 = vmul.f32 0.17677669, %v2689_v41 }
 0x11d   : > { %v725_v42 = vpop.f32.mrf.mxu0  ;;  %v789_v43 = vpop.f32.mrf.mxu1 }
 0x11e   : > { %v852_v50 = vmul.f32 0.17677669, %v725_v42  ;;  %v868_v51 = vmul.f32 0.17677669, %v789_v43 }
 0x11f   : > { %v2674_v45 = vpop.f32.mrf.mxu0  ;;  %v2690_v46 = vpop.f32.mrf.mxu1 }
 0x120   : > { %v855_v48 = vmul.f32 0.17677669, %v2674_v45  ;;  %v871_v49 = vmul.f32 0.17677669, %v2690_v46 }
 0x121   : > { %v728_v52 = vpop.f32.mrf.mxu0  ;;  %v792_v53 = vpop.f32.mrf.mxu1 }
 0x122   : > { %v2306_v54 = vpack.c.bf16 %v855_v48, %v854_v44  ;;  %v2346_v55 = vpack.c.bf16 %v871_v49, %v870_v47  ;;  %v853_v56 = vmul.f32 0.17677669, %v728_v52  ;;  %v869_v57 = vmul.f32 0.17677669, %v792_v53 }
 0x123   : > { %v2677_v58 = vpop.f32.mrf.mxu0  ;;  %v2693_v59 = vpop.f32.mrf.mxu1 }
 0x124   : > { %2538 = vst [vmem:[%s3354_s24 + $0x8] sm:$0xff] %v2306_v54   ;;  %2546 = vst [vmem:[%s3354_s24 + $0x48] sm:$0xff] %v2346_v55   ;;  %v2301_v60 = vpack.c.bf16 %v853_v56, %v852_v50  ;;  %v2341_v61 = vpack.c.bf16 %v869_v57, %v868_v51  ;;  %v858_v0 = vmul.f32 0.17677669, %v2677_v58  ;;  %v874_v3 = vmul.f32 0.17677669, %v2693_v59 }
 0x125   : > { %v741_v62 = vpop.f32.mrf.mxu0  ;;  %v805_v63 = vpop.f32.mrf.mxu1 }
 0x126   : > { %2302 = vst [vmem:[%s3354_s24] sm:$0xff] %v2301_v60   ;;  %2545 = vst [vmem:[%s3354_s24 + $0x40] sm:$0xff] %v2341_v61   ;;  %v856_v6 = vmul.f32 0.17677669, %v741_v62  ;;  %v872_v7 = vmul.f32 0.17677669, %v805_v63 }
 0x127   : > { %v2678_v1 = vpop.f32.mrf.mxu0  ;;  %v2694_v2 = vpop.f32.mrf.mxu1 }
 0x128   : > { %v859_v4 = vmul.f32 0.17677669, %v2678_v1  ;;  %v875_v5 = vmul.f32 0.17677669, %v2694_v2 }
 0x129   : > { %v744_v8 = vpop.f32.mrf.mxu0  ;;  %v808_v9 = vpop.f32.mrf.mxu1 }
 0x12a   : > { %v2316_v10 = vpack.c.bf16 %v859_v4, %v858_v0  ;;  %v2356_v11 = vpack.c.bf16 %v875_v5, %v874_v3  ;;  %v857_v12 = vmul.f32 0.17677669, %v744_v8  ;;  %v873_v13 = vmul.f32 0.17677669, %v808_v9 }
 0x12b   : > { %v2681_v14 = vpop.f32.mrf.mxu0  ;;  %v2697_v15 = vpop.f32.mrf.mxu1 }
 0x12c   : > { %2540 = vst [vmem:[%s3354_s24 + $0x18] sm:$0xff] %v2316_v10   ;;  %2548 = vst [vmem:[%s3354_s24 + $0x58] sm:$0xff] %v2356_v11   ;;  %v2311_v16 = vpack.c.bf16 %v857_v12, %v856_v6  ;;  %v2351_v17 = vpack.c.bf16 %v873_v13, %v872_v7  ;;  %v862_v20 = vmul.f32 0.17677669, %v2681_v14  ;;  %v878_v23 = vmul.f32 0.17677669, %v2697_v15 }
 0x12d   : > { %v757_v18 = vpop.f32.mrf.mxu0  ;;  %v821_v19 = vpop.f32.mrf.mxu1 }
 0x12e   : > { %2539 = vst [vmem:[%s3354_s24 + $0x10] sm:$0xff] %v2311_v16   ;;  %2547 = vst [vmem:[%s3354_s24 + $0x50] sm:$0xff] %v2351_v17   ;;  %v860_v26 = vmul.f32 0.17677669, %v757_v18  ;;  %v876_v27 = vmul.f32 0.17677669, %v821_v19 }
 0x12f   : > { %v2682_v21 = vpop.f32.mrf.mxu0  ;;  %v2698_v22 = vpop.f32.mrf.mxu1 }
 0x130   : > { %v863_v24 = vmul.f32 0.17677669, %v2682_v21  ;;  %v879_v25 = vmul.f32 0.17677669, %v2698_v22 }
 0x131   : > { %v760_v28 = vpop.f32.mrf.mxu0  ;;  %v824_v29 = vpop.f32.mrf.mxu1 }
 0x132   : > { %v2326_v30 = vpack.c.bf16 %v863_v24, %v862_v20  ;;  %v2366_v31 = vpack.c.bf16 %v879_v25, %v878_v23  ;;  %v861_v32 = vmul.f32 0.17677669, %v760_v28  ;;  %v877_v33 = vmul.f32 0.17677669, %v824_v29 }
 0x133   : > { %v2685_v34 = vpop.f32.mrf.mxu0  ;;  %v2701_v35 = vpop.f32.mrf.mxu1 }
 0x134   : > { %2542 = vst [vmem:[%s3354_s24 + $0x28] sm:$0xff] %v2326_v30   ;;  %2550 = vst [vmem:[%s3354_s24 + $0x68] sm:$0xff] %v2366_v31   ;;  %v2321_v36 = vpack.c.bf16 %v861_v32, %v860_v26  ;;  %v2361_v37 = vpack.c.bf16 %v877_v33, %v876_v27  ;;  %v866_v40 = vmul.f32 0.17677669, %v2685_v34  ;;  %v882_v43 = vmul.f32 0.17677669, %v2701_v35 }
 0x135   : > { %v773_v38 = vpop.f32.mrf.mxu0  ;;  %v837_v39 = vpop.f32.mrf.mxu1 }
 0x136   : > { %2541 = vst [vmem:[%s3354_s24 + $0x20] sm:$0xff] %v2321_v36   ;;  %2549 = vst [vmem:[%s3354_s24 + $0x60] sm:$0xff] %v2361_v37   ;;  %v864_v46 = vmul.f32 0.17677669, %v773_v38  ;;  %v880_v47 = vmul.f32 0.17677669, %v837_v39 }
 0x137   : > { %v2686_v41 = vpop.f32.mrf.mxu0  ;;  %v2702_v42 = vpop.f32.mrf.mxu1 }
 0x138   : > { %v867_v44 = vmul.f32 0.17677669, %v2686_v41  ;;  %v883_v45 = vmul.f32 0.17677669, %v2702_v42 }
 0x139   : > { %v776_v48 = vpop.f32.mrf.mxu0  ;;  %v840_v49 = vpop.f32.mrf.mxu1 }
 0x13a   : > { %v2336_v50 = vpack.c.bf16 %v867_v44, %v866_v40  ;;  %v2376_v51 = vpack.c.bf16 %v883_v45, %v882_v43  ;;  %v865_v52 = vmul.f32 0.17677669, %v776_v48  ;;  %v881_v53 = vmul.f32 0.17677669, %v840_v49 }
 0x13b   : > { %v2721_v54 = vpop.f32.mrf.mxu1  ;;  %v2769_v55 = vpop.f32.mrf.mxu0 }
 0x13c   : > { %2544 = vst [vmem:[%s3354_s24 + $0x38] sm:$0xff] %v2336_v50   ;;  %2552 = vst [vmem:[%s3354_s24 + $0x78] sm:$0xff] %v2376_v51   ;;  %v2331_v56 = vpack.c.bf16 %v865_v52, %v864_v46  ;;  %v2371_v57 = vpack.c.bf16 %v881_v53, %v880_v47 }
 0x13d   : > { %v982_v58 = vpop.f32.mrf.mxu1  ;;  %v1207_v59 = vpop.f32.mrf.mxu0 }
 0x13e   : > { %2543 = vst [vmem:[%s3354_s24 + $0x30] sm:$0xff] %v2331_v56   ;;  %2551 = vst [vmem:[%s3354_s24 + $0x70] sm:$0xff] %v2371_v57  }
 0x13f   : > { %v2722_v60 = vpop.f32.mrf.mxu1  ;;  %v2770_v61 = vpop.f32.mrf.mxu0 }
 0x140   : > { %v2386_v62 = vpack.c.bf16 %v2722_v60, %v2721_v54  ;;  %v2466_v63 = vpack.c.bf16 %v2770_v61, %v2769_v55 }
 0x141   : > { %v985_v0 = vpop.f32.mrf.mxu1  ;;  %v1210_v1 = vpop.f32.mrf.mxu0 }
 0x142   : > { %2553 = vst [vmem:[%s3376_s14 + $0x8] sm:$0xff] %v2386_v62   ;;  %2568 = vst [vmem:[%s3382_s18 + $0x8] sm:$0xff] %v2466_v63   ;;  %v2381_v2 = vpack.c.bf16 %v985_v0, %v982_v58  ;;  %v2461_v3 = vpack.c.bf16 %v1210_v1, %v1207_v59 }
 0x143   : > { %v2725_v4 = vpop.f32.mrf.mxu1  ;;  %v2773_v5 = vpop.f32.mrf.mxu0 }
 0x144   : > { %2382 = vst [vmem:[%s3376_s14] sm:$0xff] %v2381_v2   ;;  %2462 = vst [vmem:[%s3382_s18] sm:$0xff] %v2461_v3  }
 0x145   : > { %v998_v6 = vpop.f32.mrf.mxu1  ;;  %v1223_v7 = vpop.f32.mrf.mxu0 }
 0x147   : > { %v2726_v8 = vpop.f32.mrf.mxu1  ;;  %v2774_v9 = vpop.f32.mrf.mxu0 }
 0x148   : > { %v2396_v10 = vpack.c.bf16 %v2726_v8, %v2725_v4  ;;  %v2476_v11 = vpack.c.bf16 %v2774_v9, %v2773_v5 }
 0x149   : > { %v1001_v12 = vpop.f32.mrf.mxu1  ;;  %v1226_v13 = vpop.f32.mrf.mxu0 }
 0x14a   : > { %2555 = vst [vmem:[%s3376_s14 + $0x18] sm:$0xff] %v2396_v10   ;;  %2570 = vst [vmem:[%s3382_s18 + $0x18] sm:$0xff] %v2476_v11   ;;  %v2391_v14 = vpack.c.bf16 %v1001_v12, %v998_v6  ;;  %v2471_v15 = vpack.c.bf16 %v1226_v13, %v1223_v7 }
 0x14b   : > { %v2729_v16 = vpop.f32.mrf.mxu1  ;;  %v2777_v17 = vpop.f32.mrf.mxu0 }
 0x14c   : > { %2554 = vst [vmem:[%s3376_s14 + $0x10] sm:$0xff] %v2391_v14   ;;  %2569 = vst [vmem:[%s3382_s18 + $0x10] sm:$0xff] %v2471_v15  }
 0x14d   : > { %v1014_v18 = vpop.f32.mrf.mxu1  ;;  %v1239_v19 = vpop.f32.mrf.mxu0 }
 0x14f   : > { %v2730_v20 = vpop.f32.mrf.mxu1  ;;  %v2778_v21 = vpop.f32.mrf.mxu0 }
 0x150   : > { %v2406_v22 = vpack.c.bf16 %v2730_v20, %v2729_v16  ;;  %v2486_v23 = vpack.c.bf16 %v2778_v21, %v2777_v17 }
 0x151   : > { %v1017_v24 = vpop.f32.mrf.mxu1  ;;  %v1242_v25 = vpop.f32.mrf.mxu0 }
 0x152   : > { %2557 = vst [vmem:[%s3376_s14 + $0x28] sm:$0xff] %v2406_v22   ;;  %2572 = vst [vmem:[%s3382_s18 + $0x28] sm:$0xff] %v2486_v23   ;;  %v2401_v26 = vpack.c.bf16 %v1017_v24, %v1014_v18  ;;  %v2481_v27 = vpack.c.bf16 %v1242_v25, %v1239_v19 }
 0x153   : > { %v2733_v28 = vpop.f32.mrf.mxu1  ;;  %v2781_v29 = vpop.f32.mrf.mxu0 }
 0x154   : > { %2556 = vst [vmem:[%s3376_s14 + $0x20] sm:$0xff] %v2401_v26   ;;  %2571 = vst [vmem:[%s3382_s18 + $0x20] sm:$0xff] %v2481_v27  }
 0x155   : > { %v1030_v30 = vpop.f32.mrf.mxu1  ;;  %v1255_v31 = vpop.f32.mrf.mxu0 }
 0x157   : > { %v2734_v32 = vpop.f32.mrf.mxu1  ;;  %v2782_v33 = vpop.f32.mrf.mxu0 }
 0x158   : > { %v2416_v34 = vpack.c.bf16 %v2734_v32, %v2733_v28  ;;  %v2496_v35 = vpack.c.bf16 %v2782_v33, %v2781_v29 }
 0x159   : > { %v1033_v36 = vpop.f32.mrf.mxu1  ;;  %v1258_v37 = vpop.f32.mrf.mxu0 }
 0x15a   : > { %2559 = vst [vmem:[%s3376_s14 + $0x38] sm:$0xff] %v2416_v34   ;;  %2574 = vst [vmem:[%s3382_s18 + $0x38] sm:$0xff] %v2496_v35   ;;  %v2411_v38 = vpack.c.bf16 %v1033_v36, %v1030_v30  ;;  %v2491_v39 = vpack.c.bf16 %v1258_v37, %v1255_v31 }
 0x15b   : > { %v2737_v40 = vpop.f32.mrf.mxu1  ;;  %v2785_v41 = vpop.f32.mrf.mxu0 }
 0x15c   : > { %2558 = vst [vmem:[%s3376_s14 + $0x30] sm:$0xff] %v2411_v38   ;;  %2573 = vst [vmem:[%s3382_s18 + $0x30] sm:$0xff] %v2491_v39  }
 0x15d   : > { %v1046_v42 = vpop.f32.mrf.mxu1  ;;  %v1271_v43 = vpop.f32.mrf.mxu0 }
 0x15f   : > { %v2738_v44 = vpop.f32.mrf.mxu1  ;;  %v2786_v45 = vpop.f32.mrf.mxu0 }
 0x160   : > { %v2426_v46 = vpack.c.bf16 %v2738_v44, %v2737_v40  ;;  %v2506_v47 = vpack.c.bf16 %v2786_v45, %v2785_v41 }
 0x161   : > { %v1049_v48 = vpop.f32.mrf.mxu1  ;;  %v1274_v49 = vpop.f32.mrf.mxu0 }
 0x162   : > { %2561 = vst [vmem:[%s3376_s14 + $0x48] sm:$0xff] %v2426_v46   ;;  %2576 = vst [vmem:[%s3382_s18 + $0x48] sm:$0xff] %v2506_v47   ;;  %v2421_v50 = vpack.c.bf16 %v1049_v48, %v1046_v42  ;;  %v2501_v51 = vpack.c.bf16 %v1274_v49, %v1271_v43 }
 0x163   : > { %v2741_v52 = vpop.f32.mrf.mxu1  ;;  %v2789_v53 = vpop.f32.mrf.mxu0 }
 0x164   : > { %2560 = vst [vmem:[%s3376_s14 + $0x40] sm:$0xff] %v2421_v50   ;;  %2575 = vst [vmem:[%s3382_s18 + $0x40] sm:$0xff] %v2501_v51  }
 0x165   : > { %v1062_v54 = vpop.f32.mrf.mxu1  ;;  %v1287_v55 = vpop.f32.mrf.mxu0 }
 0x167   : > { %v2742_v56 = vpop.f32.mrf.mxu1  ;;  %v2790_v57 = vpop.f32.mrf.mxu0 }
 0x168   : > { %v2436_v58 = vpack.c.bf16 %v2742_v56, %v2741_v52  ;;  %v2516_v59 = vpack.c.bf16 %v2790_v57, %v2789_v53 }
 0x169   : > { %v1065_v60 = vpop.f32.mrf.mxu1  ;;  %v1290_v61 = vpop.f32.mrf.mxu0 }
 0x16a   : > { %2563 = vst [vmem:[%s3376_s14 + $0x58] sm:$0xff] %v2436_v58   ;;  %2578 = vst [vmem:[%s3382_s18 + $0x58] sm:$0xff] %v2516_v59   ;;  %v2431_v62 = vpack.c.bf16 %v1065_v60, %v1062_v54  ;;  %v2511_v63 = vpack.c.bf16 %v1290_v61, %v1287_v55 }
 0x16b   : > { %v2745_v0 = vpop.f32.mrf.mxu1  ;;  %v2793_v1 = vpop.f32.mrf.mxu0 }
 0x16c   : > { %2562 = vst [vmem:[%s3376_s14 + $0x50] sm:$0xff] %v2431_v62   ;;  %2577 = vst [vmem:[%s3382_s18 + $0x50] sm:$0xff] %v2511_v63  }
 0x16d   : > { %v1078_v2 = vpop.f32.mrf.mxu1  ;;  %v1303_v3 = vpop.f32.mrf.mxu0 }
 0x16f   : > { %v2746_v4 = vpop.f32.mrf.mxu1  ;;  %v2794_v5 = vpop.f32.mrf.mxu0 }
 0x170   : > { %v2446_v6 = vpack.c.bf16 %v2746_v4, %v2745_v0  ;;  %v2526_v7 = vpack.c.bf16 %v2794_v5, %v2793_v1 }
 0x171   : > { %v1081_v8 = vpop.f32.mrf.mxu1  ;;  %v1306_v9 = vpop.f32.mrf.mxu0 }
 0x172   : > { %2565 = vst [vmem:[%s3376_s14 + $0x68] sm:$0xff] %v2446_v6   ;;  %2580 = vst [vmem:[%s3382_s18 + $0x68] sm:$0xff] %v2526_v7   ;;  %v2441_v10 = vpack.c.bf16 %v1081_v8, %v1078_v2  ;;  %v2521_v11 = vpack.c.bf16 %v1306_v9, %v1303_v3 }
 0x173   : > { %v2749_v12 = vpop.f32.mrf.mxu1  ;;  %v2797_v13 = vpop.f32.mrf.mxu0 }
 0x174   : > { %2564 = vst [vmem:[%s3376_s14 + $0x60] sm:$0xff] %v2441_v10   ;;  %2579 = vst [vmem:[%s3382_s18 + $0x60] sm:$0xff] %v2521_v11  }
 0x175   : > { %v1094_v14 = vpop.f32.mrf.mxu1  ;;  %v1319_v15 = vpop.f32.mrf.mxu0 }
 0x177   : > { %v2750_v16 = vpop.f32.mrf.mxu1  ;;  %v2798_v17 = vpop.f32.mrf.mxu0 }
 0x178   : > { %v2456_v18 = vpack.c.bf16 %v2750_v16, %v2749_v12  ;;  %v2536_v19 = vpack.c.bf16 %v2798_v17, %v2797_v13 }
 0x179   : > { %v1097_v20 = vpop.f32.mrf.mxu1  ;;  %v1322_v21 = vpop.f32.mrf.mxu0 }
 0x17a   : > { %2567 = vst [vmem:[%s3376_s14 + $0x78] sm:$0xff] %v2456_v18   ;;  %2582 = vst [vmem:[%s3382_s18 + $0x78] sm:$0xff] %v2536_v19   ;;  %v2451_v22 = vpack.c.bf16 %v1097_v20, %v1094_v14  ;;  %v2531_v23 = vpack.c.bf16 %v1322_v21, %v1319_v15 }
 0x17c   : > { %2566 = vst [vmem:[%s3376_s14 + $0x70] sm:$0xff] %v2451_v22   ;;  %2581 = vst [vmem:[%s3382_s18 + $0x70] sm:$0xff] %v2531_v23  }
 0x17d PF: > { %s25_s10 = sadd.s32 1, %s3011_s10   ;;  %s3452_s19 = sld [smem:[#allocation9_spill]] }
 0x17e   : > { %p22_p7 = scmp.ge.s32.totalorder %s25_s10, 4   ;;  %s3453_s20 = sld [smem:[#allocation8_spill]] }
 0x17f   : > { %s3454_s27 = smov %s2995_s28  ;;  %s3455_s28 = smov %s2999_s29 }
 0x180   : > { %s3457_s30 = smov %s3007_s9  ;;  %24 = sbr.rel (!%p22_p7) target bundleno = 8 (0x8), region = 124 }
 0x183   : > { %s3456_s29 = smov %s3452_s19 }
 0x184   : > { %s3458_s9 = smov %s3453_s20 }
 0x185   :  { %1894 = vsyncpa [#allocation3], 1 }
 0x186   :  { %1896 = vsyncpa [#allocation3 + $0x1], 1 }
 0x187   :  { %1897 = vsyncpa [#allocation5], 1 }
 0x188   :  { %1899 = vsyncpa [#allocation5 + $0x1], 1 }

// kernel: multi_head_attention.3
= control target key start
LH: loop header
LB: loop body
LE: loop exit
PB: predicated region body
PF: predicated region fallthrough
CT: control target
= control target key end

     0   :  { %9 = vsyncpa [#allocation6], 0  ;;  %s11449_s0 = inlined_call_operand.vmem [shape: bf16[2,256,128], index: 0, kind: input, shape index: {}]   ;;  %s11450_s1 = inlined_call_operand.vmem [shape: bf16[2,256,128], index: 1, kind: input, shape index: {}]   ;;  %s11451_s2 = inlined_call_operand.vmem [shape: bf16[2,256,128], index: 2, kind: input, shape index: {}]   ;;  %s11452_s3 = inlined_call_operand.vmem [shape: bf16[128,128], index: 3, kind: input, shape index: {}]   ;;  %s11453_s4 = inlined_call_operand.hbm [shape: f32[2,256,128], index: 4, kind: output, shape index: {}]  }
   0x1   :  { %11 = vsyncpa [#allocation6 + $0x1], 0  ;;  %s7590_s15 = smov 0   ;;  %s7592_s16 = smov 0  }
   0x2   :  { %s7594_s17 = smov 0   ;;  %s7596_s18 = smov 0  }
   0x3   :  { %s7598_s19 = smov 0   ;;  %s7600_s20 = smov 0  }
   0x4 LB: > { %s5670_s21 = sadd.s32 4294967295, %s7557_s20   ;;  %s5671_s22 = sadd.s32 4294967294, %s7557_s20   ;;  %s7557_s20 = sphi %s7600_s20, %s17_s20   ;;  %s7553_s19 = sphi %s7598_s19, %s12448_s19   ;;  %s7549_s18 = sphi %s7596_s18, %s12447_s18   ;;  %s7545_s17 = sphi %s7594_s17, %s12446_s17   ;;  %s7541_s16 = sphi %s7592_s16, %s12445_s16   ;;  %s7537_s15 = sphi %s7590_s15, %s12444_s15  }
   0x5   : > { %s36_s23 = sadd.s32 1, %s7553_s19  ;;  %s150_s24 = sadd.s32 1, %s7545_s17 }
   0x6   : > { %p38_p0 = scmp.ge.s32.totalorder %s36_s23, 2  ;;  %p160_p1 = scmp.ne.s32.totalorder %s7545_s17, %s7541_s16 }
   0x7   : > { %p161_p2 = scmp.eq.s32.totalorder %s5670_s21, 1  ;;  %p166_p3 = scmp.ne.s32.totalorder %s7541_s16, %s7537_s15 }
   0x8   : > { %s12450_s23 = smov (%p38_p0, %s36_s23), 0  ;;  %p167_p5 = scmp.eq.s32.totalorder %s5671_s22, 1 }
   0x9   : > { %p7630_p4 = por %p161_p2, %p160_p1  ;;  %s145_s26 = ssub.s32 %s7553_s19, %s12450_s23 }
   0xa   : > { %p5674_p6 = scmp.ge.s32.totalorder %s7557_s20, 1  ;;  %p148_p7 = scmp.eq.s32.totalorder %s145_s26, 0 }
   0xb   : > { %p7637_p8 = por %p167_p5, %p166_p3  ;;  %p227_p9 = scmp.lt.s32.totalorder %s7557_s20, 3 }
   0xc   : > { %s7643_s28 = scalar_select %p148_p7, %s7545_s17, %s150_s24  }
   0xd   : > { %p228_p10 = pnand %p5674_p6, %p227_p9 }
   0xf   : > { %231 = sbr.rel (%p228_p10) target bundleno = 2633 (0xa49), region = 36 }
  0x14   : > { %p276_p11 = scmp.lt.s32.totalorder %s7549_s18, 1  ;;  %vm563_vm0 = vcmask 261120   ;;  %s7559_s8 = smov 96   ;;  %vm2792_vm1 = vcmask 523520   ;;  %vm3995_vm2 = vcmask 785920   ;;  %vm5198_vm3 = vcmask 1048320  }
  0x15   : > { %s7560_s21 = smov 64   ;;  %s7561_s22 = smov 32  }
  0x16   : > { %s277_s29 = scalar_select %p276_p11, %s7549_s18, 1 }
  0x18   : > { %s7647_s30 = sshll.u32 %s277_s29, 7 }
  0x19   : > { %s7653_s7 = scalar_lea.vmem %s11450_s1, %s7647_s30  ;;  %s7705_s11 = scalar_lea.vmem %s11449_s0, %s7647_s30 }
  0x1a   : > { %v7656_v0 = vld [vmem:[%s7653_s7 + $0x78] sm:$0xff]   ;;  %v7664_v2 = vld [vmem:[%s7653_s7 + $0x70] sm:$0xff]   ;;  %v7682_v5 = vld [vmem:[%s7653_s7 + $0x68] sm:$0xff]   ;;  %s7759_s14 = scalar_lea.vmem %s11451_s2, %s7647_s30 }
  0x1b   : > { %v7659_v1 = vld [vmem:[%s7653_s7 + $0x38] sm:$0xff]   ;;  %6539 = vmatprep.subr.msk.bf16.mxu0 %vm563_vm0, %v7656_v0  ;;  %1684 = vrot.lane.b32.xlu1 %v7656_v0, %s7559_s8  ;;  %v7675_v4 = vld [vmem:[%s7653_s7 + $0x30] sm:$0xff]   ;;  %v7687_v7 = vld [vmem:[%s7653_s7 + $0x28] sm:$0xff]  }
  0x1c   : > { %v634_v3 = vsel %vm563_vm0, %v7659_v1, 0  ;;  %1668 = vrot.lane.b32.xlu0 %v7659_v1, %s7559_s8  ;;  %v631_v6 = vsel %vm563_vm0, %v7675_v4, 0  ;;  %v7694_v8 = vld [vmem:[%s7653_s7 + $0x60] sm:$0xff]   ;;  %v7710_v10 = vld [vmem:[%s7653_s7 + $0x18] sm:$0xff]   ;;  %v628_v12 = vsel %vm563_vm0, %v7687_v7, 0  ;;  %v7720_v13 = vld [vmem:[%s7653_s7 + $0x10] sm:$0xff]  }
  0x1d   : > { %5812 = vmatpush3.bf16.xpose.msra.mxu0 %v634_v3  ;;  %v7699_v9 = vld [vmem:[%s7653_s7 + $0x20] sm:$0xff]   ;;  %v7729_v14 = vld [vmem:[%s7653_s7 + $0x58] sm:$0xff]   ;;  %v7734_v15 = vld [vmem:[%s7653_s7 + $0x8] sm:$0xff]   ;;  %v622_v23 = vsel %vm563_vm0, %v7710_v10, 0  ;;  %v619_v30 = vsel %vm563_vm0, %v7720_v13, 0 }
  0x1e   : > { %6540 = vmatprep.subr.msk.bf16.mxu0 %vm563_vm0, %v7664_v2  ;;  %v7715_v11 = vld [vmem:[%s7705_s11] sm:$0xff]   ;;  %v7741_v16 = vld [vmem:[%s7653_s7 + $0x50] sm:$0xff]   ;;  %v625_v17 = vsel %vm563_vm0, %v7699_v9, 0  ;;  %v7753_v19 = vld [vmem:[%s7653_s7 + $0x48] sm:$0xff]   ;;  %v616_v41 = vsel %vm563_vm0, %v7734_v15, 0 }
  0x1f   : > { %1682 = vrot.lane.b32.xlu1 %v7664_v2, %s7559_s8  ;;  %5827 = vmatprep.mubr.msk.bf16.mxu0 %vm563_vm0, %v7715_v11  ;;  %v7746_v18 = vld [vmem:[%s7653_s7] sm:$0xff]   ;;  %v7769_v21 = vld [vmem:[%s7705_s11 + $0x10] sm:$0xff]   ;;  %v7774_v22 = vld [vmem:[%s7759_s14 + $0x78] sm:$0xff]  }
  0x20   : > { %1666 = vrot.lane.b32.xlu0 %v7675_v4, %s7559_s8  ;;  %v7764_v20 = vld [vmem:[%s7653_s7 + $0x40] sm:$0xff]   ;;  %v7779_v24 = vld [vmem:[%s7759_s14 + $0x38] sm:$0xff]   ;;  %5859 = vmatprep.subr.bf16.mxu1 %v7774_v22  ;;  %v7783_v25 = vld [vmem:[%s7705_s11 + $0x8] sm:$0xff]   ;;  %v613_v48 = vsel %vm563_vm0, %v7746_v18, 0 }
  0x21   : > { %5860 = vmatpush3.bf16.msra.mxu1 %v7779_v24  ;;  %v7789_v26 = vld [vmem:[%s7705_s11 + $0x20] sm:$0xff]   ;;  %v7794_v27 = vld [vmem:[%s7759_s14 + $0x70] sm:$0xff]   ;;  %v7800_v29 = vld [vmem:[%s7759_s14 + $0x68] sm:$0xff]  }
  0x22   : > { %v7797_v28 = vld [vmem:[%s7759_s14 + $0x30] sm:$0xff]   ;;  %5861 = vmatprep.subr.bf16.mxu1 %v7794_v27  ;;  %v7808_v31 = vld [vmem:[%s7759_s14 + $0x28] sm:$0xff]   ;;  %v7811_v32 = vld [vmem:[%s7705_s11 + $0x18] sm:$0xff]  }
  0x23   : > { %1680 = vrot.lane.b32.xlu1 %v7682_v5, %s7559_s8  ;;  %v7819_v33 = vld [vmem:[%s7705_s11 + $0x30] sm:$0xff]   ;;  %v7823_v34 = vld [vmem:[%s7705_s11 + $0x40] sm:$0xff]   ;;  %v7826_v35 = vld [vmem:[%s7705_s11 + $0x28] sm:$0xff]  }
  0x24   : > { %1664 = vrot.lane.b32.xlu0 %v7687_v7, %s7559_s8  ;;  %11586 = vst [vmem:[#allocation8_spill] sm:$0xff] %v7826_v35  ;;  %v7834_v36 = vld [vmem:[%s7759_s14 + $0x60] sm:$0xff]   ;;  %v7840_v38 = vld [vmem:[%s7759_s14 + $0x58] sm:$0xff]   ;;  %v7865_v42 = vld [vmem:[%s7759_s14 + $0x50] sm:$0xff]  }
  0x25   : > { %5814 = vmatpush3.bf16.xpose.msra.mxu0 %v631_v6  ;;  %5862 = vmatpush3.bf16.msra.mxu1 %v7797_v28  ;;  %v7837_v37 = vld [vmem:[%s7759_s14 + $0x20] sm:$0xff]   ;;  %v7843_v39 = vld [vmem:[%s7759_s14 + $0x18] sm:$0xff]   ;;  %v7868_v43 = vld [vmem:[%s7759_s14 + $0x10] sm:$0xff]  }
  0x26   : > { %6541 = vmatprep.subr.msk.bf16.mxu0 %vm563_vm0, %v7682_v5  ;;  %5863 = vmatprep.subr.bf16.mxu1 %v7800_v29  ;;  %v7855_v40 = vld [vmem:[%s7705_s11 + $0x38] sm:$0xff]   ;;  %v7871_v44 = vld [vmem:[%s7759_s14 + $0x48] sm:$0xff]   ;;  %v7888_v47 = vld [vmem:[%s7705_s11 + $0x50] sm:$0xff]  }
  0x27   : > { %1678 = vrot.lane.b32.xlu1 %v7694_v8, %s7559_s8  ;;  %11587 = vst [vmem:[#allocation9_spill] sm:$0xff] %v7855_v40  ;;  %v7879_v45 = vld [vmem:[%s7705_s11 + $0x48] sm:$0xff]   ;;  %v7899_v49 = vld [vmem:[%s7759_s14 + $0x40] sm:$0xff]   ;;  %v7913_v51 = vld [vmem:[%s7705_s11 + $0x58] sm:$0xff]  }
  0x28   : > { %1662 = vrot.lane.b32.xlu0 %v7699_v9, %s7559_s8  ;;  %11588 = vst [vmem:[#allocation10_spill] sm:$0xff] %v7879_v45  ;;  %v7883_v46 = vld [vmem:[%s7759_s14 + $0x8] sm:$0xff]   ;;  %v7902_v50 = vld [vmem:[%s7759_s14] sm:$0xff]   ;;  %11589 = vst [vmem:[#allocation11_spill] sm:$0xff] %v7913_v51 }
  0x29   : > { %5864 = vmatpush3.bf16.msra.mxu1 %v7808_v31  ;;  %v7920_v52 = vld [vmem:[%s7705_s11 + $0x60] sm:$0xff]   ;;  %v7939_v53 = vld [vmem:[%s7705_s11 + $0x68] sm:$0xff]   ;;  %v7944_v54 = vld [vmem:[%s7705_s11 + $0x70] sm:$0xff]  }
  0x2a   : > { %5865 = vmatprep.subr.bf16.mxu1 %v7834_v36  ;;  %v7961_v55 = vld [vmem:[%s7705_s11 + $0x78] sm:$0xff]  }
  0x2b   : > { %1660 = vrot.lane.b32.xlu1 %v7710_v10, %s7559_s8 }
  0x2c   : > { %1658 = vrot.lane.b32.xlu0 %v7720_v13, %s7559_s8 }
  0x2d   : > { %5816 = vmatpush3.bf16.xpose.msra.mxu0 %v628_v12  ;;  %5866 = vmatpush3.bf16.msra.mxu1 %v7837_v37 }
  0x2e   : > { %6542 = vmatprep.subr.msk.bf16.mxu0 %vm563_vm0, %v7694_v8  ;;  %5867 = vmatprep.subr.bf16.mxu1 %v7840_v38 }
  0x2f   : > { %1676 = vrot.lane.b32.xlu1 %v7729_v14, %s7559_s8 }
  0x30   : > { %1656 = vrot.lane.b32.xlu0 %v7734_v15, %s7559_s8 }
  0x31   : > { %5868 = vmatpush3.bf16.msra.mxu1 %v7843_v39 }
  0x32   : > { %5869 = vmatprep.subr.bf16.mxu1 %v7865_v42 }
  0x33   : > { %1674 = vrot.lane.b32.xlu1 %v7741_v16, %s7559_s8 }
  0x34   : > { %1654 = vrot.lane.b32.xlu0 %v7746_v18, %s7559_s8 }
  0x35   : > { %5818 = vmatpush3.bf16.xpose.msra.mxu0 %v625_v17  ;;  %5870 = vmatpush3.bf16.msra.mxu1 %v7868_v43 }
  0x36   : > { %6543 = vmatprep.subr.msk.bf16.mxu0 %vm563_vm0, %v7729_v14  ;;  %5871 = vmatprep.subr.bf16.mxu1 %v7871_v44 }
  0x37   : > { %1672 = vrot.lane.b32.xlu1 %v7753_v19, %s7559_s8 }
  0x38   : > { %1622 = vrot.lane.b32.xlu0 %v7715_v11, %s7559_s8 }
  0x39   : > { %5872 = vmatpush3.bf16.msra.mxu1 %v7883_v46 }
  0x3a   : > { %5873 = vmatprep.subr.bf16.mxu1 %v7899_v49 }
  0x3b   : > { %1670 = vrot.lane.b32.xlu1 %v7764_v20, %s7559_s8 }
  0x3c   : > { %1626 = vrot.lane.b32.xlu0 %v7769_v21, %s7559_s8 }
  0x3d   : > { %5820 = vmatpush3.bf16.xpose.msra.mxu0 %v622_v23  ;;  %5874 = vmatpush3.bf16.msra.mxu1 %v7902_v50 }
  0x3e   : > { %6544 = vmatprep.subr.msk.bf16.mxu0 %vm563_vm0, %v7741_v16 }
  0x3f   : > { %1624 = vrot.lane.b32.xlu1 %v7783_v25, %s7559_s8 }
  0x40   : > { %1630 = vrot.lane.b32.xlu0 %v7789_v26, %s7559_s8 }
  0x43   : > { %1628 = vrot.lane.b32.xlu1 %v7811_v32, %s7559_s8 }
  0x44   : > { %1634 = vrot.lane.b32.xlu0 %v7819_v33, %s7559_s8 }
  0x45   : > { %5822 = vmatpush3.bf16.xpose.msra.mxu0 %v619_v30 }
  0x46   : > { %6545 = vmatprep.subr.msk.bf16.mxu0 %vm563_vm0, %v7753_v19 }
  0x47   : > { %1632 = vrot.lane.b32.xlu1 %v7826_v35, %s7559_s8 }
  0x48   : > { %1638 = vrot.lane.b32.xlu0 %v7823_v34, %s7559_s8 }
  0x4b   : > { %1636 = vrot.lane.b32.xlu1 %v7855_v40, %s7559_s8 }
  0x4c   : > { %2887 = vrot.lane.b32.xlu0 %v7656_v0, %s7560_s21 }
  0x4d   : > { %5824 = vmatpush3.bf16.xpose.msra.mxu0 %v616_v41 }
  0x4e   : > { %6546 = vmatprep.subr.msk.bf16.mxu0 %vm563_vm0, %v7764_v20 }
  0x4f   : > { %2871 = vrot.lane.b32.xlu1 %v7659_v1, %s7560_s21 }
  0x50   : > { %2869 = vrot.lane.b32.xlu0 %v7675_v4, %s7560_s21 }
  0x53   : > { %1640 = vrot.lane.b32.xlu1 %v7879_v45, %s7559_s8 }
  0x54   : > { %1642 = vrot.lane.b32.xlu0 %v7888_v47, %s7559_s8 }
  0x55   : > { %5826 = vmatpush3.bf16.xpose.msra.mxu0 %v613_v48 }
  0x57   : > { %2885 = vrot.lane.b32.xlu1 %v7664_v2, %s7560_s21 }
  0x58   : > { %2883 = vrot.lane.b32.xlu0 %v7682_v5, %s7560_s21 }
  0x5b   : > { %2867 = vrot.lane.b32.xlu1 %v7687_v7, %s7560_s21 }
  0x5c   : > { %5828 = vmatmul.mubr.msk.bf16.vlgmr.msra.gmra.mxu0 %vm563_vm0, %v7715_v11  ;;  %2865 = vrot.lane.b32.xlu0 %v7699_v9, %s7560_s21 }
  0x5d   : > { %5829 = vmatprep.mubr.msk.bf16.mxu0 %vm563_vm0, %v7783_v25 }
  0x5f   : > { %1644 = vrot.lane.b32.xlu1 %v7913_v51, %s7559_s8 }
  0x60   : > { %1646 = vrot.lane.b32.xlu0 %v7920_v52, %s7559_s8 }
  0x63   : > { %2881 = vrot.lane.b32.xlu1 %v7694_v8, %s7560_s21 }
  0x64   : > { %5830 = vmatmul.mubr.msk.bf16.gmra.mxu0 %vm563_vm0, %v7783_v25  ;;  %2879 = vrot.lane.b32.xlu0 %v7729_v14, %s7560_s21 }
  0x65   : > { %5831 = vmatprep.mubr.msk.bf16.mxu0 %vm563_vm0, %v7769_v21 }
  0x67   : > { %2863 = vrot.lane.b32.xlu1 %v7710_v10, %s7560_s21 }
  0x68   : > { %2861 = vrot.lane.b32.xlu0 %v7720_v13, %s7560_s21 }
  0x6b   : > { %1648 = vrot.lane.b32.xlu1 %v7939_v53, %s7559_s8 }
  0x6c   : > { %5832 = vmatmul.mubr.msk.bf16.gmra.mxu0 %vm563_vm0, %v7769_v21  ;;  %1650 = vrot.lane.b32.xlu0 %v7944_v54, %s7559_s8 }
  0x6d   : > { %5833 = vmatprep.mubr.msk.bf16.mxu0 %vm563_vm0, %v7811_v32 }
  0x6f   : > { %2877 = vrot.lane.b32.xlu1 %v7741_v16, %s7560_s21 }
  0x70   : > { %2875 = vrot.lane.b32.xlu0 %v7753_v19, %s7560_s21 }
  0x73   : > { %2859 = vrot.lane.b32.xlu1 %v7734_v15, %s7560_s21 }
  0x74   : > { %5834 = vmatmul.mubr.msk.bf16.gmra.mxu0 %vm563_vm0, %v7811_v32  ;;  %2857 = vrot.lane.b32.xlu0 %v7746_v18, %s7560_s21 }
  0x75   : > { %5835 = vmatprep.mubr.msk.bf16.mxu0 %vm563_vm0, %v7789_v26 }
  0x77   : > { %1652 = vrot.lane.b32.xlu1 %v7961_v55, %s7559_s8 }
  0x78   : > { %2825 = vrot.lane.b32.xlu0 %v7715_v11, %s7560_s21 }
  0x7b   : > { %2873 = vrot.lane.b32.xlu1 %v7764_v20, %s7560_s21 }
  0x7c   : > { %5836 = vmatmul.mubr.msk.bf16.gmra.mxu0 %vm563_vm0, %v7789_v26  ;;  %2829 = vrot.lane.b32.xlu0 %v7769_v21, %s7560_s21 }
  0x7d   : > { %5837 = vmatprep.mubr.msk.bf16.mxu0 %vm563_vm0, %v7826_v35 }
  0x7f   : > { %2827 = vrot.lane.b32.xlu1 %v7783_v25, %s7560_s21 }
  0x80   : > { %2833 = vrot.lane.b32.xlu0 %v7789_v26, %s7560_s21 }
  0x83   : > { %2831 = vrot.lane.b32.xlu1 %v7811_v32, %s7560_s21 }
  0x84   : > { %5838 = vmatmul.mubr.msk.bf16.gmra.mxu0 %vm563_vm0, %v7826_v35  ;;  %2837 = vrot.lane.b32.xlu0 %v7819_v33, %s7560_s21 }
  0x85   : > { %5839 = vmatprep.mubr.msk.bf16.mxu0 %vm563_vm0, %v7819_v33 }
  0x87   : > { %2835 = vrot.lane.b32.xlu1 %v7826_v35, %s7560_s21 }
  0x88   : > { %2841 = vrot.lane.b32.xlu0 %v7823_v34, %s7560_s21 }
  0x8b   : > { %2839 = vrot.lane.b32.xlu1 %v7855_v40, %s7560_s21 }
  0x8c   : > { %5840 = vmatmul.mubr.msk.bf16.gmra.mxu0 %vm563_vm0, %v7819_v33  ;;  %4090 = vrot.lane.b32.xlu0 %v7656_v0, %s7561_s22 }
  0x8d   : > { %5841 = vmatprep.mubr.msk.bf16.mxu0 %vm563_vm0, %v7855_v40  ;;  %v1685_v56 = vpop.permute.xlu1 %1684 }
  0x8e   : > { %6547 = vmatprep.subr.msk.bf16.mxu1 %vm563_vm0, %v1685_v56  ;;  %v8074_v57 = vpop.permute.xlu0 %1668 }
  0x8f   : > { %4074 = vrot.lane.b32.xlu1 %v7659_v1, %s7561_s22 }
  0x90   : > { %4072 = vrot.lane.b32.xlu0 %v7675_v4, %s7561_s22 }
  0x91   : > { %v8082_v59 = vpop.permute.xlu1 %1682 }
  0x92   : > { %v8078_v58 = vpop.permute.xlu0 %1666 }
  0x93   : > { %2843 = vrot.lane.b32.xlu1 %v7879_v45, %s7560_s21 }
  0x94   : > { %5842 = vmatmul.mubr.msk.bf16.gmra.mxu0 %vm563_vm0, %v7855_v40  ;;  %2845 = vrot.lane.b32.xlu0 %v7888_v47, %s7560_s21 }
  0x95   : > { %5843 = vmatprep.mubr.msk.bf16.mxu0 %vm563_vm0, %v7823_v34  ;;  %v8088_v61 = vpop.permute.xlu1 %1680 }
  0x96   : > { %v8086_v60 = vpop.permute.xlu0 %1664 }
  0x97   : > { %4088 = vrot.lane.b32.xlu1 %v7664_v2, %s7561_s22 }
  0x98   : > { %4086 = vrot.lane.b32.xlu0 %v7682_v5, %s7561_s22 }
  0x99   : > { %v8096_v63 = vpop.permute.xlu1 %1678 }
  0x9a   : > { %v8094_v62 = vpop.permute.xlu0 %1662 }
  0x9b   : > { %4070 = vrot.lane.b32.xlu1 %v7687_v7, %s7561_s22  ;;  %11590 = vst [vmem:[#allocation12_spill] sm:$0xff] %v8094_v62 }
  0x9c   : > { %5844 = vmatmul.mubr.msk.bf16.gmra.mxu0 %vm563_vm0, %v7823_v34  ;;  %4068 = vrot.lane.b32.xlu0 %v7699_v9, %s7561_s22 }
  0x9d   : > { %5845 = vmatprep.mubr.msk.bf16.mxu0 %vm563_vm0, %v7879_v45  ;;  %v8102_v1 = vpop.permute.xlu1 %1660 }
  0x9e   : > { %v8100_v0 = vpop.permute.xlu0 %1658  ;;  %11592 = vst [vmem:[#allocation14_spill] sm:$0xff] %v8102_v1 }
  0x9f   : > { %2847 = vrot.lane.b32.xlu1 %v7913_v51, %s7560_s21  ;;  %11591 = vst [vmem:[#allocation13_spill] sm:$0xff] %v8100_v0 }
  0xa0   : > { %2849 = vrot.lane.b32.xlu0 %v7920_v52, %s7560_s21 }
  0xa1   : > { %v8106_v3 = vpop.permute.xlu1 %1676 }
  0xa2   : > { %v8104_v2 = vpop.permute.xlu0 %1656  ;;  %11594 = vst [vmem:[#allocation16_spill] sm:$0xff] %v8106_v3 }
  0xa3   : > { %4084 = vrot.lane.b32.xlu1 %v7694_v8, %s7561_s22  ;;  %11593 = vst [vmem:[#allocation15_spill] sm:$0xff] %v8104_v2 }
  0xa4   : > { %5846 = vmatmul.mubr.msk.bf16.gmra.mxu0 %vm563_vm0, %v7879_v45  ;;  %4082 = vrot.lane.b32.xlu0 %v7729_v14, %s7561_s22 }
  0xa5   : > { %5847 = vmatprep.mubr.msk.bf16.mxu0 %vm563_vm0, %v7888_v47  ;;  %v8110_v5 = vpop.permute.xlu1 %1674 }
  0xa6   : > { %v8108_v4 = vpop.permute.xlu0 %1654  ;;  %11596 = vst [vmem:[#allocation18_spill] sm:$0xff] %v8110_v5 }
  0xa7   : > { %4066 = vrot.lane.b32.xlu1 %v7710_v10, %s7561_s22  ;;  %11595 = vst [vmem:[#allocation17_spill] sm:$0xff] %v8108_v4 }
  0xa8   : > { %4064 = vrot.lane.b32.xlu0 %v7720_v13, %s7561_s22 }
  0xa9   : > { %v8114_v7 = vpop.permute.xlu1 %1672 }
  0xaa   : > { %v8112_v6 = vpop.permute.xlu0 %1622  ;;  %11598 = vst [vmem:[#allocation20_spill] sm:$0xff] %v8114_v7 }
  0xab   : > { %2851 = vrot.lane.b32.xlu1 %v7939_v53, %s7560_s21  ;;  %11597 = vst [vmem:[#allocation19_spill] sm:$0xff] %v8112_v6 }
  0xac   : > { %5848 = vmatmul.mubr.msk.bf16.gmra.mxu0 %vm563_vm0, %v7888_v47  ;;  %2853 = vrot.lane.b32.xlu0 %v7944_v54, %s7560_s21 }
  0xad   : > { %5849 = vmatprep.mubr.msk.bf16.mxu0 %vm563_vm0, %v7913_v51  ;;  %v8118_v9 = vpop.permute.xlu1 %1670 }
  0xae   : > { %v8116_v8 = vpop.permute.xlu0 %1626  ;;  %11600 = vst [vmem:[#allocation22_spill] sm:$0xff] %v8118_v9 }
  0xaf   : > { %4080 = vrot.lane.b32.xlu1 %v7741_v16, %s7561_s22  ;;  %11599 = vst [vmem:[#allocation21_spill] sm:$0xff] %v8116_v8 }
  0xb0   : > { %4078 = vrot.lane.b32.xlu0 %v7753_v19, %s7561_s22 }
  0xb2   : > { %v8120_v10 = vpop.permute.xlu0 %1630 }
  0xb3   : > { %4062 = vrot.lane.b32.xlu1 %v7734_v15, %s7561_s22  ;;  %11601 = vst [vmem:[#allocation23_spill] sm:$0xff] %v8120_v10 }
  0xb4   : > { %5850 = vmatmul.mubr.msk.bf16.gmra.mxu0 %vm563_vm0, %v7913_v51  ;;  %4060 = vrot.lane.b32.xlu0 %v7746_v18, %s7561_s22 }
  0xb5   : > { %5851 = vmatprep.mubr.msk.bf16.mxu0 %vm563_vm0, %v7920_v52 }
  0xb6   : > { %v8124_v12 = vpop.permute.xlu0 %1634 }
  0xb7   : > { %2855 = vrot.lane.b32.xlu1 %v7961_v55, %s7560_s21  ;;  %11603 = vst [vmem:[#allocation25_spill] sm:$0xff] %v8124_v12 }
  0xb8   : > { %4028 = vrot.lane.b32.xlu0 %v7715_v11, %s7561_s22  ;;  %v8122_v11 = vpop.permute.xlu1 %1624 }
  0xb9   : > { %11602 = vst [vmem:[#allocation24_spill] sm:$0xff] %v8122_v11 }
  0xba   : > { %v8128_v14 = vpop.permute.xlu0 %1638 }
  0xbb   : > { %4076 = vrot.lane.b32.xlu1 %v7764_v20, %s7561_s22  ;;  %11605 = vst [vmem:[#allocation27_spill] sm:$0xff] %v8128_v14 }
  0xbc   : > { %5852 = vmatmul.mubr.msk.bf16.gmra.mxu0 %vm563_vm0, %v7920_v52  ;;  %v8126_v13 = vpop.permute.xlu1 %1628 }
  0xbd   : > { %5853 = vmatprep.mubr.msk.bf16.mxu0 %vm563_vm0, %v7939_v53  ;;  %11604 = vst [vmem:[#allocation26_spill] sm:$0xff] %v8126_v13 }
  0xbe   : > { %v8132_v16 = vpop.permute.xlu0 %2887 }
  0xbf   : > { %11607 = vst [vmem:[#allocation29_spill] sm:$0xff] %v8132_v16 }
  0xc0   : > { %v8130_v15 = vpop.permute.xlu1 %1632 }
  0xc1   : > { %11606 = vst [vmem:[#allocation28_spill] sm:$0xff] %v8130_v15 }
  0xc2   : > { %v8136_v18 = vpop.permute.xlu0 %2869 }
  0xc3   : > { %11609 = vst [vmem:[#allocation31_spill] sm:$0xff] %v8136_v18 }
  0xc4   : > { %5854 = vmatmul.mubr.msk.bf16.gmra.mxu0 %vm563_vm0, %v7939_v53  ;;  %v8134_v17 = vpop.permute.xlu1 %1636 }
  0xc5   : > { %5855 = vmatprep.mubr.msk.bf16.mxu0 %vm563_vm0, %v7944_v54  ;;  %11608 = vst [vmem:[#allocation30_spill] sm:$0xff] %v8134_v17 }
  0xc6   : > { %v8140_v20 = vpop.permute.xlu0 %1642 }
  0xc7   : > { %11611 = vst [vmem:[#allocation33_spill] sm:$0xff] %v8140_v20 }
  0xc8   : > { %v8138_v19 = vpop.permute.xlu1 %2871 }
  0xc9   : > { %11610 = vst [vmem:[#allocation32_spill] sm:$0xff] %v8138_v19 }
  0xca   : > { %v8144_v30 = vpop.permute.xlu0 %2883 }
  0xcb   : > { %11613 = vst [vmem:[#allocation35_spill] sm:$0xff] %v8144_v30 }
  0xcc   : > { %5856 = vmatmul.mubr.msk.bf16.gmra.mxu0 %vm563_vm0, %v7944_v54  ;;  %v8142_v23 = vpop.permute.xlu1 %1640 }
  0xcd   : > { %5857 = vmatprep.mubr.msk.bf16.mxu0 %vm563_vm0, %v7961_v55  ;;  %11612 = vst [vmem:[#allocation34_spill] sm:$0xff] %v8142_v23 }
  0xce   : > { %v8148_v48 = vpop.permute.xlu0 %2865 }
  0xcf   : > { %11615 = vst [vmem:[#allocation37_spill] sm:$0xff] %v8148_v48 }
  0xd0   : > { %v8146_v41 = vpop.permute.xlu1 %2885 }
  0xd1   : > { %11614 = vst [vmem:[#allocation36_spill] sm:$0xff] %v8146_v41 }
  0xd2   : > { %v8160_v20 = vpop.permute.xlu0 %1646 }
  0xd3   : > { %11617 = vst [vmem:[#allocation39_spill] sm:$0xff] %v8160_v20 }
  0xd4   : > { %5858 = vmatmul.mubr.msk.bf16.gmra.mxu0 %vm563_vm0, %v7961_v55  ;;  %v8152_v53 = vpop.permute.xlu1 %2867 }
  0xd5   : > { %11616 = vst [vmem:[#allocation38_spill] sm:$0xff] %v8152_v53 }
  0xd6   : > { %v8174_v48 = vpop.permute.xlu0 %2879 }
  0xd7   : > { %11619 = vst [vmem:[#allocation41_spill] sm:$0xff] %v8174_v48 }
  0xd8   : > { %v8166_v17 = vpop.permute.xlu1 %1644 }
  0xd9   : > { %11618 = vst [vmem:[#allocation40_spill] sm:$0xff] %v8166_v17 }
  0xdc   : > { %v8178_v20 = vpop.permute.xlu1 %2881 }
  0xdd   : > { %11620 = vst [vmem:[#allocation42_spill] sm:$0xff] %v8178_v20 }
  0xe0   : > { %v8192_v8 = vpop.permute.xlu1 %2863 }
  0xe1   : > { %11622 = vst [vmem:[#allocation44_spill] sm:$0xff] %v8192_v8 }
 0x11c   : > { %v8150_v52 = vpop.f32.mrf.mxu0 }
 0x11e   : > { %v8154_v54 = vpop.f32.mrf.mxu0 }
 0x11f   : > { %v853_v55 = vmax.f32 %v8150_v52, %v8154_v54 }
 0x120   : > { %v8158_v56 = vpop.f32.mrf.mxu0 }
 0x121   : > { %854 = vmax.xlane.f32.xlu0 %v853_v55 }
 0x122   : > { %v8162_v23 = vpop.f32.mrf.mxu0 }
 0x123   : > { %v856_v14 = vmax.f32 %v8158_v56, %v8162_v23 }
 0x124   : > { %v8168_v12 = vpop.f32.mrf.mxu0 }
 0x125   : > { %857 = vmax.xlane.f32.xlu0 %v856_v14  ;;  %v8186_v14 = vpop.permute.xlu0 %2861 }
 0x126   : > { %v8170_v15 = vpop.f32.mrf.mxu0  ;;  %11621 = vst [vmem:[#allocation43_spill] sm:$0xff] %v8186_v14  ;;  %v8204_v14 = vpop.permute.xlu1 %1648 }
 0x127   : > { %v859_v10 = vmax.f32 %v8168_v12, %v8170_v15  ;;  %11624 = vst [vmem:[#allocation46_spill] sm:$0xff] %v8204_v14 }
 0x128   : > { %v8176_v55 = vpop.f32.mrf.mxu0 }
 0x129   : > { %860 = vmax.xlane.f32.xlu1 %v859_v10  ;;  %v8200_v41 = vpop.permute.xlu0 %1650 }
 0x12a   : > { %v8180_v13 = vpop.f32.mrf.mxu0  ;;  %11623 = vst [vmem:[#allocation45_spill] sm:$0xff] %v8200_v41  ;;  %v8218_v16 = vpop.permute.xlu1 %2877 }
 0x12b   : > { %v862_v17 = vmax.f32 %v8176_v55, %v8180_v13  ;;  %11626 = vst [vmem:[#allocation48_spill] sm:$0xff] %v8218_v16 }
 0x12c   : > { %v8184_v53 = vpop.f32.mrf.mxu0 }
 0x12d   : > { %863 = vmax.xlane.f32.xlu1 %v862_v17 }
 0x12e   : > { %v8188_v30 = vpop.f32.mrf.mxu0 }
 0x12f   : > { %v865_v48 = vmax.f32 %v8184_v53, %v8188_v30 }
 0x130   : > { %v8194_v10 = vpop.f32.mrf.mxu0 }
 0x131   : > { %866 = vmax.xlane.f32.xlu0 %v865_v48  ;;  %v8212_v48 = vpop.permute.xlu0 %2875 }
 0x132   : > { %v8196_v20 = vpop.f32.mrf.mxu0  ;;  %11625 = vst [vmem:[#allocation47_spill] sm:$0xff] %v8212_v48  ;;  %v8230_v48 = vpop.permute.xlu1 %2859 }
 0x133   : > { %v868_v18 = vmax.f32 %v8194_v10, %v8196_v20  ;;  %11628 = vst [vmem:[#allocation50_spill] sm:$0xff] %v8230_v48 }
 0x134   : > { %v8202_v17 = vpop.f32.mrf.mxu0 }
 0x135   : > { %869 = vmax.xlane.f32.xlu1 %v868_v18  ;;  %v8226_v9 = vpop.permute.xlu0 %2857 }
 0x136   : > { %v8206_v11 = vpop.f32.mrf.mxu0  ;;  %11627 = vst [vmem:[#allocation49_spill] sm:$0xff] %v8226_v9  ;;  %v8244_v51 = vpop.permute.xlu1 %1652 }
 0x137   : > { %v871_v8 = vmax.f32 %v8202_v17, %v8206_v11  ;;  %11630 = vst [vmem:[#allocation52_spill] sm:$0xff] %v8244_v51 }
 0x138   : > { %v8210_v19 = vpop.f32.mrf.mxu0 }
 0x139   : > { %872 = vmax.xlane.f32.xlu0 %v871_v8 }
 0x13a   : > { %v8214_v6 = vpop.f32.mrf.mxu0 }
 0x13b   : > { %v874_v41 = vmax.f32 %v8210_v19, %v8214_v6 }
 0x13c   : > { %v8220_v18 = vpop.f32.mrf.mxu0 }
 0x13d   : > { %875 = vmax.xlane.f32.xlu1 %v874_v41  ;;  %v8238_v41 = vpop.permute.xlu0 %2825 }
 0x13e   : > { %v8222_v14 = vpop.f32.mrf.mxu0  ;;  %11629 = vst [vmem:[#allocation51_spill] sm:$0xff] %v8238_v41  ;;  %v8256_v41 = vpop.permute.xlu1 %2873 }
 0x13f   : > { %v877_v4 = vmax.f32 %v8220_v18, %v8222_v14  ;;  %11633 = vst [vmem:[#allocation55_spill] sm:$0xff] %v8256_v41 }
 0x140   : > { %v8228_v8 = vpop.f32.mrf.mxu0 }
 0x141   : > { %878 = vmax.xlane.f32.xlu0 %v877_v4  ;;  %v8252_v1 = vpop.permute.xlu0 %2829 }
 0x142   : > { %v8232_v2 = vpop.f32.mrf.mxu0  ;;  %11631 = vst [vmem:[#allocation53_spill] sm:$0xff] %v8252_v1  ;;  %v8270_v62 = vpop.permute.xlu1 %2827 }
 0x143   : > { %v880_v16 = vmax.f32 %v8228_v8, %v8232_v2  ;;  %11638 = vst [vmem:[#allocation60_spill] sm:$0xff] %v8270_v62 }
 0x144   : > { %v8236_v7 = vpop.f32.mrf.mxu0 }
 0x145   : > { %881 = vmax.xlane.f32.xlu1 %v880_v16 }
 0x146   : > { %v8240_v0 = vpop.f32.mrf.mxu0 }
 0x147   : > { %v883_v9 = vmax.f32 %v8236_v7, %v8240_v0 }
 0x148   : > { %v8246_v4 = vpop.f32.mrf.mxu0 }
 0x149   : > { %884 = vmax.xlane.f32.xlu0 %v883_v9  ;;  %v8264_v9 = vpop.permute.xlu0 %2833 }
 0x14a   : > { %v8248_v48 = vpop.f32.mrf.mxu0  ;;  %11636 = vst [vmem:[#allocation58_spill] sm:$0xff] %v8264_v9  ;;  %v8282_v9 = vpop.permute.xlu1 %2831 }
 0x14b   : > { %v886_v5 = vmax.f32 %v8246_v4, %v8248_v48  ;;  %11643 = vst [vmem:[#allocation65_spill] sm:$0xff] %v8282_v9 }
 0x14c   : > { %v8254_v16 = vpop.f32.mrf.mxu0 }
 0x14d   : > { %11632 = vst [vmem:[#allocation54_spill] sm:$0xff] %v8254_v16  ;;  %887 = vmax.xlane.f32.xlu1 %v886_v5 }
 0x14e   : > { %v8258_v45 = vpop.f32.mrf.mxu0 }
 0x14f   : > { %11634 = vst [vmem:[#allocation56_spill] sm:$0xff] %v8258_v45  ;;  %v889_v51 = vmax.f32 %v8254_v16, %v8258_v45  ;;  %v8278_v45 = vpop.permute.xlu0 %2837 }
 0x150   : > { %v8262_v40 = vpop.f32.mrf.mxu0  ;;  %11641 = vst [vmem:[#allocation63_spill] sm:$0xff] %v8278_v45 }
 0x151   : > { %11635 = vst [vmem:[#allocation57_spill] sm:$0xff] %v8262_v40  ;;  %890 = vmax.xlane.f32.xlu0 %v889_v51 }
 0x152   : > { %v8266_v3 = vpop.f32.mrf.mxu0 }
 0x153   : > { %11637 = vst [vmem:[#allocation59_spill] sm:$0xff] %v8266_v3  ;;  %v892_v1 = vmax.f32 %v8262_v40, %v8266_v3 }
 0x154   : > { %v8272_v5 = vpop.f32.mrf.mxu0 }
 0x155   : > { %11639 = vst [vmem:[#allocation61_spill] sm:$0xff] %v8272_v5  ;;  %893 = vmax.xlane.f32.xlu1 %v892_v1  ;;  %v8290_v1 = vpop.permute.xlu0 %2841 }
 0x156   : > { %v8274_v41 = vpop.f32.mrf.mxu0  ;;  %11646 = vst [vmem:[#allocation68_spill] sm:$0xff] %v8290_v1 }
 0x157   : > { %11640 = vst [vmem:[#allocation62_spill] sm:$0xff] %v8274_v41  ;;  %v895_v35 = vmax.f32 %v8272_v5, %v8274_v41  ;;  %v8296_v41 = vpop.permute.xlu1 %2835 }
 0x158   : > { %v8280_v51 = vpop.f32.mrf.mxu0  ;;  %11648 = vst [vmem:[#allocation70_spill] sm:$0xff] %v8296_v41 }
 0x159   : > { %11642 = vst [vmem:[#allocation64_spill] sm:$0xff] %v8280_v51  ;;  %896 = vmax.xlane.f32.xlu0 %v895_v35 }
 0x15a   : > { %v8284_v16 = vpop.f32.mrf.mxu0 }
 0x15b   : > { %11644 = vst [vmem:[#allocation66_spill] sm:$0xff] %v8284_v16  ;;  %v898_v62 = vmax.f32 %v8280_v51, %v8284_v16  ;;  %v8304_v51 = vpop.permute.xlu0 %4090  ;;  %v8308_v1 = vpop.permute.xlu1 %2839 }
 0x15c   : > { %v8288_v3 = vpop.f32.mrf.mxu0  ;;  %11651 = vst [vmem:[#allocation73_spill] sm:$0xff] %v8304_v51  ;;  %11653 = vst [vmem:[#allocation75_spill] sm:$0xff] %v8308_v1 }
 0x15d   : > { %11645 = vst [vmem:[#allocation67_spill] sm:$0xff] %v8288_v3  ;;  %899 = vmax.xlane.f32.xlu1 %v898_v62 }
 0x15e   : > { %v8292_v40 = vpop.f32.mrf.mxu0 }
 0x15f   : > { %11647 = vst [vmem:[#allocation69_spill] sm:$0xff] %v8292_v40  ;;  %v901_v45 = vmax.f32 %v8288_v3, %v8292_v40 }
 0x160   : > { %v8298_v35 = vpop.f32.mrf.mxu0 }
 0x161   : > { %11649 = vst [vmem:[#allocation71_spill] sm:$0xff] %v8298_v35  ;;  %902 = vmax.xlane.f32.xlu0 %v901_v45  ;;  %v8316_v45 = vpop.permute.xlu0 %4072 }
 0x162   : > { %v8300_v9 = vpop.f32.mrf.mxu0  ;;  %11656 = vst [vmem:[#allocation78_spill] sm:$0xff] %v8316_v45 }
 0x163   : > { %11650 = vst [vmem:[#allocation72_spill] sm:$0xff] %v8300_v9  ;;  %v904_v16 = vmax.f32 %v8298_v35, %v8300_v9  ;;  %v8322_v9 = vpop.permute.xlu1 %4074 }
 0x164   : > { %v8306_v62 = vpop.f32.mrf.mxu0  ;;  %11658 = vst [vmem:[#allocation80_spill] sm:$0xff] %v8322_v9 }
 0x165   : > { %11652 = vst [vmem:[#allocation74_spill] sm:$0xff] %v8306_v62  ;;  %905 = vmax.xlane.f32.xlu1 %v904_v16 }
 0x166   : > { %v8310_v5 = vpop.f32.mrf.mxu0 }
 0x167   : > { %11654 = vst [vmem:[#allocation76_spill] sm:$0xff] %v8310_v5  ;;  %v907_v41 = vmax.f32 %v8306_v62, %v8310_v5  ;;  %v8330_v62 = vpop.permute.xlu0 %2845  ;;  %v8334_v45 = vpop.permute.xlu1 %2843 }
 0x168   : > { %v8314_v40 = vpop.f32.mrf.mxu0  ;;  %11661 = vst [vmem:[#allocation83_spill] sm:$0xff] %v8330_v62  ;;  %11663 = vst [vmem:[#allocation85_spill] sm:$0xff] %v8334_v45 }
 0x169   : > { %11655 = vst [vmem:[#allocation77_spill] sm:$0xff] %v8314_v40  ;;  %908 = vmax.xlane.f32.xlu0 %v907_v41 }
 0x16a   : > { %v8318_v3 = vpop.f32.mrf.mxu0 }
 0x16b   : > { %11657 = vst [vmem:[#allocation79_spill] sm:$0xff] %v8318_v3  ;;  %v910_v51 = vmax.f32 %v8314_v40, %v8318_v3 }
 0x16c   : > { %v8324_v16 = vpop.f32.mrf.mxu0 }
 0x16d   : > { %11659 = vst [vmem:[#allocation81_spill] sm:$0xff] %v8324_v16  ;;  %911 = vmax.xlane.f32.xlu1 %v910_v51  ;;  %v8342_v51 = vpop.permute.xlu0 %4086 }
 0x16e   : > { %v8326_v1 = vpop.f32.mrf.mxu0  ;;  %11666 = vst [vmem:[#allocation88_spill] sm:$0xff] %v8342_v51 }
 0x16f   : > { %11660 = vst [vmem:[#allocation82_spill] sm:$0xff] %v8326_v1  ;;  %v913_v5 = vmax.f32 %v8324_v16, %v8326_v1  ;;  %v8348_v1 = vpop.permute.xlu1 %4088 }
 0x170   : > { %v8332_v41 = vpop.f32.mrf.mxu0  ;;  %11668 = vst [vmem:[#allocation90_spill] sm:$0xff] %v8348_v1 }
 0x171   : > { %11662 = vst [vmem:[#allocation84_spill] sm:$0xff] %v8332_v41  ;;  %914 = vmax.xlane.f32.xlu0 %v913_v5 }
 0x172   : > { %v8336_v35 = vpop.f32.mrf.mxu0 }
 0x173   : > { %11664 = vst [vmem:[#allocation86_spill] sm:$0xff] %v8336_v35  ;;  %v916_v9 = vmax.f32 %v8332_v41, %v8336_v35  ;;  %v8356_v41 = vpop.permute.xlu0 %4068  ;;  %v8360_v51 = vpop.permute.xlu1 %4070 }
 0x174   : > { %v8340_v3 = vpop.f32.mrf.mxu0  ;;  %11671 = vst [vmem:[#allocation93_spill] sm:$0xff] %v8356_v41  ;;  %11673 = vst [vmem:[#allocation95_spill] sm:$0xff] %v8360_v51 }
 0x175   : > { %11665 = vst [vmem:[#allocation87_spill] sm:$0xff] %v8340_v3  ;;  %917 = vmax.xlane.f32.xlu1 %v916_v9 }
 0x176   : > { %v8344_v40 = vpop.f32.mrf.mxu0 }
 0x177   : > { %11667 = vst [vmem:[#allocation89_spill] sm:$0xff] %v8344_v40  ;;  %v919_v62 = vmax.f32 %v8340_v3, %v8344_v40 }
 0x178   : > { %v8350_v5 = vpop.f32.mrf.mxu0 }
 0x179   : > { %11669 = vst [vmem:[#allocation91_spill] sm:$0xff] %v8350_v5  ;;  %920 = vmax.xlane.f32.xlu0 %v919_v62  ;;  %v8368_v62 = vpop.permute.xlu0 %2849 }
 0x17a   : > { %v8352_v45 = vpop.f32.mrf.mxu0  ;;  %11676 = vst [vmem:[#allocation98_spill] sm:$0xff] %v8368_v62 }
 0x17b   : > { %11670 = vst [vmem:[#allocation92_spill] sm:$0xff] %v8352_v45  ;;  %v922_v35 = vmax.f32 %v8350_v5, %v8352_v45  ;;  %v8374_v45 = vpop.permute.xlu1 %2847 }
 0x17c   : > { %v8358_v9 = vpop.f32.mrf.mxu0  ;;  %11678 = vst [vmem:[#allocation100_spill] sm:$0xff] %v8374_v45 }
 0x17d   : > { %11672 = vst [vmem:[#allocation94_spill] sm:$0xff] %v8358_v9  ;;  %923 = vmax.xlane.f32.xlu1 %v922_v35 }
 0x17e   : > { %v8362_v16 = vpop.f32.mrf.mxu0 }
 0x17f   : > { %11674 = vst [vmem:[#allocation96_spill] sm:$0xff] %v8362_v16  ;;  %v925_v1 = vmax.f32 %v8358_v9, %v8362_v16  ;;  %v8382_v9 = vpop.permute.xlu0 %4082  ;;  %v8386_v62 = vpop.permute.xlu1 %4084 }
 0x180   : > { %v8366_v40 = vpop.f32.mrf.mxu0  ;;  %11681 = vst [vmem:[#allocation103_spill] sm:$0xff] %v8382_v9  ;;  %11683 = vst [vmem:[#allocation105_spill] sm:$0xff] %v8386_v62 }
 0x181   : > { %11675 = vst [vmem:[#allocation97_spill] sm:$0xff] %v8366_v40  ;;  %926 = vmax.xlane.f32.xlu0 %v925_v1 }
 0x182   : > { %v8370_v3 = vpop.f32.mrf.mxu0 }
 0x183   : > { %11677 = vst [vmem:[#allocation99_spill] sm:$0xff] %v8370_v3  ;;  %v928_v41 = vmax.f32 %v8366_v40, %v8370_v3 }
 0x184   : > { %v8376_v35 = vpop.f32.mrf.mxu0 }
 0x185   : > { %11679 = vst [vmem:[#allocation101_spill] sm:$0xff] %v8376_v35  ;;  %929 = vmax.xlane.f32.xlu1 %v928_v41  ;;  %v8394_v41 = vpop.permute.xlu0 %4064 }
 0x186   : > { %v8378_v51 = vpop.f32.mrf.mxu0  ;;  %11686 = vst [vmem:[#allocation108_spill] sm:$0xff] %v8394_v41 }
 0x187   : > { %11680 = vst [vmem:[#allocation102_spill] sm:$0xff] %v8378_v51  ;;  %v931_v16 = vmax.f32 %v8376_v35, %v8378_v51  ;;  %v8400_v51 = vpop.permute.xlu1 %4066 }
 0x188   : > { %v8384_v1 = vpop.f32.mrf.mxu0  ;;  %11688 = vst [vmem:[#allocation110_spill] sm:$0xff] %v8400_v51 }
 0x189   : > { %11682 = vst [vmem:[#allocation104_spill] sm:$0xff] %v8384_v1  ;;  %932 = vmax.xlane.f32.xlu1 %v931_v16 }
 0x18a   : > { %v8388_v5 = vpop.f32.mrf.mxu0 }
 0x18b   : > { %11684 = vst [vmem:[#allocation106_spill] sm:$0xff] %v8388_v5  ;;  %v934_v45 = vmax.f32 %v8384_v1, %v8388_v5  ;;  %v8408_v1 = vpop.permute.xlu0 %2853  ;;  %v8412_v41 = vpop.permute.xlu1 %2851 }
 0x18c   : > { %v8392_v3 = vpop.f32.mrf.mxu0  ;;  %11691 = vst [vmem:[#allocation113_spill] sm:$0xff] %v8408_v1  ;;  %11693 = vst [vmem:[#allocation115_spill] sm:$0xff] %v8412_v41 }
 0x18d   : > { %11685 = vst [vmem:[#allocation107_spill] sm:$0xff] %v8392_v3  ;;  %935 = vmax.xlane.f32.xlu0 %v934_v45 }
 0x18e   : > { %v8396_v40 = vpop.f32.mrf.mxu0 }
 0x18f   : > { %11687 = vst [vmem:[#allocation109_spill] sm:$0xff] %v8396_v40  ;;  %v937_v9 = vmax.f32 %v8392_v3, %v8396_v40 }
 0x190   : > { %v8402_v16 = vpop.f32.mrf.mxu0 }
 0x191   : > { %11689 = vst [vmem:[#allocation111_spill] sm:$0xff] %v8402_v16  ;;  %938 = vmax.xlane.f32.xlu1 %v937_v9  ;;  %v8420_v9 = vpop.permute.xlu0 %4078 }
 0x192   : > { %v8404_v62 = vpop.f32.mrf.mxu0  ;;  %11696 = vst [vmem:[#allocation118_spill] sm:$0xff] %v8420_v9 }
 0x193   : > { %11690 = vst [vmem:[#allocation112_spill] sm:$0xff] %v8404_v62  ;;  %v940_v5 = vmax.f32 %v8402_v16, %v8404_v62  ;;  %v8426_v62 = vpop.permute.xlu1 %4080 }
 0x194   : > { %v8410_v45 = vpop.f32.mrf.mxu0  ;;  %11698 = vst [vmem:[#allocation120_spill] sm:$0xff] %v8426_v62 }
 0x195   : > { %11692 = vst [vmem:[#allocation114_spill] sm:$0xff] %v8410_v45  ;;  %941 = vmax.xlane.f32.xlu0 %v940_v5  ;;  %v8428_v5 = vpop.permute.xlu0 %4060 }
 0x196   : > { %v8414_v35 = vpop.f32.mrf.mxu0  ;;  %11699 = vst [vmem:[#allocation121_spill] sm:$0xff] %v8428_v5 }
 0x197   : > { %11694 = vst [vmem:[#allocation116_spill] sm:$0xff] %v8414_v35  ;;  %v943_v51 = vmax.f32 %v8410_v45, %v8414_v35  ;;  %v8430_v41 = vpop.permute.xlu1 %4062 }
 0x198   : > { %v8418_v40 = vpop.f32.mrf.mxu0  ;;  %11700 = vst [vmem:[#allocation122_spill] sm:$0xff] %v8430_v41 }
 0x199   : > { %11695 = vst [vmem:[#allocation117_spill] sm:$0xff] %v8418_v40  ;;  %944 = vmax.xlane.f32.xlu1 %v943_v51  ;;  %v8432_v16 = vpop.permute.xlu0 %4028 }
 0x19a   : > { %v8422_v3 = vpop.f32.mrf.mxu0  ;;  %11701 = vst [vmem:[#allocation123_spill] sm:$0xff] %v8432_v16 }
 0x19b   : > { %11697 = vst [vmem:[#allocation119_spill] sm:$0xff] %v8422_v3  ;;  %v946_v1 = vmax.f32 %v8418_v40, %v8422_v3  ;;  %v8434_v35 = vpop.permute.xlu1 %2855 }
 0x19c   : > { %11702 = vst [vmem:[#allocation124_spill] sm:$0xff] %v8434_v35 }
 0x19d   : > { %947 = vmax.xlane.f32.xlu0 %v946_v1 }
 0x19f   : > { %v8440_v62 = vpop.permute.xlu1 %4076 }
 0x1aa   : > { %v855_v45 = vpop.xlane.xlu0 %854  ;;  %2405 = vrot.lane.b32.xlu1 %v7779_v24, %s7559_s8 }
 0x1ab   : > { %v949_v51 = vsub.f32 %v8150_v52, %v855_v45  ;;  %v950_v9 = vsub.f32 %v8154_v54, %v855_v45 }
 0x1ad   : > { %v1013_v3 = vmul.f32 1.442695, %v949_v51  ;;  %v1015_v40 = vmul.f32 1.442695, %v950_v9 }
 0x1ae   : > { %v858_v1 = vpop.xlane.xlu0 %857  ;;  %4030 = vrot.lane.b32.xlu1 %v7783_v25, %s7561_s22 }
 0x1af   : > { %6687 = vpow2.f32 %v1013_v3  ;;  %v951_v16 = vsub.f32 %v8158_v56, %v858_v1  ;;  %v952_v35 = vsub.f32 %v8162_v23, %v858_v1 }
 0x1b0   : > { %6689 = vpow2.f32 %v1015_v40 }
 0x1b1   : > { %v1017_v5 = vmul.f32 1.442695, %v951_v16  ;;  %v1019_v24 = vmul.f32 1.442695, %v952_v35 }
 0x1b2   : > { %v861_v41 = vpop.xlane.xlu1 %860  ;;  %2403 = vrot.lane.b32.xlu1 %v7797_v28, %s7559_s8 }
 0x1b3   : > { %6691 = vpow2.f32 %v1017_v5  ;;  %v953_v52 = vsub.f32 %v8168_v12, %v861_v41  ;;  %v954_v54 = vsub.f32 %v8170_v15, %v861_v41  ;;  %2421 = vrot.lane.b32.xlu0 %v7774_v22, %s7559_s8 }
 0x1b4   : > { %6693 = vpow2.f32 %v1019_v24 }
 0x1b5   : > { %v1021_v25 = vmul.f32 1.442695, %v953_v52  ;;  %v1023_v3 = vmul.f32 1.442695, %v954_v54  ;;  %v1756_v52 = vsel %vm563_vm0, %v8074_v57, 0 }
 0x1b6   : > { %v864_v56 = vpop.xlane.xlu1 %863  ;;  %2401 = vrot.lane.b32.xlu1 %v7808_v31, %s7559_s8 }
 0x1b7   : > { %6695 = vpow2.f32 %v1021_v25  ;;  %v955_v40 = vsub.f32 %v8176_v55, %v864_v56  ;;  %v956_v28 = vsub.f32 %v8180_v13, %v864_v56  ;;  %2419 = vrot.lane.b32.xlu0 %v7794_v27, %s7559_s8 }
 0x1b8   : > { %6697 = vpow2.f32 %v1023_v3 }
 0x1b9   : > { %v1025_v12 = vmul.f32 1.442695, %v955_v40  ;;  %v1027_v15 = vmul.f32 1.442695, %v956_v28 }
 0x1ba   : > { %v867_v23 = vpop.xlane.xlu0 %866  ;;  %2415 = vrot.lane.b32.xlu1 %v7834_v36, %s7559_s8 }
 0x1bb   : > { %6699 = vpow2.f32 %v1025_v12  ;;  %v957_v22 = vsub.f32 %v8184_v53, %v867_v23  ;;  %v958_v31 = vsub.f32 %v8188_v30, %v867_v23  ;;  %2417 = vrot.lane.b32.xlu0 %v7800_v29, %s7559_s8  ;;  %v1753_v23 = vsel %vm563_vm0, %v8078_v58, 0 }
 0x1bc   : > { %v6688_v55 = vpop.eup %6687  ;;  %6701 = vpow2.f32 %v1027_v15 }
 0x1bd   : > { %v6690_v13 = vpop.eup %6689  ;;  %v1029_v35 = vmul.f32 1.442695, %v957_v22  ;;  %v1031_v27 = vmul.f32 1.442695, %v958_v31 }
 0x1be   : > { %v870_v41 = vpop.xlane.xlu1 %869  ;;  %2397 = vrot.lane.b32.xlu1 %v7843_v39, %s7559_s8  ;;  %v8466_v16 = vadd.f32 %v6690_v13, %v6688_v55 }
 0x1bf   : > { %6703 = vpow2.f32 %v1029_v35  ;;  %v959_v36 = vsub.f32 %v8194_v10, %v870_v41  ;;  %v960_v53 = vsub.f32 %v8196_v20, %v870_v41  ;;  %4032 = vrot.lane.b32.xlu0 %v7769_v21, %s7561_s22 }
 0x1c0   : > { %11703 = vst [vmem:[#allocation125_spill] sm:$0xff] %v8466_v16  ;;  %v6692_v29 = vpop.eup %6691  ;;  %6705 = vpow2.f32 %v1031_v27 }
 0x1c1   : > { %v6694_v30 = vpop.eup %6693  ;;  %v1033_v45 = vmul.f32 1.442695, %v959_v36  ;;  %v1035_v9 = vmul.f32 1.442695, %v960_v53  ;;  %v1237_v5 = vpack.c.bf16 %v6692_v29, %v6688_v55  ;;  %v1750_v53 = vsel %vm563_vm0, %v8086_v60, 0 }
 0x1c2   : > { %v873_v51 = vpop.xlane.xlu0 %872  ;;  %v1238_v1 = vpack.c.bf16 %v6694_v30, %v6690_v13  ;;  %4034 = vrot.lane.b32.xlu1 %v7811_v32, %s7561_s22  ;;  %v8474_v39 = vadd.f32 %v6694_v30, %v6692_v29 }
 0x1c3   : > { %6707 = vpow2.f32 %v1033_v45  ;;  %v961_v10 = vsub.f32 %v8202_v17, %v873_v51  ;;  %v962_v20 = vsub.f32 %v8206_v11, %v873_v51  ;;  %2399 = vrot.lane.b32.xlu0 %v7837_v37, %s7559_s8 }
 0x1c4   : > { %11704 = vst [vmem:[#allocation126_spill] sm:$0xff] %v8474_v39  ;;  %v6696_v21 = vpop.eup %6695  ;;  %6709 = vpow2.f32 %v1035_v9  ;;  %1397 = vmatprep.mubr.bf16.mxu1 %v1238_v1 }
 0x1c5   : > { %v6698_v24 = vpop.eup %6697  ;;  %v1037_v54 = vmul.f32 1.442695, %v961_v10  ;;  %v1039_v25 = vmul.f32 1.442695, %v962_v20  ;;  %1398 = vmatmul.mubr.bf16.vlgmr.msra.gmra.mxu1 %v1237_v5 }
 0x1c6   : > { %5972 = vmatpush3.bf16.xpose.msra.mxu1 %v1756_v52  ;;  %v876_v32 = vpop.xlane.xlu1 %875  ;;  %2395 = vrot.lane.b32.xlu1 %v7868_v43, %s7559_s8  ;;  %v8484_v17 = vadd.f32 %v6698_v24, %v6696_v21  ;;  %v11714_v52 = vld [vmem:[#allocation12_spill] sm:$0xff] }
 0x1c7   : > { %6711 = vpow2.f32 %v1037_v54  ;;  %6548 = vmatprep.subr.msk.bf16.mxu1 %vm563_vm0, %v8082_v59  ;;  %v963_v37 = vsub.f32 %v8210_v19, %v876_v32  ;;  %v964_v11 = vsub.f32 %v8214_v6, %v876_v32  ;;  %2413 = vrot.lane.b32.xlu0 %v7840_v38, %s7559_s8  ;;  %v1747_v54 = vsel %vm563_vm0, %v11714_v52, 0 }
 0x1c8   : > { %11705 = vst [vmem:[#allocation127_spill] sm:$0xff] %v8484_v17  ;;  %v6700_v57 = vpop.eup %6699  ;;  %6713 = vpow2.f32 %v1039_v25 }
 0x1c9   : > { %v6702_v3 = vpop.eup %6701  ;;  %v1041_v56 = vmul.f32 1.442695, %v963_v37  ;;  %v1043_v40 = vmul.f32 1.442695, %v964_v11  ;;  %v1239_v28 = vpack.c.bf16 %v6700_v57, %v6696_v21  ;;  %v11716_v11 = vld [vmem:[#allocation16_spill] sm:$0xff] }
 0x1ca   : > { %v879_v43 = vpop.xlane.xlu0 %878  ;;  %v1240_v12 = vpack.c.bf16 %v6702_v3, %v6698_v24  ;;  %2393 = vrot.lane.b32.xlu1 %v7883_v46, %s7559_s8  ;;  %v8494_v15 = vadd.f32 %v6702_v3, %v6700_v57  ;;  %v11717_v57 = vld [vmem:[#allocation57_spill] sm:$0xff] }
 0x1cb   : > { %6715 = vpow2.f32 %v1041_v56  ;;  %v965_v59 = vsub.f32 %v8220_v18, %v879_v43  ;;  %v966_v6 = vsub.f32 %v8222_v14, %v879_v43  ;;  %2411 = vrot.lane.b32.xlu0 %v7865_v42, %s7559_s8  ;;  %v11718_v56 = vld [vmem:[#allocation59_spill] sm:$0xff] }
 0x1cc   : > { %11706 = vst [vmem:[#allocation128_spill] sm:$0xff] %v8494_v15  ;;  %v6704_v38 = vpop.eup %6703  ;;  %6717 = vpow2.f32 %v1043_v40  ;;  %1405 = vmatprep.mubr.bf16.mxu1 %v1240_v12 }
 0x1cd   : > { %v6706_v19 = vpop.eup %6705  ;;  %v1045_v22 = vmul.f32 1.442695, %v965_v59  ;;  %v1047_v31 = vmul.f32 1.442695, %v966_v6  ;;  %1406 = vmatmul.mubr.bf16.gmra.mxu1 %v1239_v28  ;;  %v11719_v28 = vld [vmem:[#allocation9_spill] sm:$0xff] }
 0x1ce   : > { %5974 = vmatpush3.bf16.xpose.msra.mxu1 %v1753_v23  ;;  %v882_v46 = vpop.xlane.xlu1 %881  ;;  %2407 = vrot.lane.b32.xlu1 %v7899_v49, %s7559_s8  ;;  %v8504_v18 = vadd.f32 %v6706_v19, %v6704_v38 }
 0x1cf   : > { %6719 = vpow2.f32 %v1045_v22  ;;  %6549 = vmatprep.subr.msk.bf16.mxu1 %vm563_vm0, %v8088_v61  ;;  %v967_v42 = vsub.f32 %v8228_v8, %v882_v46  ;;  %v968_v14 = vsub.f32 %v8232_v2, %v882_v46  ;;  %2409 = vrot.lane.b32.xlu0 %v7871_v44, %s7559_s8 }
 0x1d0   : > { %11707 = vst [vmem:[#allocation129_spill] sm:$0xff] %v8504_v18  ;;  %v6708_v58 = vpop.eup %6707  ;;  %6721 = vpow2.f32 %v1047_v31  ;;  %v11721_v31 = vld [vmem:[#allocation61_spill] sm:$0xff] }
 0x1d1   : > { %v6710_v55 = vpop.eup %6709  ;;  %v1049_v13 = vmul.f32 1.442695, %v967_v42  ;;  %v1051_v35 = vmul.f32 1.442695, %v968_v14  ;;  %v1241_v27 = vpack.c.bf16 %v6708_v58, %v6704_v38  ;;  %v11722_v42 = vld [vmem:[#allocation62_spill] sm:$0xff] }
 0x1d2   : > { %v885_v49 = vpop.xlane.xlu0 %884  ;;  %v1242_v41 = vpack.c.bf16 %v6710_v55, %v6706_v19  ;;  %4040 = vrot.lane.b32.xlu1 %v7819_v33, %s7561_s22  ;;  %v8514_v36 = vadd.f32 %v6710_v55, %v6708_v58  ;;  %v11723_v58 = vld [vmem:[#allocation10_spill] sm:$0xff] }
 0x1d3   : > { %6723 = vpow2.f32 %v1049_v13  ;;  %v969_v61 = vsub.f32 %v8236_v7, %v885_v49  ;;  %v970_v2 = vsub.f32 %v8240_v0, %v885_v49  ;;  %4036 = vrot.lane.b32.xlu0 %v7789_v26, %s7561_s22 }
 0x1d4   : > { %11708 = vst [vmem:[#allocation130_spill] sm:$0xff] %v8514_v36  ;;  %v6712_v44 = vpop.eup %6711  ;;  %6725 = vpow2.f32 %v1051_v35  ;;  %1413 = vmatprep.mubr.bf16.mxu1 %v1242_v41  ;;  %v11724_v35 = vld [vmem:[#allocation14_spill] sm:$0xff] }
 0x1d5   : > { %v6714_v8 = vpop.eup %6713  ;;  %v1053_v29 = vmul.f32 1.442695, %v969_v61  ;;  %v1055_v30 = vmul.f32 1.442695, %v970_v2  ;;  %1414 = vmatmul.mubr.bf16.gmra.mxu1 %v1241_v27  ;;  %v1744_v27 = vsel %vm563_vm0, %v11724_v35, 0 }
 0x1d6   : > { %5976 = vmatpush3.bf16.xpose.msra.mxu1 %v1750_v53  ;;  %v888_v33 = vpop.xlane.xlu1 %887  ;;  %4044 = vrot.lane.b32.xlu1 %v7823_v34, %s7561_s22  ;;  %v8524_v7 = vadd.f32 %v6714_v8, %v6712_v44 }
 0x1d7   : > { %6727 = vpow2.f32 %v1053_v29  ;;  %6550 = vmatprep.subr.msk.bf16.mxu1 %vm563_vm0, %v8096_v63  ;;  %v971_v26 = vsub.f32 %v8246_v4, %v888_v33  ;;  %v972_v0 = vsub.f32 %v8248_v48, %v888_v33  ;;  %2391 = vrot.lane.b32.xlu0 %v7902_v50, %s7559_s8  ;;  %v11711_v63 = vld [vmem:[#allocation54_spill] sm:$0xff]  ;;  %v11712_v48 = vld [vmem:[#allocation56_spill] sm:$0xff]  ;;  %v11729_v33 = vld [vmem:[#allocation11_spill] sm:$0xff] }
 0x1d8   : > { %11709 = vst [vmem:[#allocation131_spill] sm:$0xff] %v8524_v7  ;;  %v6716_v60 = vpop.eup %6715  ;;  %6729 = vpow2.f32 %v1055_v30  ;;  %v11713_v50 = vld [vmem:[#allocation8_spill] sm:$0xff]  ;;  %v11728_v29 = vld [vmem:[#allocation66_spill] sm:$0xff] }
 0x1d9   : > { %v6718_v45 = vpop.eup %6717  ;;  %v1057_v9 = vmul.f32 1.442695, %v971_v26  ;;  %v1059_v5 = vmul.f32 1.442695, %v972_v0  ;;  %v1243_v51 = vpack.c.bf16 %v6716_v60, %v6712_v44  ;;  %v11726_v44 = vld [vmem:[#allocation18_spill] sm:$0xff] }
 0x1da   : > { %v891_v34 = vpop.xlane.xlu0 %890  ;;  %v1244_v1 = vpack.c.bf16 %v6718_v45, %v6714_v8  ;;  %4048 = vrot.lane.b32.xlu1 %v7888_v47, %s7561_s22  ;;  %v8534_v10 = vadd.f32 %v6718_v45, %v6716_v60  ;;  %v11727_v8 = vld [vmem:[#allocation64_spill] sm:$0xff] }
 0x1db   : > { %6731 = vpow2.f32 %v1057_v9  ;;  %v973_v4 = vsub.f32 %v11711_v63, %v891_v34  ;;  %v974_v20 = vsub.f32 %v11712_v48, %v891_v34  ;;  %4038 = vrot.lane.b32.xlu0 %v11713_v50, %s7561_s22 }
 0x1dc   : > { %11710 = vst [vmem:[#allocation132_spill] sm:$0xff] %v8534_v10  ;;  %v6720_v21 = vpop.eup %6719  ;;  %6733 = vpow2.f32 %v1059_v5  ;;  %1421 = vmatprep.mubr.bf16.mxu1 %v1244_v1  ;;  %v11731_v1 = vld [vmem:[#allocation67_spill] sm:$0xff] }
 0x1dd   : > { %v6722_v24 = vpop.eup %6721  ;;  %v1061_v25 = vmul.f32 1.442695, %v973_v4  ;;  %v1063_v32 = vmul.f32 1.442695, %v974_v20  ;;  %1422 = vmatmul.mubr.bf16.gmra.mxu1 %v1243_v51  ;;  %v11732_v4 = vld [vmem:[#allocation69_spill] sm:$0xff] }
 0x1de   : > { %5978 = vmatpush3.bf16.xpose.msra.mxu1 %v1747_v54  ;;  %v894_v47 = vpop.xlane.xlu1 %893  ;;  %v8542_v37 = vadd.f32 %v6722_v24, %v6720_v21 }
 0x1df   : > { %6735 = vpow2.f32 %v1061_v25  ;;  %6551 = vmatprep.subr.msk.bf16.mxu1 %vm563_vm0, %v11716_v11  ;;  %v975_v3 = vsub.f32 %v11717_v57, %v894_v47  ;;  %v976_v40 = vsub.f32 %v11718_v56, %v894_v47  ;;  %4042 = vrot.lane.b32.xlu0 %v11719_v28, %s7561_s22  ;;  %v11735_v47 = vld [vmem:[#allocation20_spill] sm:$0xff]  ;;  %v11736_v11 = vld [vmem:[#allocation71_spill] sm:$0xff] }
 0x1e0   : > { %11715 = vst [vmem:[#allocation54_spill] sm:$0xff] %v8542_v37  ;;  %v6724_v43 = vpop.eup %6723  ;;  %6737 = vpow2.f32 %v1063_v32 }
 0x1e1   : > { %v6726_v12 = vpop.eup %6725  ;;  %v1065_v59 = vmul.f32 1.442695, %v975_v3  ;;  %v1067_v6 = vmul.f32 1.442695, %v976_v40  ;;  %v1245_v38 = vpack.c.bf16 %v6724_v43, %v6720_v21  ;;  %v11733_v21 = vld [vmem:[#allocation13_spill] sm:$0xff]  ;;  %v11737_v3 = vld [vmem:[#allocation72_spill] sm:$0xff] }
 0x1e2   : > { %v897_v19 = vpop.xlane.xlu0 %896  ;;  %v1246_v23 = vpack.c.bf16 %v6726_v12, %v6722_v24  ;;  %v8550_v22 = vadd.f32 %v6726_v12, %v6724_v43  ;;  %v1741_v24 = vsel %vm563_vm0, %v11733_v21, 0 }
 0x1e3   : > { %6739 = vpow2.f32 %v1065_v59  ;;  %v977_v46 = vsub.f32 %v11721_v31, %v897_v19  ;;  %v978_v14 = vsub.f32 %v11722_v42, %v897_v19  ;;  %4046 = vrot.lane.b32.xlu0 %v11723_v58, %s7561_s22 }
 0x1e4   : > { %11720 = vst [vmem:[#allocation56_spill] sm:$0xff] %v8550_v22  ;;  %v6728_v55 = vpop.eup %6727  ;;  %6741 = vpow2.f32 %v1067_v6  ;;  %1429 = vmatprep.mubr.bf16.mxu1 %v1246_v23  ;;  %v11739_v23 = vld [vmem:[#allocation74_spill] sm:$0xff] }
 0x1e5   : > { %v6730_v13 = vpop.eup %6729  ;;  %v1069_v49 = vmul.f32 1.442695, %v977_v46  ;;  %v1071_v41 = vmul.f32 1.442695, %v978_v14  ;;  %1430 = vmatmul.mubr.bf16.gmra.mxu1 %v1245_v38  ;;  %v11740_v46 = vld [vmem:[#allocation76_spill] sm:$0xff] }
 0x1e6   : > { %5980 = vmatpush3.bf16.xpose.msra.mxu1 %v1744_v27  ;;  %v900_v61 = vpop.xlane.xlu1 %899  ;;  %v8558_v2 = vadd.f32 %v6730_v13, %v6728_v55 }
 0x1e7   : > { %6743 = vpow2.f32 %v1069_v49  ;;  %6552 = vmatprep.subr.msk.bf16.mxu1 %vm563_vm0, %v11726_v44  ;;  %v979_v53 = vsub.f32 %v11727_v8, %v900_v61  ;;  %v980_v30 = vsub.f32 %v11728_v29, %v900_v61  ;;  %4050 = vrot.lane.b32.xlu0 %v11729_v33, %s7561_s22  ;;  %v11743_v61 = vld [vmem:[#allocation22_spill] sm:$0xff]  ;;  %v11744_v44 = vld [vmem:[#allocation77_spill] sm:$0xff] }
 0x1e8   : > { %11725 = vst [vmem:[#allocation8_spill] sm:$0xff] %v8558_v2  ;;  %v6732_v26 = vpop.eup %6731  ;;  %6745 = vpow2.f32 %v1071_v41 }
 0x1e9   : > { %v6734_v0 = vpop.eup %6733  ;;  %v1073_v60 = vmul.f32 1.442695, %v979_v53  ;;  %v1075_v45 = vmul.f32 1.442695, %v980_v30  ;;  %v1247_v9 = vpack.c.bf16 %v6732_v26, %v6728_v55  ;;  %v11741_v55 = vld [vmem:[#allocation15_spill] sm:$0xff] }
 0x1ea   : > { %v903_v5 = vpop.xlane.xlu0 %902  ;;  %v1248_v51 = vpack.c.bf16 %v6734_v0, %v6730_v13  ;;  %v8566_v34 = vadd.f32 %v6734_v0, %v6732_v26  ;;  %v1738_v13 = vsel %vm563_vm0, %v11741_v55, 0  ;;  %v11745_v53 = vld [vmem:[#allocation79_spill] sm:$0xff] }
 0x1eb   : > { %6747 = vpow2.f32 %v1073_v60  ;;  %v981_v63 = vsub.f32 %v11731_v1, %v903_v5  ;;  %v982_v48 = vsub.f32 %v11732_v4, %v903_v5 }
 0x1ec   : > { %11730 = vst [vmem:[#allocation12_spill] sm:$0xff] %v8566_v34  ;;  %v6736_v20 = vpop.eup %6735  ;;  %6749 = vpow2.f32 %v1075_v45  ;;  %1437 = vmatprep.mubr.bf16.mxu1 %v1248_v51  ;;  %v11747_v51 = vld [vmem:[#allocation81_spill] sm:$0xff] }
 0x1ed   : > { %v6738_v50 = vpop.eup %6737  ;;  %v1077_v52 = vmul.f32 1.442695, %v981_v63  ;;  %v1079_v54 = vmul.f32 1.442695, %v982_v48  ;;  %1438 = vmatmul.mubr.bf16.gmra.mxu1 %v1247_v9  ;;  %v11748_v63 = vld [vmem:[#allocation82_spill] sm:$0xff] }
 0x1ee   : > { %5982 = vmatpush3.bf16.xpose.msra.mxu1 %v1741_v24  ;;  %v906_v25 = vpop.xlane.xlu1 %905  ;;  %v8572_v32 = vadd.f32 %v6738_v50, %v6736_v20 }
 0x1ef   : > { %6751 = vpow2.f32 %v1077_v52  ;;  %6553 = vmatprep.subr.msk.bf16.mxu1 %vm563_vm0, %v11735_v47  ;;  %v983_v57 = vsub.f32 %v11736_v11, %v906_v25  ;;  %v984_v56 = vsub.f32 %v11737_v3, %v906_v25  ;;  %v11751_v47 = vld [vmem:[#allocation29_spill] sm:$0xff]  ;;  %v11752_v11 = vld [vmem:[#allocation84_spill] sm:$0xff]  ;;  %v11753_v3 = vld [vmem:[#allocation86_spill] sm:$0xff] }
 0x1f0   : > { %11734 = vst [vmem:[#allocation16_spill] sm:$0xff] %v8572_v32  ;;  %v6740_v40 = vpop.eup %6739  ;;  %6753 = vpow2.f32 %v1079_v54 }
 0x1f1   : > { %v6742_v28 = vpop.eup %6741  ;;  %v1081_v43 = vmul.f32 1.442695, %v983_v57  ;;  %v1083_v12 = vmul.f32 1.442695, %v984_v56  ;;  %v1249_v59 = vpack.c.bf16 %v6740_v40, %v6736_v20 }
 0x1f2   : > { %v909_v6 = vpop.xlane.xlu0 %908  ;;  %v1250_v38 = vpack.c.bf16 %v6742_v28, %v6738_v50  ;;  %v8578_v19 = vadd.f32 %v6742_v28, %v6740_v40  ;;  %v11749_v50 = vld [vmem:[#allocation17_spill] sm:$0xff] }
 0x1f3   : > { %6755 = vpow2.f32 %v1081_v43  ;;  %v985_v31 = vsub.f32 %v11739_v23, %v909_v6  ;;  %v986_v42 = vsub.f32 %v11740_v46, %v909_v6  ;;  %v1735_v21 = vsel %vm563_vm0, %v11749_v50, 0 }
 0x1f4   : > { %11738 = vst [vmem:[#allocation57_spill] sm:$0xff] %v8578_v19  ;;  %v6744_v14 = vpop.eup %6743  ;;  %6757 = vpow2.f32 %v1083_v12  ;;  %1445 = vmatprep.mubr.bf16.mxu1 %v1250_v38 }
 0x1f5   : > { %v6746_v58 = vpop.eup %6745  ;;  %v1085_v35 = vmul.f32 1.442695, %v985_v31  ;;  %v1087_v27 = vmul.f32 1.442695, %v986_v42  ;;  %1446 = vmatmul.mubr.bf16.gmra.mxu1 %v1249_v59  ;;  %v11755_v31 = vld [vmem:[#allocation87_spill] sm:$0xff]  ;;  %v11756_v42 = vld [vmem:[#allocation89_spill] sm:$0xff] }
 0x1f6   : > { %5984 = vmatpush3.bf16.xpose.msra.mxu1 %v1738_v13  ;;  %v912_v49 = vpop.xlane.xlu1 %911  ;;  %v8584_v41 = vadd.f32 %v6746_v58, %v6744_v14 }
 0x1f7   : > { %6759 = vpow2.f32 %v1085_v35  ;;  %6554 = vmatprep.subr.msk.bf16.mxu1 %vm563_vm0, %v11743_v61  ;;  %v987_v8 = vsub.f32 %v11744_v44, %v912_v49  ;;  %v988_v29 = vsub.f32 %v11745_v53, %v912_v49  ;;  %v11758_v61 = vld [vmem:[#allocation91_spill] sm:$0xff] }
 0x1f8   : > { %11742 = vst [vmem:[#allocation59_spill] sm:$0xff] %v8584_v41  ;;  %v6748_v30 = vpop.eup %6747  ;;  %6761 = vpow2.f32 %v1087_v27 }
 0x1f9   : > { %v6750_v33 = vpop.eup %6749  ;;  %v1089_v26 = vmul.f32 1.442695, %v987_v8  ;;  %v1091_v0 = vmul.f32 1.442695, %v988_v29  ;;  %v1251_v60 = vpack.c.bf16 %v6748_v30, %v6744_v14  ;;  %v11759_v8 = vld [vmem:[#allocation92_spill] sm:$0xff] }
 0x1fa   : > { %v915_v45 = vpop.xlane.xlu0 %914  ;;  %v1252_v9 = vpack.c.bf16 %v6750_v33, %v6746_v58  ;;  %v8590_v5 = vadd.f32 %v6750_v33, %v6748_v30 }
 0x1fb   : > { %6763 = vpow2.f32 %v1089_v26  ;;  %v989_v1 = vsub.f32 %v11747_v51, %v915_v45  ;;  %v990_v4 = vsub.f32 %v11748_v63, %v915_v45  ;;  %v11761_v51 = vld [vmem:[#allocation94_spill] sm:$0xff]  ;;  %v11762_v63 = vld [vmem:[#allocation96_spill] sm:$0xff] }
 0x1fc   : > { %11746 = vst [vmem:[#allocation9_spill] sm:$0xff] %v8590_v5  ;;  %v6752_v48 = vpop.eup %6751  ;;  %6765 = vpow2.f32 %v1091_v0  ;;  %1453 = vmatprep.mubr.bf16.mxu1 %v1252_v9 }
 0x1fd   : > { %v6754_v20 = vpop.eup %6753  ;;  %v1093_v24 = vmul.f32 1.442695, %v989_v1  ;;  %v1095_v52 = vmul.f32 1.442695, %v990_v4  ;;  %1454 = vmatmul.mubr.bf16.gmra.mxu1 %v1251_v60 }
 0x1fe   : > { %5986 = vmatpush3.bf16.xpose.msra.mxu1 %v1735_v21  ;;  %v918_v54 = vpop.xlane.xlu1 %917  ;;  %v8596_v25 = vadd.f32 %v6754_v20, %v6752_v48 }
 0x1ff   : > { %6767 = vpow2.f32 %v1093_v24  ;;  %6555 = vmatprep.subr.msk.bf16.mxu1 %vm563_vm0, %v11751_v47  ;;  %v991_v57 = vsub.f32 %v11752_v11, %v918_v54  ;;  %v992_v56 = vsub.f32 %v11753_v3, %v918_v54  ;;  %v11764_v54 = vld [vmem:[#allocation97_spill] sm:$0xff]  ;;  %v11765_v11 = vld [vmem:[#allocation99_spill] sm:$0xff] }
 0x200   : > { %11750 = vst [vmem:[#allocation61_spill] sm:$0xff] %v8596_v25  ;;  %v6756_v40 = vpop.eup %6755  ;;  %6769 = vpow2.f32 %v1095_v52 }
 0x201   : > { %v6758_v28 = vpop.eup %6757  ;;  %v1097_v43 = vmul.f32 1.442695, %v991_v57  ;;  %v1099_v12 = vmul.f32 1.442695, %v992_v56  ;;  %v1253_v59 = vpack.c.bf16 %v6756_v40, %v6752_v48 }
 0x202   : > { %v921_v6 = vpop.xlane.xlu0 %920  ;;  %v1254_v38 = vpack.c.bf16 %v6758_v28, %v6754_v20  ;;  %v8602_v23 = vadd.f32 %v6758_v28, %v6756_v40 }
 0x203   : > { %6771 = vpow2.f32 %v1097_v43  ;;  %v993_v46 = vsub.f32 %v11755_v31, %v921_v6  ;;  %v994_v14 = vsub.f32 %v11756_v42, %v921_v6 }
 0x204   : > { %11754 = vst [vmem:[#allocation62_spill] sm:$0xff] %v8602_v23  ;;  %v6760_v58 = vpop.eup %6759  ;;  %6773 = vpow2.f32 %v1099_v12  ;;  %1461 = vmatprep.mubr.bf16.mxu1 %v1254_v38  ;;  %v11767_v38 = vld [vmem:[#allocation101_spill] sm:$0xff] }
 0x205   : > { %v6762_v55 = vpop.eup %6761  ;;  %v1101_v13 = vmul.f32 1.442695, %v993_v46  ;;  %v1103_v35 = vmul.f32 1.442695, %v994_v14  ;;  %1462 = vmatmul.mubr.bf16.gmra.mxu1 %v1253_v59  ;;  %v11768_v46 = vld [vmem:[#allocation102_spill] sm:$0xff] }
 0x206   : > { %v924_v27 = vpop.xlane.xlu1 %923  ;;  %v8606_v49 = vadd.f32 %v6762_v55, %v6760_v58 }
 0x207   : > { %6775 = vpow2.f32 %v1101_v13  ;;  %v995_v44 = vsub.f32 %v11758_v61, %v924_v27  ;;  %v996_v53 = vsub.f32 %v11759_v8, %v924_v27  ;;  %v11770_v61 = vld [vmem:[#allocation104_spill] sm:$0xff]  ;;  %v11771_v8 = vld [vmem:[#allocation106_spill] sm:$0xff] }
 0x208   : > { %11757 = vst [vmem:[#allocation10_spill] sm:$0xff] %v8606_v49  ;;  %v6764_v29 = vpop.eup %6763  ;;  %6777 = vpow2.f32 %v1103_v35 }
 0x209   : > { %v6766_v30 = vpop.eup %6765  ;;  %v1105_v33 = vmul.f32 1.442695, %v995_v44  ;;  %v1107_v26 = vmul.f32 1.442695, %v996_v53  ;;  %v1255_v0 = vpack.c.bf16 %v6764_v29, %v6760_v58 }
 0x20a   : > { %v927_v60 = vpop.xlane.xlu0 %926  ;;  %v1256_v45 = vpack.c.bf16 %v6766_v30, %v6762_v55  ;;  %v8610_v9 = vadd.f32 %v6766_v30, %v6764_v29 }
 0x20b   : > { %6779 = vpow2.f32 %v1105_v33  ;;  %v997_v1 = vsub.f32 %v11761_v51, %v927_v60  ;;  %v998_v4 = vsub.f32 %v11762_v63, %v927_v60 }
 0x20c   : > { %11760 = vst [vmem:[#allocation14_spill] sm:$0xff] %v8610_v9  ;;  %v6768_v48 = vpop.eup %6767  ;;  %6781 = vpow2.f32 %v1107_v26  ;;  %1469 = vmatprep.mubr.bf16.mxu1 %v1256_v45 }
 0x20d   : > { %v6770_v20 = vpop.eup %6769  ;;  %v1109_v50 = vmul.f32 1.442695, %v997_v1  ;;  %v1111_v21 = vmul.f32 1.442695, %v998_v4  ;;  %1470 = vmatmul.mubr.bf16.gmra.mxu1 %v1255_v0  ;;  %v11773_v1 = vld [vmem:[#allocation107_spill] sm:$0xff]  ;;  %v11774_v4 = vld [vmem:[#allocation109_spill] sm:$0xff] }
 0x20e   : > { %v930_v24 = vpop.xlane.xlu1 %929  ;;  %v8614_v52 = vadd.f32 %v6770_v20, %v6768_v48 }
 0x20f   : > { %6783 = vpow2.f32 %v1109_v50  ;;  %v999_v47 = vsub.f32 %v11764_v54, %v930_v24  ;;  %v1000_v57 = vsub.f32 %v11765_v11, %v930_v24  ;;  %v11776_v11 = vld [vmem:[#allocation111_spill] sm:$0xff] }
 0x210   : > { %11763 = vst [vmem:[#allocation18_spill] sm:$0xff] %v8614_v52  ;;  %v6772_v3 = vpop.eup %6771  ;;  %6785 = vpow2.f32 %v1111_v21 }
 0x211   : > { %v6774_v56 = vpop.eup %6773  ;;  %v1113_v40 = vmul.f32 1.442695, %v999_v47  ;;  %v1115_v28 = vmul.f32 1.442695, %v1000_v57  ;;  %v1257_v43 = vpack.c.bf16 %v6772_v3, %v6768_v48 }
 0x212   : > { %v933_v12 = vpop.xlane.xlu1 %932  ;;  %v1258_v59 = vpack.c.bf16 %v6774_v56, %v6770_v20  ;;  %v8618_v6 = vadd.f32 %v6774_v56, %v6772_v3  ;;  %v11777_v3 = vld [vmem:[#allocation112_spill] sm:$0xff] }
 0x213   : > { %6787 = vpow2.f32 %v1113_v40  ;;  %v1001_v31 = vsub.f32 %v11767_v38, %v933_v12  ;;  %v1002_v42 = vsub.f32 %v11768_v46, %v933_v12 }
 0x214   : > { %11766 = vst [vmem:[#allocation64_spill] sm:$0xff] %v8618_v6  ;;  %v6776_v14 = vpop.eup %6775  ;;  %6789 = vpow2.f32 %v1115_v28  ;;  %1477 = vmatprep.mubr.bf16.mxu1 %v1258_v59 }
 0x215   : > { %v6778_v58 = vpop.eup %6777  ;;  %v1117_v55 = vmul.f32 1.442695, %v1001_v31  ;;  %v1119_v13 = vmul.f32 1.442695, %v1002_v42  ;;  %1478 = vmatmul.mubr.bf16.gmra.mxu1 %v1257_v43  ;;  %v11779_v42 = vld [vmem:[#allocation114_spill] sm:$0xff] }
 0x216   : > { %v936_v35 = vpop.xlane.xlu0 %935  ;;  %v8622_v27 = vadd.f32 %v6778_v58, %v6776_v14 }
 0x217   : > { %6791 = vpow2.f32 %v1117_v55  ;;  %v1003_v44 = vsub.f32 %v11770_v61, %v936_v35  ;;  %v1004_v53 = vsub.f32 %v11771_v8, %v936_v35 }
 0x218   : > { %11769 = vst [vmem:[#allocation66_spill] sm:$0xff] %v8622_v27  ;;  %v6780_v29 = vpop.eup %6779  ;;  %6793 = vpow2.f32 %v1119_v13 }
 0x219   : > { %v6782_v30 = vpop.eup %6781  ;;  %v1121_v33 = vmul.f32 1.442695, %v1003_v44  ;;  %v1123_v26 = vmul.f32 1.442695, %v1004_v53  ;;  %v1259_v0 = vpack.c.bf16 %v6780_v29, %v6776_v14 }
 0x21a   : > { %v939_v60 = vpop.xlane.xlu1 %938  ;;  %v1260_v45 = vpack.c.bf16 %v6782_v30, %v6778_v58  ;;  %v8626_v51 = vadd.f32 %v6782_v30, %v6780_v29  ;;  %v11780_v58 = vld [vmem:[#allocation116_spill] sm:$0xff]  ;;  %v11782_v29 = vld [vmem:[#allocation117_spill] sm:$0xff] }
 0x21b   : > { %6795 = vpow2.f32 %v1121_v33  ;;  %v1005_v63 = vsub.f32 %v11773_v1, %v939_v60  ;;  %v1006_v48 = vsub.f32 %v11774_v4, %v939_v60  ;;  %v11783_v33 = vld [vmem:[#allocation119_spill] sm:$0xff] }
 0x21c   : > { %11772 = vst [vmem:[#allocation11_spill] sm:$0xff] %v8626_v51  ;;  %v6784_v20 = vpop.eup %6783  ;;  %6797 = vpow2.f32 %v1123_v26  ;;  %1485 = vmatprep.mubr.bf16.mxu1 %v1260_v45 }
 0x21d   : > { %v6786_v50 = vpop.eup %6785  ;;  %v1125_v21 = vmul.f32 1.442695, %v1005_v63  ;;  %v1127_v24 = vmul.f32 1.442695, %v1006_v48  ;;  %1486 = vmatmul.mubr.bf16.gmra.mxu1 %v1259_v0 }
 0x21e   : > { %v942_v54 = vpop.xlane.xlu0 %941  ;;  %v8630_v47 = vadd.f32 %v6786_v50, %v6784_v20 }
 0x21f   : > { %6799 = vpow2.f32 %v1125_v21  ;;  %v1007_v57 = vsub.f32 %v11776_v11, %v942_v54  ;;  %v1008_v56 = vsub.f32 %v11777_v3, %v942_v54 }
 0x220   : > { %11775 = vst [vmem:[#allocation67_spill] sm:$0xff] %v8630_v47  ;;  %v6788_v40 = vpop.eup %6787  ;;  %6801 = vpow2.f32 %v1127_v24 }
 0x221   : > { %v6790_v28 = vpop.eup %6789  ;;  %v1129_v43 = vmul.f32 1.442695, %v1007_v57  ;;  %v1131_v12 = vmul.f32 1.442695, %v1008_v56  ;;  %v1261_v59 = vpack.c.bf16 %v6788_v40, %v6784_v20 }
 0x222   : > { %v945_v38 = vpop.xlane.xlu1 %944  ;;  %v1262_v31 = vpack.c.bf16 %v6790_v28, %v6786_v50  ;;  %v8634_v46 = vadd.f32 %v6790_v28, %v6788_v40 }
 0x223   : > { %6803 = vpow2.f32 %v1129_v43  ;;  %v1009_v14 = vsub.f32 %v11779_v42, %v945_v38  ;;  %v1010_v55 = vsub.f32 %v11780_v58, %v945_v38  ;;  %v11789_v42 = vld [vmem:[#allocation19_spill] sm:$0xff] }
 0x224   : > { %11778 = vst [vmem:[#allocation69_spill] sm:$0xff] %v8634_v46  ;;  %v6792_v13 = vpop.eup %6791  ;;  %6805 = vpow2.f32 %v1131_v12  ;;  %1493 = vmatprep.mubr.bf16.mxu1 %v1262_v31 }
 0x225   : > { %v6794_v35 = vpop.eup %6793  ;;  %v1133_v61 = vmul.f32 1.442695, %v1009_v14  ;;  %v1135_v44 = vmul.f32 1.442695, %v1010_v55  ;;  %1494 = vmatmul.mubr.bf16.gmra.mxu1 %v1261_v59  ;;  %v11790_v14 = vld [vmem:[#allocation32_spill] sm:$0xff] }
 0x226   : > { %v948_v8 = vpop.xlane.xlu0 %947  ;;  %v8638_v53 = vadd.f32 %v6794_v35, %v6792_v13  ;;  %v2959_v58 = vsel %vm563_vm0, %v11790_v14, 0  ;;  %v11791_v55 = vld [vmem:[#allocation24_spill] sm:$0xff]  ;;  %v11813_v14 = vld [vmem:[#allocation73_spill] sm:$0xff] }
 0x227   : > { %6807 = vpow2.f32 %v1133_v61  ;;  %v1011_v30 = vsub.f32 %v11782_v29, %v948_v8  ;;  %v1012_v26 = vsub.f32 %v11783_v33, %v948_v8  ;;  %v11795_v8 = vld [vmem:[#allocation35_spill] sm:$0xff]  ;;  %v11796_v29 = vld [vmem:[#allocation38_spill] sm:$0xff] }
 0x228   : > { %11781 = vst [vmem:[#allocation13_spill] sm:$0xff] %v8638_v53  ;;  %v6796_v0 = vpop.eup %6795  ;;  %6809 = vpow2.f32 %v1135_v44  ;;  %v11794_v44 = vld [vmem:[#allocation21_spill] sm:$0xff]  ;;  %v11797_v33 = vld [vmem:[#allocation26_spill] sm:$0xff] }
 0x229   : > { %v6798_v60 = vpop.eup %6797  ;;  %v1137_v45 = vmul.f32 1.442695, %v1011_v30  ;;  %v1139_v1 = vmul.f32 1.442695, %v1012_v26  ;;  %v1263_v63 = vpack.c.bf16 %v6796_v0, %v6792_v13  ;;  %v11792_v13 = vld [vmem:[#allocation36_spill] sm:$0xff]  ;;  %v2953_v30 = vsel %vm563_vm0, %v11796_v29, 0 }
 0x22a   : > { %v1264_v4 = vpack.c.bf16 %v6798_v60, %v6794_v35  ;;  %v8642_v48 = vadd.f32 %v6798_v60, %v6796_v0  ;;  %v11793_v35 = vld [vmem:[#allocation31_spill] sm:$0xff]  ;;  %v11798_v26 = vld [vmem:[#allocation42_spill] sm:$0xff]  ;;  %v11799_v0 = vld [vmem:[#allocation37_spill] sm:$0xff] }
 0x22b   : > { %6811 = vpow2.f32 %v1137_v45  ;;  %v2956_v61 = vsel %vm563_vm0, %v11793_v35, 0  ;;  %v2950_v60 = vsel %vm563_vm0, %v11799_v0, 0  ;;  %v11800_v45 = vld [vmem:[#allocation23_spill] sm:$0xff] }
 0x22c   : > { %11784 = vst [vmem:[#allocation20_spill] sm:$0xff] %v8642_v48  ;;  %v6800_v20 = vpop.eup %6799  ;;  %6813 = vpow2.f32 %v1139_v1  ;;  %1501 = vmatprep.mubr.bf16.mxu1 %v1264_v4  ;;  %v11801_v1 = vld [vmem:[#allocation41_spill] sm:$0xff] }
 0x22d   : > { %v6802_v50 = vpop.eup %6801  ;;  %1502 = vmatmul.mubr.bf16.gmra.mxu1 %v1263_v63  ;;  %v11802_v63 = vld [vmem:[#allocation44_spill] sm:$0xff] }
 0x22e   : > { %v8644_v21 = vadd.f32 %v6802_v50, %v6800_v20  ;;  %v2947_v4 = vsel %vm563_vm0, %v11802_v63, 0  ;;  %v11820_v63 = vld [vmem:[#allocation40_spill] sm:$0xff] }
 0x230   : > { %11785 = vst [vmem:[#allocation71_spill] sm:$0xff] %v8644_v21  ;;  %v6804_v24 = vpop.eup %6803 }
 0x231   : > { %v6806_v54 = vpop.eup %6805  ;;  %v1265_v11 = vpack.c.bf16 %v6804_v24, %v6800_v20  ;;  %v11803_v20 = vld [vmem:[#allocation28_spill] sm:$0xff] }
 0x232   : > { %v1266_v57 = vpack.c.bf16 %v6806_v54, %v6802_v50  ;;  %v8646_v3 = vadd.f32 %v6806_v54, %v6804_v24  ;;  %v11804_v50 = vld [vmem:[#allocation48_spill] sm:$0xff]  ;;  %v11805_v24 = vld [vmem:[#allocation43_spill] sm:$0xff] }
 0x233   : > { %v2944_v54 = vsel %vm563_vm0, %v11805_v24, 0 }
 0x234   : > { %11786 = vst [vmem:[#allocation72_spill] sm:$0xff] %v8646_v3  ;;  %v6808_v56 = vpop.eup %6807  ;;  %1509 = vmatprep.mubr.bf16.mxu1 %v1266_v57  ;;  %v11807_v57 = vld [vmem:[#allocation47_spill] sm:$0xff] }
 0x235   : > { %v6810_v40 = vpop.eup %6809  ;;  %1510 = vmatmul.mubr.bf16.gmra.mxu1 %v1265_v11  ;;  %v11806_v11 = vld [vmem:[#allocation25_spill] sm:$0xff] }
 0x236   : > { %v8648_v28 = vadd.f32 %v6810_v40, %v6808_v56 }
 0x238   : > { %11787 = vst [vmem:[#allocation74_spill] sm:$0xff] %v8648_v28  ;;  %v6812_v43 = vpop.eup %6811  ;;  %v11858_v28 = vld [vmem:[#allocation110_spill] sm:$0xff] }
 0x239   : > { %v6814_v12 = vpop.eup %6813  ;;  %v1267_v59 = vpack.c.bf16 %v6812_v43, %v6808_v56  ;;  %v11808_v56 = vld [vmem:[#allocation50_spill] sm:$0xff] }
 0x23a   : > { %v1268_v38 = vpack.c.bf16 %v6814_v12, %v6810_v40  ;;  %v8650_v31 = vadd.f32 %v6814_v12, %v6812_v43  ;;  %v2941_v40 = vsel %vm563_vm0, %v11808_v56, 0  ;;  %v11809_v43 = vld [vmem:[#allocation30_spill] sm:$0xff]  ;;  %v11810_v12 = vld [vmem:[#allocation55_spill] sm:$0xff] }
 0x23c   : > { %11788 = vst [vmem:[#allocation76_spill] sm:$0xff] %v8650_v31  ;;  %1517 = vmatprep.mubr.bf16.mxu1 %v1268_v38 }
 0x23d   : > { %1518 = vmatmul.mubr.bf16.gmra.mxu1 %v1267_v59  ;;  %v11811_v59 = vld [vmem:[#allocation49_spill] sm:$0xff] }
 0x23e   : > { %5987 = vmatprep.mubr.msk.bf16.mxu1 %vm563_vm0, %v11789_v42  ;;  %v2938_v38 = vsel %vm563_vm0, %v11811_v59, 0 }
 0x245   : > { %5988 = vmatmul.mubr.msk.bf16.vlgmr.msra.gmra.mxu1 %vm563_vm0, %v11789_v42  ;;  %v11812_v42 = vld [vmem:[#allocation27_spill] sm:$0xff] }
 0x246   : > { %6132 = vmatpush3.bf16.xpose.msra.mxu1 %v2959_v58  ;;  %5989 = vmatprep.mubr.msk.bf16.mxu1 %vm563_vm0, %v11791_v55 }
 0x247   : > { %6556 = vmatprep.subr.msk.bf16.mxu1 %vm563_vm0, %v11792_v13 }
 0x24d   : > { %5990 = vmatmul.mubr.msk.bf16.gmra.mxu1 %vm563_vm0, %v11791_v55  ;;  %v11814_v55 = vld [vmem:[#allocation34_spill] sm:$0xff] }
 0x24e   : > { %6134 = vmatpush3.bf16.xpose.msra.mxu1 %v2956_v61  ;;  %5991 = vmatprep.mubr.msk.bf16.mxu1 %vm563_vm0, %v11794_v44 }
 0x24f   : > { %6557 = vmatprep.subr.msk.bf16.mxu1 %vm563_vm0, %v11795_v8 }
 0x255   : > { %5992 = vmatmul.mubr.msk.bf16.gmra.mxu1 %vm563_vm0, %v11794_v44 }
 0x256   : > { %6136 = vmatpush3.bf16.xpose.msra.mxu1 %v2953_v30  ;;  %5993 = vmatprep.mubr.msk.bf16.mxu1 %vm563_vm0, %v11797_v33  ;;  %v11817_v30 = vld [vmem:[#allocation33_spill] sm:$0xff] }
 0x257   : > { %6558 = vmatprep.subr.msk.bf16.mxu1 %vm563_vm0, %v11798_v26 }
 0x25d   : > { %5994 = vmatmul.mubr.msk.bf16.gmra.mxu1 %vm563_vm0, %v11797_v33 }
 0x25e   : > { %6138 = vmatpush3.bf16.xpose.msra.mxu1 %v2950_v60  ;;  %5995 = vmatprep.mubr.msk.bf16.mxu1 %vm563_vm0, %v11800_v45 }
 0x25f   : > { %6559 = vmatprep.subr.msk.bf16.mxu1 %vm563_vm0, %v11801_v1 }
 0x265   : > { %5996 = vmatmul.mubr.msk.bf16.gmra.mxu1 %vm563_vm0, %v11800_v45 }
 0x266   : > { %6140 = vmatpush3.bf16.xpose.msra.mxu1 %v2947_v4  ;;  %5997 = vmatprep.mubr.msk.bf16.mxu1 %vm563_vm0, %v11803_v20 }
 0x267   : > { %6560 = vmatprep.subr.msk.bf16.mxu1 %vm563_vm0, %v11804_v50 }
 0x26d   : > { %5998 = vmatmul.mubr.msk.bf16.gmra.mxu1 %vm563_vm0, %v11803_v20 }
 0x26e   : > { %6142 = vmatpush3.bf16.xpose.msra.mxu1 %v2944_v54  ;;  %5999 = vmatprep.mubr.msk.bf16.mxu1 %vm563_vm0, %v11806_v11 }
 0x26f   : > { %6561 = vmatprep.subr.msk.bf16.mxu1 %vm563_vm0, %v11807_v57  ;;  %v11823_v57 = vld [vmem:[#allocation39_spill] sm:$0xff] }
 0x275   : > { %6000 = vmatmul.mubr.msk.bf16.gmra.mxu1 %vm563_vm0, %v11806_v11 }
 0x276   : > { %6144 = vmatpush3.bf16.xpose.msra.mxu1 %v2941_v40  ;;  %6001 = vmatprep.mubr.msk.bf16.mxu1 %vm563_vm0, %v11809_v43 }
 0x277   : > { %6562 = vmatprep.subr.msk.bf16.mxu1 %vm563_vm0, %v11810_v12 }
 0x27d   : > { %6002 = vmatmul.mubr.msk.bf16.gmra.mxu1 %vm563_vm0, %v11809_v43 }
 0x27e   : > { %6146 = vmatpush3.bf16.xpose.msra.mxu1 %v2938_v38  ;;  %6003 = vmatprep.mubr.msk.bf16.mxu1 %vm563_vm0, %v11812_v42 }
 0x27f   : > { %6563 = vmatprep.subr.msk.bf16.mxu1 %vm563_vm0, %v11813_v14 }
 0x285   : > { %v5875_v58 = vpop.f32.mrf.mxu1  ;;  %6004 = vmatmul.mubr.msk.bf16.gmra.mxu1 %vm563_vm0, %v11812_v42  ;;  %v11826_v42 = vld [vmem:[#allocation46_spill] sm:$0xff] }
 0x286   : > { %6005 = vmatprep.mubr.msk.bf16.mxu1 %vm563_vm0, %v11814_v55 }
 0x287   : > { %v5876_v13 = vpop.f32.mrf.mxu1 }
 0x288   : > { %v8722_v35 = vadd.f32 %v5876_v13, %v5875_v58 }
 0x289   : > { %v5878_v61 = vpop.f32.mrf.mxu1 }
 0x28a   : > { %11815 = vst [vmem:[#allocation15_spill] sm:$0xff] %v8722_v35 }
 0x28b   : > { %v5879_v44 = vpop.f32.mrf.mxu1 }
 0x28c   : > { %v8724_v8 = vadd.f32 %v5879_v44, %v5878_v61 }
 0x28d   : > { %v5881_v29 = vpop.f32.mrf.mxu1  ;;  %6006 = vmatmul.mubr.msk.bf16.gmra.mxu1 %vm563_vm0, %v11814_v55 }
 0x28e   : > { %11816 = vst [vmem:[#allocation22_spill] sm:$0xff] %v8724_v8  ;;  %6007 = vmatprep.mubr.msk.bf16.mxu1 %vm563_vm0, %v11817_v30 }
 0x28f   : > { %v5882_v33 = vpop.f32.mrf.mxu1 }
 0x290   : > { %v8730_v26 = vadd.f32 %v5882_v33, %v5881_v29  ;;  %v11829_v29 = vld [vmem:[#allocation45_spill] sm:$0xff] }
 0x291   : > { %v5884_v0 = vpop.f32.mrf.mxu1 }
 0x292   : > { %11818 = vst [vmem:[#allocation77_spill] sm:$0xff] %v8730_v26 }
 0x293   : > { %v5885_v60 = vpop.f32.mrf.mxu1 }
 0x294   : > { %v8732_v45 = vadd.f32 %v5885_v60, %v5884_v0 }
 0x295   : > { %v5887_v1 = vpop.f32.mrf.mxu1  ;;  %6008 = vmatmul.mubr.msk.bf16.gmra.mxu1 %vm563_vm0, %v11817_v30 }
 0x296   : > { %11819 = vst [vmem:[#allocation79_spill] sm:$0xff] %v8732_v45  ;;  %6009 = vmatprep.mubr.msk.bf16.mxu1 %vm563_vm0, %v11820_v63 }
 0x297   : > { %v5888_v4 = vpop.f32.mrf.mxu1 }
 0x298   : > { %v8738_v20 = vadd.f32 %v5888_v4, %v5887_v1  ;;  %v11832_v4 = vld [vmem:[#allocation52_spill] sm:$0xff] }
 0x299   : > { %v5890_v50 = vpop.f32.mrf.mxu1 }
 0x29a   : > { %11821 = vst [vmem:[#allocation81_spill] sm:$0xff] %v8738_v20 }
 0x29b   : > { %v5891_v24 = vpop.f32.mrf.mxu1 }
 0x29c   : > { %v8740_v54 = vadd.f32 %v5891_v24, %v5890_v50 }
 0x29d   : > { %v5893_v11 = vpop.f32.mrf.mxu1  ;;  %6010 = vmatmul.mubr.msk.bf16.gmra.mxu1 %vm563_vm0, %v11820_v63 }
 0x29e   : > { %11822 = vst [vmem:[#allocation82_spill] sm:$0xff] %v8740_v54  ;;  %6011 = vmatprep.mubr.msk.bf16.mxu1 %vm563_vm0, %v11823_v57 }
 0x29f   : > { %v5894_v56 = vpop.f32.mrf.mxu1 }
 0x2a0   : > { %v8746_v40 = vadd.f32 %v5894_v56, %v5893_v11 }
 0x2a1   : > { %v5896_v43 = vpop.f32.mrf.mxu1 }
 0x2a2   : > { %11824 = vst [vmem:[#allocation17_spill] sm:$0xff] %v8746_v40 }
 0x2a3   : > { %v5897_v12 = vpop.f32.mrf.mxu1 }
 0x2a4   : > { %v8748_v59 = vadd.f32 %v5897_v12, %v5896_v43  ;;  %v11835_v12 = vld [vmem:[#allocation51_spill] sm:$0xff] }
 0x2a5   : > { %v5899_v38 = vpop.f32.mrf.mxu1  ;;  %6012 = vmatmul.mubr.msk.bf16.gmra.mxu1 %vm563_vm0, %v11823_v57 }
 0x2a6   : > { %11825 = vst [vmem:[#allocation29_spill] sm:$0xff] %v8748_v59  ;;  %6013 = vmatprep.mubr.msk.bf16.mxu1 %vm563_vm0, %v11826_v42 }
 0x2a7   : > { %v5900_v14 = vpop.f32.mrf.mxu1 }
 0x2a8   : > { %v8754_v58 = vadd.f32 %v5900_v14, %v5899_v38 }
 0x2a9   : > { %v5902_v55 = vpop.f32.mrf.mxu1 }
 0x2aa   : > { %11827 = vst [vmem:[#allocation84_spill] sm:$0xff] %v8754_v58 }
 0x2ab   : > { %v5903_v13 = vpop.f32.mrf.mxu1 }
 0x2ac   : > { %v8756_v61 = vadd.f32 %v5903_v13, %v5902_v55  ;;  %v2406_v55 = vpop.permute.xlu1 %2405 }
 0x2ad   : > { %v5905_v44 = vpop.f32.mrf.mxu1  ;;  %6014 = vmatmul.mubr.msk.bf16.gmra.mxu1 %vm563_vm0, %v11826_v42 }
 0x2ae   : > { %11828 = vst [vmem:[#allocation86_spill] sm:$0xff] %v8756_v61  ;;  %6015 = vmatprep.mubr.msk.bf16.mxu1 %vm563_vm0, %v11829_v29 }
 0x2af   : > { %v5906_v30 = vpop.f32.mrf.mxu1 }
 0x2b0   : > { %v8762_v33 = vadd.f32 %v5906_v30, %v5905_v44  ;;  %v11838_v30 = vld [vmem:[#allocation80_spill] sm:$0xff] }
 0x2b1   : > { %v5908_v0 = vpop.f32.mrf.mxu1 }
 0x2b2   : > { %11830 = vst [vmem:[#allocation87_spill] sm:$0xff] %v8762_v33 }
 0x2b3   : > { %v5909_v60 = vpop.f32.mrf.mxu1 }
 0x2b4   : > { %v8764_v1 = vadd.f32 %v5909_v60, %v5908_v0  ;;  %v4162_v0 = vsel %vm563_vm0, %v11838_v30, 0  ;;  %v11843_v30 = vld [vmem:[#allocation78_spill] sm:$0xff] }
 0x2b5   : > { %v5911_v63 = vpop.f32.mrf.mxu1  ;;  %6016 = vmatmul.mubr.msk.bf16.gmra.mxu1 %vm563_vm0, %v11829_v29  ;;  %v2422_v29 = vpop.permute.xlu0 %2421 }
 0x2b6   : > { %11831 = vst [vmem:[#allocation89_spill] sm:$0xff] %v8764_v1  ;;  %6017 = vmatprep.mubr.msk.bf16.mxu1 %vm563_vm0, %v11832_v4  ;;  %6019 = vmatprep.subr.bf16.mxu0 %v2422_v29 }
 0x2b7   : > { %v5912_v50 = vpop.f32.mrf.mxu1  ;;  %6020 = vmatpush3.bf16.msra.mxu0 %v2406_v55  ;;  %v11844_v55 = vld [vmem:[#allocation53_spill] sm:$0xff] }
 0x2b8   : > { %v8770_v24 = vadd.f32 %v5912_v50, %v5911_v63  ;;  %v11839_v63 = vld [vmem:[#allocation60_spill] sm:$0xff]  ;;  %v11840_v50 = vld [vmem:[#allocation90_spill] sm:$0xff] }
 0x2b9   : > { %v5914_v11 = vpop.f32.mrf.mxu1 }
 0x2ba   : > { %11833 = vst [vmem:[#allocation91_spill] sm:$0xff] %v8770_v24 }
 0x2bb   : > { %v5915_v57 = vpop.f32.mrf.mxu1 }
 0x2bc   : > { %v8772_v56 = vadd.f32 %v5915_v57, %v5914_v11 }
 0x2bd   : > { %v5917_v43 = vpop.f32.mrf.mxu1  ;;  %6018 = vmatmul.mubr.msk.bf16.gmra.mxu1 %vm563_vm0, %v11832_v4  ;;  %v8788_v4 = vpop.permute.xlu1 %4030 }
 0x2be   : > { %11834 = vst [vmem:[#allocation92_spill] sm:$0xff] %v8772_v56  ;;  %6147 = vmatprep.mubr.msk.bf16.mxu1 %vm563_vm0, %v11835_v12 }
 0x2bf   : > { %v5918_v38 = vpop.f32.mrf.mxu1 }
 0x2c0   : > { %v8778_v42 = vadd.f32 %v5918_v38, %v5917_v43  ;;  %v2420_v43 = vpop.permute.xlu0 %2419 }
 0x2c1   : > { %v5920_v14 = vpop.f32.mrf.mxu1  ;;  %6021 = vmatprep.subr.bf16.mxu0 %v2420_v43 }
 0x2c2   : > { %11836 = vst [vmem:[#allocation94_spill] sm:$0xff] %v8778_v42 }
 0x2c3   : > { %v5921_v13 = vpop.f32.mrf.mxu1 }
 0x2c4   : > { %v8780_v44 = vadd.f32 %v5921_v13, %v5920_v14  ;;  %v2404_v14 = vpop.permute.xlu1 %2403  ;;  %v2418_v29 = vpop.permute.xlu0 %2417 }
 0x2c5   : > { %v5923_v60 = vpop.f32.mrf.mxu1  ;;  %6148 = vmatmul.mubr.msk.bf16.vlgmr.msra.gmra.mxu1 %vm563_vm0, %v11835_v12  ;;  %6022 = vmatpush3.bf16.msra.mxu0 %v2404_v14 }
 0x2c6   : > { %11837 = vst [vmem:[#allocation96_spill] sm:$0xff] %v8780_v44  ;;  %6292 = vmatpush3.bf16.xpose.msra.mxu1 %v4162_v0  ;;  %6149 = vmatprep.mubr.msk.bf16.mxu1 %vm563_vm0, %v11839_v63  ;;  %v4159_v0 = vsel %vm563_vm0, %v11843_v30, 0 }
 0x2c7   : > { %6564 = vmatprep.subr.msk.bf16.mxu1 %vm563_vm0, %v11840_v50  ;;  %v5924_v11 = vpop.f32.mrf.mxu1  ;;  %6023 = vmatprep.subr.bf16.mxu0 %v2418_v29  ;;  %v11845_v50 = vld [vmem:[#allocation88_spill] sm:$0xff] }
 0x2c8   : > { %v8792_v57 = vadd.f32 %v5924_v11, %v5923_v60  ;;  %v2402_v60 = vpop.permute.xlu1 %2401 }
 0x2c9   : > { %v5926_v38 = vpop.f32.mrf.mxu1  ;;  %6024 = vmatpush3.bf16.msra.mxu0 %v2402_v60  ;;  %v11850_v60 = vld [vmem:[#allocation105_spill] sm:$0xff] }
 0x2ca   : > { %11841 = vst [vmem:[#allocation97_spill] sm:$0xff] %v8792_v57 }
 0x2cb   : > { %v5927_v13 = vpop.f32.mrf.mxu1 }
 0x2cc   : > { %v8794_v12 = vadd.f32 %v5927_v13, %v5926_v38  ;;  %v8806_v38 = vpop.permute.xlu0 %4032  ;;  %v2416_v13 = vpop.permute.xlu1 %2415 }
 0x2cd   : > { %v5929_v59 = vpop.f32.mrf.mxu1  ;;  %6150 = vmatmul.mubr.msk.bf16.gmra.mxu1 %vm563_vm0, %v11839_v63  ;;  %6025 = vmatprep.subr.bf16.mxu0 %v2416_v13 }
 0x2ce   : > { %11842 = vst [vmem:[#allocation99_spill] sm:$0xff] %v8794_v12  ;;  %6294 = vmatpush3.bf16.xpose.msra.mxu1 %v4159_v0  ;;  %6151 = vmatprep.mubr.msk.bf16.mxu1 %vm563_vm0, %v11844_v55  ;;  %v11848_v0 = vld [vmem:[#allocation95_spill] sm:$0xff] }
 0x2cf   : > { %6565 = vmatprep.subr.msk.bf16.mxu1 %vm563_vm0, %v11845_v50  ;;  %v5930_v11 = vpop.f32.mrf.mxu1  ;;  %v4156_v40 = vsel %vm563_vm0, %v11848_v0, 0 }
 0x2d0   : > { %v8804_v43 = vadd.f32 %v5930_v11, %v5929_v59  ;;  %v2400_v29 = vpop.permute.xlu0 %2399  ;;  %v11849_v59 = vld [vmem:[#allocation65_spill] sm:$0xff] }
 0x2d1   : > { %v5932_v14 = vpop.f32.mrf.mxu1  ;;  %6026 = vmatpush3.bf16.msra.mxu0 %v2400_v29  ;;  %v11853_v29 = vld [vmem:[#allocation93_spill] sm:$0xff] }
 0x2d2   : > { %11846 = vst [vmem:[#allocation101_spill] sm:$0xff] %v8804_v43 }
 0x2d3   : > { %v5933_v30 = vpop.f32.mrf.mxu1 }
 0x2d4   : > { %v8808_v63 = vadd.f32 %v5933_v30, %v5932_v14  ;;  %v2414_v14 = vpop.permute.xlu0 %2413  ;;  %v2398_v30 = vpop.permute.xlu1 %2397 }
 0x2d5   : > { %v5935_v54 = vpop.f32.mrf.mxu1  ;;  %6152 = vmatmul.mubr.msk.bf16.gmra.mxu1 %vm563_vm0, %v11844_v55  ;;  %6027 = vmatprep.subr.bf16.mxu0 %v2414_v14 }
 0x2d6   : > { %11847 = vst [vmem:[#allocation102_spill] sm:$0xff] %v8808_v63  ;;  %6296 = vmatpush3.bf16.xpose.msra.mxu1 %v4156_v40  ;;  %6153 = vmatprep.mubr.msk.bf16.mxu1 %vm563_vm0, %v11849_v59  ;;  %v4153_v40 = vsel %vm563_vm0, %v11853_v29, 0 }
 0x2d7   : > { %6566 = vmatprep.subr.msk.bf16.mxu1 %vm563_vm0, %v11850_v60  ;;  %v5936_v50 = vpop.f32.mrf.mxu1  ;;  %6028 = vmatpush3.bf16.msra.mxu0 %v2398_v30  ;;  %v11855_v60 = vld [vmem:[#allocation103_spill] sm:$0xff] }
 0x2d8   : > { %v8818_v11 = vadd.f32 %v5936_v50, %v5935_v54  ;;  %v2412_v55 = vpop.permute.xlu0 %2411  ;;  %v11854_v54 = vld [vmem:[#allocation58_spill] sm:$0xff]  ;;  %v8832_v30 = vpop.permute.xlu1 %4034 }
 0x2d9   : > { %v5938_v13 = vpop.f32.mrf.mxu1  ;;  %6029 = vmatprep.subr.bf16.mxu0 %v2412_v55 }
 0x2da   : > { %11851 = vst [vmem:[#allocation104_spill] sm:$0xff] %v8818_v11 }
 0x2db   : > { %v5939_v0 = vpop.f32.mrf.mxu1 }
 0x2dc   : > { %v8820_v20 = vadd.f32 %v5939_v0, %v5938_v13  ;;  %v2410_v29 = vpop.permute.xlu0 %2409 }
 0x2dd   : > { %v5941_v45 = vpop.f32.mrf.mxu1  ;;  %6154 = vmatmul.mubr.msk.bf16.gmra.mxu1 %vm563_vm0, %v11849_v59  ;;  %v4150_v59 = vsel %vm563_vm0, %v11858_v28, 0 }
 0x2de   : > { %11852 = vst [vmem:[#allocation106_spill] sm:$0xff] %v8820_v20  ;;  %6298 = vmatpush3.bf16.xpose.msra.mxu1 %v4153_v40  ;;  %6155 = vmatprep.mubr.msk.bf16.mxu1 %vm563_vm0, %v11854_v54  ;;  %v11859_v40 = vld [vmem:[#allocation70_spill] sm:$0xff] }
 0x2df   : > { %6567 = vmatprep.subr.msk.bf16.mxu1 %vm563_vm0, %v11855_v60  ;;  %v5942_v50 = vpop.f32.mrf.mxu1  ;;  %v11860_v60 = vld [vmem:[#allocation120_spill] sm:$0xff] }
 0x2e0   : > { %v8830_v14 = vadd.f32 %v5942_v50, %v5941_v45  ;;  %v2396_v45 = vpop.permute.xlu1 %2395 }
 0x2e1   : > { %v5944_v13 = vpop.f32.mrf.mxu1  ;;  %6030 = vmatpush3.bf16.msra.mxu0 %v2396_v45  ;;  %v11864_v45 = vld [vmem:[#allocation63_spill] sm:$0xff] }
 0x2e2   : > { %11856 = vst [vmem:[#allocation107_spill] sm:$0xff] %v8830_v14  ;;  %6031 = vmatprep.subr.bf16.mxu0 %v2410_v29 }
 0x2e3   : > { %v5945_v0 = vpop.f32.mrf.mxu1 }
 0x2e4   : > { %v8834_v26 = vadd.f32 %v5945_v0, %v5944_v13  ;;  %v8846_v0 = vpop.permute.xlu0 %4036  ;;  %v2394_v28 = vpop.permute.xlu1 %2393 }
 0x2e5   : > { %v5947_v55 = vpop.f32.mrf.mxu1  ;;  %6156 = vmatmul.mubr.msk.bf16.gmra.mxu1 %vm563_vm0, %v11854_v54  ;;  %6032 = vmatpush3.bf16.msra.mxu0 %v2394_v28 }
 0x2e6   : > { %11857 = vst [vmem:[#allocation109_spill] sm:$0xff] %v8834_v26  ;;  %6300 = vmatpush3.bf16.xpose.msra.mxu1 %v4150_v59  ;;  %6157 = vmatprep.mubr.msk.bf16.mxu1 %vm563_vm0, %v11859_v40  ;;  %v11863_v59 = vld [vmem:[#allocation108_spill] sm:$0xff] }
 0x2e7   : > { %6568 = vmatprep.subr.msk.bf16.mxu1 %vm563_vm0, %v11860_v60  ;;  %v5948_v50 = vpop.f32.mrf.mxu1  ;;  %v4147_v7 = vsel %vm563_vm0, %v11863_v59, 0 }
 0x2e8   : > { %v8844_v31 = vadd.f32 %v5948_v50, %v5947_v55  ;;  %v2408_v29 = vpop.permute.xlu1 %2407  ;;  %v11865_v55 = vld [vmem:[#allocation118_spill] sm:$0xff]  ;;  %v2392_v50 = vpop.permute.xlu0 %2391 }
 0x2e9   : > { %v5950_v13 = vpop.f32.mrf.mxu1  ;;  %6033 = vmatprep.subr.bf16.mxu0 %v2408_v29 }
 0x2ea   : > { %11861 = vst [vmem:[#allocation111_spill] sm:$0xff] %v8844_v31  ;;  %6034 = vmatpush3.bf16.msra.mxu0 %v2392_v50  ;;  %v11868_v31 = vld [vmem:[#allocation122_spill] sm:$0xff] }
 0x2eb   : > { %v5951_v10 = vpop.f32.mrf.mxu1 }
 0x2ec   : > { %v8848_v54 = vadd.f32 %v5951_v10, %v5950_v13  ;;  %v4039_v49 = vpop.permute.xlu0 %4038  ;;  %v4041_v23 = vpop.permute.xlu1 %4040 }
 0x2ed   : > { %v5953_v8 = vpop.f32.mrf.mxu1  ;;  %6158 = vmatmul.mubr.msk.bf16.gmra.mxu1 %vm563_vm0, %v11859_v40 }
 0x2ee   : > { %11862 = vst [vmem:[#allocation112_spill] sm:$0xff] %v8848_v54  ;;  %6302 = vmatpush3.bf16.xpose.msra.mxu1 %v4147_v7  ;;  %6159 = vmatprep.mubr.msk.bf16.mxu1 %vm563_vm0, %v11864_v45  ;;  %v4144_v7 = vsel %vm563_vm0, %v11868_v31, 0  ;;  %v11869_v54 = vld [vmem:[#allocation75_spill] sm:$0xff] }
 0x2ef   : > { %6569 = vmatprep.subr.msk.bf16.mxu1 %vm563_vm0, %v11865_v55  ;;  %v5954_v60 = vpop.f32.mrf.mxu1 }
 0x2f0   : > { %v8858_v10 = vadd.f32 %v5954_v60, %v5953_v8  ;;  %v4043_v5 = vpop.permute.xlu0 %4042 }
 0x2f1   : > { %v5956_v13 = vpop.f32.mrf.mxu1 }
 0x2f2   : > { %11866 = vst [vmem:[#allocation114_spill] sm:$0xff] %v8858_v10 }
 0x2f3   : > { %v5957_v28 = vpop.f32.mrf.mxu1 }
 0x2f4   : > { %v8860_v59 = vadd.f32 %v5957_v28, %v5956_v13  ;;  %v11872_v13 = vld [vmem:[#allocation121_spill] sm:$0xff]  ;;  %v4047_v34 = vpop.permute.xlu0 %4046 }
 0x2f5   : > { %v5959_v40 = vpop.f32.mrf.mxu1  ;;  %6160 = vmatmul.mubr.msk.bf16.gmra.mxu1 %vm563_vm0, %v11864_v45  ;;  %v4141_v31 = vsel %vm563_vm0, %v11872_v13, 0  ;;  %v11873_v45 = vld [vmem:[#allocation68_spill] sm:$0xff] }
 0x2f6   : > { %11867 = vst [vmem:[#allocation116_spill] sm:$0xff] %v8860_v59  ;;  %6304 = vmatpush3.bf16.xpose.msra.mxu1 %v4144_v7  ;;  %6161 = vmatprep.mubr.msk.bf16.mxu1 %vm563_vm0, %v11869_v54 }
 0x2f7   : > { %6570 = vmatprep.subr.msk.bf16.mxu1 %vm563_vm0, %v8440_v62  ;;  %v5960_v8 = vpop.f32.mrf.mxu1 }
 0x2f8   : > { %v8870_v29 = vadd.f32 %v5960_v8, %v5959_v40 }
 0x2f9   : > { %v5962_v55 = vpop.f32.mrf.mxu1 }
 0x2fa   : > { %11870 = vst [vmem:[#allocation117_spill] sm:$0xff] %v8870_v29 }
 0x2fb   : > { %v5963_v60 = vpop.f32.mrf.mxu1 }
 0x2fc   : > { %v8872_v50 = vadd.f32 %v5963_v60, %v5962_v55  ;;  %v11876_v60 = vld [vmem:[#allocation85_spill] sm:$0xff] }
 0x2fd   : > { %v5965_v28 = vpop.f32.mrf.mxu1  ;;  %6162 = vmatmul.mubr.msk.bf16.gmra.mxu1 %vm563_vm0, %v11869_v54 }
 0x2fe   : > { %11871 = vst [vmem:[#allocation119_spill] sm:$0xff] %v8872_v50  ;;  %6306 = vmatpush3.bf16.xpose.msra.mxu1 %v4141_v31  ;;  %6163 = vmatprep.mubr.msk.bf16.mxu1 %vm563_vm0, %v11873_v45 }
 0x2ff   : > { %v5966_v7 = vpop.f32.mrf.mxu1 }
 0x300   : > { %v8880_v62 = vadd.f32 %v5966_v7, %v5965_v28 }
 0x301   : > { %v5968_v40 = vpop.f32.mrf.mxu1 }
 0x302   : > { %11874 = vst [vmem:[#allocation19_spill] sm:$0xff] %v8880_v62 }
 0x303   : > { %v5969_v8 = vpop.f32.mrf.mxu1 }
 0x304   : > { %v8882_v29 = vadd.f32 %v5969_v8, %v5968_v40 }
 0x305   : > { %v8884_v55 = vpop.f32.mrf.mxu1  ;;  %6164 = vmatmul.mubr.msk.bf16.gmra.mxu1 %vm563_vm0, %v11873_v45  ;;  %v11877_v45 = vld [vmem:[#allocation83_spill] sm:$0xff] }
 0x306   : > { %11875 = vst [vmem:[#allocation32_spill] sm:$0xff] %v8882_v29  ;;  %6165 = vmatprep.mubr.msk.bf16.mxu1 %vm563_vm0, %v11876_v60 }
 0x307   : > { %v8890_v54 = vpop.f32.mrf.mxu1 }
 0x308   : > { %v1975_v13 = vmax.f32 %v8884_v55, %v8890_v54 }
 0x309   : > { %v8894_v31 = vpop.f32.mrf.mxu1 }
 0x30a   : > { %1976 = vmax.xlane.f32.xlu1 %v1975_v13 }
 0x30b   : > { %v8896_v28 = vpop.f32.mrf.mxu1 }
 0x30c   : > { %v1978_v7 = vmax.f32 %v8894_v31, %v8896_v28 }
 0x30d   : > { %v8900_v40 = vpop.f32.mrf.mxu1  ;;  %6166 = vmatmul.mubr.msk.bf16.gmra.mxu1 %vm563_vm0, %v11876_v60  ;;  %v11878_v60 = vld [vmem:[#allocation100_spill] sm:$0xff] }
 0x30e   : > { %6167 = vmatprep.mubr.msk.bf16.mxu1 %vm563_vm0, %v11877_v45  ;;  %1979 = vmax.xlane.f32.xlu0 %v1978_v7 }
 0x30f   : > { %v8906_v8 = vpop.f32.mrf.mxu1 }
 0x310   : > { %v1981_v62 = vmax.f32 %v8900_v40, %v8906_v8 }
 0x311   : > { %v8910_v13 = vpop.f32.mrf.mxu1 }
 0x312   : > { %1982 = vmax.xlane.f32.xlu0 %v1981_v62 }
 0x313   : > { %v8912_v29 = vpop.f32.mrf.mxu1 }
 0x314   : > { %v1984_v50 = vmax.f32 %v8910_v13, %v8912_v29 }
 0x315   : > { %v8916_v10 = vpop.f32.mrf.mxu1  ;;  %6168 = vmatmul.mubr.msk.bf16.gmra.mxu1 %vm563_vm0, %v11877_v45  ;;  %v11879_v45 = vld [vmem:[#allocation98_spill] sm:$0xff] }
 0x316   : > { %6169 = vmatprep.mubr.msk.bf16.mxu1 %vm563_vm0, %v11878_v60  ;;  %1985 = vmax.xlane.f32.xlu1 %v1984_v50 }
 0x317   : > { %v8922_v7 = vpop.f32.mrf.mxu1 }
 0x318   : > { %v1987_v59 = vmax.f32 %v8916_v10, %v8922_v7 }
 0x319   : > { %v8926_v62 = vpop.f32.mrf.mxu1 }
 0x31a   : > { %1988 = vmax.xlane.f32.xlu1 %v1987_v59 }
 0x31b   : > { %v8928_v35 = vpop.f32.mrf.mxu1 }
 0x31c   : > { %v1990_v21 = vmax.f32 %v8926_v62, %v8928_v35 }
 0x31d   : > { %v8932_v3 = vpop.f32.mrf.mxu1  ;;  %6170 = vmatmul.mubr.msk.bf16.gmra.mxu1 %vm563_vm0, %v11878_v60  ;;  %v11880_v60 = vld [vmem:[#allocation115_spill] sm:$0xff] }
 0x31e   : > { %6171 = vmatprep.mubr.msk.bf16.mxu1 %vm563_vm0, %v11879_v45  ;;  %1991 = vmax.xlane.f32.xlu0 %v1990_v21 }
 0x31f   : > { %v8938_v50 = vpop.f32.mrf.mxu1 }
 0x320   : > { %v1993_v36 = vmax.f32 %v8932_v3, %v8938_v50 }
 0x321   : > { %v8942_v59 = vpop.f32.mrf.mxu1 }
 0x322   : > { %1994 = vmax.xlane.f32.xlu0 %v1993_v36 }
 0x323   : > { %v8944_v18 = vpop.f32.mrf.mxu1 }
 0x324   : > { %v1996_v14 = vmax.f32 %v8942_v59, %v8944_v18 }
 0x325   : > { %v8948_v26 = vpop.f32.mrf.mxu1  ;;  %6172 = vmatmul.mubr.msk.bf16.gmra.mxu1 %vm563_vm0, %v11879_v45  ;;  %v11881_v45 = vld [vmem:[#allocation113_spill] sm:$0xff] }
 0x326   : > { %6173 = vmatprep.mubr.msk.bf16.mxu1 %vm563_vm0, %v11880_v60  ;;  %1997 = vmax.xlane.f32.xlu1 %v1996_v14 }
 0x327   : > { %v8954_v21 = vpop.f32.mrf.mxu1 }
 0x328   : > { %v1999_v11 = vmax.f32 %v8948_v26, %v8954_v21 }
 0x329   : > { %v8958_v36 = vpop.f32.mrf.mxu1 }
 0x32a   : > { %2000 = vmax.xlane.f32.xlu1 %v1999_v11 }
 0x32b   : > { %v8960_v20 = vpop.f32.mrf.mxu1 }
 0x32c   : > { %v2002_v43 = vmax.f32 %v8958_v36, %v8960_v20 }
 0x32d   : > { %v8964_v63 = vpop.f32.mrf.mxu1  ;;  %6174 = vmatmul.mubr.msk.bf16.gmra.mxu1 %vm563_vm0, %v11880_v60  ;;  %v11882_v60 = vld [vmem:[#allocation124_spill] sm:$0xff] }
 0x32e   : > { %6175 = vmatprep.mubr.msk.bf16.mxu1 %vm563_vm0, %v11881_v45  ;;  %2003 = vmax.xlane.f32.xlu0 %v2002_v43 }
 0x32f   : > { %v8970_v14 = vpop.f32.mrf.mxu1 }
 0x330   : > { %v2005_v57 = vmax.f32 %v8964_v63, %v8970_v14 }
 0x331   : > { %v8974_v11 = vpop.f32.mrf.mxu1 }
 0x332   : > { %2006 = vmax.xlane.f32.xlu1 %v2005_v57 }
 0x333   : > { %v8976_v12 = vpop.f32.mrf.mxu1 }
 0x334   : > { %v2008_v42 = vmax.f32 %v8974_v11, %v8976_v12 }
 0x335   : > { %v8980_v44 = vpop.f32.mrf.mxu1  ;;  %6176 = vmatmul.mubr.msk.bf16.gmra.mxu1 %vm563_vm0, %v11881_v45  ;;  %v11883_v45 = vld [vmem:[#allocation123_spill] sm:$0xff] }
 0x336   : > { %6177 = vmatprep.mubr.msk.bf16.mxu1 %vm563_vm0, %v11882_v60  ;;  %2009 = vmax.xlane.f32.xlu1 %v2008_v42 }
 0x337   : > { %v8986_v43 = vpop.f32.mrf.mxu1 }
 0x338   : > { %v2011_v24 = vmax.f32 %v8980_v44, %v8986_v43 }
 0x339   : > { %v8990_v57 = vpop.f32.mrf.mxu1 }
 0x33a   : > { %2012 = vmax.xlane.f32.xlu0 %v2011_v24 }
 0x33b   : > { %v8992_v56 = vpop.f32.mrf.mxu1 }
 0x33c   : > { %v2014_v53 = vmax.f32 %v8990_v57, %v8992_v56 }
 0x33d   : > { %v8996_v48 = vpop.f32.mrf.mxu1  ;;  %6178 = vmatmul.mubr.msk.bf16.gmra.mxu1 %vm563_vm0, %v11882_v60 }
 0x33e   : > { %6307 = vmatprep.mubr.msk.bf16.mxu1 %vm563_vm0, %v11883_v45  ;;  %2015 = vmax.xlane.f32.xlu1 %v2014_v53 }
 0x33f   : > { %v9002_v42 = vpop.f32.mrf.mxu1 }
 0x340   : > { %v2017_v33 = vmax.f32 %v8996_v48, %v9002_v42 }
 0x341   : > { %v9006_v24 = vpop.f32.mrf.mxu1 }
 0x342   : > { %2018 = vmax.xlane.f32.xlu1 %v2017_v33 }
 0x343   : > { %v9008_v1 = vpop.f32.mrf.mxu1 }
 0x344   : > { %v2020_v15 = vmax.f32 %v9006_v24, %v9008_v1 }
 0x345   : > { %v9012_v17 = vpop.f32.mrf.mxu1  ;;  %6308 = vmatmul.mubr.msk.bf16.vlgmr.msra.gmra.mxu1 %vm563_vm0, %v11883_v45 }
 0x346   : > { %2021 = vmax.xlane.f32.xlu1 %v2020_v15  ;;  %6309 = vmatprep.mubr.msk.bf16.mxu1 %vm563_vm0, %v8788_v4 }
 0x347   : > { %v9018_v53 = vpop.f32.mrf.mxu1 }
 0x348   : > { %v2023_v60 = vmax.f32 %v9012_v17, %v9018_v53 }
 0x349   : > { %v9022_v33 = vpop.f32.mrf.mxu1 }
 0x34a   : > { %2024 = vmax.xlane.f32.xlu0 %v2023_v60 }
 0x34b   : > { %v9024_v58 = vpop.f32.mrf.mxu1 }
 0x34c   : > { %v2026_v61 = vmax.f32 %v9022_v33, %v9024_v58 }
 0x34d   : > { %v9028_v47 = vpop.f32.mrf.mxu1  ;;  %6310 = vmatmul.mubr.msk.bf16.gmra.mxu1 %vm563_vm0, %v8788_v4 }
 0x34e   : > { %2027 = vmax.xlane.f32.xlu1 %v2026_v61  ;;  %6311 = vmatprep.mubr.msk.bf16.mxu1 %vm563_vm0, %v8806_v38 }
 0x34f   : > { %v9034_v15 = vpop.f32.mrf.mxu1 }
 0x350   : > { %v2029_v45 = vmax.f32 %v9028_v47, %v9034_v15 }
 0x351   : > { %v9038_v60 = vpop.f32.mrf.mxu1 }
 0x352   : > { %2030 = vmax.xlane.f32.xlu1 %v2029_v45 }
 0x353   : > { %v9040_v46 = vpop.f32.mrf.mxu1 }
 0x354   : > { %v2032_v39 = vmax.f32 %v9038_v60, %v9040_v46 }
 0x355   : > { %v9044_v16 = vpop.f32.mrf.mxu1  ;;  %6312 = vmatmul.mubr.msk.bf16.gmra.mxu1 %vm563_vm0, %v8806_v38 }
 0x356   : > { %2033 = vmax.xlane.f32.xlu0 %v2032_v39  ;;  %6313 = vmatprep.mubr.msk.bf16.mxu1 %vm563_vm0, %v8832_v30 }
 0x357   : > { %v9050_v61 = vpop.f32.mrf.mxu1 }
 0x358   : > { %v2035_v4 = vmax.f32 %v9044_v16, %v9050_v61 }
 0x359   : > { %v9054_v45 = vpop.f32.mrf.mxu1 }
 0x35a   : > { %11884 = vst [vmem:[#allocation24_spill] sm:$0xff] %v9054_v45  ;;  %2036 = vmax.xlane.f32.xlu1 %v2035_v4 }
 0x35b   : > { %v9056_v27 = vpop.f32.mrf.mxu1 }
 0x35c   : > { %11885 = vst [vmem:[#allocation36_spill] sm:$0xff] %v9056_v27  ;;  %v2038_v51 = vmax.f32 %v9054_v45, %v9056_v27 }
 0x35d   : > { %v9060_v52 = vpop.f32.mrf.mxu1  ;;  %6314 = vmatmul.mubr.msk.bf16.gmra.mxu1 %vm563_vm0, %v8832_v30 }
 0x35e   : > { %11886 = vst [vmem:[#allocation31_spill] sm:$0xff] %v9060_v52  ;;  %2039 = vmax.xlane.f32.xlu0 %v2038_v51  ;;  %6315 = vmatprep.mubr.msk.bf16.mxu1 %vm563_vm0, %v8846_v0 }
 0x35f   : > { %v9066_v39 = vpop.f32.mrf.mxu1 }
 0x360   : > { %11887 = vst [vmem:[#allocation21_spill] sm:$0xff] %v9066_v39  ;;  %v2041_v38 = vmax.f32 %v9060_v52, %v9066_v39 }
 0x361   : > { %v9070_v4 = vpop.f32.mrf.mxu1 }
 0x362   : > { %11888 = vst [vmem:[#allocation35_spill] sm:$0xff] %v9070_v4  ;;  %2042 = vmax.xlane.f32.xlu1 %v2041_v38 }
 0x363   : > { %v9072_v6 = vpop.f32.mrf.mxu1 }
 0x364   : > { %11889 = vst [vmem:[#allocation38_spill] sm:$0xff] %v9072_v6  ;;  %v2044_v9 = vmax.f32 %v9070_v4, %v9072_v6 }
 0x365   : > { %v9076_v30 = vpop.f32.mrf.mxu1  ;;  %6316 = vmatmul.mubr.msk.bf16.gmra.mxu1 %vm563_vm0, %v8846_v0 }
 0x366   : > { %11890 = vst [vmem:[#allocation26_spill] sm:$0xff] %v9076_v30  ;;  %2045 = vmax.xlane.f32.xlu0 %v2044_v9  ;;  %6317 = vmatprep.mubr.msk.bf16.mxu1 %vm563_vm0, %v4039_v49  ;;  %v7455_v9 = vld [vmem:[%s7705_s11 + $0x60] sm:$0xff]  }
 0x367   : > { %v9081_v51 = vpop.f32.mrf.mxu1 }
 0x368   : > { %11891 = vst [vmem:[#allocation42_spill] sm:$0xff] %v9081_v51 }
 0x369   : > { %v9083_v25 = vpop.f32.mrf.mxu1 }
 0x36a   : > { %11892 = vst [vmem:[#allocation37_spill] sm:$0xff] %v9083_v25 }
 0x36b   : > { %v9085_v38 = vpop.f32.mrf.mxu1 }
 0x36c   : > { %11893 = vst [vmem:[#allocation23_spill] sm:$0xff] %v9085_v38  ;;  %v2050_v41 = vmax.f32 %v9083_v25, %v9085_v38  ;;  %v4051_v25 = vpop.permute.xlu0 %4050 }
 0x36d   : > { %6318 = vmatmul.mubr.msk.bf16.gmra.mxu1 %vm563_vm0, %v4039_v49  ;;  %v9091_v0 = vpop.f32.mrf.mxu1 }
 0x36e   : > { %2051 = vmax.xlane.f32.xlu0 %v2050_v41  ;;  %6319 = vmatprep.mubr.msk.bf16.mxu1 %vm563_vm0, %v4041_v23  ;;  %v4045_v41 = vpop.permute.xlu1 %4044 }
 0x36f   : > { %v9095_v32 = vpop.f32.mrf.mxu1 }
 0x371   : > { %v9099_v19 = vpop.f32.mrf.mxu1 }
 0x372   : > { %v4049_v38 = vpop.permute.xlu1 %4048 }
 0x373   : > { %4052 = vrot.lane.b32.xlu1 %v7455_v9, %s7561_s22  ;;  %v9101_v2 = vpop.f32.mrf.mxu1  ;;  %v7456_v9 = vld [vmem:[%s7705_s11 + $0x68] sm:$0xff]  }
 0x375   : > { %6320 = vmatmul.mubr.msk.bf16.gmra.mxu1 %vm563_vm0, %v4041_v23  ;;  %v9105_v49 = vpop.f32.mrf.mxu1 }
 0x376   : > { %6321 = vmatprep.mubr.msk.bf16.mxu1 %vm563_vm0, %v4043_v5 }
 0x377   : > { %v9109_v37 = vpop.f32.mrf.mxu1 }
 0x379   : > { %v9113_v23 = vpop.f32.mrf.mxu1 }
 0x37b   : > { %v9115_v22 = vpop.f32.mrf.mxu1 }
 0x37d   : > { %6322 = vmatmul.mubr.msk.bf16.gmra.mxu1 %vm563_vm0, %v4043_v5  ;;  %v9119_v5 = vpop.f32.mrf.mxu1 }
 0x37e   : > { %6323 = vmatprep.mubr.msk.bf16.mxu1 %vm563_vm0, %v4045_v41 }
 0x37f   : > { %v9125_v39 = vpop.f32.mrf.mxu1 }
 0x384   : > { %4054 = vrot.lane.b32.xlu0 %v7456_v9, %s7561_s22 }
 0x385   : > { %6324 = vmatmul.mubr.msk.bf16.gmra.mxu1 %vm563_vm0, %v4045_v41  ;;  %v2047_v41 = vmax.f32 %v9076_v30, %v9081_v51 }
 0x386   : > { %6325 = vmatprep.mubr.msk.bf16.mxu1 %vm563_vm0, %v4047_v34 }
 0x38d   : > { %6326 = vmatmul.mubr.msk.bf16.gmra.mxu1 %vm563_vm0, %v4047_v34 }
 0x38e   : > { %6327 = vmatprep.mubr.msk.bf16.mxu1 %vm563_vm0, %v4049_v38 }
 0x393   : > { %v1977_v6 = vpop.xlane.xlu1 %1976 }
 0x394   : > { %v2071_v9 = vsub.f32 %v8884_v55, %v1977_v6  ;;  %v2072_v4 = vsub.f32 %v8890_v54, %v1977_v6  ;;  %v2053_v6 = vmax.f32 %v9091_v0, %v9095_v32  ;;  %v9133_v54 = vpop.f32.mrf.mxu1 }
 0x395   : > { %6328 = vmatmul.mubr.msk.bf16.gmra.mxu1 %vm563_vm0, %v4049_v38 }
 0x396   : > { %v2135_v52 = vmul.f32 1.442695, %v2071_v9  ;;  %v2137_v27 = vmul.f32 1.442695, %v2072_v4  ;;  %6329 = vmatprep.mubr.msk.bf16.mxu1 %vm563_vm0, %v4051_v25 }
 0x397   : > { %2048 = vmax.xlane.f32.xlu1 %v2047_v41  ;;  %v1980_v34 = vpop.xlane.xlu0 %1979 }
 0x398   : > { %6815 = vpow2.f32 %v2135_v52  ;;  %v2073_v45 = vsub.f32 %v8894_v31, %v1980_v34  ;;  %v2074_v55 = vsub.f32 %v8896_v28, %v1980_v34  ;;  %v9137_v52 = vpop.f32.mrf.mxu1 }
 0x399   : > { %6817 = vpow2.f32 %v2137_v27 }
 0x39a   : > { %v2139_v51 = vmul.f32 1.442695, %v2073_v45  ;;  %v2141_v30 = vmul.f32 1.442695, %v2074_v55 }
 0x39b   : > { %2054 = vmax.xlane.f32.xlu1 %v2053_v6  ;;  %v1983_v38 = vpop.xlane.xlu0 %1982  ;;  %v2062_v6 = vmax.f32 %v9113_v23, %v9115_v22 }
 0x39c   : > { %6819 = vpow2.f32 %v2139_v51  ;;  %v2075_v4 = vsub.f32 %v8900_v40, %v1983_v38  ;;  %v2076_v9 = vsub.f32 %v8906_v8, %v1983_v38  ;;  %v2056_v51 = vmax.f32 %v9099_v19, %v9101_v2 }
 0x39d   : > { %6821 = vpow2.f32 %v2141_v30  ;;  %6330 = vmatmul.mubr.msk.bf16.gmra.mxu1 %vm563_vm0, %v4051_v25 }
 0x39e   : > { %v2143_v31 = vmul.f32 1.442695, %v2075_v4  ;;  %v2145_v28 = vmul.f32 1.442695, %v2076_v9 }
 0x39f   : > { %v1986_v41 = vpop.xlane.xlu1 %1985 }
 0x3a0   : > { %6823 = vpow2.f32 %v2143_v31  ;;  %v2077_v27 = vsub.f32 %v8910_v13, %v1986_v41  ;;  %v2078_v45 = vsub.f32 %v8912_v29, %v1986_v41 }
 0x3a1   : > { %6825 = vpow2.f32 %v2145_v28 }
 0x3a2   : > { %v2147_v40 = vmul.f32 1.442695, %v2077_v27  ;;  %v2149_v34 = vmul.f32 1.442695, %v2078_v45 }
 0x3a3   : > { %v1989_v8 = vpop.xlane.xlu1 %1988  ;;  %2057 = vmax.xlane.f32.xlu0 %v2056_v51 }
 0x3a4   : > { %6827 = vpow2.f32 %v2147_v40  ;;  %v2079_v30 = vsub.f32 %v8916_v10, %v1989_v8  ;;  %v2080_v25 = vsub.f32 %v8922_v7, %v1989_v8 }
 0x3a5   : > { %v6816_v55 = vpop.eup %6815  ;;  %6829 = vpow2.f32 %v2149_v34 }
 0x3a6   : > { %v6818_v13 = vpop.eup %6817  ;;  %v2151_v29 = vmul.f32 1.442695, %v2079_v30  ;;  %v2153_v38 = vmul.f32 1.442695, %v2080_v25  ;;  %v7457_v25 = vld [vmem:[%s7705_s11 + $0x70] sm:$0xff]  }
 0x3a7   : > { %2063 = vmax.xlane.f32.xlu0 %v2062_v6  ;;  %v1992_v4 = vpop.xlane.xlu0 %1991  ;;  %v9148_v9 = vadd.f32 %v6818_v13, %v6816_v55 }
 0x3a8   : > { %6831 = vpow2.f32 %v2151_v29  ;;  %v2081_v31 = vsub.f32 %v8926_v62, %v1992_v4  ;;  %v2082_v10 = vsub.f32 %v8928_v35, %v1992_v4 }
 0x3a9   : > { %11894 = vst [vmem:[#allocation41_spill] sm:$0xff] %v9148_v9  ;;  %v6820_v28 = vpop.eup %6819  ;;  %6833 = vpow2.f32 %v2153_v38 }
 0x3aa   : > { %v6822_v7 = vpop.eup %6821  ;;  %v2155_v41 = vmul.f32 1.442695, %v2081_v31  ;;  %v2157_v27 = vmul.f32 1.442695, %v2082_v10  ;;  %v2359_v45 = vpack.c.bf16 %v6820_v28, %v6816_v55 }
 0x3ab   : > { %v1995_v51 = vpop.xlane.xlu0 %1994  ;;  %v2360_v40 = vpack.c.bf16 %v6822_v7, %v6818_v13  ;;  %v9152_v34 = vadd.f32 %v6822_v7, %v6820_v28 }
 0x3ac   : > { %6835 = vpow2.f32 %v2155_v41  ;;  %v2083_v8 = vsub.f32 %v8932_v3, %v1995_v51  ;;  %v2084_v30 = vsub.f32 %v8938_v50, %v1995_v51  ;;  %4056 = vrot.lane.b32.xlu1 %v7457_v25, %s7561_s22 }
 0x3ad   : > { %11895 = vst [vmem:[#allocation44_spill] sm:$0xff] %v9152_v34  ;;  %v6824_v62 = vpop.eup %6823  ;;  %6837 = vpow2.f32 %v2157_v27  ;;  %2471 = vmatprep.mubr.bf16.mxu0 %v2360_v40 }
 0x3ae   : > { %v6826_v35 = vpop.eup %6825  ;;  %v2159_v6 = vmul.f32 1.442695, %v2083_v8  ;;  %v2161_v29 = vmul.f32 1.442695, %v2084_v30  ;;  %2472 = vmatmul.mubr.bf16.vlgmr.msra.gmra.mxu0 %v2359_v45 }
 0x3af   : > { %v1998_v55 = vpop.xlane.xlu1 %1997  ;;  %v9158_v38 = vadd.f32 %v6826_v35, %v6824_v62 }
 0x3b0   : > { %6839 = vpow2.f32 %v2159_v6  ;;  %v2085_v13 = vsub.f32 %v8942_v59, %v1998_v55  ;;  %v2086_v3 = vsub.f32 %v8944_v18, %v1998_v55 }
 0x3b1   : > { %11896 = vst [vmem:[#allocation28_spill] sm:$0xff] %v9158_v38  ;;  %v6828_v4 = vpop.eup %6827  ;;  %6841 = vpow2.f32 %v2161_v29 }
 0x3b2   : > { %v6830_v50 = vpop.eup %6829  ;;  %v2163_v31 = vmul.f32 1.442695, %v2085_v13  ;;  %v2165_v10 = vmul.f32 1.442695, %v2086_v3  ;;  %v2361_v28 = vpack.c.bf16 %v6828_v4, %v6824_v62 }
 0x3b3   : > { %v2001_v7 = vpop.xlane.xlu1 %2000  ;;  %v2362_v41 = vpack.c.bf16 %v6830_v50, %v6826_v35  ;;  %v9162_v27 = vadd.f32 %v6830_v50, %v6828_v4 }
 0x3b4   : > { %6843 = vpow2.f32 %v2163_v31  ;;  %v2087_v45 = vsub.f32 %v8948_v26, %v2001_v7  ;;  %v2088_v51 = vsub.f32 %v8954_v21, %v2001_v7 }
 0x3b5   : > { %11897 = vst [vmem:[#allocation48_spill] sm:$0xff] %v9162_v27  ;;  %v6832_v40 = vpop.eup %6831  ;;  %6845 = vpow2.f32 %v2165_v10  ;;  %2479 = vmatprep.mubr.bf16.mxu0 %v2362_v41 }
 0x3b6   : > { %v6834_v59 = vpop.eup %6833  ;;  %v2167_v18 = vmul.f32 1.442695, %v2087_v45  ;;  %v2169_v8 = vmul.f32 1.442695, %v2088_v51  ;;  %2480 = vmatmul.mubr.bf16.gmra.mxu0 %v2361_v28 }
 0x3b7   : > { %v2004_v30 = vpop.xlane.xlu0 %2003  ;;  %v9166_v25 = vadd.f32 %v6834_v59, %v6832_v40 }
 0x3b8   : > { %6847 = vpow2.f32 %v2167_v18  ;;  %v2089_v62 = vsub.f32 %v8958_v36, %v2004_v30  ;;  %v2090_v35 = vsub.f32 %v8960_v20, %v2004_v30  ;;  %v7458_v20 = vld [vmem:[%s7705_s11 + $0x78] sm:$0xff]   ;;  %s7562_s11 = smov [#allocation5]  }
 0x3b9   : > { %11898 = vst [vmem:[#allocation43_spill] sm:$0xff] %v9166_v25  ;;  %v6836_v6 = vpop.eup %6835  ;;  %6849 = vpow2.f32 %v2169_v8  ;;  %v11930_v25 = vld [vmem:[#allocation42_spill] sm:$0xff]  ;;  %s7485_s12 = sshll.u32 %s7562_s11, 4  ;;  %s7486_s12 = int_to_ptr.vmem [resolvable:$false] %s7485_s12 }
 0x3ba   : > { %v6838_v26 = vpop.eup %6837  ;;  %v2171_v21 = vmul.f32 1.442695, %v2089_v62  ;;  %v2173_v29 = vmul.f32 1.442695, %v2090_v35  ;;  %v2363_v55 = vpack.c.bf16 %v6836_v6, %v6832_v40  ;;  %s7487_s13 = scalar_lea.vmem %s7486_s12, 8192 }
 0x3bb   : > { %v2007_v13 = vpop.xlane.xlu1 %2006  ;;  %v2364_v3 = vpack.c.bf16 %v6838_v26, %v6834_v59  ;;  %v9170_v4 = vadd.f32 %v6838_v26, %v6836_v6 }
 0x3bc   : > { %6851 = vpow2.f32 %v2171_v21  ;;  %v2091_v50 = vsub.f32 %v8964_v63, %v2007_v13  ;;  %v2092_v31 = vsub.f32 %v8970_v14, %v2007_v13 }
 0x3bd   : > { %11899 = vst [vmem:[#allocation25_spill] sm:$0xff] %v9170_v4  ;;  %v6840_v10 = vpop.eup %6839  ;;  %6853 = vpow2.f32 %v2173_v29  ;;  %2487 = vmatprep.mubr.bf16.mxu0 %v2364_v3  ;;  %4058 = vrot.lane.b32.xlu0 %v7458_v20, %s7561_s22 }
 0x3be   : > { %v6842_v36 = vpop.eup %6841  ;;  %v2175_v28 = vmul.f32 1.442695, %v2091_v50  ;;  %v2177_v7 = vmul.f32 1.442695, %v2092_v31  ;;  %2488 = vmatmul.mubr.bf16.gmra.mxu0 %v2363_v55 }
 0x3bf   : > { %v2010_v41 = vpop.xlane.xlu1 %2009  ;;  %v9176_v45 = vadd.f32 %v6842_v36, %v6840_v10 }
 0x3c0   : > { %6855 = vpow2.f32 %v2175_v28  ;;  %v2093_v51 = vsub.f32 %v8974_v11, %v2010_v41  ;;  %v2094_v63 = vsub.f32 %v8976_v12, %v2010_v41 }
 0x3c1   : > { %11900 = vst [vmem:[#allocation47_spill] sm:$0xff] %v9176_v45  ;;  %v6844_v40 = vpop.eup %6843  ;;  %6857 = vpow2.f32 %v2177_v7  ;;  %v11929_v45 = vld [vmem:[#allocation26_spill] sm:$0xff] }
 0x3c2   : > { %v6846_v14 = vpop.eup %6845  ;;  %v2179_v59 = vmul.f32 1.442695, %v2093_v51  ;;  %v2181_v18 = vmul.f32 1.442695, %v2094_v63  ;;  %v2365_v8 = vpack.c.bf16 %v6844_v40, %v6840_v10 }
 0x3c3   : > { %v2013_v30 = vpop.xlane.xlu0 %2012  ;;  %v2366_v62 = vpack.c.bf16 %v6846_v14, %v6842_v36  ;;  %v9180_v35 = vadd.f32 %v6846_v14, %v6844_v40  ;;  %v9188_v36 = vpop.f32.mrf.mxu1  ;;  %v2059_v40 = vmax.f32 %v9105_v49, %v9109_v37 }
 0x3c4   : > { %6859 = vpow2.f32 %v2179_v59  ;;  %v2095_v6 = vsub.f32 %v8980_v44, %v2013_v30  ;;  %v2096_v26 = vsub.f32 %v8986_v43, %v2013_v30 }
 0x3c5   : > { %11901 = vst [vmem:[#allocation50_spill] sm:$0xff] %v9180_v35  ;;  %v6848_v21 = vpop.eup %6847  ;;  %6861 = vpow2.f32 %v2181_v18  ;;  %2495 = vmatprep.mubr.bf16.mxu0 %v2366_v62  ;;  %v9196_v18 = vpop.f32.mrf.mxu1 }
 0x3c6   : > { %v6850_v11 = vpop.eup %6849  ;;  %v2183_v12 = vmul.f32 1.442695, %v2095_v6  ;;  %v2185_v29 = vmul.f32 1.442695, %v2096_v26  ;;  %2496 = vmatmul.mubr.bf16.gmra.mxu0 %v2365_v8  ;;  %v2065_v26 = vmax.f32 %v9119_v5, %v9125_v39 }
 0x3c7   : > { %v2016_v55 = vpop.xlane.xlu1 %2015  ;;  %v9184_v13 = vadd.f32 %v6850_v11, %v6848_v21 }
 0x3c8   : > { %6863 = vpow2.f32 %v2183_v12  ;;  %v2097_v3 = vsub.f32 %v8990_v57, %v2016_v55  ;;  %v2098_v50 = vsub.f32 %v8992_v56, %v2016_v55 }
 0x3c9   : > { %11902 = vst [vmem:[#allocation30_spill] sm:$0xff] %v9184_v13  ;;  %v6852_v31 = vpop.eup %6851  ;;  %6865 = vpow2.f32 %v2185_v29  ;;  %v9204_v29 = vpop.f32.mrf.mxu1 }
 0x3ca   : > { %v6854_v44 = vpop.eup %6853  ;;  %v2187_v10 = vmul.f32 1.442695, %v2097_v3  ;;  %v2189_v43 = vmul.f32 1.442695, %v2098_v50  ;;  %v2367_v20 = vpack.c.bf16 %v6852_v31, %v6848_v21 }
 0x3cb   : > { %v2019_v28 = vpop.xlane.xlu1 %2018  ;;  %v2368_v7 = vpack.c.bf16 %v6854_v44, %v6850_v11  ;;  %v9190_v41 = vadd.f32 %v6854_v44, %v6852_v31 }
 0x3cc   : > { %6867 = vpow2.f32 %v2187_v10  ;;  %v2099_v51 = vsub.f32 %v8996_v48, %v2019_v28  ;;  %v2100_v63 = vsub.f32 %v9002_v42, %v2019_v28  ;;  %v3178_v10 = vmax.f32 %v9188_v36, %v9196_v18  ;;  %v9212_v28 = vpop.f32.mrf.mxu1 }
 0x3cd   : > { %11903 = vst [vmem:[#allocation55_spill] sm:$0xff] %v9190_v41  ;;  %v6856_v57 = vpop.eup %6855  ;;  %6869 = vpow2.f32 %v2189_v43  ;;  %2503 = vmatprep.mubr.bf16.mxu0 %v2368_v7 }
 0x3ce   : > { %v6858_v56 = vpop.eup %6857  ;;  %v2191_v14 = vmul.f32 1.442695, %v2099_v51  ;;  %v2193_v59 = vmul.f32 1.442695, %v2100_v63  ;;  %2504 = vmatmul.mubr.bf16.gmra.mxu0 %v2367_v20 }
 0x3cf   : > { %v2022_v8 = vpop.xlane.xlu1 %2021  ;;  %v9198_v30 = vadd.f32 %v6858_v56, %v6856_v57 }
 0x3d0   : > { %6871 = vpow2.f32 %v2191_v14  ;;  %v2101_v48 = vsub.f32 %v9006_v24, %v2022_v8  ;;  %v2102_v42 = vsub.f32 %v9008_v1, %v2022_v8  ;;  %2060 = vmax.xlane.f32.xlu1 %v2059_v40  ;;  %v3181_v40 = vmax.f32 %v9204_v29, %v9212_v28 }
 0x3d1   : > { %11904 = vst [vmem:[#allocation49_spill] sm:$0xff] %v9198_v30  ;;  %v6860_v62 = vpop.eup %6859  ;;  %6873 = vpow2.f32 %v2193_v59 }
 0x3d2   : > { %v6862_v6 = vpop.eup %6861  ;;  %v2195_v21 = vmul.f32 1.442695, %v2101_v48  ;;  %v2197_v11 = vmul.f32 1.442695, %v2102_v42  ;;  %v2369_v12 = vpack.c.bf16 %v6860_v62, %v6856_v57  ;;  %v2068_v57 = vmax.f32 %v9133_v54, %v9137_v52 }
 0x3d3   : > { %v2025_v55 = vpop.xlane.xlu0 %2024  ;;  %v2370_v3 = vpack.c.bf16 %v6862_v6, %v6858_v56  ;;  %v9206_v50 = vadd.f32 %v6862_v6, %v6860_v62 }
 0x3d4   : > { %6875 = vpow2.f32 %v2195_v21  ;;  %v2103_v24 = vsub.f32 %v9012_v17, %v2025_v55  ;;  %v2104_v1 = vsub.f32 %v9018_v53, %v2025_v55  ;;  %2066 = vmax.xlane.f32.xlu1 %v2065_v26 }
 0x3d5   : > { %11905 = vst [vmem:[#allocation27_spill] sm:$0xff] %v9206_v50  ;;  %v6864_v31 = vpop.eup %6863  ;;  %6877 = vpow2.f32 %v2197_v11  ;;  %2511 = vmatprep.mubr.bf16.mxu0 %v2370_v3 }
 0x3d6   : > { %v6866_v44 = vpop.eup %6865  ;;  %v2199_v43 = vmul.f32 1.442695, %v2103_v24  ;;  %v2201_v20 = vmul.f32 1.442695, %v2104_v1  ;;  %2512 = vmatmul.mubr.bf16.gmra.mxu0 %v2369_v12 }
 0x3d7   : > { %v2028_v7 = vpop.xlane.xlu1 %2027  ;;  %v9214_v51 = vadd.f32 %v6866_v44, %v6864_v31 }
 0x3d8   : > { %6879 = vpow2.f32 %v2199_v43  ;;  %v2105_v17 = vsub.f32 %v9022_v33, %v2028_v7  ;;  %v2106_v53 = vsub.f32 %v9024_v58, %v2028_v7  ;;  %3179 = vmax.xlane.f32.xlu1 %v3178_v10 }
 0x3d9   : > { %11906 = vst [vmem:[#allocation73_spill] sm:$0xff] %v9214_v51  ;;  %v6868_v63 = vpop.eup %6867  ;;  %6881 = vpow2.f32 %v2201_v20 }
 0x3da   : > { %v6870_v56 = vpop.eup %6869  ;;  %v2203_v14 = vmul.f32 1.442695, %v2105_v17  ;;  %v2205_v59 = vmul.f32 1.442695, %v2106_v53  ;;  %v2371_v8 = vpack.c.bf16 %v6868_v63, %v6864_v31 }
 0x3db   : > { %v2031_v48 = vpop.xlane.xlu1 %2030  ;;  %v2372_v42 = vpack.c.bf16 %v6870_v56, %v6866_v44  ;;  %v9222_v62 = vadd.f32 %v6870_v56, %v6868_v63 }
 0x3dc   : > { %6883 = vpow2.f32 %v2203_v14  ;;  %v2107_v58 = vsub.f32 %v9028_v47, %v2031_v48  ;;  %v2108_v33 = vsub.f32 %v9034_v15, %v2031_v48  ;;  %3182 = vmax.xlane.f32.xlu1 %v3181_v40  ;;  %2069 = vmax.xlane.f32.xlu0 %v2068_v57  ;;  %v11911_v40 = vld [vmem:[#allocation24_spill] sm:$0xff] }
 0x3dd   : > { %11907 = vst [vmem:[#allocation34_spill] sm:$0xff] %v9222_v62  ;;  %v6872_v6 = vpop.eup %6871  ;;  %6885 = vpow2.f32 %v2205_v59  ;;  %2519 = vmatprep.mubr.bf16.mxu0 %v2372_v42  ;;  %v11912_v59 = vld [vmem:[#allocation36_spill] sm:$0xff] }
 0x3de   : > { %v6874_v26 = vpop.eup %6873  ;;  %v2207_v21 = vmul.f32 1.442695, %v2107_v58  ;;  %v2209_v11 = vmul.f32 1.442695, %v2108_v33  ;;  %2520 = vmatmul.mubr.bf16.gmra.mxu0 %v2371_v8  ;;  %v9238_v33 = vpop.f32.mrf.mxu1 }
 0x3df   : > { %v2034_v12 = vpop.xlane.xlu0 %2033  ;;  %v9226_v55 = vadd.f32 %v6874_v26, %v6872_v6 }
 0x3e0   : > { %6887 = vpow2.f32 %v2207_v21  ;;  %v2109_v3 = vsub.f32 %v9038_v60, %v2034_v12  ;;  %v2110_v24 = vsub.f32 %v9040_v46, %v2034_v12 }
 0x3e1   : > { %11908 = vst [vmem:[#allocation33_spill] sm:$0xff] %v9226_v55  ;;  %v6876_v47 = vpop.eup %6875  ;;  %6889 = vpow2.f32 %v2209_v11  ;;  %v11914_v11 = vld [vmem:[#allocation31_spill] sm:$0xff] }
 0x3e2   : > { %v6878_v15 = vpop.eup %6877  ;;  %v2211_v1 = vmul.f32 1.442695, %v2109_v3  ;;  %v2213_v31 = vmul.f32 1.442695, %v2110_v24  ;;  %v2373_v44 = vpack.c.bf16 %v6876_v47, %v6872_v6  ;;  %v11915_v3 = vld [vmem:[#allocation21_spill] sm:$0xff] }
 0x3e3   : > { %v2037_v10 = vpop.xlane.xlu1 %2036  ;;  %v2374_v43 = vpack.c.bf16 %v6878_v15, %v6874_v26  ;;  %v9230_v20 = vadd.f32 %v6878_v15, %v6876_v47  ;;  %v9245_v15 = vld [vmem:[%s7759_s14 + $0x78] sm:$0xff]  }
 0x3e4   : > { %6891 = vpow2.f32 %v2211_v1  ;;  %v2111_v7 = vsub.f32 %v9044_v16, %v2037_v10  ;;  %v2112_v17 = vsub.f32 %v9050_v61, %v2037_v10  ;;  %v9249_v10 = vpop.f32.mrf.mxu1 }
 0x3e5   : > { %11909 = vst [vmem:[#allocation40_spill] sm:$0xff] %v9230_v20  ;;  %v6880_v53 = vpop.eup %6879  ;;  %6893 = vpow2.f32 %v2213_v31  ;;  %2527 = vmatprep.mubr.bf16.mxu0 %v2374_v43 }
 0x3e6   : > { %v6882_v60 = vpop.eup %6881  ;;  %v2215_v46 = vmul.f32 1.442695, %v2111_v7  ;;  %v2217_v63 = vmul.f32 1.442695, %v2112_v17  ;;  %2528 = vmatmul.mubr.bf16.gmra.mxu0 %v2373_v44 }
 0x3e7   : > { %v2040_v57 = vpop.xlane.xlu0 %2039  ;;  %v9234_v56 = vadd.f32 %v6882_v60, %v6880_v53 }
 0x3e8   : > { %6895 = vpow2.f32 %v2215_v46  ;;  %v2113_v14 = vsub.f32 %v11911_v40, %v2040_v57  ;;  %v2114_v8 = vsub.f32 %v11912_v59, %v2040_v57  ;;  %v9257_v40 = vld [vmem:[%s7759_s14 + $0x38] sm:$0xff]   ;;  %v9263_v59 = vld [vmem:[%s7759_s14 + $0x70] sm:$0xff]  }
 0x3e9   : > { %11910 = vst [vmem:[#allocation39_spill] sm:$0xff] %v9234_v56  ;;  %v6884_v48 = vpop.eup %6883  ;;  %6897 = vpow2.f32 %v2217_v63  ;;  %v11918_v63 = vld [vmem:[#allocation38_spill] sm:$0xff] }
 0x3ea   : > { %v6886_v16 = vpop.eup %6885  ;;  %v2219_v61 = vmul.f32 1.442695, %v2113_v14  ;;  %v2221_v42 = vmul.f32 1.442695, %v2114_v8  ;;  %v2375_v58 = vpack.c.bf16 %v6884_v48, %v6880_v53 }
 0x3eb   : > { %v2043_v6 = vpop.xlane.xlu1 %2042  ;;  %v2376_v26 = vpack.c.bf16 %v6886_v16, %v6882_v60  ;;  %v9240_v21 = vadd.f32 %v6886_v16, %v6884_v48  ;;  %v11917_v60 = vld [vmem:[#allocation35_spill] sm:$0xff]  ;;  %v9267_v48 = vpop.f32.mrf.mxu1 }
 0x3ec   : > { %6899 = vpow2.f32 %v2219_v61  ;;  %v2115_v12 = vsub.f32 %v11914_v11, %v2043_v6  ;;  %v2116_v24 = vsub.f32 %v11915_v3, %v2043_v6 }
 0x3ed   : > { %11913 = vst [vmem:[#allocation46_spill] sm:$0xff] %v9240_v21  ;;  %v6888_v47 = vpop.eup %6887  ;;  %6901 = vpow2.f32 %v2221_v42  ;;  %2535 = vmatprep.mubr.bf16.mxu0 %v2376_v26  ;;  %3624 = vrot.lane.b32.xlu1 %v9245_v15, %s7560_s21  ;;  %v9272_v26 = vld [vmem:[%s7759_s14 + $0x30] sm:$0xff]   ;;  %v7467_v21 = vld [vmem:[%s7759_s14 + $0x18] sm:$0xff]  }
 0x3ee   : > { %v6890_v1 = vpop.eup %6889  ;;  %v2223_v31 = vmul.f32 1.442695, %v2115_v12  ;;  %v2225_v44 = vmul.f32 1.442695, %v2116_v24  ;;  %2536 = vmatmul.mubr.bf16.gmra.mxu0 %v2375_v58  ;;  %v9276_v12 = vpop.f32.mrf.mxu1 }
 0x3ef   : > { %v4053_v43 = vpop.permute.xlu1 %4052  ;;  %v9251_v7 = vadd.f32 %v6890_v1, %v6888_v47  ;;  %v2046_v17 = vpop.xlane.xlu0 %2045 }
 0x3f0   : > { %6903 = vpow2.f32 %v2223_v31  ;;  %6331 = vmatprep.mubr.msk.bf16.mxu1 %vm563_vm0, %v4053_v43  ;;  %v2117_v46 = vsub.f32 %v11917_v60, %v2046_v17  ;;  %v2118_v57 = vsub.f32 %v11918_v63, %v2046_v17  ;;  %v11922_v31 = vld [vmem:[#allocation23_spill] sm:$0xff]  ;;  %v9282_v63 = vpop.f32.mrf.mxu1 }
 0x3f1   : > { %11916 = vst [vmem:[#allocation45_spill] sm:$0xff] %v9251_v7  ;;  %v6892_v53 = vpop.eup %6891  ;;  %6905 = vpow2.f32 %v2225_v44  ;;  %3608 = vrot.lane.b32.xlu1 %v9257_v40, %s7560_s21  ;;  %6332 = vmatmul.mubr.msk.bf16.gmra.mxu1 %vm563_vm0, %v4053_v43 }
 0x3f2   : > { %v6894_v14 = vpop.eup %6893  ;;  %3622 = vrot.lane.b32.xlu0 %v9263_v59, %s7560_s21  ;;  %v2377_v8 = vpack.c.bf16 %v6892_v53, %v6888_v47  ;;  %v2227_v16 = vmul.f32 1.442695, %v2117_v46  ;;  %v2229_v61 = vmul.f32 1.442695, %v2118_v57  ;;  %v11921_v47 = vld [vmem:[#allocation37_spill] sm:$0xff] }
 0x3f3   : > { %v2378_v42 = vpack.c.bf16 %v6894_v14, %v6890_v1  ;;  %v9269_v58 = vadd.f32 %v6894_v14, %v6892_v53 }
 0x3f4   : > { %6907 = vpow2.f32 %v2227_v16 }
 0x3f5   : > { %11919 = vst [vmem:[#allocation52_spill] sm:$0xff] %v9269_v58  ;;  %v6896_v6 = vpop.eup %6895  ;;  %2543 = vmatprep.mubr.bf16.mxu0 %v2378_v42  ;;  %3606 = vrot.lane.b32.xlu1 %v9272_v26, %s7560_s21  ;;  %6909 = vpow2.f32 %v2229_v61  ;;  %v9288_v42 = vpop.f32.mrf.mxu1 }
 0x3f6   : > { %v6898_v11 = vpop.eup %6897  ;;  %2544 = vmatmul.mubr.bf16.gmra.mxu0 %v2377_v8 }
 0x3f7   : > { %v2052_v3 = vpop.xlane.xlu0 %2051  ;;  %v9278_v24 = vadd.f32 %v6898_v11, %v6896_v6 }
 0x3f8   : > { %v2121_v1 = vsub.f32 %v11921_v47, %v2052_v3  ;;  %v2122_v44 = vsub.f32 %v11922_v31, %v2052_v3 }
 0x3f9   : > { %11920 = vst [vmem:[#allocation51_spill] sm:$0xff] %v9278_v24  ;;  %v6900_v43 = vpop.eup %6899 }
 0x3fa   : > { %v6902_v17 = vpop.eup %6901  ;;  %v2235_v53 = vmul.f32 1.442695, %v2121_v1  ;;  %v2237_v60 = vmul.f32 1.442695, %v2122_v44  ;;  %v2379_v46 = vpack.c.bf16 %v6900_v43, %v6896_v6 }
 0x3fb   : > { %v2380_v57 = vpack.c.bf16 %v6902_v17, %v6898_v11  ;;  %v4055_v14 = vpop.permute.xlu0 %4054  ;;  %v9284_v16 = vadd.f32 %v6902_v17, %v6900_v43  ;;  %v9292_v11 = vpop.f32.mrf.mxu1 }
 0x3fc   : > { %6911 = vpow2.f32 %v2235_v53  ;;  %6333 = vmatprep.mubr.msk.bf16.mxu1 %vm563_vm0, %v4055_v14 }
 0x3fd   : > { %11923 = vst [vmem:[#allocation80_spill] sm:$0xff] %v9284_v16  ;;  %v6904_v8 = vpop.eup %6903  ;;  %6913 = vpow2.f32 %v2237_v60  ;;  %2551 = vmatprep.mubr.bf16.mxu0 %v2380_v57  ;;  %6334 = vmatmul.mubr.msk.bf16.gmra.mxu1 %vm563_vm0, %v4055_v14  ;;  %v9296_v43 = vpop.f32.mrf.mxu1  ;;  %v3187_v57 = vmax.f32 %v9267_v48, %v9276_v12 }
 0x3fe   : > { %v6906_v61 = vpop.eup %6905  ;;  %2552 = vmatmul.mubr.bf16.gmra.mxu0 %v2379_v46 }
 0x3ff   : > { %v9290_v3 = vadd.f32 %v6906_v61, %v6904_v8  ;;  %v9302_v60 = vpop.f32.mrf.mxu1 }
 0x401   : > { %11924 = vst [vmem:[#allocation60_spill] sm:$0xff] %v9290_v3  ;;  %v6908_v6 = vpop.eup %6907  ;;  %v9310_v14 = vpop.f32.mrf.mxu1 }
 0x402   : > { %v6910_v47 = vpop.eup %6909  ;;  %v2381_v1 = vpack.c.bf16 %v6908_v6, %v6904_v8 }
 0x403   : > { %v2382_v31 = vpack.c.bf16 %v6910_v47, %v6906_v61  ;;  %v9294_v44 = vadd.f32 %v6910_v47, %v6908_v6  ;;  %v9312_v8 = vpop.f32.mrf.mxu1  ;;  %v3184_v61 = vmax.f32 %v9238_v33, %v9249_v10 }
 0x405   : > { %11925 = vst [vmem:[#allocation90_spill] sm:$0xff] %v9294_v44  ;;  %2559 = vmatprep.mubr.bf16.mxu0 %v2382_v31  ;;  %v9316_v6 = vpop.f32.mrf.mxu1 }
 0x406   : > { %2560 = vmatmul.mubr.bf16.gmra.mxu0 %v2381_v1 }
 0x407   : > { %v9318_v47 = vpop.f32.mrf.mxu1 }
 0x408   : > { %11927 = vst [vmem:[#allocation53_spill] sm:$0xff] %v9318_v47 }
 0x409   : > { %v9298_v17 = vpop.eup %6911  ;;  %v9320_v1 = vpop.f32.mrf.mxu1 }
 0x40a   : > { %v9300_v53 = vpop.eup %6913  ;;  %11928 = vst [vmem:[#allocation88_spill] sm:$0xff] %v9320_v1 }
 0x40b   : > { %v9306_v46 = vadd.f32 %v9300_v53, %v9298_v17  ;;  %v9324_v38 = vpop.f32.mrf.mxu1 }
 0x40c   : > { %11931 = vst [vmem:[#allocation95_spill] sm:$0xff] %v9324_v38 }
 0x40d   : > { %11926 = vst [vmem:[#allocation78_spill] sm:$0xff] %v9306_v46  ;;  %v9328_v34 = vpop.f32.mrf.mxu1 }
 0x40e   : > { %11932 = vst [vmem:[#allocation65_spill] sm:$0xff] %v9328_v34 }
 0x411   : > { %3188 = vmax.xlane.f32.xlu0 %v3187_v57 }
 0x419   : > { %3185 = vmax.xlane.f32.xlu1 %v3184_v61 }
 0x420   : > { %v2049_v31 = vpop.xlane.xlu1 %2048 }
 0x421   : > { %v2119_v35 = vsub.f32 %v11929_v45, %v2049_v31  ;;  %v2120_v4 = vsub.f32 %v11930_v25, %v2049_v31  ;;  %v9331_v45 = vld [vmem:[%s7759_s14 + $0x28] sm:$0xff]  }
 0x422   : > { %11933 = vst [vmem:[#allocation105_spill] sm:$0xff] %v9331_v45 }
 0x423   : > { %v2231_v57 = vmul.f32 1.442695, %v2119_v35  ;;  %v2233_v27 = vmul.f32 1.442695, %v2120_v4  ;;  %v9337_v4 = vld [vmem:[%s7759_s14 + $0x68] sm:$0xff]   ;;  %v9347_v35 = vld [vmem:[%s7759_s14 + $0x60] sm:$0xff]  }
 0x424   : > { %v2055_v46 = vpop.xlane.xlu1 %2054  ;;  %11934 = vst [vmem:[#allocation93_spill] sm:$0xff] %v9337_v4  ;;  %11936 = vst [vmem:[#allocation103_spill] sm:$0xff] %v9347_v35 }
 0x425   : > { %6915 = vpow2.f32 %v2231_v57  ;;  %v2123_v9 = vsub.f32 %v9091_v0, %v2055_v46  ;;  %v2124_v61 = vsub.f32 %v9095_v32, %v2055_v46  ;;  %v9342_v32 = vpop.f32.mrf.mxu1 }
 0x426   : > { %6917 = vpow2.f32 %v2233_v27  ;;  %11935 = vst [vmem:[#allocation58_spill] sm:$0xff] %v9342_v32 }
 0x427   : > { %v2239_v3 = vmul.f32 1.442695, %v2123_v9  ;;  %v2241_v44 = vmul.f32 1.442695, %v2124_v61  ;;  %3604 = vrot.lane.b32.xlu0 %v9331_v45, %s7560_s21 }
 0x428   : > { %v4057_v25 = vpop.permute.xlu1 %4056 }
 0x429   : > { %6919 = vpow2.f32 %v2239_v3  ;;  %6335 = vmatprep.mubr.msk.bf16.mxu1 %vm563_vm0, %v4057_v25  ;;  %v9351_v3 = vpop.f32.mrf.mxu1 }
 0x42a   : > { %6921 = vpow2.f32 %v2241_v44  ;;  %3620 = vrot.lane.b32.xlu1 %v9337_v4, %s7560_s21  ;;  %6336 = vmatmul.mubr.msk.bf16.gmra.mxu1 %vm563_vm0, %v4057_v25  ;;  %11937 = vst [vmem:[#allocation110_spill] sm:$0xff] %v9351_v3 }
 0x42c   : > { %v2058_v0 = vpop.xlane.xlu0 %2057 }
 0x42d   : > { %v2125_v9 = vsub.f32 %v9099_v19, %v2058_v0  ;;  %v2126_v27 = vsub.f32 %v9101_v2, %v2058_v0  ;;  %v9356_v19 = vld [vmem:[%s7759_s14 + $0x20] sm:$0xff]   ;;  %v9360_v0 = vpop.f32.mrf.mxu1 }
 0x42e   : > { %3618 = vrot.lane.b32.xlu1 %v9347_v35, %s7560_s21  ;;  %11938 = vst [vmem:[#allocation70_spill] sm:$0xff] %v9356_v19 }
 0x42f   : > { %v2243_v44 = vmul.f32 1.442695, %v2125_v9  ;;  %v2245_v46 = vmul.f32 1.442695, %v2126_v27 }
 0x430   : > { %v2064_v31 = vpop.xlane.xlu0 %2063 }
 0x431   : > { %6923 = vpow2.f32 %v2243_v44  ;;  %v2129_v57 = vsub.f32 %v9113_v23, %v2064_v31  ;;  %v2130_v61 = vsub.f32 %v9115_v22, %v2064_v31  ;;  %v9368_v31 = vpop.f32.mrf.mxu1 }
 0x432   : > { %v6916_v25 = vpop.eup %6915  ;;  %6925 = vpow2.f32 %v2245_v46  ;;  %3602 = vrot.lane.b32.xlu1 %v9356_v19, %s7560_s21 }
 0x433   : > { %v6918_v2 = vpop.eup %6917  ;;  %v2251_v24 = vmul.f32 1.442695, %v2129_v57  ;;  %v2253_v16 = vmul.f32 1.442695, %v2130_v61  ;;  %v2383_v9 = vpack.c.bf16 %v9298_v17, %v6916_v25  ;;  %v9372_v17 = vpop.f32.mrf.mxu1 }
 0x434   : > { %v2384_v27 = vpack.c.bf16 %v9300_v53, %v6918_v2  ;;  %v4059_v44 = vpop.permute.xlu0 %4058  ;;  %v9364_v23 = vadd.f32 %v6918_v2, %v6916_v25 }
 0x435   : > { %6927 = vpow2.f32 %v2251_v24  ;;  %6337 = vmatprep.mubr.msk.bf16.mxu1 %vm563_vm0, %v4059_v44  ;;  %v9374_v25 = vpop.f32.mrf.mxu1 }
 0x436   : > { %11939 = vst [vmem:[#allocation120_spill] sm:$0xff] %v9364_v23  ;;  %v6920_v22 = vpop.eup %6919  ;;  %6929 = vpow2.f32 %v2253_v16  ;;  %2567 = vmatprep.mubr.bf16.mxu0 %v2384_v27  ;;  %6338 = vmatmul.mubr.msk.bf16.gmra.mxu1 %vm563_vm0, %v4059_v44 }
 0x437   : > { %v6922_v46 = vpop.eup %6921  ;;  %2568 = vmatmul.mubr.bf16.gmra.mxu0 %v2383_v9  ;;  %v9382_v44 = vpop.f32.mrf.mxu1  ;;  %v3193_v9 = vmax.f32 %v9292_v11, %v9296_v43 }
 0x438   : > { %v9370_v57 = vadd.f32 %v6922_v46, %v6920_v22 }
 0x43a   : > { %11940 = vst [vmem:[#allocation108_spill] sm:$0xff] %v9370_v57 }
 0x43e   : > { %v6924_v53 = vpop.eup %6923 }
 0x43f   : > { %v6926_v61 = vpop.eup %6925  ;;  %v2385_v24 = vpack.c.bf16 %v6924_v53, %v6920_v22  ;;  %v9390_v22 = vpop.f32.mrf.mxu1 }
 0x440   : > { %v2386_v2 = vpack.c.bf16 %v6926_v61, %v6922_v46  ;;  %v9376_v23 = vadd.f32 %v6926_v61, %v6924_v53 }
 0x441   : > { %v9392_v46 = vpop.f32.mrf.mxu1 }
 0x442   : > { %11941 = vst [vmem:[#allocation63_spill] sm:$0xff] %v9376_v23  ;;  %v9378_v16 = vpop.eup %6927  ;;  %2575 = vmatprep.mubr.bf16.mxu0 %v2386_v2 }
 0x443   : > { %v9380_v27 = vpop.eup %6929  ;;  %2576 = vmatmul.mubr.bf16.gmra.mxu0 %v2385_v24  ;;  %v9394_v53 = vpop.f32.mrf.mxu1  ;;  %v3190_v24 = vmax.f32 %v9282_v63, %v9288_v42 }
 0x444   : > { %v9388_v57 = vadd.f32 %v9380_v27, %v9378_v16  ;;  %11943 = vst [vmem:[#allocation122_spill] sm:$0xff] %v9394_v53 }
 0x445   : > { %v9396_v61 = vpop.f32.mrf.mxu1 }
 0x446   : > { %11942 = vst [vmem:[#allocation118_spill] sm:$0xff] %v9388_v57  ;;  %3194 = vmax.xlane.f32.xlu0 %v3193_v9 }
 0x447   : > { %v9400_v2 = vpop.f32.mrf.mxu1 }
 0x449   : > { %v9404_v9 = vpop.f32.mrf.mxu1 }
 0x44b   : > { %v9410_v51 = vpop.f32.mrf.mxu1 }
 0x456   : > { %3191 = vmax.xlane.f32.xlu1 %v3190_v24 }
 0x459   : > { %v2061_v23 = vpop.xlane.xlu1 %2060 }
 0x45a   : > { %v2127_v7 = vsub.f32 %v9105_v49, %v2061_v23  ;;  %v2128_v57 = vsub.f32 %v9109_v37, %v2061_v23  ;;  %v9414_v23 = vpop.f32.mrf.mxu1 }
 0x45c   : > { %v2247_v58 = vmul.f32 1.442695, %v2127_v7  ;;  %v2249_v56 = vmul.f32 1.442695, %v2128_v57  ;;  %3600 = vrot.lane.b32.xlu0 %v7467_v21, %s7560_s21 }
 0x45d   : > { %v2067_v55 = vpop.xlane.xlu1 %2066 }
 0x45e   : > { %6931 = vpow2.f32 %v2247_v58  ;;  %v2131_v20 = vsub.f32 %v9119_v5, %v2067_v55  ;;  %v2132_v24 = vsub.f32 %v9125_v39, %v2067_v55 }
 0x45f   : > { %6933 = vpow2.f32 %v2249_v56 }
 0x460   : > { %v2255_v62 = vmul.f32 1.442695, %v2131_v20  ;;  %v2257_v49 = vmul.f32 1.442695, %v2132_v24 }
 0x461   : > { %v3180_v50 = vpop.xlane.xlu1 %3179 }
 0x462   : > { %6935 = vpow2.f32 %v2255_v62  ;;  %v3274_v37 = vsub.f32 %v9188_v36, %v3180_v50  ;;  %v3275_v7 = vsub.f32 %v9196_v18, %v3180_v50  ;;  %v9419_v62 = vpop.f32.mrf.mxu1  ;;  %v9423_v18 = vld [vmem:[%s7759_s14 + $0x58] sm:$0xff]  }
 0x463   : > { %6937 = vpow2.f32 %v2257_v49  ;;  %11944 = vst [vmem:[#allocation75_spill] sm:$0xff] %v9423_v18 }
 0x464   : > { %v3338_v21 = vmul.f32 1.442695, %v3274_v37  ;;  %v3340_v58 = vmul.f32 1.442695, %v3275_v7  ;;  %v7469_v37 = vld [vmem:[%s7759_s14 + $0x50] sm:$0xff]  }
 0x465   : > { %v3183_v5 = vpop.xlane.xlu1 %3182  ;;  %v2070_v57 = vpop.xlane.xlu0 %2069 }
 0x466   : > { %6939 = vpow2.f32 %v3338_v21  ;;  %v3276_v39 = vsub.f32 %v9204_v29, %v3183_v5  ;;  %v3277_v55 = vsub.f32 %v9212_v28, %v3183_v5  ;;  %v2133_v20 = vsub.f32 %v9133_v54, %v2070_v57  ;;  %v9427_v54 = vpop.f32.mrf.mxu1 }
 0x467   : > { %6941 = vpow2.f32 %v3340_v58  ;;  %v2134_v36 = vsub.f32 %v9137_v52, %v2070_v57  ;;  %3616 = vrot.lane.b32.xlu1 %v9423_v18, %s7560_s21 }
 0x468   : > { %v3342_v50 = vmul.f32 1.442695, %v3276_v39  ;;  %v3344_v56 = vmul.f32 1.442695, %v3277_v55  ;;  %v2259_v24 = vmul.f32 1.442695, %v2133_v20  ;;  %v9435_v20 = vpop.f32.mrf.mxu1 }
 0x469   : > { %v2261_v49 = vmul.f32 1.442695, %v2134_v36  ;;  %v3625_v29 = vpop.permute.xlu1 %3624  ;;  %v3623_v5 = vpop.permute.xlu0 %3622  ;;  %11946 = vst [vmem:[#allocation68_spill] sm:$0xff] %v9435_v20  ;;  %v9438_v36 = vld [vmem:[%s7759_s14 + $0x10] sm:$0xff]  }
 0x46a   : > { %6943 = vpow2.f32 %v3342_v50  ;;  %6179 = vmatprep.subr.bf16.mxu0 %v3625_v29  ;;  %11947 = vst [vmem:[#allocation85_spill] sm:$0xff] %v9438_v36 }
 0x46b   : > { %v6932_v28 = vpop.eup %6931  ;;  %6945 = vpow2.f32 %v3344_v56  ;;  %3614 = vrot.lane.b32.xlu1 %v7469_v37, %s7560_s21 }
 0x46c   : > { %v6934_v52 = vpop.eup %6933  ;;  %6947 = vpow2.f32 %v2259_v24  ;;  %v2387_v7 = vpack.c.bf16 %v9378_v16, %v6932_v28 }
 0x46d   : > { %6949 = vpow2.f32 %v2261_v49  ;;  %v3609_v21 = vpop.permute.xlu1 %3608  ;;  %v2388_v58 = vpack.c.bf16 %v9380_v27, %v6934_v52  ;;  %v9433_v57 = vadd.f32 %v6934_v52, %v6932_v28  ;;  %v9450_v28 = vpop.f32.mrf.mxu1 }
 0x46e   : > { %v6035_v39 = vpop.f32.mrf.mxu0  ;;  %6180 = vmatpush3.bf16.msra.mxu0 %v3609_v21  ;;  %11951 = vst [vmem:[#allocation115_spill] sm:$0xff] %v9450_v28 }
 0x46f   : > { %11945 = vst [vmem:[#allocation121_spill] sm:$0xff] %v9433_v57  ;;  %v6936_v55 = vpop.eup %6935  ;;  %2583 = vmatprep.mubr.bf16.mxu0 %v2388_v58  ;;  %3598 = vrot.lane.b32.xlu1 %v9438_v36, %s7560_s21 }
 0x470   : > { %v6938_v50 = vpop.eup %6937  ;;  %v6036_v16 = vpop.f32.mrf.mxu0  ;;  %2584 = vmatmul.mubr.bf16.gmra.mxu0 %v2387_v7  ;;  %6181 = vmatprep.subr.bf16.mxu0 %v3623_v5 }
 0x471   : > { %v9442_v56 = vadd.f32 %v6036_v16, %v6035_v39  ;;  %v3607_v27 = vpop.permute.xlu1 %3606  ;;  %v9444_v24 = vadd.f32 %v6938_v50, %v6936_v55  ;;  %v9459_v5 = vpop.f32.mrf.mxu1 }
 0x472   : > { %v9446_v49 = vpop.f32.mrf.mxu0  ;;  %6182 = vmatpush3.bf16.msra.mxu0 %v3607_v27  ;;  %11954 = vst [vmem:[#allocation123_spill] sm:$0xff] %v9459_v5  ;;  %v3199_v27 = vmax.f32 %v9312_v8, %v9316_v6 }
 0x473   : > { %11948 = vst [vmem:[#allocation83_spill] sm:$0xff] %v9442_v56  ;;  %11949 = vst [vmem:[#allocation100_spill] sm:$0xff] %v9444_v24  ;;  %v9448_v29 = vpop.eup %6939  ;;  %v9470_v41 = vpop.f32.mrf.mxu1 }
 0x474   : > { %11950 = vst [vmem:[#allocation98_spill] sm:$0xff] %v9446_v49  ;;  %v6942_v37 = vpop.eup %6941  ;;  %v9452_v52 = vpop.f32.mrf.mxu0 }
 0x475   : > { %11952 = vst [vmem:[#allocation113_spill] sm:$0xff] %v9452_v52  ;;  %v9455_v21 = vadd.f32 %v6942_v37, %v9448_v29 }
 0x476   : > { %v6041_v7 = vpop.f32.mrf.mxu0 }
 0x477   : > { %11953 = vst [vmem:[#allocation124_spill] sm:$0xff] %v9455_v21  ;;  %v9457_v58 = vpop.eup %6943 }
 0x478   : > { %v6946_v39 = vpop.eup %6945  ;;  %v6042_v16 = vpop.f32.mrf.mxu0 }
 0x479   : > { %v6948_v56 = vpop.eup %6947  ;;  %v9463_v49 = vadd.f32 %v6042_v16, %v6041_v7  ;;  %v9466_v24 = vadd.f32 %v6946_v39, %v9457_v58  ;;  %v3563_v18 = vpack.c.bf16 %v6946_v39, %v6942_v37  ;;  %v9476_v16 = vpop.f32.mrf.mxu1 }
 0x47a   : > { %v6950_v52 = vpop.eup %6949  ;;  %v9468_v57 = vpop.f32.mrf.mxu0  ;;  %v2389_v21 = vpack.c.bf16 %v6948_v56, %v6936_v55 }
 0x47b   : > { %11955 = vst [vmem:[#allocation24_spill] sm:$0xff] %v9463_v49  ;;  %11956 = vst [vmem:[#allocation36_spill] sm:$0xff] %v9466_v24  ;;  %v2390_v30 = vpack.c.bf16 %v6950_v52, %v6938_v50  ;;  %3200 = vmax.xlane.f32.xlu0 %v3199_v27  ;;  %v9472_v13 = vadd.f32 %v6950_v52, %v6948_v56 }
 0x47c   : > { %11957 = vst [vmem:[#allocation31_spill] sm:$0xff] %v9468_v57  ;;  %v9474_v36 = vpop.f32.mrf.mxu0  ;;  %v9482_v57 = vpop.f32.mrf.mxu1 }
 0x47d   : > { %11958 = vst [vmem:[#allocation21_spill] sm:$0xff] %v9472_v13  ;;  %11959 = vst [vmem:[#allocation35_spill] sm:$0xff] %v9474_v36  ;;  %2591 = vmatprep.mubr.bf16.mxu0 %v2390_v30 }
 0x47e   : > { %2592 = vmatmul.mubr.bf16.gmra.mxu0 %v2389_v21  ;;  %v6047_v7 = vpop.f32.mrf.mxu0  ;;  %v9486_v52 = vpop.f32.mrf.mxu1 }
 0x47f   : > { %3674 = vmatprep.mubr.bf16.mxu0 %v3563_v18 }
 0x480   : > { %v6048_v49 = vpop.f32.mrf.mxu0  ;;  %v9492_v18 = vpop.f32.mrf.mxu1 }
 0x481   : > { %v9478_v24 = vadd.f32 %v6048_v49, %v6047_v7 }
 0x482   : > { %v9480_v55 = vpop.f32.mrf.mxu0  ;;  %v9496_v27 = vpop.f32.mrf.mxu1 }
 0x483   : > { %11960 = vst [vmem:[#allocation38_spill] sm:$0xff] %v9478_v24  ;;  %11961 = vst [vmem:[#allocation37_spill] sm:$0xff] %v9480_v55  ;;  %v7471_v24 = vld [vmem:[%s7759_s14 + $0x48] sm:$0xff]  }
 0x484   : > { %v9484_v50 = vpop.f32.mrf.mxu0 }
 0x485   : > { %11962 = vst [vmem:[#allocation23_spill] sm:$0xff] %v9484_v50  ;;  %v3196_v50 = vmax.f32 %v9302_v60, %v9310_v14 }
 0x486   : > { %v6053_v56 = vpop.f32.mrf.mxu0 }
 0x488   : > { %v6054_v30 = vpop.f32.mrf.mxu0 }
 0x489   : > { %v9488_v37 = vadd.f32 %v6054_v30, %v6053_v56  ;;  %v9506_v30 = vpop.f32.mrf.mxu1 }
 0x48a   : > { %v9490_v21 = vpop.f32.mrf.mxu0 }
 0x48b   : > { %11963 = vst [vmem:[#allocation26_spill] sm:$0xff] %v9488_v37  ;;  %11964 = vst [vmem:[#allocation42_spill] sm:$0xff] %v9490_v21  ;;  %v9512_v36 = vpop.f32.mrf.mxu1 }
 0x48c   : > { %v9494_v49 = vpop.f32.mrf.mxu0 }
 0x48d   : > { %11965 = vst [vmem:[#allocation133_spill] sm:$0xff] %v9494_v49  ;;  %v7472_v49 = vld [vmem:[%s7759_s14] sm:$0xff]  }
 0x48e   : > { %v6059_v39 = vpop.f32.mrf.mxu0 }
 0x490   : > { %v6060_v7 = vpop.f32.mrf.mxu0 }
 0x491   : > { %v9500_v55 = vadd.f32 %v6060_v7, %v6059_v39  ;;  %3612 = vrot.lane.b32.xlu0 %v7471_v24, %s7560_s21  ;;  %v9518_v24 = vpop.f32.mrf.mxu1 }
 0x492   : > { %v9504_v56 = vpop.f32.mrf.mxu0 }
 0x493   : > { %11966 = vst [vmem:[#allocation134_spill] sm:$0xff] %v9500_v55  ;;  %11967 = vst [vmem:[#allocation135_spill] sm:$0xff] %v9504_v56  ;;  %3197 = vmax.xlane.f32.xlu1 %v3196_v50  ;;  %v9524_v19 = vpop.f32.mrf.mxu1 }
 0x494   : > { %v9508_v21 = vpop.f32.mrf.mxu0 }
 0x495   : > { %11968 = vst [vmem:[#allocation136_spill] sm:$0xff] %v9508_v21  ;;  %3594 = vrot.lane.b32.xlu0 %v7472_v49, %s7560_s21  ;;  %v9530_v4 = vpop.f32.mrf.mxu1 }
 0x496   : > { %v6065_v37 = vpop.f32.mrf.mxu0 }
 0x498   : > { %v6066_v13 = vpop.f32.mrf.mxu0 }
 0x499   : > { %v9514_v35 = vadd.f32 %v6066_v13, %v6065_v37 }
 0x49a   : > { %v9516_v39 = vpop.f32.mrf.mxu0  ;;  %v3189_v7 = vpop.xlane.xlu0 %3188 }
 0x49b   : > { %11969 = vst [vmem:[#allocation137_spill] sm:$0xff] %v9514_v35  ;;  %11970 = vst [vmem:[#allocation138_spill] sm:$0xff] %v9516_v39  ;;  %v3280_v55 = vsub.f32 %v9267_v48, %v3189_v7  ;;  %v3281_v50 = vsub.f32 %v9276_v12, %v3189_v7  ;;  %v7473_v7 = vld [vmem:[%s7759_s14 + $0x8] sm:$0xff]  }
 0x49c   : > { %v9522_v21 = vpop.f32.mrf.mxu0 }
 0x49d   : > { %11971 = vst [vmem:[#allocation139_spill] sm:$0xff] %v9522_v21  ;;  %v3350_v56 = vmul.f32 1.442695, %v3280_v55  ;;  %v3352_v49 = vmul.f32 1.442695, %v3281_v50  ;;  %v9538_v21 = vpop.f32.mrf.mxu1 }
 0x49e   : > { %v6071_v45 = vpop.f32.mrf.mxu0 }
 0x49f   : > { %6951 = vpow2.f32 %v3350_v56 }
 0x4a0   : > { %6953 = vpow2.f32 %v3352_v49  ;;  %v6072_v13 = vpop.f32.mrf.mxu0  ;;  %v3605_v49 = vpop.permute.xlu0 %3604 }
 0x4a1   : > { %v9526_v37 = vadd.f32 %v6072_v13, %v6071_v45 }
 0x4a2   : > { %v9528_v39 = vpop.f32.mrf.mxu0  ;;  %v3186_v35 = vpop.xlane.xlu1 %3185 }
 0x4a3   : > { %11972 = vst [vmem:[#allocation140_spill] sm:$0xff] %v9526_v37  ;;  %11973 = vst [vmem:[#allocation141_spill] sm:$0xff] %v9528_v39  ;;  %v3278_v48 = vsub.f32 %v9238_v33, %v3186_v35  ;;  %v3279_v12 = vsub.f32 %v9249_v10, %v3186_v35  ;;  %v7474_v39 = vld [vmem:[%s7759_s14 + $0x40] sm:$0xff]  }
 0x4a4   : > { %v9534_v55 = vpop.f32.mrf.mxu0  ;;  %3596 = vrot.lane.b32.xlu1 %v7473_v7, %s7560_s21 }
 0x4a5   : > { %11974 = vst [vmem:[#allocation142_spill] sm:$0xff] %v9534_v55  ;;  %v3346_v56 = vmul.f32 1.442695, %v3278_v48  ;;  %v3348_v50 = vmul.f32 1.442695, %v3279_v12  ;;  %v9546_v48 = vpop.f32.mrf.mxu1 }
 0x4a6   : > { %v6077_v45 = vpop.f32.mrf.mxu0  ;;  %v3621_v13 = vpop.permute.xlu1 %3620 }
 0x4a7   : > { %6955 = vpow2.f32 %v3346_v56  ;;  %6183 = vmatprep.subr.bf16.mxu0 %v3621_v13 }
 0x4a8   : > { %6957 = vpow2.f32 %v3348_v50  ;;  %v6078_v37 = vpop.f32.mrf.mxu0  ;;  %3610 = vrot.lane.b32.xlu1 %v7474_v39, %s7560_s21  ;;  %6184 = vmatpush3.bf16.msra.mxu0 %v3605_v49 }
 0x4a9   : > { %v9542_v33 = vadd.f32 %v6078_v37, %v6077_v45  ;;  %v9558_v37 = vpop.f32.mrf.mxu1 }
 0x4aa   : > { %v9544_v10 = vpop.f32.mrf.mxu0  ;;  %v3619_v35 = vpop.permute.xlu1 %3618 }
 0x4ab   : > { %11975 = vst [vmem:[#allocation143_spill] sm:$0xff] %v9542_v33  ;;  %11976 = vst [vmem:[#allocation144_spill] sm:$0xff] %v9544_v10  ;;  %6185 = vmatprep.subr.bf16.mxu0 %v3619_v35  ;;  %v3205_v35 = vmax.f32 %v9324_v38, %v9328_v34 }
 0x4ac   : > { %v9548_v12 = vpop.eup %6951  ;;  %v9550_v7 = vpop.f32.mrf.mxu0 }
 0x4ad   : > { %11977 = vst [vmem:[#allocation145_spill] sm:$0xff] %v9548_v12  ;;  %11978 = vst [vmem:[#allocation146_spill] sm:$0xff] %v9550_v7  ;;  %v9552_v56 = vpop.eup %6953  ;;  %v9566_v7 = vpop.f32.mrf.mxu1 }
 0x4ae   : > { %v6083_v50 = vpop.f32.mrf.mxu0  ;;  %v3603_v13 = vpop.permute.xlu1 %3602  ;;  %v9556_v39 = vadd.f32 %v9552_v56, %v9548_v12 }
 0x4af   : > { %6186 = vmatpush3.bf16.msra.mxu0 %v3603_v13  ;;  %v3208_v13 = vmax.f32 %v9342_v32, %v9351_v3  ;;  %v3220_v3 = vmax.f32 %v9392_v46, %v9394_v53 }
 0x4b0   : > { %11979 = vst [vmem:[#allocation147_spill] sm:$0xff] %v9556_v39  ;;  %v6084_v49 = vpop.f32.mrf.mxu0 }
 0x4b1   : > { %v9560_v45 = vadd.f32 %v6084_v49, %v6083_v50  ;;  %v9580_v49 = vpop.f32.mrf.mxu1 }
 0x4b2   : > { %v9564_v10 = vpop.f32.mrf.mxu0 }
 0x4b3   : > { %11980 = vst [vmem:[#allocation148_spill] sm:$0xff] %v9560_v45  ;;  %11981 = vst [vmem:[#allocation149_spill] sm:$0xff] %v9564_v10  ;;  %v9588_v34 = vpop.f32.mrf.mxu1 }
 0x4b4   : > { %v9568_v33 = vpop.eup %6955  ;;  %v9570_v55 = vpop.f32.mrf.mxu0  ;;  %3206 = vmax.xlane.f32.xlu0 %v3205_v35 }
 0x4b5   : > { %11982 = vst [vmem:[#allocation150_spill] sm:$0xff] %v9568_v33  ;;  %11983 = vst [vmem:[#allocation151_spill] sm:$0xff] %v9570_v55  ;;  %v9572_v12 = vpop.eup %6957  ;;  %v3214_v55 = vmax.f32 %v9372_v17, %v9374_v25  ;;  %v9594_v32 = vpop.f32.mrf.mxu1 }
 0x4b6   : > { %v6089_v39 = vpop.f32.mrf.mxu0  ;;  %v9578_v50 = vadd.f32 %v9572_v12, %v9568_v33  ;;  %11988 = vst [vmem:[#allocation156_spill] sm:$0xff] %v9594_v32 }
 0x4b8   : > { %11984 = vst [vmem:[#allocation152_spill] sm:$0xff] %v9578_v50  ;;  %v6090_v45 = vpop.f32.mrf.mxu0  ;;  %3209 = vmax.xlane.f32.xlu0 %v3208_v13 }
 0x4b9   : > { %v9582_v10 = vadd.f32 %v6090_v45, %v6089_v39  ;;  %v3226_v45 = vmax.f32 %v9404_v9, %v9410_v51 }
 0x4ba   : > { %v9586_v35 = vpop.f32.mrf.mxu0 }
 0x4bb   : > { %11985 = vst [vmem:[#allocation153_spill] sm:$0xff] %v9582_v10  ;;  %11986 = vst [vmem:[#allocation154_spill] sm:$0xff] %v9586_v35  ;;  %v9602_v35 = vpop.f32.mrf.mxu1 }
 0x4bc   : > { %v9590_v38 = vpop.f32.mrf.mxu0  ;;  %3215 = vmax.xlane.f32.xlu0 %v3214_v55  ;;  %v3232_v55 = vmax.f32 %v9427_v54, %v9435_v20 }
 0x4bd   : > { %11987 = vst [vmem:[#allocation155_spill] sm:$0xff] %v9590_v38  ;;  %v9608_v38 = vpop.f32.mrf.mxu1 }
 0x4be   : > { %v6095_v50 = vpop.f32.mrf.mxu0 }
 0x4c0   : > { %v6096_v33 = vpop.f32.mrf.mxu0  ;;  %3221 = vmax.xlane.f32.xlu0 %v3220_v3 }
 0x4c1   : > { %v9596_v39 = vadd.f32 %v6096_v33, %v6095_v50  ;;  %v3202_v33 = vmax.f32 %v9318_v47, %v9320_v1  ;;  %v3238_v50 = vmax.f32 %v9470_v41, %v9476_v16 }
 0x4c2   : > { %v9600_v13 = vpop.f32.mrf.mxu0 }
 0x4c3   : > { %11989 = vst [vmem:[#allocation157_spill] sm:$0xff] %v9596_v39  ;;  %11990 = vst [vmem:[#allocation158_spill] sm:$0xff] %v9600_v13  ;;  %v9616_v39 = vpop.f32.mrf.mxu1 }
 0x4c4   : > { %v9604_v10 = vpop.f32.mrf.mxu0  ;;  %3227 = vmax.xlane.f32.xlu0 %v3226_v45  ;;  %11993 = vst [vmem:[#allocation161_spill] sm:$0xff] %v9616_v39  ;;  %v3211_v45 = vmax.f32 %v9360_v0, %v9368_v31 }
 0x4c5   : > { %11991 = vst [vmem:[#allocation159_spill] sm:$0xff] %v9604_v10  ;;  %v3244_v10 = vmax.f32 %v9492_v18, %v9496_v27 }
 0x4c6   : > { %v6101_v53 = vpop.f32.mrf.mxu0 }
 0x4c8   : > { %3233 = vmax.xlane.f32.xlu0 %v3232_v55  ;;  %v6102_v3 = vpop.f32.mrf.mxu0  ;;  %v9622_v55 = vpop.f32.mrf.mxu1 }
 0x4c9   : > { %v9614_v13 = vadd.f32 %v6102_v3, %v6101_v53  ;;  %11994 = vst [vmem:[#allocation162_spill] sm:$0xff] %v9622_v55  ;;  %v3217_v53 = vmax.f32 %v9382_v44, %v9390_v22  ;;  %v3250_v3 = vmax.f32 %v9518_v24, %v9524_v19 }
 0x4cb   : > { %11992 = vst [vmem:[#allocation160_spill] sm:$0xff] %v9614_v13  ;;  %v9630_v13 = vpop.f32.mrf.mxu1 }
 0x4cc   : > { %3203 = vmax.xlane.f32.xlu1 %v3202_v33  ;;  %3239 = vmax.xlane.f32.xlu0 %v3238_v50 }
 0x4cf   : > { %v3195_v20 = vpop.xlane.xlu0 %3194 }
 0x4d0   : > { %v3284_v1 = vsub.f32 %v9292_v11, %v3195_v20  ;;  %v3285_v47 = vsub.f32 %v9296_v43, %v3195_v20  ;;  %3212 = vmax.xlane.f32.xlu1 %v3211_v45  ;;  %3245 = vmax.xlane.f32.xlu0 %v3244_v10  ;;  %v3223_v11 = vmax.f32 %v9396_v61, %v9400_v2  ;;  %v9636_v20 = vpop.f32.mrf.mxu1 }
 0x4d1   : > { %v3256_v43 = vmax.f32 %v9546_v48, %v9558_v37  ;;  %11995 = vst [vmem:[#allocation163_spill] sm:$0xff] %v9636_v20  ;;  %v3235_v45 = vmax.f32 %v9450_v28, %v9459_v5 }
 0x4d2   : > { %v3358_v33 = vmul.f32 1.442695, %v3284_v1  ;;  %v3360_v50 = vmul.f32 1.442695, %v3285_v47  ;;  %v3229_v1 = vmax.f32 %v9414_v23, %v9419_v62  ;;  %v3262_v47 = vmax.f32 %v9588_v34, %v9594_v32  ;;  %v9642_v10 = vpop.f32.mrf.mxu1 }
 0x4d3   : > { %v3601_v28 = vpop.permute.xlu0 %3600 }
 0x4d4   : > { %6959 = vpow2.f32 %v3358_v33  ;;  %3218 = vmax.xlane.f32.xlu1 %v3217_v53  ;;  %3251 = vmax.xlane.f32.xlu0 %v3250_v3  ;;  %v3268_v53 = vmax.f32 %v9616_v39, %v9622_v55  ;;  %v9648_v3 = vpop.f32.mrf.mxu1 }
 0x4d5   : > { %6961 = vpow2.f32 %v3360_v50 }
 0x4d8   : > { %3224 = vmax.xlane.f32.xlu1 %v3223_v11  ;;  %3257 = vmax.xlane.f32.xlu0 %v3256_v43 }
 0x4dc   : > { %3230 = vmax.xlane.f32.xlu1 %v3229_v1  ;;  %3263 = vmax.xlane.f32.xlu0 %v3262_v47  ;;  %v3241_v1 = vmax.f32 %v9482_v57, %v9486_v52  ;;  %v4381_v47 = vmax.f32 %v9642_v10, %v9648_v3 }
 0x4df   : > { %v3192_v33 = vpop.xlane.xlu1 %3191 }
 0x4e0   : > { %v3282_v50 = vsub.f32 %v9282_v63, %v3192_v33  ;;  %v3283_v11 = vsub.f32 %v9288_v42, %v3192_v33  ;;  %3236 = vmax.xlane.f32.xlu1 %v3235_v45  ;;  %3269 = vmax.xlane.f32.xlu0 %v3268_v53  ;;  %v3247_v42 = vmax.f32 %v9506_v30, %v9512_v36 }
 0x4e1   : > { %v9652_v43 = vpop.eup %6959  ;;  %v3253_v53 = vmax.f32 %v9530_v4, %v9538_v21 }
 0x4e2   : > { %v9654_v32 = vpop.eup %6961  ;;  %v3354_v55 = vmul.f32 1.442695, %v3282_v50  ;;  %v3356_v39 = vmul.f32 1.442695, %v3283_v11  ;;  %v9678_v11 = vpop.f32.mrf.mxu1 }
 0x4e3   : > { %v3617_v5 = vpop.permute.xlu1 %3616  ;;  %v9662_v63 = vadd.f32 %v9654_v32, %v9652_v43 }
 0x4e4   : > { %6963 = vpow2.f32 %v3354_v55  ;;  %3242 = vmax.xlane.f32.xlu1 %v3241_v1  ;;  %4382 = vmax.xlane.f32.xlu0 %v4381_v47  ;;  %v3259_v55 = vmax.f32 %v9566_v7, %v9580_v49 }
 0x4e5   : > { %11996 = vst [vmem:[#allocation164_spill] sm:$0xff] %v9662_v63  ;;  %6965 = vpow2.f32 %v3356_v39  ;;  %6187 = vmatprep.subr.bf16.mxu0 %v3617_v5  ;;  %v9672_v5 = vpop.f32.mrf.mxu0 }
 0x4e6   : > { %6188 = vmatpush3.bf16.msra.mxu0 %v3601_v28  ;;  %11997 = vst [vmem:[#allocation165_spill] sm:$0xff] %v9672_v5  ;;  %v3265_v28 = vmax.f32 %v9602_v35, %v9608_v38 }
 0x4e7   : > { %v3615_v45 = vpop.permute.xlu1 %3614  ;;  %v9684_v47 = vpop.f32.mrf.mxu0 }
 0x4e8   : > { %3248 = vmax.xlane.f32.xlu1 %v3247_v42  ;;  %6189 = vmatprep.subr.bf16.mxu0 %v3615_v45  ;;  %11999 = vst [vmem:[#allocation167_spill] sm:$0xff] %v9684_v47  ;;  %v3271_v42 = vmax.f32 %v9630_v13, %v9636_v20  ;;  %v9688_v45 = vpop.f32.mrf.mxu1 }
 0x4e9   : > { %12000 = vst [vmem:[#allocation168_spill] sm:$0xff] %v9688_v45 }
 0x4eb   : > { %v3599_v33 = vpop.permute.xlu1 %3598 }
 0x4ec   : > { %3254 = vmax.xlane.f32.xlu1 %v3253_v53  ;;  %6190 = vmatpush3.bf16.msra.mxu0 %v3599_v33 }
 0x4f0   : > { %3260 = vmax.xlane.f32.xlu1 %v3259_v55  ;;  %v4384_v55 = vmax.f32 %v9678_v11, %v9688_v45 }
 0x4f1   : > { %v9670_v50 = vpop.eup %6963 }
 0x4f2   : > { %v9674_v39 = vpop.eup %6965 }
 0x4f3   : > { %v9682_v1 = vadd.f32 %v9674_v39, %v9670_v50 }
 0x4f4   : > { %3266 = vmax.xlane.f32.xlu1 %v3265_v28 }
 0x4f5   : > { %11998 = vst [vmem:[#allocation166_spill] sm:$0xff] %v9682_v1 }
 0x4f7   : > { %v6107_v53 = vpop.f32.mrf.mxu0 }
 0x4f8   : > { %3272 = vmax.xlane.f32.xlu1 %v3271_v42 }
 0x4f9   : > { %v6108_v33 = vpop.f32.mrf.mxu0 }
 0x4fa   : > { %v9692_v5 = vadd.f32 %v6108_v33, %v6107_v53  ;;  %4827 = vrot.lane.b32.xlu0 %v9245_v15, %s7561_s22 }
 0x4fb   : > { %v9696_v28 = vpop.f32.mrf.mxu0 }
 0x4fc   : > { %12001 = vst [vmem:[#allocation169_spill] sm:$0xff] %v9692_v5  ;;  %4385 = vmax.xlane.f32.xlu1 %v4384_v55  ;;  %12002 = vst [vmem:[#allocation170_spill] sm:$0xff] %v9696_v28  ;;  %v9706_v55 = vpop.f32.mrf.mxu1 }
 0x4fd   : > { %v9700_v47 = vpop.f32.mrf.mxu0  ;;  %12005 = vst [vmem:[#allocation173_spill] sm:$0xff] %v9706_v55 }
 0x4fe   : > { %4809 = vrot.lane.b32.xlu0 %v9272_v26, %s7561_s22  ;;  %12003 = vst [vmem:[#allocation171_spill] sm:$0xff] %v9700_v47  ;;  %v9710_v26 = vpop.f32.mrf.mxu1 }
 0x4ff   : > { %12006 = vst [vmem:[#allocation174_spill] sm:$0xff] %v9710_v26 }
 0x503   : > { %v6113_v1 = vpop.f32.mrf.mxu0 }
 0x504   : > { %v3201_v63 = vpop.xlane.xlu0 %3200 }
 0x505   : > { %v6114_v42 = vpop.f32.mrf.mxu0  ;;  %v3288_v20 = vsub.f32 %v9312_v8, %v3201_v63  ;;  %v3289_v45 = vsub.f32 %v9316_v6, %v3201_v63  ;;  %v9714_v8 = vpop.f32.mrf.mxu1 }
 0x506   : > { %v9704_v53 = vadd.f32 %v6114_v42, %v6113_v1  ;;  %12007 = vst [vmem:[#allocation175_spill] sm:$0xff] %v9714_v8 }
 0x507   : > { %v3366_v33 = vmul.f32 1.442695, %v3288_v20  ;;  %v3368_v5 = vmul.f32 1.442695, %v3289_v45  ;;  %v9716_v20 = vpop.f32.mrf.mxu1 }
 0x508   : > { %12004 = vst [vmem:[#allocation172_spill] sm:$0xff] %v9704_v53  ;;  %v3613_v15 = vpop.permute.xlu0 %3612  ;;  %12008 = vst [vmem:[#allocation176_spill] sm:$0xff] %v9716_v20 }
 0x509   : > { %6967 = vpow2.f32 %v3366_v33  ;;  %6191 = vmatprep.subr.bf16.mxu0 %v3613_v15  ;;  %v9724_v28 = vpop.f32.mrf.mxu1 }
 0x50a   : > { %6969 = vpow2.f32 %v3368_v5  ;;  %v4390_v5 = vmax.f32 %v9714_v8, %v9716_v20  ;;  %12010 = vst [vmem:[#allocation178_spill] sm:$0xff] %v9724_v28 }
 0x50c   : > { %v3595_v47 = vpop.permute.xlu0 %3594 }
 0x50d   : > { %4811 = vrot.lane.b32.xlu1 %v9257_v40, %s7561_s22 }
 0x511   : > { %4825 = vrot.lane.b32.xlu1 %v9263_v59, %s7561_s22 }
 0x516   : > { %v6968_v6 = vpop.eup %6967 }
 0x517   : > { %v6970_v63 = vpop.eup %6969 }
 0x518   : > { %v9718_v1 = vadd.f32 %v6970_v63, %v6968_v6 }
 0x51a   : > { %12009 = vst [vmem:[#allocation177_spill] sm:$0xff] %v9718_v1  ;;  %v3562_v1 = vpack.c.bf16 %v9457_v58, %v9448_v29  ;;  %v3567_v29 = vpack.c.bf16 %v9654_v32, %v9674_v39  ;;  %v12021_v32 = vld [vmem:[#allocation70_spill] sm:$0xff]  ;;  %v3566_v39 = vpack.c.bf16 %v9652_v43, %v9670_v50 }
 0x51c   : > { %v3198_v45 = vpop.xlane.xlu1 %3197 }
 0x51d   : > { %v3286_v42 = vsub.f32 %v9302_v60, %v3198_v45  ;;  %v3287_v40 = vsub.f32 %v9310_v14, %v3198_v45  ;;  %4391 = vmax.xlane.f32.xlu0 %v4390_v5  ;;  %v3565_v60 = vpack.c.bf16 %v9552_v56, %v9572_v12  ;;  %v9730_v14 = vpop.f32.mrf.mxu1  ;;  %v9732_v5 = vpop.f32.mrf.mxu0 }
 0x51e   : > { %12011 = vst [vmem:[#allocation179_spill] sm:$0xff] %v9730_v14  ;;  %12012 = vst [vmem:[#allocation180_spill] sm:$0xff] %v9732_v5 }
 0x51f   : > { %v3362_v33 = vmul.f32 1.442695, %v3286_v42  ;;  %v3364_v15 = vmul.f32 1.442695, %v3287_v40  ;;  %v9734_v42 = vpop.f32.mrf.mxu1  ;;  %v9736_v40 = vpop.f32.mrf.mxu0 }
 0x520   : > { %v3597_v59 = vpop.permute.xlu1 %3596  ;;  %12013 = vst [vmem:[#allocation181_spill] sm:$0xff] %v9736_v40  ;;  %v12019_v40 = vld [vmem:[#allocation93_spill] sm:$0xff] }
 0x521   : > { %6971 = vpow2.f32 %v3362_v33  ;;  %6192 = vmatpush3.bf16.msra.mxu0 %v3597_v59  ;;  %v12014_v33 = vld [vmem:[#allocation150_spill] sm:$0xff]  ;;  %v9744_v12 = vpop.f32.mrf.mxu1 }
 0x522   : > { %6973 = vpow2.f32 %v3364_v15 }
 0x524   : > { %v3611_v53 = vpop.permute.xlu1 %3610 }
 0x525   : > { %6193 = vmatprep.subr.bf16.mxu0 %v3611_v53 }
 0x526   : > { %6194 = vmatpush3.bf16.msra.mxu0 %v3595_v47  ;;  %v12015_v47 = vld [vmem:[#allocation145_spill] sm:$0xff] }
 0x527   : > { %v3564_v15 = vpack.c.bf16 %v12015_v47, %v12014_v33  ;;  %12017 = vst [vmem:[#allocation145_spill] sm:$0xff] %v9744_v12  ;;  %v9752_v33 = vpop.f32.mrf.mxu1 }
 0x528   : > { %12020 = vst [vmem:[#allocation93_spill] sm:$0xff] %v9752_v33 }
 0x529   : > { %3675 = vmatmul.mubr.bf16.vlgmr.msra.gmra.mxu0 %v3562_v1  ;;  %v4387_v1 = vmax.f32 %v9706_v55, %v9710_v26 }
 0x52a   : > { %3682 = vmatprep.mubr.bf16.mxu0 %v3565_v60 }
 0x52e   : > { %v6972_v45 = vpop.eup %6971 }
 0x52f   : > { %v6974_v53 = vpop.eup %6973  ;;  %v3568_v26 = vpack.c.bf16 %v6968_v6, %v6972_v45 }
 0x530   : > { %v6119_v59 = vpop.f32.mrf.mxu0  ;;  %v9742_v58 = vadd.f32 %v6974_v53, %v6972_v45 }
 0x531   : > { %3683 = vmatmul.mubr.bf16.gmra.mxu0 %v3564_v15  ;;  %v3569_v15 = vpack.c.bf16 %v6970_v63, %v6974_v53 }
 0x532   : > { %12016 = vst [vmem:[#allocation150_spill] sm:$0xff] %v9742_v58  ;;  %v6120_v56 = vpop.f32.mrf.mxu0  ;;  %3690 = vmatprep.mubr.bf16.mxu0 %v3567_v29  ;;  %v9760_v29 = vpop.f32.mrf.mxu1  ;;  %v12025_v58 = vld [vmem:[#allocation65_spill] sm:$0xff] }
 0x533   : > { %v9748_v60 = vadd.f32 %v6120_v56, %v6119_v59  ;;  %4823 = vrot.lane.b32.xlu0 %v12019_v40, %s7561_s22 }
 0x534   : > { %v9758_v47 = vpop.f32.mrf.mxu0  ;;  %v9764_v40 = vpop.f32.mrf.mxu1 }
 0x535   : > { %12018 = vst [vmem:[#allocation182_spill] sm:$0xff] %v9748_v60  ;;  %4388 = vmax.xlane.f32.xlu1 %v4387_v1  ;;  %12022 = vst [vmem:[#allocation70_spill] sm:$0xff] %v9758_v47  ;;  %v12024_v60 = vld [vmem:[#allocation95_spill] sm:$0xff] }
 0x536   : > { %v9762_v59 = vpop.f32.mrf.mxu0  ;;  %v9770_v53 = vpop.f32.mrf.mxu1 }
 0x537   : > { %4805 = vrot.lane.b32.xlu0 %v12021_v32, %s7561_s22  ;;  %12023 = vst [vmem:[#allocation183_spill] sm:$0xff] %v9762_v59  ;;  %v12028_v59 = vld [vmem:[#allocation110_spill] sm:$0xff] }
 0x539   : > { %3691 = vmatmul.mubr.bf16.gmra.mxu0 %v3566_v39  ;;  %v12027_v39 = vld [vmem:[#allocation58_spill] sm:$0xff] }
 0x53a   : > { %3698 = vmatprep.mubr.bf16.mxu0 %v3569_v15 }
 0x53d   : > { %v3207_v56 = vpop.xlane.xlu0 %3206 }
 0x53e   : > { %v6125_v1 = vpop.f32.mrf.mxu0  ;;  %v3292_v5 = vsub.f32 %v12024_v60, %v3207_v56  ;;  %v3293_v32 = vsub.f32 %v12025_v58, %v3207_v56  ;;  %v9774_v58 = vpop.f32.mrf.mxu1 }
 0x540   : > { %v6126_v55 = vpop.f32.mrf.mxu0  ;;  %v3374_v43 = vmul.f32 1.442695, %v3292_v5  ;;  %v3376_v50 = vmul.f32 1.442695, %v3293_v32 }
 0x541   : > { %v9768_v47 = vadd.f32 %v6126_v55, %v6125_v1  ;;  %3699 = vmatmul.mubr.bf16.gmra.mxu0 %v3568_v26  ;;  %v3210_v63 = vpop.xlane.xlu0 %3209  ;;  %v12029_v26 = vld [vmem:[#allocation105_spill] sm:$0xff]  ;;  %v9780_v1 = vpop.f32.mrf.mxu1 }
 0x542   : > { %6975 = vpow2.f32 %v3374_v43  ;;  %v3294_v15 = vsub.f32 %v12027_v39, %v3210_v63  ;;  %v3295_v20 = vsub.f32 %v12028_v59, %v3210_v63  ;;  %v12030_v59 = vld [vmem:[#allocation122_spill] sm:$0xff] }
 0x543   : > { %12026 = vst [vmem:[#allocation95_spill] sm:$0xff] %v9768_v47  ;;  %6977 = vpow2.f32 %v3376_v50  ;;  %v9786_v43 = vpop.f32.mrf.mxu1 }
 0x544   : > { %v3378_v8 = vmul.f32 1.442695, %v3294_v15  ;;  %v3380_v60 = vmul.f32 1.442695, %v3295_v20 }
 0x545   : > { %v3216_v33 = vpop.xlane.xlu0 %3215 }
 0x546   : > { %6979 = vpow2.f32 %v3378_v8  ;;  %v3298_v6 = vsub.f32 %v9372_v17, %v3216_v33  ;;  %v3299_v55 = vsub.f32 %v9374_v25, %v3216_v33  ;;  %4807 = vrot.lane.b32.xlu1 %v12029_v26, %s7561_s22  ;;  %v12031_v8 = vld [vmem:[#allocation103_spill] sm:$0xff]  ;;  %v9798_v26 = vpop.f32.mrf.mxu1 }
 0x547   : > { %6981 = vpow2.f32 %v3380_v60 }
 0x548   : > { %v3386_v5 = vmul.f32 1.442695, %v3298_v6  ;;  %v3388_v45 = vmul.f32 1.442695, %v3299_v55 }
 0x549   : > { %v3222_v56 = vpop.xlane.xlu0 %3221 }
 0x54a   : > { %6983 = vpow2.f32 %v3386_v5  ;;  %v3302_v20 = vsub.f32 %v9392_v46, %v3222_v56  ;;  %v3303_v32 = vsub.f32 %v12030_v59, %v3222_v56  ;;  %4821 = vrot.lane.b32.xlu1 %v12031_v8, %s7561_s22 }
 0x54b   : > { %6985 = vpow2.f32 %v3388_v45 }
 0x54c   : > { %v3394_v17 = vmul.f32 1.442695, %v3302_v20  ;;  %v3396_v25 = vmul.f32 1.442695, %v3303_v32  ;;  %v4396_v20 = vmax.f32 %v9734_v42, %v9744_v12 }
 0x54d   : > { %v3228_v33 = vpop.xlane.xlu0 %3227 }
 0x54e   : > { %6987 = vpow2.f32 %v3394_v17  ;;  %v3306_v50 = vsub.f32 %v9404_v9, %v3228_v33  ;;  %v3307_v63 = vsub.f32 %v9410_v51, %v3228_v33  ;;  %v12033_v9 = vld [vmem:[#allocation68_spill] sm:$0xff]  ;;  %v9812_v33 = vpop.f32.mrf.mxu1 }
 0x54f   : > { %v9790_v39 = vpop.eup %6975  ;;  %6989 = vpow2.f32 %v3396_v25 }
 0x550   : > { %v9792_v46 = vpop.eup %6977  ;;  %v3402_v15 = vmul.f32 1.442695, %v3306_v50  ;;  %v3404_v60 = vmul.f32 1.442695, %v3307_v63  ;;  %v12036_v63 = vld [vmem:[#allocation88_spill] sm:$0xff] }
 0x551   : > { %v3234_v6 = vpop.xlane.xlu0 %3233  ;;  %v9796_v55 = vadd.f32 %v9792_v46, %v9790_v39 }
 0x552   : > { %6991 = vpow2.f32 %v3402_v15  ;;  %v3310_v5 = vsub.f32 %v9427_v54, %v3234_v6  ;;  %v3311_v45 = vsub.f32 %v12033_v9, %v3234_v6  ;;  %v12035_v54 = vld [vmem:[#allocation53_spill] sm:$0xff] }
 0x553   : > { %12032 = vst [vmem:[#allocation65_spill] sm:$0xff] %v9796_v55  ;;  %v9802_v51 = vpop.eup %6979  ;;  %6993 = vpow2.f32 %v3404_v60 }
 0x554   : > { %v9804_v56 = vpop.eup %6981  ;;  %v3410_v59 = vmul.f32 1.442695, %v3310_v5  ;;  %v3412_v32 = vmul.f32 1.442695, %v3311_v45 }
 0x555   : > { %v3204_v8 = vpop.xlane.xlu1 %3203  ;;  %v3240_v17 = vpop.xlane.xlu0 %3239  ;;  %v9810_v25 = vadd.f32 %v9804_v56, %v9802_v51 }
 0x556   : > { %6995 = vpow2.f32 %v3410_v59  ;;  %v3290_v50 = vsub.f32 %v12035_v54, %v3204_v8  ;;  %v3291_v15 = vsub.f32 %v12036_v63, %v3204_v8  ;;  %v3314_v60 = vsub.f32 %v9470_v41, %v3240_v17  ;;  %4397 = vmax.xlane.f32.xlu0 %v4396_v20  ;;  %v9826_v8 = vpop.f32.mrf.mxu1 }
 0x557   : > { %12034 = vst [vmem:[#allocation58_spill] sm:$0xff] %v9810_v25  ;;  %v9817_v6 = vpop.eup %6983  ;;  %6997 = vpow2.f32 %v3412_v32  ;;  %v3315_v5 = vsub.f32 %v9476_v16, %v3240_v17 }
 0x558   : > { %v9820_v9 = vpop.eup %6985  ;;  %v3370_v45 = vmul.f32 1.442695, %v3290_v50  ;;  %v3372_v47 = vmul.f32 1.442695, %v3291_v15  ;;  %v3418_v55 = vmul.f32 1.442695, %v3314_v60 }
 0x559   : > { %v3420_v25 = vmul.f32 1.442695, %v3315_v5  ;;  %v3213_v12 = vpop.xlane.xlu1 %3212  ;;  %v3246_v59 = vpop.xlane.xlu0 %3245  ;;  %v9824_v54 = vadd.f32 %v9820_v9, %v9817_v6 }
 0x55a   : > { %6999 = vpow2.f32 %v3370_v45  ;;  %v3296_v41 = vsub.f32 %v9360_v0, %v3213_v12  ;;  %v3297_v20 = vsub.f32 %v9368_v31, %v3213_v12  ;;  %v3318_v16 = vsub.f32 %v9492_v18, %v3246_v59  ;;  %v9840_v31 = vpop.f32.mrf.mxu1 }
 0x55b   : > { %12037 = vst [vmem:[#allocation110_spill] sm:$0xff] %v9824_v54  ;;  %v9831_v32 = vpop.eup %6987  ;;  %7001 = vpow2.f32 %v3372_v47  ;;  %v3319_v17 = vsub.f32 %v9496_v27, %v3246_v59 }
 0x55c   : > { %v9834_v50 = vpop.eup %6989  ;;  %7003 = vpow2.f32 %v3418_v55  ;;  %v3382_v63 = vmul.f32 1.442695, %v3296_v41  ;;  %v3384_v15 = vmul.f32 1.442695, %v3297_v20  ;;  %v3426_v60 = vmul.f32 1.442695, %v3318_v16 }
 0x55d   : > { %7005 = vpow2.f32 %v3420_v25  ;;  %v3428_v5 = vmul.f32 1.442695, %v3319_v17  ;;  %v3219_v45 = vpop.xlane.xlu1 %3218  ;;  %v3252_v54 = vpop.xlane.xlu0 %3251  ;;  %v9838_v0 = vadd.f32 %v9834_v50, %v9831_v32 }
 0x55e   : > { %7007 = vpow2.f32 %v3382_v63  ;;  %v3300_v18 = vsub.f32 %v9382_v44, %v3219_v45  ;;  %v3301_v27 = vsub.f32 %v9390_v22, %v3219_v45  ;;  %v3322_v12 = vsub.f32 %v9518_v24, %v3252_v54  ;;  %v9854_v22 = vpop.f32.mrf.mxu1 }
 0x55f   : > { %12038 = vst [vmem:[#allocation105_spill] sm:$0xff] %v9838_v0  ;;  %v9845_v47 = vpop.eup %6991  ;;  %7009 = vpow2.f32 %v3384_v15  ;;  %v3323_v55 = vsub.f32 %v9524_v19, %v3252_v54 }
 0x560   : > { %v9848_v25 = vpop.eup %6993  ;;  %7011 = vpow2.f32 %v3426_v60  ;;  %v3390_v59 = vmul.f32 1.442695, %v3300_v18  ;;  %v3392_v41 = vmul.f32 1.442695, %v3301_v27  ;;  %v3434_v20 = vmul.f32 1.442695, %v3322_v12 }
 0x561   : > { %7013 = vpow2.f32 %v3428_v5  ;;  %v3436_v16 = vmul.f32 1.442695, %v3323_v55  ;;  %v3225_v17 = vpop.xlane.xlu1 %3224  ;;  %v3258_v63 = vpop.xlane.xlu0 %3257  ;;  %v9852_v44 = vadd.f32 %v9848_v25, %v9845_v47 }
 0x562   : > { %7015 = vpow2.f32 %v3390_v59  ;;  %v3304_v24 = vsub.f32 %v9396_v61, %v3225_v17  ;;  %v3305_v19 = vsub.f32 %v9400_v2, %v3225_v17  ;;  %v3326_v54 = vsub.f32 %v9546_v48, %v3258_v63  ;;  %v9868_v2 = vpop.f32.mrf.mxu1  ;;  %v12041_v17 = vld [vmem:[#allocation156_spill] sm:$0xff] }
 0x563   : > { %12039 = vst [vmem:[#allocation122_spill] sm:$0xff] %v9852_v44  ;;  %v9859_v15 = vpop.eup %6995  ;;  %7017 = vpow2.f32 %v3392_v41  ;;  %v3327_v60 = vsub.f32 %v9558_v37, %v3258_v63 }
 0x564   : > { %v9862_v5 = vpop.eup %6997  ;;  %7019 = vpow2.f32 %v3434_v20  ;;  %v3398_v45 = vmul.f32 1.442695, %v3304_v24  ;;  %v3400_v18 = vmul.f32 1.442695, %v3305_v19  ;;  %v3442_v27 = vmul.f32 1.442695, %v3326_v54 }
 0x565   : > { %7021 = vpow2.f32 %v3436_v16  ;;  %v3444_v12 = vmul.f32 1.442695, %v3327_v60  ;;  %v3231_v55 = vpop.xlane.xlu1 %3230  ;;  %v3264_v59 = vpop.xlane.xlu0 %3263  ;;  %v9866_v61 = vadd.f32 %v9862_v5, %v9859_v15  ;;  %v4393_v16 = vmax.f32 %v9724_v28, %v9730_v14 }
 0x566   : > { %7023 = vpow2.f32 %v3398_v45  ;;  %v3308_v48 = vsub.f32 %v9414_v23, %v3231_v55  ;;  %v3309_v37 = vsub.f32 %v9419_v62, %v3231_v55  ;;  %v3330_v41 = vsub.f32 %v9588_v34, %v3264_v59 }
 0x567   : > { %12040 = vst [vmem:[#allocation103_spill] sm:$0xff] %v9866_v61  ;;  %v7000_v20 = vpop.eup %6999  ;;  %7025 = vpow2.f32 %v3400_v18  ;;  %v3331_v63 = vsub.f32 %v12041_v17, %v3264_v59  ;;  %v9882_v18 = vpop.f32.mrf.mxu1  ;;  %v12042_v59 = vld [vmem:[#allocation115_spill] sm:$0xff] }
 0x568   : > { %v7002_v24 = vpop.eup %7001  ;;  %7027 = vpow2.f32 %v3442_v27  ;;  %v3406_v19 = vmul.f32 1.442695, %v3308_v48  ;;  %v3408_v54 = vmul.f32 1.442695, %v3309_v37  ;;  %v3450_v60 = vmul.f32 1.442695, %v3330_v41 }
 0x569   : > { %v9876_v61 = vpop.eup %7003  ;;  %7029 = vpow2.f32 %v3444_v12  ;;  %v3452_v23 = vmul.f32 1.442695, %v3331_v63  ;;  %v3237_v45 = vpop.xlane.xlu1 %3236  ;;  %v3571_v34 = vpack.c.bf16 %v9792_v46, %v7002_v24  ;;  %v3570_v55 = vpack.c.bf16 %v9790_v39, %v7000_v20  ;;  %v12043_v48 = vld [vmem:[#allocation123_spill] sm:$0xff]  ;;  %v12044_v41 = vld [vmem:[#allocation161_spill] sm:$0xff]  ;;  %v12045_v12 = vld [vmem:[#allocation162_spill] sm:$0xff] }
 0x56a   : > { %v3270_v62 = vpop.xlane.xlu0 %3269  ;;  %v9880_v44 = vpop.eup %7005  ;;  %7031 = vpow2.f32 %v3406_v19  ;;  %v3312_v27 = vsub.f32 %v12042_v59, %v3237_v45  ;;  %v3313_v37 = vsub.f32 %v12043_v48, %v3237_v45  ;;  %v9888_v14 = vadd.f32 %v7002_v24, %v7000_v20  ;;  %v12047_v45 = vld [vmem:[#allocation75_spill] sm:$0xff] }
 0x56b   : > { %v3334_v17 = vsub.f32 %v12044_v41, %v3270_v62  ;;  %v7008_v0 = vpop.eup %7007  ;;  %7033 = vpow2.f32 %v3408_v54  ;;  %v3335_v63 = vsub.f32 %v12045_v12, %v3270_v62  ;;  %3706 = vmatprep.mubr.bf16.mxu0 %v3571_v34  ;;  %v9892_v39 = vadd.f32 %v9880_v44, %v9876_v61  ;;  %v9901_v41 = vpop.f32.mrf.mxu1 }
 0x56c   : > { %v7010_v46 = vpop.eup %7009  ;;  %7035 = vpow2.f32 %v3450_v60  ;;  %v3414_v19 = vmul.f32 1.442695, %v3312_v27  ;;  %v3416_v28 = vmul.f32 1.442695, %v3313_v37  ;;  %3707 = vmatmul.mubr.bf16.gmra.mxu0 %v3570_v55  ;;  %4819 = vrot.lane.b32.xlu0 %v12047_v45, %s7561_s22 }
 0x56d   : > { %12046 = vst [vmem:[#allocation68_spill] sm:$0xff] %v9892_v39  ;;  %v3458_v59 = vmul.f32 1.442695, %v3334_v17  ;;  %v9896_v48 = vpop.eup %7011  ;;  %7037 = vpow2.f32 %v3452_v23  ;;  %v3460_v54 = vmul.f32 1.442695, %v3335_v63  ;;  %v3243_v62 = vpop.xlane.xlu1 %3242  ;;  %v3573_v24 = vpack.c.bf16 %v7010_v46, %v9804_v56  ;;  %v7476_v39 = vld [vmem:[%s7759_s14 + $0x50] sm:$0xff]  }
 0x56e   : > { %v4383_v20 = vpop.xlane.xlu0 %4382  ;;  %v9899_v34 = vpop.eup %7013  ;;  %7039 = vpow2.f32 %v3414_v19  ;;  %v3316_v60 = vsub.f32 %v9482_v57, %v3243_v62  ;;  %v3317_v55 = vsub.f32 %v9486_v52, %v3243_v62  ;;  %4394 = vmax.xlane.f32.xlu1 %v4393_v16  ;;  %v9909_v17 = vadd.f32 %v7010_v46, %v7008_v0 }
 0x56f   : > { %v4477_v27 = vsub.f32 %v9642_v10, %v4383_v20  ;;  %v9906_v37 = vpop.eup %7015  ;;  %7041 = vpow2.f32 %v3416_v28  ;;  %v4478_v23 = vsub.f32 %v9648_v3, %v4383_v20  ;;  %3714 = vmatprep.mubr.bf16.mxu0 %v3573_v24  ;;  %v9913_v56 = vadd.f32 %v9899_v34, %v9896_v48  ;;  %v12049_v10 = vld [vmem:[#allocation85_spill] sm:$0xff]  ;;  %v9922_v62 = vpop.f32.mrf.mxu1 }
 0x570   : > { %v7018_v12 = vpop.eup %7017  ;;  %7043 = vpow2.f32 %v3458_v59  ;;  %v3422_v57 = vmul.f32 1.442695, %v3316_v60  ;;  %v3424_v63 = vmul.f32 1.442695, %v3317_v55  ;;  %4801 = vrot.lane.b32.xlu0 %v12049_v10, %s7561_s22  ;;  %v3572_v46 = vpack.c.bf16 %v7008_v0, %v9802_v51 }
 0x571   : > { %12048 = vst [vmem:[#allocation53_spill] sm:$0xff] %v9913_v56  ;;  %v4541_v52 = vmul.f32 1.442695, %v4477_v27  ;;  %v9917_v16 = vpop.eup %7019  ;;  %7045 = vpow2.f32 %v3460_v54  ;;  %v4543_v28 = vmul.f32 1.442695, %v4478_v23  ;;  %v3249_v3 = vpop.xlane.xlu1 %3248  ;;  %v9927_v24 = vadd.f32 %v7018_v12, %v9906_v37  ;;  %v12059_v56 = vld [vmem:[#allocation163_spill] sm:$0xff] }
 0x572   : > { %v4828_v19 = vpop.permute.xlu0 %4827  ;;  %v9920_v45 = vpop.eup %7021  ;;  %7047 = vpow2.f32 %v3422_v57  ;;  %v3320_v59 = vsub.f32 %v9506_v30, %v3249_v3  ;;  %v3321_v20 = vsub.f32 %v9512_v36, %v3249_v3  ;;  %v3575_v54 = vpack.c.bf16 %v7018_v12, %v9820_v9 }
 0x573   : > { %6339 = vmatprep.subr.bf16.mxu0 %v4828_v19  ;;  %12050 = vst [vmem:[#allocation88_spill] sm:$0xff] %v9927_v24  ;;  %v9929_v60 = vpop.eup %7023  ;;  %7049 = vpow2.f32 %v3424_v63  ;;  %v9934_v51 = vadd.f32 %v9920_v45, %v9917_v16  ;;  %v9943_v9 = vpop.f32.mrf.mxu1 }
 0x574   : > { %v7026_v0 = vpop.eup %7025  ;;  %7051 = vpow2.f32 %v4541_v52  ;;  %v3430_v55 = vmul.f32 1.442695, %v3320_v59  ;;  %v3432_v27 = vmul.f32 1.442695, %v3321_v20  ;;  %3715 = vmatmul.mubr.bf16.gmra.mxu0 %v3572_v46 }
 0x575   : > { %12051 = vst [vmem:[#allocation156_spill] sm:$0xff] %v9934_v51  ;;  %v9936_v30 = vpop.eup %7027  ;;  %7053 = vpow2.f32 %v4543_v28  ;;  %3722 = vmatprep.mubr.bf16.mxu0 %v3575_v54  ;;  %v3255_v36 = vpop.xlane.xlu1 %3254  ;;  %v9939_v23 = vadd.f32 %v7026_v0, %v9929_v60 }
 0x576   : > { %v9941_v57 = vpop.eup %7029  ;;  %7055 = vpow2.f32 %v3430_v55  ;;  %v3324_v12 = vsub.f32 %v9530_v4, %v3255_v36  ;;  %v3325_v63 = vsub.f32 %v9538_v21, %v3255_v36  ;;  %v9960_v4 = vpop.f32.mrf.mxu1 }
 0x577   : > { %12052 = vst [vmem:[#allocation115_spill] sm:$0xff] %v9939_v23  ;;  %v9947_v52 = vpop.eup %7031  ;;  %7057 = vpow2.f32 %v3432_v27  ;;  %v9951_v10 = vadd.f32 %v9941_v57, %v9936_v30  ;;  %v3574_v27 = vpack.c.bf16 %v9906_v37, %v9817_v6 }
 0x578   : > { %v7034_v28 = vpop.eup %7033  ;;  %v3438_v3 = vmul.f32 1.442695, %v3324_v12  ;;  %v3440_v46 = vmul.f32 1.442695, %v3325_v63  ;;  %v3577_v12 = vpack.c.bf16 %v7026_v0, %v9834_v50  ;;  %v9983_v50 = vpop.f32.mrf.mxu1 }
 0x579   : > { %12053 = vst [vmem:[#allocation123_spill] sm:$0xff] %v9951_v10  ;;  %v9953_v19 = vpop.eup %7035  ;;  %v3261_v59 = vpop.xlane.xlu1 %3260  ;;  %v9956_v20 = vadd.f32 %v7034_v28, %v9947_v52 }
 0x57a   : > { %v9958_v54 = vpop.eup %7037  ;;  %7059 = vpow2.f32 %v3438_v3  ;;  %v3328_v21 = vsub.f32 %v9566_v7, %v3261_v59  ;;  %v3329_v55 = vsub.f32 %v9580_v49, %v3261_v59 }
 0x57b   : > { %12054 = vst [vmem:[#allocation161_spill] sm:$0xff] %v9956_v20  ;;  %v9966_v36 = vpop.eup %7039  ;;  %7061 = vpow2.f32 %v3440_v46  ;;  %v9971_v63 = vadd.f32 %v9958_v54, %v9953_v19 }
 0x57c   : > { %v9973_v10 = vpop.eup %7041  ;;  %v3446_v3 = vmul.f32 1.442695, %v3328_v21  ;;  %v3448_v51 = vmul.f32 1.442695, %v3329_v55  ;;  %3723 = vmatmul.mubr.bf16.gmra.mxu0 %v3574_v27  ;;  %v7475_v21 = vld [vmem:[%s7759_s14 + $0x18] sm:$0xff]  }
 0x57d   : > { %12055 = vst [vmem:[#allocation162_spill] sm:$0xff] %v9971_v63  ;;  %v9975_v7 = vpop.eup %7043  ;;  %3730 = vmatprep.mubr.bf16.mxu0 %v3577_v12  ;;  %v3267_v49 = vpop.xlane.xlu1 %3266  ;;  %v9979_v6 = vadd.f32 %v9973_v10, %v9966_v36 }
 0x57e   : > { %v9981_v37 = vpop.eup %7045  ;;  %7063 = vpow2.f32 %v3446_v3  ;;  %v3332_v0 = vsub.f32 %v9602_v35, %v3267_v49  ;;  %v3333_v46 = vsub.f32 %v9608_v38, %v3267_v49  ;;  %v10005_v49 = vpop.f32.mrf.mxu1 }
 0x57f   : > { %12056 = vst [vmem:[#allocation75_spill] sm:$0xff] %v9979_v6  ;;  %v9987_v59 = vpop.eup %7047  ;;  %7065 = vpow2.f32 %v3448_v51  ;;  %4803 = vrot.lane.b32.xlu1 %v7475_v21, %s7561_s22  ;;  %v9993_v55 = vadd.f32 %v9981_v37, %v9975_v7 }
 0x580   : > { %v9995_v27 = vpop.eup %7049  ;;  %v3454_v12 = vmul.f32 1.442695, %v3332_v0  ;;  %v3456_v63 = vmul.f32 1.442695, %v3333_v46  ;;  %v3576_v0 = vpack.c.bf16 %v9929_v60, %v9831_v32  ;;  %v10023_v60 = vpop.f32.mrf.mxu1 }
 0x581   : > { %12057 = vst [vmem:[#allocation85_spill] sm:$0xff] %v9993_v55  ;;  %v9997_v3 = vpop.eup %7051  ;;  %v3273_v35 = vpop.xlane.xlu1 %3272  ;;  %v10001_v38 = vadd.f32 %v9995_v27, %v9987_v59  ;;  %12062 = vst [vmem:[#allocation186_spill] sm:$0xff] %v10023_v60 }
 0x582   : > { %v10003_v51 = vpop.eup %7053  ;;  %7067 = vpow2.f32 %v3454_v12  ;;  %v3336_v21 = vsub.f32 %v9630_v13, %v3273_v35  ;;  %v3337_v55 = vsub.f32 %v12059_v56, %v3273_v35 }
 0x583   : > { %12058 = vst [vmem:[#allocation184_spill] sm:$0xff] %v10001_v38  ;;  %v10011_v46 = vpop.eup %7055  ;;  %7069 = vpow2.f32 %v3456_v63  ;;  %4817 = vrot.lane.b32.xlu1 %v7476_v39, %s7561_s22  ;;  %v3579_v38 = vpack.c.bf16 %v7034_v28, %v9848_v25  ;;  %v10018_v6 = vadd.f32 %v10003_v51, %v9997_v3  ;;  %v12063_v63 = vld [vmem:[#allocation168_spill] sm:$0xff] }
 0x584   : > { %v7058_v12 = vpop.eup %7057  ;;  %v3462_v20 = vmul.f32 1.442695, %v3336_v21  ;;  %v3464_v13 = vmul.f32 1.442695, %v3337_v55  ;;  %3731 = vmatmul.mubr.bf16.gmra.mxu0 %v3576_v0  ;;  %v10032_v0 = vpop.f32.mrf.mxu1 }
 0x585   : > { %12060 = vst [vmem:[#allocation163_spill] sm:$0xff] %v10018_v6  ;;  %3738 = vmatprep.mubr.bf16.mxu0 %v3579_v38  ;;  %v4386_v56 = vpop.xlane.xlu1 %4385  ;;  %v10021_v32 = vadd.f32 %v7058_v12, %v10011_v46  ;;  %12065 = vst [vmem:[#allocation187_spill] sm:$0xff] %v10032_v0 }
 0x586   : > { %7071 = vpow2.f32 %v3462_v20  ;;  %v4479_v39 = vsub.f32 %v9678_v11, %v4386_v56  ;;  %v4480_v25 = vsub.f32 %v12063_v63, %v4386_v56  ;;  %v3578_v20 = vpack.c.bf16 %v9947_v52, %v9845_v47 }
 0x587   : > { %12061 = vst [vmem:[#allocation185_spill] sm:$0xff] %v10021_v32  ;;  %v10027_v28 = vpop.eup %7059  ;;  %7073 = vpow2.f32 %v3464_v13  ;;  %v3581_v13 = vpack.c.bf16 %v9973_v10, %v9862_v5 }
 0x588   : > { %v7062_v35 = vpop.eup %7061  ;;  %v4545_v6 = vmul.f32 1.442695, %v4479_v39  ;;  %v4547_v21 = vmul.f32 1.442695, %v4480_v25  ;;  %v4402_v39 = vmax.f32 %v9764_v40, %v9770_v53 }
 0x589   : > { %v4812_v55 = vpop.permute.xlu1 %4811  ;;  %v10030_v38 = vadd.f32 %v7062_v35, %v10027_v28 }
 0x58a   : > { %7075 = vpow2.f32 %v4545_v6  ;;  %6340 = vmatpush3.bf16.msra.mxu0 %v4812_v55  ;;  %v10045_v6 = vpop.f32.mrf.mxu1  ;;  %v4810_v55 = vpop.permute.xlu0 %4809 }
 0x58b   : > { %12064 = vst [vmem:[#allocation168_spill] sm:$0xff] %v10030_v38  ;;  %v10036_v11 = vpop.eup %7063  ;;  %7077 = vpow2.f32 %v4547_v21  ;;  %12067 = vst [vmem:[#allocation189_spill] sm:$0xff] %v10045_v6  ;;  %v3580_v21 = vpack.c.bf16 %v9966_v36, %v9859_v15  ;;  %v3587_v38 = vpack.c.bf16 %v7062_v35, %v9920_v45  ;;  %v3586_v35 = vpack.c.bf16 %v10027_v28, %v9917_v16  ;;  %v7479_v28 = vld [vmem:[%s7759_s14 + $0x8] sm:$0xff]  }
 0x58c   : > { %v7066_v56 = vpop.eup %7065  ;;  %3739 = vmatmul.mubr.bf16.gmra.mxu0 %v3578_v20  ;;  %v10052_v10 = vpop.f32.mrf.mxu1 }
 0x58d   : > { %3746 = vmatprep.mubr.bf16.mxu0 %v3581_v13  ;;  %v4826_v63 = vpop.permute.xlu1 %4825  ;;  %v10043_v25 = vadd.f32 %v7066_v56, %v10036_v11  ;;  %v3583_v13 = vpack.c.bf16 %v9995_v27, %v9880_v44  ;;  %v3582_v44 = vpack.c.bf16 %v9987_v59, %v9876_v61  ;;  %v3585_v27 = vpack.c.bf16 %v7058_v12, %v9899_v34  ;;  %v7477_v61 = vld [vmem:[%s7759_s14 + $0x48] sm:$0xff]   ;;  %v12077_v12 = vld [vmem:[#allocation175_spill] sm:$0xff] }
 0x58e   : > { %6341 = vmatprep.subr.bf16.mxu0 %v4826_v63  ;;  %v10063_v63 = vpop.f32.mrf.mxu1 }
 0x58f   : > { %12066 = vst [vmem:[#allocation188_spill] sm:$0xff] %v10043_v25  ;;  %v10047_v47 = vpop.eup %7067  ;;  %4403 = vmax.xlane.f32.xlu0 %v4402_v39  ;;  %6342 = vmatpush3.bf16.msra.mxu0 %v4810_v55  ;;  %12070 = vst [vmem:[#allocation192_spill] sm:$0xff] %v10063_v63 }
 0x590   : > { %v7070_v52 = vpop.eup %7069  ;;  %v10073_v36 = vpop.f32.mrf.mxu1 }
 0x591   : > { %v10050_v5 = vadd.f32 %v7070_v52, %v10047_v47  ;;  %12072 = vst [vmem:[#allocation194_spill] sm:$0xff] %v10073_v36 }
 0x593   : > { %12068 = vst [vmem:[#allocation190_spill] sm:$0xff] %v10050_v5  ;;  %v10056_v20 = vpop.eup %7071 }
 0x594   : > { %v7074_v25 = vpop.eup %7073  ;;  %3747 = vmatmul.mubr.bf16.gmra.mxu0 %v3580_v21  ;;  %v10078_v21 = vpop.f32.mrf.mxu1 }
 0x595   : > { %3754 = vmatprep.mubr.bf16.mxu0 %v3583_v13  ;;  %v10061_v39 = vadd.f32 %v7074_v25, %v10056_v20  ;;  %12073 = vst [vmem:[#allocation195_spill] sm:$0xff] %v10078_v21 }
 0x596   : > { %v10080_v13 = vpop.f32.mrf.mxu1 }
 0x597   : > { %12069 = vst [vmem:[#allocation191_spill] sm:$0xff] %v10061_v39  ;;  %v10065_v55 = vpop.eup %7075  ;;  %12074 = vst [vmem:[#allocation196_spill] sm:$0xff] %v10080_v13  ;;  %v3584_v39 = vpack.c.bf16 %v10011_v46, %v9896_v48  ;;  %v7478_v46 = vld [vmem:[%s7759_s14] sm:$0xff]  }
 0x598   : > { %v10067_v5 = vpop.eup %7077  ;;  %v10089_v34 = vpop.f32.mrf.mxu1 }
 0x599   : > { %v10071_v15 = vadd.f32 %v10067_v5, %v10065_v55 }
 0x59a   : > { %v10095_v45 = vpop.f32.mrf.mxu1 }
 0x59b   : > { %12071 = vst [vmem:[#allocation193_spill] sm:$0xff] %v10071_v15  ;;  %v12075_v15 = vld [vmem:[#allocation93_spill] sm:$0xff]  ;;  %12079 = vst [vmem:[#allocation175_spill] sm:$0xff] %v10095_v45 }
 0x59c   : > { %3755 = vmatmul.mubr.bf16.gmra.mxu0 %v3582_v44  ;;  %v4399_v32 = vmax.f32 %v12075_v15, %v9760_v29  ;;  %12076 = vst [vmem:[#allocation93_spill] sm:$0xff] %v10089_v34 }
 0x59d   : > { %3762 = vmatprep.mubr.bf16.mxu0 %v3585_v27  ;;  %v12078_v27 = vld [vmem:[#allocation176_spill] sm:$0xff] }
 0x5a4   : > { %3763 = vmatmul.mubr.bf16.gmra.mxu0 %v3584_v39  ;;  %v3589_v39 = vpack.c.bf16 %v7066_v56, %v9941_v57 }
 0x5a5   : > { %3770 = vmatprep.mubr.bf16.mxu0 %v3587_v38  ;;  %4815 = vrot.lane.b32.xlu0 %v7477_v61, %s7561_s22  ;;  %v3588_v61 = vpack.c.bf16 %v10036_v11, %v9936_v30 }
 0x5a6   : > { %v4392_v59 = vpop.xlane.xlu0 %4391 }
 0x5a7   : > { %v4483_v44 = vsub.f32 %v12077_v12, %v4392_v59  ;;  %v4484_v23 = vsub.f32 %v12078_v27, %v4392_v59  ;;  %4400 = vmax.xlane.f32.xlu1 %v4399_v32  ;;  %v10100_v32 = vpop.f32.mrf.mxu1  ;;  %v3591_v59 = vpack.c.bf16 %v7070_v52, %v9958_v54  ;;  %v3590_v12 = vpack.c.bf16 %v10047_v47, %v9953_v19  ;;  %v7480_v52 = vld [vmem:[%s7759_s14 + $0x40] sm:$0xff]   ;;  %v12083_v27 = vld [vmem:[#allocation173_spill] sm:$0xff] }
 0x5a8   : > { %v3593_v54 = vpack.c.bf16 %v7074_v25, %v9981_v37  ;;  %v3592_v37 = vpack.c.bf16 %v10056_v20, %v9975_v7  ;;  %v4766_v25 = vpack.c.bf16 %v10067_v5, %v10003_v51  ;;  %v4411_v7 = vmax.f32 %v9812_v33, %v9826_v8 }
 0x5a9   : > { %v4553_v24 = vmul.f32 1.442695, %v4483_v44  ;;  %v4555_v48 = vmul.f32 1.442695, %v4484_v23  ;;  %4797 = vrot.lane.b32.xlu0 %v7478_v46, %s7561_s22  ;;  %v10102_v23 = vpop.f32.mrf.mxu1  ;;  %v12084_v46 = vld [vmem:[#allocation174_spill] sm:$0xff]  ;;  %v4417_v51 = vmax.f32 %v9868_v2, %v9882_v18 }
 0x5aa   : > { %v4824_v38 = vpop.permute.xlu0 %4823 }
 0x5ab   : > { %7079 = vpow2.f32 %v4553_v24  ;;  %6343 = vmatprep.subr.bf16.mxu0 %v4824_v38  ;;  %v10107_v16 = vpop.f32.mrf.mxu1 }
 0x5ac   : > { %7081 = vpow2.f32 %v4555_v48  ;;  %3771 = vmatmul.mubr.bf16.gmra.mxu0 %v3586_v35  ;;  %12080 = vst [vmem:[#allocation176_spill] sm:$0xff] %v10107_v16 }
 0x5ad   : > { %3778 = vmatprep.mubr.bf16.mxu0 %v3589_v39  ;;  %v10111_v57 = vpop.f32.mrf.mxu1 }
 0x5ae   : > { %12081 = vst [vmem:[#allocation197_spill] sm:$0xff] %v10111_v57 }
 0x5af   : > { %v10124_v11 = vpop.f32.mrf.mxu1 }
 0x5b1   : > { %v10130_v38 = vpop.f32.mrf.mxu1 }
 0x5b3   : > { %v10132_v39 = vpop.f32.mrf.mxu1 }
 0x5b4   : > { %3779 = vmatmul.mubr.bf16.gmra.mxu0 %v3588_v61 }
 0x5b5   : > { %3786 = vmatprep.mubr.bf16.mxu0 %v3591_v59  ;;  %v4408_v59 = vmax.f32 %v9786_v43, %v9798_v26 }
 0x5b8   : > { %v10109_v24 = vpop.eup %7079  ;;  %4799 = vrot.lane.b32.xlu1 %v7479_v28, %s7561_s22  ;;  %v10140_v28 = vpop.f32.mrf.mxu1 }
 0x5b9   : > { %v10115_v56 = vpop.eup %7081 }
 0x5ba   : > { %v10121_v30 = vadd.f32 %v10115_v56, %v10109_v24  ;;  %v10144_v20 = vpop.f32.mrf.mxu1 }
 0x5bc   : > { %12082 = vst [vmem:[#allocation198_spill] sm:$0xff] %v10121_v30  ;;  %3787 = vmatmul.mubr.bf16.gmra.mxu0 %v3590_v12  ;;  %4813 = vrot.lane.b32.xlu1 %v7480_v52, %s7561_s22  ;;  %v10148_v5 = vpop.f32.mrf.mxu1 }
 0x5bd   : > { %3794 = vmatprep.mubr.bf16.mxu0 %v3593_v54  ;;  %v4806_v54 = vpop.permute.xlu0 %4805 }
 0x5be   : > { %v4389_v44 = vpop.xlane.xlu1 %4388 }
 0x5bf   : > { %v4481_v48 = vsub.f32 %v12083_v27, %v4389_v44  ;;  %v4482_v35 = vsub.f32 %v12084_v46, %v4389_v44  ;;  %v10152_v44 = vpop.f32.mrf.mxu1 }
 0x5c1   : > { %v4549_v19 = vmul.f32 1.442695, %v4481_v48  ;;  %v4551_v47 = vmul.f32 1.442695, %v4482_v35  ;;  %v4423_v48 = vmax.f32 %v9943_v9, %v9960_v4  ;;  %v10162_v35 = vpop.f32.mrf.mxu1 }
 0x5c2   : > { %v4808_v61 = vpop.permute.xlu1 %4807 }
 0x5c3   : > { %7083 = vpow2.f32 %v4549_v19  ;;  %6344 = vmatpush3.bf16.msra.mxu0 %v4808_v61  ;;  %v4429_v19 = vmax.f32 %v10023_v60, %v10032_v0  ;;  %v4435_v61 = vmax.f32 %v10063_v63, %v10073_v36  ;;  %v12099_v0 = vld [vmem:[#allocation30_spill] sm:$0xff] }
 0x5c4   : > { %7085 = vpow2.f32 %v4551_v47  ;;  %3795 = vmatmul.mubr.bf16.gmra.mxu0 %v3592_v37  ;;  %v10166_v47 = vpop.f32.mrf.mxu1 }
 0x5c5   : > { %4877 = vmatprep.mubr.bf16.mxu0 %v4766_v25  ;;  %12086 = vst [vmem:[#allocation174_spill] sm:$0xff] %v10166_v47  ;;  %v4405_v25 = vmax.f32 %v9774_v58, %v9780_v1 }
 0x5c6   : > { %v4822_v12 = vpop.permute.xlu1 %4821  ;;  %v10170_v37 = vpop.f32.mrf.mxu1 }
 0x5c7   : > { %6345 = vmatprep.subr.bf16.mxu0 %v4822_v12 }
 0x5c8   : > { %4409 = vmax.xlane.f32.xlu0 %v4408_v59  ;;  %6346 = vmatpush3.bf16.msra.mxu0 %v4806_v54  ;;  %v4441_v59 = vmax.f32 %v10089_v34, %v10095_v45  ;;  %v10176_v12 = vpop.f32.mrf.mxu1  ;;  %v10186_v34 = vpop.f32.mrf.mxu0 }
 0x5cc   : > { %4412 = vmax.xlane.f32.xlu0 %v4411_v7 }
 0x5d0   : > { %v10150_v52 = vpop.eup %7083  ;;  %4418 = vmax.xlane.f32.xlu0 %v4417_v51  ;;  %v12087_v51 = vld [vmem:[#allocation145_spill] sm:$0xff] }
 0x5d1   : > { %v10154_v27 = vpop.eup %7085  ;;  %12088 = vst [vmem:[#allocation145_spill] sm:$0xff] %v10186_v34 }
 0x5d2   : > { %v10160_v46 = vadd.f32 %v10154_v27, %v10150_v52 }
 0x5d4   : > { %12085 = vst [vmem:[#allocation173_spill] sm:$0xff] %v10160_v46  ;;  %4424 = vmax.xlane.f32.xlu0 %v4423_v48  ;;  %v10184_v46 = vpop.f32.mrf.mxu1 }
 0x5d8   : > { %4430 = vmax.xlane.f32.xlu0 %v4429_v19  ;;  %v4414_v19 = vmax.f32 %v9840_v31, %v9854_v22 }
 0x5dc   : > { %4436 = vmax.xlane.f32.xlu0 %v4435_v61  ;;  %v4447_v61 = vmax.f32 %v10107_v16, %v10111_v57 }
 0x5df   : > { %v4398_v54 = vpop.xlane.xlu0 %4397 }
 0x5e0   : > { %v4487_v7 = vsub.f32 %v9734_v42, %v4398_v54  ;;  %v4488_v48 = vsub.f32 %v12087_v51, %v4398_v54  ;;  %4406 = vmax.xlane.f32.xlu1 %v4405_v25  ;;  %4442 = vmax.xlane.f32.xlu0 %v4441_v59  ;;  %v4420_v42 = vmax.f32 %v9901_v41, %v9922_v62  ;;  %v10192_v59 = vpop.f32.mrf.mxu1  ;;  %v10194_v54 = vpop.f32.mrf.mxu0 }
 0x5e1   : > { %v4453_v25 = vmax.f32 %v10132_v39, %v10140_v28  ;;  %12089 = vst [vmem:[#allocation199_spill] sm:$0xff] %v10194_v54 }
 0x5e2   : > { %v4561_v30 = vmul.f32 1.442695, %v4487_v7  ;;  %v4563_v63 = vmul.f32 1.442695, %v4488_v48 }
 0x5e3   : > { %v4820_v45 = vpop.permute.xlu0 %4819 }
 0x5e4   : > { %7087 = vpow2.f32 %v4561_v30  ;;  %4415 = vmax.xlane.f32.xlu1 %v4414_v19  ;;  %4448 = vmax.xlane.f32.xlu0 %v4447_v61  ;;  %v4426_v30 = vmax.f32 %v9983_v50, %v10005_v49 }
 0x5e5   : > { %7089 = vpow2.f32 %v4563_v63  ;;  %6347 = vmatprep.subr.bf16.mxu0 %v4820_v45  ;;  %v4459_v63 = vmax.f32 %v10152_v44, %v10162_v35  ;;  %v10200_v45 = vpop.f32.mrf.mxu1 }
 0x5e7   : > { %v10204_v19 = vpop.f32.mrf.mxu1 }
 0x5e8   : > { %4421 = vmax.xlane.f32.xlu1 %v4420_v42  ;;  %4454 = vmax.xlane.f32.xlu0 %v4453_v25  ;;  %v4432_v42 = vmax.f32 %v10045_v6, %v10052_v10  ;;  %v4465_v25 = vmax.f32 %v10176_v12, %v10184_v46 }
 0x5e9   : > { %v6195_v7 = vpop.f32.mrf.mxu0 }
 0x5eb   : > { %v6196_v51 = vpop.f32.mrf.mxu0 }
 0x5ec   : > { %v10202_v48 = vadd.f32 %v6196_v51, %v6195_v7  ;;  %4427 = vmax.xlane.f32.xlu1 %v4426_v30  ;;  %4460 = vmax.xlane.f32.xlu0 %v4459_v63  ;;  %v10216_v7 = vpop.f32.mrf.mxu1  ;;  %v4438_v51 = vmax.f32 %v10078_v21, %v10080_v13  ;;  %v12097_v21 = vld [vmem:[#allocation178_spill] sm:$0xff]  ;;  %v12098_v13 = vld [vmem:[#allocation179_spill] sm:$0xff] }
 0x5ed   : > { %v10206_v61 = vpop.f32.mrf.mxu0 }
 0x5ee   : > { %12090 = vst [vmem:[#allocation200_spill] sm:$0xff] %v10202_v48  ;;  %12091 = vst [vmem:[#allocation201_spill] sm:$0xff] %v10206_v61  ;;  %v4471_v61 = vmax.f32 %v10204_v19, %v10216_v7 }
 0x5ef   : > { %v10212_v54 = vpop.f32.mrf.mxu0 }
 0x5f0   : > { %12092 = vst [vmem:[#allocation202_spill] sm:$0xff] %v10212_v54  ;;  %4433 = vmax.xlane.f32.xlu1 %v4432_v42  ;;  %4466 = vmax.xlane.f32.xlu0 %v4465_v25  ;;  %v4444_v54 = vmax.f32 %v10100_v32, %v10102_v23 }
 0x5f1   : > { %v10214_v34 = vpop.eup %7087  ;;  %v6201_v30 = vpop.f32.mrf.mxu0 }
 0x5f2   : > { %v10218_v63 = vpop.eup %7089 }
 0x5f3   : > { %v6202_v48 = vpop.f32.mrf.mxu0  ;;  %v10226_v16 = vadd.f32 %v10218_v63, %v10214_v34 }
 0x5f4   : > { %v10228_v42 = vadd.f32 %v6202_v48, %v6201_v30  ;;  %4439 = vmax.xlane.f32.xlu1 %v4438_v51  ;;  %4472 = vmax.xlane.f32.xlu0 %v4471_v61  ;;  %v4450_v48 = vmax.f32 %v10124_v11, %v10130_v38 }
 0x5f5   : > { %12093 = vst [vmem:[#allocation203_spill] sm:$0xff] %v10226_v16  ;;  %v10230_v25 = vpop.f32.mrf.mxu0 }
 0x5f6   : > { %12094 = vst [vmem:[#allocation204_spill] sm:$0xff] %v10228_v42  ;;  %12095 = vst [vmem:[#allocation205_spill] sm:$0xff] %v10230_v25 }
 0x5f7   : > { %v4395_v57 = vpop.xlane.xlu1 %4394  ;;  %v10234_v36 = vpop.f32.mrf.mxu0 }
 0x5f8   : > { %12096 = vst [vmem:[#allocation206_spill] sm:$0xff] %v10234_v36  ;;  %v4485_v60 = vsub.f32 %v12097_v21, %v4395_v57  ;;  %v4486_v6 = vsub.f32 %v12098_v13, %v4395_v57  ;;  %4445 = vmax.xlane.f32.xlu1 %v4444_v54  ;;  %2288 = vadd.xlane.f32.xlu0 %v12099_v0  ;;  %v12101_v36 = vld [vmem:[#allocation49_spill] sm:$0xff] }
 0x5f9   : > { %v6207_v16 = vpop.f32.mrf.mxu0  ;;  %v4456_v0 = vmax.f32 %v10144_v20, %v10148_v5 }
 0x5fa   : > { %v4557_v61 = vmul.f32 1.442695, %v4485_v60  ;;  %v4559_v30 = vmul.f32 1.442695, %v4486_v6  ;;  %v4802_v60 = vpop.permute.xlu0 %4801 }
 0x5fb   : > { %v4804_v51 = vpop.permute.xlu1 %4803  ;;  %v6208_v25 = vpop.f32.mrf.mxu0 }
 0x5fc   : > { %7091 = vpow2.f32 %v4557_v61  ;;  %v10241_v42 = vadd.f32 %v6208_v25, %v6207_v16  ;;  %4451 = vmax.xlane.f32.xlu1 %v4450_v48  ;;  %2294 = vadd.xlane.f32.xlu0 %v12101_v36  ;;  %v4462_v16 = vmax.f32 %v10166_v47, %v10170_v37  ;;  %v10253_v36 = vpop.f32.mrf.mxu1  ;;  %v12105_v48 = vld [vmem:[#allocation58_spill] sm:$0xff]  ;;  %v4468_v61 = vmax.f32 %v10192_v59, %v10200_v45 }
 0x5fd   : > { %7093 = vpow2.f32 %v4559_v30  ;;  %6348 = vmatpush3.bf16.msra.mxu0 %v4804_v51  ;;  %v10244_v21 = vpop.f32.mrf.mxu0 }
 0x5fe   : > { %12100 = vst [vmem:[#allocation178_spill] sm:$0xff] %v10241_v42  ;;  %12102 = vst [vmem:[#allocation179_spill] sm:$0xff] %v10244_v21  ;;  %v10260_v30 = vpop.f32.mrf.mxu1 }
 0x5ff   : > { %v4818_v13 = vpop.permute.xlu1 %4817  ;;  %v10248_v57 = vpop.f32.mrf.mxu0 }
 0x600   : > { %12103 = vst [vmem:[#allocation30_spill] sm:$0xff] %v10248_v57  ;;  %4457 = vmax.xlane.f32.xlu1 %v4456_v0  ;;  %3491 = vadd.xlane.f32.xlu0 %v9888_v14  ;;  %v4474_v0 = vmax.f32 %v10253_v36, %v10260_v30 }
 0x601   : > { %6349 = vmatprep.subr.bf16.mxu0 %v4818_v13  ;;  %v6213_v6 = vpop.f32.mrf.mxu0 }
 0x602   : > { %6350 = vmatpush3.bf16.msra.mxu0 %v4802_v60  ;;  %v12107_v60 = vld [vmem:[#allocation55_spill] sm:$0xff] }
 0x603   : > { %v6214_v54 = vpop.f32.mrf.mxu0 }
 0x604   : > { %v10255_v25 = vadd.f32 %v6214_v54, %v6213_v6  ;;  %4463 = vmax.xlane.f32.xlu1 %v4462_v16  ;;  %3497 = vadd.xlane.f32.xlu0 %v12105_v48  ;;  %v12108_v6 = vld [vmem:[#allocation27_spill] sm:$0xff]  ;;  %v12109_v16 = vld [vmem:[#allocation65_spill] sm:$0xff] }
 0x606   : > { %12104 = vst [vmem:[#allocation49_spill] sm:$0xff] %v10255_v25 }
 0x608   : > { %4469 = vmax.xlane.f32.xlu1 %v4468_v61 }
 0x609   : > { %v10262_v14 = vpop.eup %7091 }
 0x60a   : > { %v10264_v51 = vpop.eup %7093 }
 0x60b   : > { %v10270_v13 = vadd.f32 %v10264_v51, %v10262_v14 }
 0x60c   : > { %4475 = vmax.xlane.f32.xlu1 %v4474_v0  ;;  %v10278_v0 = vpop.f32.mrf.mxu0 }
 0x60d   : > { %12106 = vst [vmem:[#allocation58_spill] sm:$0xff] %v10270_v13  ;;  %12110 = vst [vmem:[#allocation55_spill] sm:$0xff] %v10278_v0 }
 0x610   : > { %2291 = vadd.xlane.f32.xlu1 %v12107_v60 }
 0x614   : > { %2297 = vadd.xlane.f32.xlu1 %v12108_v6  ;;  %v10282_v6 = vpop.f32.mrf.mxu0 }
 0x615   : > { %12111 = vst [vmem:[#allocation27_spill] sm:$0xff] %v10282_v6 }
 0x618   : > { %3494 = vadd.xlane.f32.xlu1 %v12109_v16  ;;  %v4404_v54 = vpop.xlane.xlu0 %4403 }
 0x619   : > { %v4491_v48 = vsub.f32 %v9764_v40, %v4404_v54  ;;  %v4492_v61 = vsub.f32 %v9770_v53, %v4404_v54 }
 0x61b   : > { %v4569_v25 = vmul.f32 1.442695, %v4491_v48  ;;  %v4571_v57 = vmul.f32 1.442695, %v4492_v61 }
 0x61c   : > { %3500 = vadd.xlane.f32.xlu1 %v9909_v17  ;;  %v4816_v21 = vpop.permute.xlu0 %4815 }
 0x61d   : > { %7095 = vpow2.f32 %v4569_v25  ;;  %6351 = vmatprep.subr.bf16.mxu0 %v4816_v21 }
 0x61e   : > { %7097 = vpow2.f32 %v4571_v57 }
 0x62a   : > { %v10280_v60 = vpop.eup %7095 }
 0x62b   : > { %v7098_v16 = vpop.eup %7097 }
 0x62c   : > { %v6219_v42 = vpop.f32.mrf.mxu0  ;;  %v10285_v40 = vadd.f32 %v7098_v16, %v10280_v60 }
 0x62e   : > { %12112 = vst [vmem:[#allocation65_spill] sm:$0xff] %v10285_v40  ;;  %v6220_v53 = vpop.f32.mrf.mxu0 }
 0x62f   : > { %v10287_v54 = vadd.f32 %v6220_v53, %v6219_v42 }
 0x630   : > { %v10289_v48 = vpop.f32.mrf.mxu0  ;;  %v4401_v17 = vpop.xlane.xlu1 %4400 }
 0x631   : > { %12113 = vst [vmem:[#allocation207_spill] sm:$0xff] %v10289_v48  ;;  %v4489_v21 = vsub.f32 %v12075_v15, %v4401_v17  ;;  %v4490_v57 = vsub.f32 %v9760_v29, %v4401_v17  ;;  %v4798_v48 = vpop.permute.xlu0 %4797  ;;  %v4765_v29 = vpack.c.bf16 %v10065_v55, %v9997_v3  ;;  %v4770_v3 = vpack.c.bf16 %v10218_v63, %v10264_v51 }
 0x632   : > { %v10293_v25 = vpop.f32.mrf.mxu0 }
 0x633   : > { %v4565_v61 = vmul.f32 1.442695, %v4489_v21  ;;  %v4567_v0 = vmul.f32 1.442695, %v4490_v57  ;;  %v4768_v21 = vpack.c.bf16 %v10115_v56, %v10154_v27 }
 0x634   : > { %v6225_v6 = vpop.f32.mrf.mxu0  ;;  %v4800_v13 = vpop.permute.xlu1 %4799 }
 0x635   : > { %7099 = vpow2.f32 %v4565_v61  ;;  %6352 = vmatpush3.bf16.msra.mxu0 %v4800_v13 }
 0x636   : > { %7101 = vpow2.f32 %v4567_v0  ;;  %v6226_v40 = vpop.f32.mrf.mxu0 }
 0x637   : > { %v10295_v47 = vadd.f32 %v6226_v40, %v6225_v6 }
 0x638   : > { %v10297_v42 = vpop.f32.mrf.mxu0  ;;  %v4814_v53 = vpop.permute.xlu1 %4813 }
 0x639   : > { %6353 = vmatprep.subr.bf16.mxu0 %v4814_v53 }
 0x63a   : > { %v10299_v15 = vpop.f32.mrf.mxu0  ;;  %6354 = vmatpush3.bf16.msra.mxu0 %v4798_v48  ;;  %v4767_v48 = vpack.c.bf16 %v10109_v24, %v10150_v52 }
 0x63b   : > { %12114 = vst [vmem:[#allocation208_spill] sm:$0xff] %v10299_v15 }
 0x63c   : > { %v6231_v17 = vpop.f32.mrf.mxu0 }
 0x63d   : > { %4878 = vmatmul.mubr.bf16.vlgmr.msra.gmra.mxu0 %v4765_v29 }
 0x63e   : > { %v6232_v13 = vpop.f32.mrf.mxu0  ;;  %4885 = vmatprep.mubr.bf16.mxu0 %v4768_v21 }
 0x63f   : > { %v10305_v0 = vadd.f32 %v6232_v13, %v6231_v17  ;;  %v4769_v13 = vpack.c.bf16 %v10214_v34, %v10262_v14 }
 0x640   : > { %v6234_v6 = vpop.f32.mrf.mxu0 }
 0x642   : > { %v7100_v40 = vpop.eup %7099  ;;  %v6235_v57 = vpop.f32.mrf.mxu0 }
 0x643   : > { %v7102_v61 = vpop.eup %7101  ;;  %v10307_v53 = vadd.f32 %v6235_v57, %v6234_v6 }
 0x644   : > { %v6237_v15 = vpop.f32.mrf.mxu0  ;;  %v10313_v55 = vadd.f32 %v7102_v61, %v7100_v40  ;;  %v4772_v24 = vpack.c.bf16 %v7098_v16, %v7102_v61 }
 0x645   : > { %12115 = vst [vmem:[#allocation209_spill] sm:$0xff] %v10307_v53  ;;  %4886 = vmatmul.mubr.bf16.gmra.mxu0 %v4767_v48 }
 0x646   : > { %v6238_v56 = vpop.f32.mrf.mxu0  ;;  %4893 = vmatprep.mubr.bf16.mxu0 %v4770_v3 }
 0x647   : > { %v10315_v27 = vadd.f32 %v6238_v56, %v6237_v15 }
 0x648   : > { %v6240_v29 = vpop.f32.mrf.mxu0 }
 0x64a   : > { %v6241_v17 = vpop.f32.mrf.mxu0 }
 0x64b   : > { %v10317_v21 = vadd.f32 %v6241_v17, %v6240_v29  ;;  %v4771_v29 = vpack.c.bf16 %v10280_v60, %v7100_v40 }
 0x64c   : > { %v6243_v6 = vpop.f32.mrf.mxu0 }
 0x64d   : > { %12116 = vst [vmem:[#allocation210_spill] sm:$0xff] %v10317_v21  ;;  %4894 = vmatmul.mubr.bf16.gmra.mxu0 %v4769_v13 }
 0x64e   : > { %v6244_v52 = vpop.f32.mrf.mxu0  ;;  %4901 = vmatprep.mubr.bf16.mxu0 %v4772_v24 }
 0x64f   : > { %v10321_v63 = vadd.f32 %v6244_v52, %v6243_v6 }
 0x650   : > { %v6246_v51 = vpop.f32.mrf.mxu0 }
 0x651   : > { %12117 = vst [vmem:[#allocation211_spill] sm:$0xff] %v10321_v63  ;;  %v4410_v57 = vpop.xlane.xlu0 %4409 }
 0x652   : > { %v6247_v48 = vpop.f32.mrf.mxu0  ;;  %v4495_v15 = vsub.f32 %v9786_v43, %v4410_v57  ;;  %v4496_v3 = vsub.f32 %v9798_v26, %v4410_v57 }
 0x653   : > { %v10325_v56 = vadd.f32 %v6247_v48, %v6246_v51 }
 0x654   : > { %v4577_v17 = vmul.f32 1.442695, %v4495_v15  ;;  %v4579_v34 = vmul.f32 1.442695, %v4496_v3  ;;  %v6249_v14 = vpop.f32.mrf.mxu0 }
 0x655   : > { %12118 = vst [vmem:[#allocation212_spill] sm:$0xff] %v10325_v56  ;;  %4902 = vmatmul.mubr.bf16.gmra.mxu0 %v4771_v29  ;;  %v4413_v16 = vpop.xlane.xlu0 %4412 }
 0x656   : > { %7103 = vpow2.f32 %v4577_v17  ;;  %v6250_v61 = vpop.f32.mrf.mxu0 }
 0x657   : > { %7105 = vpow2.f32 %v4579_v34  ;;  %v10328_v13 = vadd.f32 %v6250_v61, %v6249_v14 }
 0x658   : > { %v6252_v6 = vpop.f32.mrf.mxu0 }
 0x659   : > { %12119 = vst [vmem:[#allocation213_spill] sm:$0xff] %v10328_v13  ;;  %v10330_v24 = vpop.xlane.xlu0 %4418 }
 0x65a   : > { %v6253_v43 = vpop.f32.mrf.mxu0 }
 0x65b   : > { %v10332_v52 = vadd.f32 %v6253_v43, %v6252_v6 }
 0x65c   : > { %v6255_v26 = vpop.f32.mrf.mxu0 }
 0x65d   : > { %12120 = vst [vmem:[#allocation214_spill] sm:$0xff] %v10332_v52  ;;  %v10334_v51 = vpop.xlane.xlu0 %4424 }
 0x65e   : > { %v6256_v60 = vpop.f32.mrf.mxu0 }
 0x65f   : > { %v10336_v40 = vadd.f32 %v6256_v60, %v6255_v26  ;;  %v4497_v26 = vsub.f32 %v9812_v33, %v4413_v16 }
 0x660   : > { %v6258_v57 = vpop.f32.mrf.mxu0 }
 0x661   : > { %12121 = vst [vmem:[#allocation215_spill] sm:$0xff] %v10336_v40  ;;  %v10338_v48 = vpop.xlane.xlu0 %4430  ;;  %v4498_v40 = vsub.f32 %v9826_v8, %v4413_v16  ;;  %v4581_v63 = vmul.f32 1.442695, %v4497_v26 }
 0x662   : > { %v6259_v15 = vpop.f32.mrf.mxu0 }
 0x663   : > { %v10340_v3 = vpop.eup %7103  ;;  %v10342_v29 = vadd.f32 %v6259_v15, %v6258_v57 }
 0x664   : > { %v10344_v17 = vpop.eup %7105  ;;  %v6261_v34 = vpop.f32.mrf.mxu0 }
 0x665   : > { %12122 = vst [vmem:[#allocation216_spill] sm:$0xff] %v10342_v29  ;;  %v10346_v14 = vpop.xlane.xlu0 %4436  ;;  %v4696_v61 = vadd.f32 %v10344_v17, %v10340_v3 }
 0x666   : > { %v6262_v6 = vpop.f32.mrf.mxu0 }
 0x667   : > { %v10350_v43 = vadd.f32 %v6262_v6, %v6261_v34  ;;  %4697 = vadd.xlane.f32.xlu1 %v4696_v61  ;;  %v4583_v61 = vmul.f32 1.442695, %v4498_v40  ;;  %v4501_v40 = vsub.f32 %v9868_v2, %v10330_v24 }
 0x668   : > { %v6264_v60 = vpop.f32.mrf.mxu0 }
 0x669   : > { %12123 = vst [vmem:[#allocation217_spill] sm:$0xff] %v10350_v43  ;;  %v4407_v52 = vpop.xlane.xlu1 %4406  ;;  %v10354_v57 = vpop.xlane.xlu0 %4442 }
 0x66a   : > { %v4493_v15 = vsub.f32 %v9774_v58, %v4407_v52  ;;  %v4494_v29 = vsub.f32 %v9780_v1, %v4407_v52  ;;  %v6265_v56 = vpop.f32.mrf.mxu0 }
 0x66b   : > { %v10358_v13 = vadd.f32 %v6265_v56, %v6264_v60 }
 0x66c   : > { %v4573_v21 = vmul.f32 1.442695, %v4493_v15  ;;  %v4575_v34 = vmul.f32 1.442695, %v4494_v29  ;;  %v6267_v6 = vpop.f32.mrf.mxu0 }
 0x66d   : > { %12124 = vst [vmem:[#allocation218_spill] sm:$0xff] %v10358_v13  ;;  %v4416_v43 = vpop.xlane.xlu1 %4415  ;;  %v10360_v33 = vpop.xlane.xlu0 %4448 }
 0x66e   : > { %7107 = vpow2.f32 %v4573_v21  ;;  %v4499_v8 = vsub.f32 %v9840_v31, %v4416_v43  ;;  %v4500_v16 = vsub.f32 %v9854_v22, %v4416_v43  ;;  %v6268_v53 = vpop.f32.mrf.mxu0  ;;  %v4502_v21 = vsub.f32 %v9882_v18, %v10330_v24 }
 0x66f   : > { %7109 = vpow2.f32 %v4575_v34  ;;  %v10364_v58 = vadd.f32 %v6268_v53, %v6267_v6 }
 0x670   : > { %7111 = vpow2.f32 %v4581_v63  ;;  %v4585_v1 = vmul.f32 1.442695, %v4499_v8  ;;  %v4587_v56 = vmul.f32 1.442695, %v4500_v16  ;;  %v6270_v52 = vpop.f32.mrf.mxu0  ;;  %v4589_v8 = vmul.f32 1.442695, %v4501_v40 }
 0x671   : > { %12125 = vst [vmem:[#allocation219_spill] sm:$0xff] %v10364_v58  ;;  %7113 = vpow2.f32 %v4583_v61  ;;  %v4422_v29 = vpop.xlane.xlu1 %4421  ;;  %v4455_v26 = vpop.xlane.xlu0 %4454  ;;  %v4591_v18 = vmul.f32 1.442695, %v4502_v21  ;;  %v12245_v58 = vld [vmem:[#allocation139_spill] sm:$0xff] }
 0x672   : > { %7115 = vpow2.f32 %v4585_v1  ;;  %v4504_v31 = vsub.f32 %v9922_v62, %v4422_v29  ;;  %v6271_v22 = vpop.f32.mrf.mxu0  ;;  %v4525_v53 = vsub.f32 %v10132_v39, %v4455_v26  ;;  %v4526_v43 = vsub.f32 %v10140_v28, %v4455_v26 }
 0x673   : > { %7117 = vpow2.f32 %v4587_v56  ;;  %v10372_v63 = vadd.f32 %v6271_v22, %v6270_v52  ;;  %v4503_v24 = vsub.f32 %v9901_v41, %v4422_v29  ;;  %v4506_v41 = vsub.f32 %v9960_v4, %v10334_v51 }
 0x674   : > { %v4595_v60 = vmul.f32 1.442695, %v4504_v31  ;;  %v4637_v15 = vmul.f32 1.442695, %v4525_v53  ;;  %v6273_v34 = vpop.f32.mrf.mxu0  ;;  %v4639_v2 = vmul.f32 1.442695, %v4526_v43 }
 0x675   : > { %12126 = vst [vmem:[#allocation220_spill] sm:$0xff] %v10372_v63  ;;  %v10375_v6 = vpop.xlane.xlu1 %4427  ;;  %v4461_v61 = vpop.xlane.xlu0 %4460 }
 0x676   : > { %v6274_v62 = vpop.f32.mrf.mxu0  ;;  %v4529_v16 = vsub.f32 %v10152_v44, %v4461_v61  ;;  %7119 = vpow2.f32 %v4595_v60  ;;  %v4508_v39 = vsub.f32 %v10005_v49, %v10375_v6  ;;  %v4530_v28 = vsub.f32 %v10162_v35, %v4461_v61 }
 0x677   : > { %v10381_v1 = vadd.f32 %v6274_v62, %v6273_v34  ;;  %7121 = vpow2.f32 %v4637_v15  ;;  %v4593_v44 = vmul.f32 1.442695, %v4503_v24  ;;  %v4599_v24 = vmul.f32 1.442695, %v4506_v41 }
 0x678   : > { %v4645_v56 = vmul.f32 1.442695, %v4529_v16  ;;  %v6276_v52 = vpop.f32.mrf.mxu0  ;;  %7123 = vpow2.f32 %v4639_v2  ;;  %v4647_v26 = vmul.f32 1.442695, %v4530_v28  ;;  %v4603_v22 = vmul.f32 1.442695, %v4508_v39 }
 0x679   : > { %12127 = vst [vmem:[#allocation221_spill] sm:$0xff] %v10381_v1  ;;  %v10384_v40 = vpop.xlane.xlu1 %4433  ;;  %v4467_v21 = vpop.xlane.xlu0 %4466  ;;  %7125 = vpow2.f32 %v4591_v18 }
 0x67a   : > { %v6277_v29 = vpop.f32.mrf.mxu0  ;;  %v4533_v49 = vsub.f32 %v10176_v12, %v4467_v21  ;;  %7127 = vpow2.f32 %v4589_v8  ;;  %v4534_v53 = vsub.f32 %v10184_v46, %v4467_v21  ;;  %v4507_v46 = vsub.f32 %v9983_v50, %v10375_v6 }
 0x67b   : > { %v7108_v31 = vpop.eup %7107  ;;  %v10389_v35 = vadd.f32 %v6277_v29, %v6276_v52  ;;  %7129 = vpow2.f32 %v4645_v56  ;;  %v4512_v50 = vsub.f32 %v10052_v10, %v10384_v40 }
 0x67c   : > { %v7110_v43 = vpop.eup %7109  ;;  %v4653_v60 = vmul.f32 1.442695, %v4533_v49  ;;  %v6279_v15 = vpop.f32.mrf.mxu0  ;;  %7131 = vpow2.f32 %v4647_v26  ;;  %v4655_v2 = vmul.f32 1.442695, %v4534_v53  ;;  %v4773_v52 = vpack.c.bf16 %v10340_v3, %v7108_v31  ;;  %v12130_v3 = vld [vmem:[#allocation187_spill] sm:$0xff] }
 0x67d   : > { %12128 = vst [vmem:[#allocation222_spill] sm:$0xff] %v10389_v35  ;;  %v10392_v34 = vpop.eup %7111  ;;  %v10394_v4 = vpop.xlane.xlu1 %4439  ;;  %v4693_v18 = vadd.f32 %v7110_v43, %v7108_v31  ;;  %v4774_v12 = vpack.c.bf16 %v10344_v17, %v7110_v43  ;;  %7133 = vpow2.f32 %v4593_v44  ;;  %v4505_v26 = vsub.f32 %v9943_v9, %v10334_v51 }
 0x67e   : > { %v4473_v61 = vpop.xlane.xlu0 %4472  ;;  %v7114_v8 = vpop.eup %7113  ;;  %7135 = vpow2.f32 %v4603_v22  ;;  %v4510_v29 = vsub.f32 %v12130_v3, %v10338_v48  ;;  %v4601_v49 = vmul.f32 1.442695, %v4507_v46  ;;  %v4611_v22 = vmul.f32 1.442695, %v4512_v50  ;;  %v12136_v50 = vld [vmem:[#allocation73_spill] sm:$0xff] }
 0x67f   : > { %v6280_v62 = vpop.f32.mrf.mxu0  ;;  %v4537_v16 = vsub.f32 %v10204_v19, %v4473_v61  ;;  %v7116_v39 = vpop.eup %7115  ;;  %v4538_v56 = vsub.f32 %v10216_v7, %v4473_v61  ;;  %4694 = vadd.xlane.f32.xlu0 %v4693_v18  ;;  %4909 = vmatprep.mubr.bf16.mxu0 %v4774_v12  ;;  %7137 = vpow2.f32 %v4653_v60  ;;  %v4699_v9 = vadd.f32 %v7114_v8, %v10392_v34 }
 0x680   : > { %v10400_v28 = vadd.f32 %v6280_v62, %v6279_v15  ;;  %v7118_v17 = vpop.eup %7117  ;;  %7139 = vpow2.f32 %v4655_v2  ;;  %4910 = vmatmul.mubr.bf16.gmra.mxu0 %v4773_v52  ;;  %v4597_v60 = vmul.f32 1.442695, %v4505_v26  ;;  %v4607_v61 = vmul.f32 1.442695, %v4510_v29  ;;  %v12134_v62 = vld [vmem:[#allocation34_spill] sm:$0xff] }
 0x681   : > { %v4661_v6 = vmul.f32 1.442695, %v4537_v16  ;;  %v6282_v19 = vpop.f32.mrf.mxu0  ;;  %v4663_v21 = vmul.f32 1.442695, %v4538_v56  ;;  %v10408_v41 = vpop.xlane.xlu1 %4445  ;;  %v4702_v7 = vadd.f32 %v7118_v17, %v7116_v39  ;;  %v4776_v44 = vpack.c.bf16 %v7118_v17, %v7114_v8  ;;  %v12132_v8 = vld [vmem:[#allocation189_spill] sm:$0xff]  ;;  %v12135_v17 = vld [vmem:[#allocation196_spill] sm:$0xff] }
 0x682   : > { %12129 = vst [vmem:[#allocation223_spill] sm:$0xff] %v10400_v28  ;;  %7141 = vpow2.f32 %v4599_v24  ;;  %v4511_v24 = vsub.f32 %v12132_v8, %v10384_v40  ;;  %v4775_v16 = vpack.c.bf16 %v7116_v39, %v10392_v34  ;;  %v4516_v26 = vsub.f32 %v12135_v17, %v10394_v4  ;;  %v12137_v34 = vld [vmem:[#allocation186_spill] sm:$0xff]  ;;  %v12142_v8 = vld [vmem:[#allocation195_spill] sm:$0xff] }
 0x683   : > { %v6283_v31 = vpop.f32.mrf.mxu0  ;;  %4703 = vadd.xlane.f32.xlu1 %v4702_v7  ;;  %4917 = vmatprep.mubr.bf16.mxu0 %v4776_v44  ;;  %v10415_v10 = vpop.eup %7119  ;;  %7143 = vpow2.f32 %v4661_v6  ;;  %v4509_v39 = vsub.f32 %v12137_v34, %v10338_v48  ;;  %v12138_v7 = vld [vmem:[#allocation194_spill] sm:$0xff]  ;;  %v12140_v48 = vld [vmem:[#allocation192_spill] sm:$0xff]  ;;  %v12236_v28 = vld [vmem:[#allocation135_spill] sm:$0xff] }
 0x684   : > { %v10413_v51 = vadd.f32 %v6283_v31, %v6282_v19  ;;  %4700 = vadd.xlane.f32.xlu0 %v4699_v9  ;;  %v10417_v43 = vpop.eup %7121  ;;  %7145 = vpow2.f32 %v4663_v21  ;;  %v4514_v44 = vsub.f32 %v12138_v7, %v10346_v14  ;;  %v4609_v29 = vmul.f32 1.442695, %v4511_v24 }
 0x685   : > { %v6285_v53 = vpop.f32.mrf.mxu0  ;;  %v10419_v15 = vpop.xlane.xlu1 %4451  ;;  %7147 = vpow2.f32 %v4601_v49  ;;  %v12139_v49 = vld [vmem:[#allocation40_spill] sm:$0xff]  ;;  %v4515_v24 = vsub.f32 %v12142_v8, %v10394_v4  ;;  %v4520_v4 = vsub.f32 %v10102_v23, %v10408_v41 }
 0x686   : > { %12131 = vst [vmem:[#allocation187_spill] sm:$0xff] %v10413_v51  ;;  %v10421_v2 = vpop.eup %7123  ;;  %7149 = vpow2.f32 %v4611_v22  ;;  %v4513_v22 = vsub.f32 %v12140_v48, %v10346_v14  ;;  %v4615_v17 = vmul.f32 1.442695, %v4514_v44  ;;  %v12235_v51 = vld [vmem:[#allocation66_spill] sm:$0xff] }
 0x687   : > { %v6286_v18 = vpop.f32.mrf.mxu0  ;;  %v10423_v12 = vpop.eup %7125  ;;  %2303 = vadd.xlane.f32.xlu1 %v12134_v62  ;;  %v10433_v56 = vadd.f32 %v10421_v2, %v10417_v43  ;;  %7151 = vpow2.f32 %v4597_v60  ;;  %v12141_v60 = vld [vmem:[#allocation33_spill] sm:$0xff]  ;;  %v4617_v48 = vmul.f32 1.442695, %v4515_v24 }
 0x688   : > { %v10427_v46 = vadd.f32 %v6286_v18, %v6285_v53  ;;  %v10435_v52 = vpop.eup %7127  ;;  %2300 = vadd.xlane.f32.xlu0 %v12136_v50  ;;  %v4778_v40 = vpack.c.bf16 %v10415_v10, %v10423_v12  ;;  %4918 = vmatmul.mubr.bf16.gmra.mxu0 %v4775_v16  ;;  %7153 = vpow2.f32 %v4607_v61  ;;  %v4619_v53 = vmul.f32 1.442695, %v4516_v26 }
 0x689   : > { %v10442_v6 = vpop.eup %7129  ;;  %v10446_v19 = vpop.xlane.xlu1 %4457  ;;  %v4605_v18 = vmul.f32 1.442695, %v4509_v39  ;;  %7155 = vpow2.f32 %v4609_v29  ;;  %v4613_v34 = vmul.f32 1.442695, %v4513_v22  ;;  %v12144_v39 = vld [vmem:[#allocation110_spill] sm:$0xff]  ;;  %v12145_v29 = vld [vmem:[#allocation175_spill] sm:$0xff] }
 0x68a   : > { %12133 = vst [vmem:[#allocation189_spill] sm:$0xff] %v10427_v46  ;;  %v10448_v21 = vpop.eup %7131  ;;  %4925 = vmatprep.mubr.bf16.mxu0 %v4778_v40  ;;  %v12143_v40 = vld [vmem:[#allocation88_spill] sm:$0xff]  ;;  %7157 = vpow2.f32 %v4619_v53 }
 0x68b   : > { %v7134_v3 = vpop.eup %7133  ;;  %2309 = vadd.xlane.f32.xlu1 %v12139_v49  ;;  %v10455_v31 = vadd.f32 %v10448_v21, %v10442_v6  ;;  %7159 = vpow2.f32 %v4605_v18  ;;  %v4518_v49 = vsub.f32 %v12145_v29, %v10354_v57  ;;  %v12147_v29 = vld [vmem:[#allocation105_spill] sm:$0xff] }
 0x68c   : > { %v10457_v9 = vpop.eup %7135  ;;  %2306 = vadd.xlane.f32.xlu0 %v12141_v60  ;;  %v4777_v14 = vpack.c.bf16 %v7134_v3, %v10435_v52  ;;  %7161 = vpow2.f32 %v4615_v17 }
 0x68d   : > { %v10462_v61 = vpop.eup %7137  ;;  %v10466_v62 = vpop.xlane.xlu1 %4463  ;;  %7163 = vpow2.f32 %v4613_v34  ;;  %v4623_v17 = vmul.f32 1.442695, %v4518_v49  ;;  %v4705_v34 = vadd.f32 %v10435_v52, %v10423_v12  ;;  %v4524_v49 = vsub.f32 %v10130_v38, %v10419_v15 }
 0x68e   : > { %v10468_v16 = vpop.eup %7139  ;;  %7165 = vpow2.f32 %v4617_v48 }
 0x68f   : > { %v7142_v50 = vpop.eup %7141  ;;  %3506 = vadd.xlane.f32.xlu1 %v12143_v40  ;;  %v10474_v26 = vadd.f32 %v10468_v16, %v10462_v61  ;;  %v12146_v40 = vld [vmem:[#allocation115_spill] sm:$0xff] }
 0x690   : > { %3503 = vadd.xlane.f32.xlu0 %v12144_v39  ;;  %v4780_v7 = vpack.c.bf16 %v10457_v9, %v7142_v50  ;;  %v10480_v44 = vpop.eup %7143  ;;  %4926 = vmatmul.mubr.bf16.gmra.mxu0 %v4777_v14  ;;  %v4627_v39 = vmul.f32 1.442695, %v4520_v4 }
 0x691   : > { %v4470_v60 = vpop.xlane.xlu1 %4469  ;;  %v10484_v8 = vpop.eup %7145 }
 0x692   : > { %4933 = vmatprep.mubr.bf16.mxu0 %v4780_v7  ;;  %v4535_v22 = vsub.f32 %v10192_v59, %v4470_v60  ;;  %v4536_v23 = vsub.f32 %v10200_v45, %v4470_v60  ;;  %v7148_v53 = vpop.eup %7147  ;;  %v10491_v18 = vadd.f32 %v10484_v8, %v10480_v44  ;;  %v4708_v45 = vadd.f32 %v7134_v3, %v10415_v10 }
 0x693   : > { %3512 = vadd.xlane.f32.xlu1 %v12146_v40  ;;  %v10494_v46 = vpop.eup %7149 }
 0x694   : > { %v4657_v24 = vmul.f32 1.442695, %v4535_v22  ;;  %v4659_v14 = vmul.f32 1.442695, %v4536_v23  ;;  %3509 = vadd.xlane.f32.xlu0 %v12147_v29  ;;  %v7152_v7 = vpop.eup %7151  ;;  %v4519_v22 = vsub.f32 %v10100_v32, %v10408_v41  ;;  %v4714_v32 = vadd.f32 %v7148_v53, %v10457_v9  ;;  %v12149_v41 = vld [vmem:[#allocation197_spill] sm:$0xff] }
 0x695   : > { %v4476_v59 = vpop.xlane.xlu1 %4475  ;;  %v10501_v4 = vpop.eup %7153  ;;  %v4779_v10 = vpack.c.bf16 %v7148_v53, %v7152_v7  ;;  %v4522_v38 = vsub.f32 %v12149_v41, %v10360_v33  ;;  %v4711_v52 = vadd.f32 %v7152_v7, %v7142_v50  ;;  %v4523_v9 = vsub.f32 %v10124_v11, %v10419_v15  ;;  %v12150_v53 = vld [vmem:[#allocation46_spill] sm:$0xff]  ;;  %v12151_v7 = vld [vmem:[#allocation39_spill] sm:$0xff] }
 0x696   : > { %7167 = vpow2.f32 %v4657_v24  ;;  %v4539_v60 = vsub.f32 %v10253_v36, %v4476_v59  ;;  %v4540_v40 = vsub.f32 %v10260_v30, %v4476_v59  ;;  %v4782_v36 = vpack.c.bf16 %v10494_v46, %v10501_v4  ;;  %v12148_v30 = vld [vmem:[#allocation93_spill] sm:$0xff] }
 0x697   : > { %7169 = vpow2.f32 %v4659_v14  ;;  %4709 = vadd.xlane.f32.xlu1 %v4708_v45  ;;  %v4517_v12 = vsub.f32 %v12148_v30, %v10354_v57  ;;  %v4625_v23 = vmul.f32 1.442695, %v4519_v22  ;;  %v4635_v24 = vmul.f32 1.442695, %v4524_v49 }
 0x698   : > { %7171 = vpow2.f32 %v4627_v39  ;;  %v4665_v3 = vmul.f32 1.442695, %v4539_v60  ;;  %v4667_v48 = vmul.f32 1.442695, %v4540_v40  ;;  %4706 = vadd.xlane.f32.xlu0 %v4705_v34  ;;  %4934 = vmatmul.mubr.bf16.gmra.mxu0 %v4779_v10  ;;  %v7156_v39 = vpop.eup %7155  ;;  %v4631_v57 = vmul.f32 1.442695, %v4522_v38 }
 0x699   : > { %7173 = vpow2.f32 %v4623_v17  ;;  %4941 = vmatprep.mubr.bf16.mxu0 %v4782_v36  ;;  %v7158_v14 = vpop.eup %7157  ;;  %v4621_v29 = vmul.f32 1.442695, %v4517_v12  ;;  %v4528_v50 = vsub.f32 %v10148_v5, %v10446_v19  ;;  %v12152_v34 = vld [vmem:[#allocation176_spill] sm:$0xff]  ;;  %v4633_v15 = vmul.f32 1.442695, %v4523_v9  ;;  %v12155_v38 = vld [vmem:[#allocation161_spill] sm:$0xff] }
 0x69a   : > { %7175 = vpow2.f32 %v4665_v3  ;;  %v7160_v59 = vpop.eup %7159  ;;  %v4521_v22 = vsub.f32 %v12152_v34, %v10360_v33  ;;  %v12153_v10 = vld [vmem:[#allocation52_spill] sm:$0xff]  ;;  %v4527_v41 = vsub.f32 %v10144_v20, %v10446_v19  ;;  %v12157_v19 = vld [vmem:[#allocation75_spill] sm:$0xff] }
 0x69b   : > { %7177 = vpow2.f32 %v4667_v48  ;;  %4715 = vadd.xlane.f32.xlu1 %v4714_v32  ;;  %v7162_v17 = vpop.eup %7161  ;;  %v4781_v45 = vpack.c.bf16 %v7156_v39, %v7160_v59  ;;  %v4643_v5 = vmul.f32 1.442695, %v4528_v50  ;;  %v12154_v48 = vld [vmem:[#allocation45_spill] sm:$0xff]  ;;  %v12158_v50 = vld [vmem:[#allocation103_spill] sm:$0xff]  ;;  %v4717_v34 = vadd.f32 %v7160_v59, %v10501_v4  ;;  %v12160_v59 = vld [vmem:[#allocation80_spill] sm:$0xff] }
 0x69c   : > { %4712 = vadd.xlane.f32.xlu0 %v4711_v52  ;;  %7179 = vpow2.f32 %v4625_v23  ;;  %v4784_v60 = vpack.c.bf16 %v7158_v14, %v7162_v17  ;;  %v7164_v40 = vpop.eup %7163  ;;  %v4629_v30 = vmul.f32 1.442695, %v4521_v22  ;;  %v4641_v20 = vmul.f32 1.442695, %v4527_v41 }
 0x69d   : > { %7181 = vpow2.f32 %v4635_v24  ;;  %v7166_v49 = vpop.eup %7165  ;;  %v4532_v24 = vsub.f32 %v10170_v37, %v10466_v62  ;;  %v4723_v41 = vadd.f32 %v7164_v40, %v7162_v17  ;;  %v12163_v17 = vld [vmem:[#allocation60_spill] sm:$0xff] }
 0x69e   : > { %7183 = vpow2.f32 %v4621_v29  ;;  %v4783_v52 = vpack.c.bf16 %v7166_v49, %v7164_v40  ;;  %v12156_v29 = vld [vmem:[#allocation122_spill] sm:$0xff] }
 0x69f   : > { %2315 = vadd.xlane.f32.xlu1 %v12150_v53  ;;  %7185 = vpow2.f32 %v4631_v57 }
 0x6a0   : > { %2312 = vadd.xlane.f32.xlu0 %v12151_v7  ;;  %4942 = vmatmul.mubr.bf16.gmra.mxu0 %v4781_v45  ;;  %7187 = vpow2.f32 %v4633_v15  ;;  %v4651_v45 = vmul.f32 1.442695, %v4532_v24  ;;  %v4720_v7 = vadd.f32 %v7156_v39, %v10494_v46  ;;  %v12159_v15 = vld [vmem:[#allocation174_spill] sm:$0xff] }
 0x6a1   : > { %4949 = vmatprep.mubr.bf16.mxu0 %v4784_v60  ;;  %7189 = vpow2.f32 %v4643_v5 }
 0x6a2   : > { %7191 = vpow2.f32 %v4629_v30  ;;  %v4726_v30 = vadd.f32 %v7166_v49, %v7158_v14  ;;  %v12164_v49 = vld [vmem:[#allocation184_spill] sm:$0xff] }
 0x6a3   : > { %v10522_v11 = vpop.eup %7167  ;;  %2321 = vadd.xlane.f32.xlu1 %v12153_v10  ;;  %7193 = vpow2.f32 %v4641_v20  ;;  %v4531_v10 = vsub.f32 %v12159_v15, %v10466_v62  ;;  %v12161_v62 = vld [vmem:[#allocation51_spill] sm:$0xff]  ;;  %v12165_v20 = vld [vmem:[#allocation68_spill] sm:$0xff] }
 0x6a4   : > { %v10525_v3 = vpop.eup %7169  ;;  %2318 = vadd.xlane.f32.xlu0 %v12154_v48  ;;  %7195 = vpow2.f32 %v4651_v45  ;;  %v12166_v45 = vld [vmem:[#allocation185_spill] sm:$0xff] }
 0x6a5   : > { %v10528_v36 = vpop.eup %7171  ;;  %v10532_v33 = vadd.f32 %v10525_v3, %v10522_v11 }
 0x6a6   : > { %v10534_v12 = vpop.eup %7173 }
 0x6a7   : > { %v10536_v32 = vpop.eup %7175  ;;  %3518 = vadd.xlane.f32.xlu1 %v12155_v38  ;;  %v4786_v57 = vpack.c.bf16 %v10528_v36, %v10534_v12  ;;  %v4649_v38 = vmul.f32 1.442695, %v4531_v10 }
 0x6a8   : > { %v10541_v23 = vpop.eup %7177  ;;  %3515 = vadd.xlane.f32.xlu0 %v12156_v29  ;;  %4950 = vmatmul.mubr.bf16.gmra.mxu0 %v4783_v52  ;;  %v12162_v29 = vld [vmem:[#allocation90_spill] sm:$0xff] }
 0x6a9   : > { %v10550_v9 = vadd.f32 %v10541_v23, %v10536_v32  ;;  %4957 = vmatprep.mubr.bf16.mxu0 %v4786_v57  ;;  %v7180_v53 = vpop.eup %7179  ;;  %7197 = vpow2.f32 %v4649_v38  ;;  %v12184_v38 = vld [vmem:[#allocation193_spill] sm:$0xff] }
 0x6aa   : > { %v7182_v37 = vpop.eup %7181 }
 0x6ab   : > { %3524 = vadd.xlane.f32.xlu1 %v12157_v19  ;;  %v7184_v60 = vpop.eup %7183 }
 0x6ac   : > { %3521 = vadd.xlane.f32.xlu0 %v12158_v50  ;;  %v7186_v22 = vpop.eup %7185  ;;  %v4785_v5 = vpack.c.bf16 %v7180_v53, %v7184_v60  ;;  %v12167_v50 = vld [vmem:[#allocation53_spill] sm:$0xff] }
 0x6ad   : > { %v4788_v48 = vpack.c.bf16 %v7182_v37, %v7186_v22  ;;  %v7188_v46 = vpop.eup %7187 }
 0x6ae   : > { %v7190_v39 = vpop.eup %7189 }
 0x6af   : > { %4721 = vadd.xlane.f32.xlu1 %v4720_v7  ;;  %v7192_v4 = vpop.eup %7191  ;;  %v4790_v24 = vpack.c.bf16 %v7190_v39, %v10421_v2  ;;  %v4732_v7 = vadd.f32 %v7180_v53, %v10528_v36  ;;  %v4793_v36 = vpack.c.bf16 %v10522_v11, %v10462_v61  ;;  %v12169_v53 = vld [vmem:[#allocation41_spill] sm:$0xff]  ;;  %v12174_v61 = vld [vmem:[#allocation63_spill] sm:$0xff]  ;;  %v12175_v11 = vld [vmem:[#allocation108_spill] sm:$0xff] }
 0x6b0   : > { %4718 = vadd.xlane.f32.xlu0 %v4717_v34  ;;  %4958 = vmatmul.mubr.bf16.gmra.mxu0 %v4785_v5  ;;  %v4787_v52 = vpack.c.bf16 %v7188_v46, %v7192_v4  ;;  %v7194_v14 = vpop.eup %7193  ;;  %v4729_v34 = vadd.f32 %v7184_v60, %v10534_v12  ;;  %v4735_v10 = vadd.f32 %v7192_v4, %v7186_v22  ;;  %v12168_v5 = vld [vmem:[#allocation44_spill] sm:$0xff]  ;;  %v12170_v12 = vld [vmem:[#allocation78_spill] sm:$0xff] }
 0x6b1   : > { %4965 = vmatprep.mubr.bf16.mxu0 %v4788_v48  ;;  %v7196_v40 = vpop.eup %7195  ;;  %v4789_v57 = vpack.c.bf16 %v7194_v14, %v10417_v43  ;;  %v4794_v43 = vpack.c.bf16 %v10525_v3, %v10468_v16  ;;  %v12171_v16 = vld [vmem:[#allocation120_spill] sm:$0xff]  ;;  %v4744_v4 = vadd.f32 %v7194_v14, %v7190_v39 }
 0x6b2   : > { %v4792_v19 = vpack.c.bf16 %v7196_v40, %v10448_v21  ;;  %v4738_v21 = vadd.f32 %v7188_v46, %v7182_v37  ;;  %v12172_v3 = vld [vmem:[#allocation48_spill] sm:$0xff]  ;;  %v4795_v37 = vpack.c.bf16 %v10536_v32, %v10480_v44  ;;  %v12183_v32 = vld [vmem:[#allocation123_spill] sm:$0xff] }
 0x6b3   : > { %4727 = vadd.xlane.f32.xlu1 %v4726_v30  ;;  %v12173_v60 = vld [vmem:[#allocation28_spill] sm:$0xff]  ;;  %v12180_v30 = vld [vmem:[#allocation147_spill] sm:$0xff] }
 0x6b4   : > { %4724 = vadd.xlane.f32.xlu0 %v4723_v41  ;;  %v12176_v22 = vld [vmem:[#allocation36_spill] sm:$0xff]  ;;  %v12185_v46 = vld [vmem:[#allocation163_spill] sm:$0xff] }
 0x6b5   : > { %v12179_v48 = vld [vmem:[#allocation156_spill] sm:$0xff] }
 0x6b6   : > { %v7198_v2 = vpop.eup %7197  ;;  %v12181_v41 = vld [vmem:[#allocation152_spill] sm:$0xff] }
 0x6b7   : > { %2327 = vadd.xlane.f32.xlu1 %v12160_v59  ;;  %v4791_v15 = vpack.c.bf16 %v7198_v2, %v10442_v6  ;;  %v4796_v6 = vpack.c.bf16 %v10541_v23, %v10484_v8  ;;  %v12177_v8 = vld [vmem:[#allocation124_spill] sm:$0xff]  ;;  %v10598_v59 = vpop.xlane.xlu0 %2288 }
 0x6b8   : > { %2324 = vadd.xlane.f32.xlu0 %v12161_v62  ;;  %4966 = vmatmul.mubr.bf16.gmra.mxu0 %v4787_v52  ;;  %v12178_v23 = vld [vmem:[#allocation168_spill] sm:$0xff]  ;;  %v10600_v52 = vpop.xlane.xlu1 %2291  ;;  %v10603_v62 = vpop.f32.mrf.mxu0 }
 0x6b9   : > { %4973 = vmatprep.mubr.bf16.mxu0 %v4790_v24  ;;  %v12182_v44 = vld [vmem:[#allocation188_spill] sm:$0xff]  ;;  %12186 = vst [vmem:[#allocation34_spill] sm:$0xff] %v10603_v62  ;;  %v12187_v24 = vld [vmem:[#allocation198_spill] sm:$0xff] }
 0x6bb   : > { %2333 = vadd.xlane.f32.xlu1 %v12162_v29  ;;  %v10606_v29 = vpop.xlane.xlu0 %2294 }
 0x6bc   : > { %2330 = vadd.xlane.f32.xlu0 %v12163_v17  ;;  %v10608_v17 = vpop.xlane.xlu1 %2297 }
 0x6bf   : > { %3530 = vadd.xlane.f32.xlu1 %v12164_v49  ;;  %v12188_v49 = vld [vmem:[#allocation173_spill] sm:$0xff]  ;;  %v10614_v14 = vpop.xlane.xlu0 %3491 }
 0x6c0   : > { %3527 = vadd.xlane.f32.xlu0 %v12165_v20  ;;  %4974 = vmatmul.mubr.bf16.gmra.mxu0 %v4789_v57  ;;  %v4750_v57 = vadd.f32 %v7198_v2, %v7196_v40  ;;  %v10611_v20 = vpop.f32.mrf.mxu0 }
 0x6c1   : > { %4981 = vmatprep.mubr.bf16.mxu0 %v4792_v19  ;;  %12189 = vst [vmem:[#allocation196_spill] sm:$0xff] %v10611_v20  ;;  %v12190_v19 = vld [vmem:[#allocation25_spill] sm:$0xff]  ;;  %v12233_v20 = vld [vmem:[#allocation18_spill] sm:$0xff] }
 0x6c3   : > { %3536 = vadd.xlane.f32.xlu1 %v12166_v45  ;;  %v10623_v2 = vpop.xlane.xlu0 %3497 }
 0x6c4   : > { %3533 = vadd.xlane.f32.xlu0 %v12167_v50  ;;  %v12191_v50 = vld [vmem:[#allocation43_spill] sm:$0xff] }
 0x6c7   : > { %4733 = vadd.xlane.f32.xlu1 %v4732_v7 }
 0x6c8   : > { %4730 = vadd.xlane.f32.xlu0 %v4729_v34  ;;  %4982 = vmatmul.mubr.bf16.gmra.mxu0 %v4791_v15  ;;  %v12193_v15 = vld [vmem:[#allocation118_spill] sm:$0xff] }
 0x6c9   : > { %4989 = vmatprep.mubr.bf16.mxu0 %v4794_v43 }
 0x6cb   : > { %4739 = vadd.xlane.f32.xlu1 %v4738_v21 }
 0x6cc   : > { %4736 = vadd.xlane.f32.xlu0 %v4735_v10 }
 0x6cf   : > { %2267 = vadd.xlane.f32.xlu1 %v12168_v5  ;;  %v12196_v5 = vld [vmem:[#allocation50_spill] sm:$0xff] }
 0x6d0   : > { %2264 = vadd.xlane.f32.xlu0 %v12169_v53  ;;  %4990 = vmatmul.mubr.bf16.gmra.mxu0 %v4793_v36 }
 0x6d1   : > { %4997 = vmatprep.mubr.bf16.mxu0 %v4796_v6  ;;  %v12197_v6 = vld [vmem:[#allocation47_spill] sm:$0xff] }
 0x6d3   : > { %2339 = vadd.xlane.f32.xlu1 %v12170_v12 }
 0x6d4   : > { %2336 = vadd.xlane.f32.xlu0 %v12171_v16 }
 0x6d7   : > { %2273 = vadd.xlane.f32.xlu1 %v12172_v3 }
 0x6d8   : > { %2270 = vadd.xlane.f32.xlu0 %v12173_v60  ;;  %4998 = vmatmul.mubr.bf16.gmra.mxu0 %v4795_v37  ;;  %v12199_v37 = vld [vmem:[#allocation21_spill] sm:$0xff] }
 0x6db   : > { %2345 = vadd.xlane.f32.xlu1 %v12174_v61  ;;  %v12200_v61 = vld [vmem:[#allocation100_spill] sm:$0xff] }
 0x6dc   : > { %2342 = vadd.xlane.f32.xlu0 %v12175_v11 }
 0x6df   : > { %3470 = vadd.xlane.f32.xlu1 %v12176_v22 }
 0x6e0   : > { %3467 = vadd.xlane.f32.xlu0 %v12177_v8 }
 0x6e3   : > { %3542 = vadd.xlane.f32.xlu1 %v12178_v23 }
 0x6e4   : > { %3539 = vadd.xlane.f32.xlu0 %v12179_v48  ;;  %v12202_v48 = vld [vmem:[#allocation164_spill] sm:$0xff] }
 0x6e7   : > { %3476 = vadd.xlane.f32.xlu1 %v12180_v30 }
 0x6e8   : > { %3473 = vadd.xlane.f32.xlu0 %v12181_v41  ;;  %v12203_v41 = vld [vmem:[#allocation166_spill] sm:$0xff] }
 0x6eb   : > { %3548 = vadd.xlane.f32.xlu1 %v12182_v44 }
 0x6ec   : > { %3545 = vadd.xlane.f32.xlu0 %v12183_v32 }
 0x6ef   : > { %4673 = vadd.xlane.f32.xlu1 %v12184_v38 }
 0x6f0   : > { %4670 = vadd.xlane.f32.xlu0 %v12185_v46 }
 0x6f3   : > { %4745 = vadd.xlane.f32.xlu1 %v4744_v4  ;;  %v12205_v4 = vld [vmem:[#allocation190_spill] sm:$0xff] }
 0x6f4   : > { %4742 = vadd.xlane.f32.xlu0 %v10433_v56  ;;  %v10616_v56 = vpop.xlane.xlu1 %3494 }
 0x6f7   : > { %4679 = vadd.xlane.f32.xlu1 %v12187_v24 }
 0x6f8   : > { %4676 = vadd.xlane.f32.xlu0 %v12188_v49  ;;  %v10625_v43 = vpop.xlane.xlu1 %3500  ;;  %v12206_v49 = vld [vmem:[#allocation162_spill] sm:$0xff] }
 0x6fb   : > { %4751 = vadd.xlane.f32.xlu1 %v4750_v57 }
 0x6fc   : > { %4748 = vadd.xlane.f32.xlu0 %v10455_v31  ;;  %v12194_v31 = vld [vmem:[#allocation121_spill] sm:$0xff]  ;;  %v10631_v53 = vpop.xlane.xlu1 %4697 }
 0x6fd   : > { %v6355_v39 = vpop.f32.mrf.mxu0 }
 0x6ff   : > { %2279 = vadd.xlane.f32.xlu1 %v12190_v19  ;;  %v6356_v45 = vpop.f32.mrf.mxu0 }
 0x700   : > { %2276 = vadd.xlane.f32.xlu0 %v12191_v50  ;;  %v10620_v7 = vadd.f32 %v6356_v45, %v6355_v39  ;;  %v12208_v50 = vld [vmem:[#allocation177_spill] sm:$0xff] }
 0x701   : > { %v6358_v34 = vpop.f32.mrf.mxu0 }
 0x702   : > { %12192 = vst [vmem:[#allocation73_spill] sm:$0xff] %v10620_v7 }
 0x703   : > { %2351 = vadd.xlane.f32.xlu1 %v12193_v15  ;;  %v6359_v40 = vpop.f32.mrf.mxu0  ;;  %v12209_v15 = vld [vmem:[#allocation150_spill] sm:$0xff] }
 0x704   : > { %2348 = vadd.xlane.f32.xlu0 %v12194_v31  ;;  %v10628_v21 = vadd.f32 %v6359_v40, %v6358_v34 }
 0x705   : > { %v6361_v10 = vpop.f32.mrf.mxu0 }
 0x706   : > { %12195 = vst [vmem:[#allocation186_spill] sm:$0xff] %v10628_v21 }
 0x707   : > { %2285 = vadd.xlane.f32.xlu1 %v12196_v5  ;;  %v6362_v36 = vpop.f32.mrf.mxu0 }
 0x708   : > { %2282 = vadd.xlane.f32.xlu0 %v12197_v6  ;;  %v10634_v12 = vadd.f32 %v6362_v36, %v6361_v10  ;;  %v10636_v16 = vpop.xlane.xlu0 %4694  ;;  %v12211_v36 = vld [vmem:[#allocation191_spill] sm:$0xff] }
 0x709   : > { %v6364_v3 = vpop.f32.mrf.mxu0 }
 0x70a   : > { %12198 = vst [vmem:[#allocation194_spill] sm:$0xff] %v10634_v12 }
 0x70b   : > { %2357 = vadd.xlane.f32.xlu1 %v12199_v37  ;;  %v6365_v60 = vpop.f32.mrf.mxu0 }
 0x70c   : > { %2354 = vadd.xlane.f32.xlu0 %v12200_v61  ;;  %v10640_v11 = vadd.f32 %v6365_v60, %v6364_v3  ;;  %v10642_v22 = vpop.xlane.xlu1 %4703  ;;  %v12212_v3 = vld [vmem:[#allocation85_spill] sm:$0xff] }
 0x70d   : > { %v10644_v8 = vpop.xlane.xlu0 %4700  ;;  %v6367_v23 = vpop.f32.mrf.mxu0  ;;  %v12214_v61 = vld [vmem:[#allocation141_spill] sm:$0xff] }
 0x70e   : > { %12201 = vst [vmem:[#allocation40_spill] sm:$0xff] %v10640_v11  ;;  %v12237_v11 = vld [vmem:[#allocation136_spill] sm:$0xff] }
 0x70f   : > { %3482 = vadd.xlane.f32.xlu1 %v12202_v48  ;;  %v6368_v30 = vpop.f32.mrf.mxu0 }
 0x710   : > { %3479 = vadd.xlane.f32.xlu0 %v12203_v41  ;;  %v10648_v44 = vadd.f32 %v6368_v30, %v6367_v23  ;;  %v2304_v32 = vpop.xlane.xlu1 %2303  ;;  %v12215_v23 = vld [vmem:[#allocation142_spill] sm:$0xff] }
 0x711   : > { %7199 = vrcp.f32 %v2304_v32  ;;  %v2301_v38 = vpop.xlane.xlu0 %2300  ;;  %v6370_v46 = vpop.f32.mrf.mxu0  ;;  %v6076_v48 = vadd.f32 %v12215_v23, %v12214_v61  ;;  %v12221_v61 = vld [vmem:[#allocation54_spill] sm:$0xff] }
 0x712   : > { %12204 = vst [vmem:[#allocation192_spill] sm:$0xff] %v10648_v44  ;;  %7201 = vrcp.f32 %v2301_v38  ;;  %v12216_v38 = vld [vmem:[#allocation203_spill] sm:$0xff] }
 0x713   : > { %3554 = vadd.xlane.f32.xlu1 %v12205_v4  ;;  %v6371_v24 = vpop.f32.mrf.mxu0  ;;  %v12217_v4 = vld [vmem:[#allocation58_spill] sm:$0xff]  ;;  %7203 = vrcp.f32 %v10600_v52 }
 0x714   : > { %3551 = vadd.xlane.f32.xlu0 %v12206_v49  ;;  %v10652_v57 = vadd.f32 %v6371_v24, %v6370_v46  ;;  %v10654_v39 = vpop.xlane.xlu1 %2309  ;;  %v12218_v49 = vld [vmem:[#allocation140_spill] sm:$0xff]  ;;  %7205 = vrcp.f32 %v10606_v29  ;;  %v6064_v29 = vadd.f32 %v12237_v11, %v12236_v28  ;;  %v12240_v28 = vld [vmem:[#allocation137_spill] sm:$0xff] }
 0x715   : > { %v10656_v19 = vpop.xlane.xlu0 %2306  ;;  %v6373_v45 = vpop.f32.mrf.mxu0  ;;  %7207 = vrcp.f32 %v10598_v59 }
 0x716   : > { %12207 = vst [vmem:[#allocation33_spill] sm:$0xff] %v10652_v57  ;;  %v12231_v57 = vld [vmem:[#allocation10_spill] sm:$0xff]  ;;  %7209 = vrcp.f32 %v10614_v14 }
 0x717   : > { %3488 = vadd.xlane.f32.xlu1 %v12208_v50  ;;  %v6374_v34 = vpop.f32.mrf.mxu0  ;;  %7211 = vrcp.f32 %v10608_v17 }
 0x718   : > { %3485 = vadd.xlane.f32.xlu0 %v12209_v15  ;;  %v10660_v40 = vadd.f32 %v6374_v34, %v6373_v45  ;;  %v10662_v31 = vpop.xlane.xlu1 %3506  ;;  %7213 = vrcp.f32 %v10623_v2 }
 0x719   : > { %v10664_v10 = vpop.xlane.xlu0 %3503  ;;  %v6376_v5 = vpop.f32.mrf.mxu0  ;;  %7215 = vrcp.f32 %v10616_v56 }
 0x71a   : > { %12210 = vst [vmem:[#allocation195_spill] sm:$0xff] %v10660_v40  ;;  %7217 = vrcp.f32 %v10625_v43 }
 0x71b   : > { %3560 = vadd.xlane.f32.xlu1 %v12211_v36  ;;  %v6377_v6 = vpop.f32.mrf.mxu0  ;;  %7219 = vrcp.f32 %v10636_v16 }
 0x71c   : > { %3557 = vadd.xlane.f32.xlu0 %v12212_v3  ;;  %v10668_v37 = vadd.f32 %v6377_v6, %v6376_v5  ;;  %v10670_v60 = vpop.xlane.xlu1 %3512  ;;  %v12219_v5 = vld [vmem:[#allocation65_spill] sm:$0xff]  ;;  %7221 = vrcp.f32 %v10631_v53 }
 0x71d   : > { %v10674_v30 = vpop.xlane.xlu0 %3509  ;;  %7223 = vrcp.f32 %v10642_v22  ;;  %v6683_v22 = vld [vmem:[%s11452_s3 + $0x18] sm:$0xff]  }
 0x71e   : > { %12213 = vst [vmem:[#allocation88_spill] sm:$0xff] %v10668_v37  ;;  %v7200_v41 = vpop.eup %7199  ;;  %v12229_v37 = vld [vmem:[#allocation61_spill] sm:$0xff]  ;;  %7225 = vrcp.f32 %v10644_v8 }
 0x71f   : > { %v7202_v32 = vpop.eup %7201  ;;  %4685 = vadd.xlane.f32.xlu1 %v12216_v38  ;;  %v10677_v46 = vmul.f32 %v7200_v41, %v6076_v48  ;;  %v12223_v41 = vld [vmem:[#allocation8_spill] sm:$0xff] }
 0x720   : > { %4682 = vadd.xlane.f32.xlu0 %v12217_v4  ;;  %v10680_v24 = vpop.xlane.xlu1 %4709  ;;  %v10683_v45 = vmul.f32 %v7202_v32, %v12218_v49  ;;  %v12225_v38 = vld [vmem:[#allocation16_spill] sm:$0xff] }
 0x721   : > { %v10685_v50 = vpop.xlane.xlu0 %4706 }
 0x723   : > { %4757 = vadd.xlane.f32.xlu1 %v10532_v33 }
 0x724   : > { %4754 = vadd.xlane.f32.xlu0 %v10474_v26  ;;  %v10689_v34 = vpop.xlane.xlu1 %4715  ;;  %v12220_v26 = vld [vmem:[#allocation56_spill] sm:$0xff] }
 0x725   : > { %v10691_v15 = vpop.xlane.xlu0 %4712 }
 0x727   : > { %4691 = vadd.xlane.f32.xlu1 %v12219_v5  ;;  %v12226_v5 = vld [vmem:[#allocation9_spill] sm:$0xff] }
 0x728   : > { %4688 = vadd.xlane.f32.xlu0 %v10313_v55  ;;  %v10695_v36 = vpop.xlane.xlu1 %2315  ;;  %v12222_v55 = vld [vmem:[#allocation12_spill] sm:$0xff] }
 0x729   : > { %v10697_v6 = vpop.xlane.xlu0 %2312 }
 0x72b   : > { %4763 = vadd.xlane.f32.xlu1 %v10550_v9 }
 0x72c   : > { %4760 = vadd.xlane.f32.xlu0 %v10491_v18  ;;  %v10701_v3 = vpop.xlane.xlu1 %2321  ;;  %v12224_v18 = vld [vmem:[#allocation57_spill] sm:$0xff] }
 0x72d   : > { %v10703_v33 = vpop.xlane.xlu0 %2318 }
 0x72f   : > { %1169 = vadd.xlane.f32.xlu1 %v12220_v26  ;;  %v12227_v26 = vld [vmem:[#allocation59_spill] sm:$0xff] }
 0x730   : > { %1166 = vadd.xlane.f32.xlu0 %v12221_v61  ;;  %v10707_v23 = vpop.xlane.xlu1 %3518 }
 0x731   : > { %v10709_v48 = vpop.xlane.xlu0 %3515 }
 0x733   : > { %1175 = vadd.xlane.f32.xlu1 %v12222_v55 }
 0x734   : > { %1172 = vadd.xlane.f32.xlu0 %v12223_v41  ;;  %v10713_v32 = vpop.xlane.xlu1 %3524  ;;  %v12228_v41 = vld [vmem:[#allocation62_spill] sm:$0xff] }
 0x735   : > { %v10715_v9 = vpop.xlane.xlu0 %3521 }
 0x737   : > { %1181 = vadd.xlane.f32.xlu1 %v12224_v18 }
 0x738   : > { %1178 = vadd.xlane.f32.xlu0 %v12225_v38  ;;  %v10719_v4 = vpop.xlane.xlu1 %4721  ;;  %v12230_v38 = vld [vmem:[#allocation14_spill] sm:$0xff] }
 0x739   : > { %v10721_v49 = vpop.xlane.xlu0 %4718 }
 0x73b   : > { %1187 = vadd.xlane.f32.xlu1 %v12226_v5 }
 0x73c   : > { %1184 = vadd.xlane.f32.xlu0 %v12227_v26  ;;  %v10725_v61 = vpop.xlane.xlu1 %4727  ;;  %v12232_v26 = vld [vmem:[#allocation64_spill] sm:$0xff] }
 0x73d   : > { %v10727_v55 = vpop.xlane.xlu0 %4724 }
 0x73f   : > { %1193 = vadd.xlane.f32.xlu1 %v12228_v41 }
 0x740   : > { %1190 = vadd.xlane.f32.xlu0 %v12229_v37  ;;  %v10731_v40 = vpop.xlane.xlu1 %2327  ;;  %v12234_v37 = vld [vmem:[#allocation11_spill] sm:$0xff]  ;;  %v6379_v35 = vpop.f32.mrf.mxu0 }
 0x741   : > { %v10733_v18 = vpop.xlane.xlu0 %2324 }
 0x742   : > { %v6380_v63 = vpop.f32.mrf.mxu0 }
 0x743   : > { %1199 = vadd.xlane.f32.xlu1 %v12230_v38 }
 0x744   : > { %1196 = vadd.xlane.f32.xlu0 %v12231_v57  ;;  %v10737_v44 = vpop.xlane.xlu1 %2333 }
 0x745   : > { %v10739_v5 = vpop.xlane.xlu0 %2330 }
 0x747   : > { %1205 = vadd.xlane.f32.xlu1 %v12232_v26 }
 0x748   : > { %1202 = vadd.xlane.f32.xlu0 %v12233_v20  ;;  %v10743_v62 = vpop.xlane.xlu1 %3530 }
 0x749   : > { %v10745_v41 = vpop.xlane.xlu0 %3527 }
 0x74b   : > { %1211 = vadd.xlane.f32.xlu1 %v12234_v37 }
 0x74c   : > { %1208 = vadd.xlane.f32.xlu0 %v12235_v51  ;;  %v10750_v38 = vpop.xlane.xlu1 %3536  ;;  %v7204_v51 = vpop.eup %7203 }
 0x74d   : > { %v10752_v57 = vpop.xlane.xlu0 %3533  ;;  %v2641_v21 = vmul.f32 %v7204_v51, %v6064_v29  ;;  %v7206_v14 = vpop.eup %7205  ;;  %v12242_v51 = vld [vmem:[#allocation134_spill] sm:$0xff] }
 0x74e   : > { %v7208_v2 = vpop.eup %7207  ;;  %v2642_v56 = vmul.f32 %v7206_v14, %v12240_v28 }
 0x74f   : > { %v7210_v11 = vpop.eup %7209  ;;  %v2640_v29 = vmul.f32 %v7208_v2, %v12242_v51  ;;  %v6382_v51 = vpop.f32.mrf.mxu0 }
 0x750   : > { %v10756_v26 = vpop.xlane.xlu1 %4733  ;;  %v7212_v43 = vpop.eup %7211  ;;  %v3843_v14 = vmul.f32 %v7210_v11, %v10287_v54 }
 0x751   : > { %v10758_v20 = vpop.xlane.xlu0 %4730  ;;  %v7214_v28 = vpop.eup %7213 }
 0x752   : > { %v7216_v2 = vpop.eup %7215  ;;  %v3845_v53 = vmul.f32 %v7214_v28, %v10295_v47 }
 0x754   : > { %v10762_v52 = vpop.xlane.xlu1 %4739 }
 0x755   : > { %v10764_v37 = vpop.xlane.xlu0 %4736 }
 0x758   : > { %v10770_v59 = vpop.xlane.xlu1 %2267 }
 0x759   : > { %12238 = vst [vmem:[#allocation110_spill] sm:$0xff] %v10770_v59  ;;  %v10772_v12 = vpop.xlane.xlu0 %2264 }
 0x75c   : > { %2714 = vrot.lane.b32.xlu1 %v2641_v21, %s7561_s22  ;;  %v10777_v17 = vpop.xlane.xlu1 %2339  ;;  %v12244_v21 = vld [vmem:[#allocation138_spill] sm:$0xff] }
 0x75d   : > { %12239 = vst [vmem:[#allocation175_spill] sm:$0xff] %v10777_v17  ;;  %v10779_v7 = vpop.xlane.xlu0 %2336  ;;  %v6070_v13 = vadd.f32 %v12245_v58, %v12244_v21  ;;  %v6381_v58 = vadd.f32 %v6380_v63, %v6379_v35 }
 0x760   : > { %v10782_v1 = vpop.xlane.xlu1 %2273  ;;  %2716 = vrot.lane.b32.xlu1 %v2642_v56, %s7561_s22  ;;  %v2643_v56 = vmul.f32 %v7212_v43, %v6070_v13  ;;  %v6383_v13 = vpop.f32.mrf.mxu0 }
 0x761   : > { %12241 = vst [vmem:[#allocation115_spill] sm:$0xff] %v10782_v1  ;;  %v10786_v16 = vpop.xlane.xlu0 %2270 }
 0x762   : > { %12243 = vst [vmem:[#allocation105_spill] sm:$0xff] %v10786_v16  ;;  %2712 = vrot.lane.b32.xlu0 %v2640_v29, %s7561_s22  ;;  %v12248_v16 = vld [vmem:[#allocation207_spill] sm:$0xff]  ;;  %v7218_v29 = vpop.eup %7217 }
 0x763   : > { %v6224_v59 = vadd.f32 %v10293_v25, %v12248_v16  ;;  %v7220_v21 = vpop.eup %7219  ;;  %v6384_v25 = vadd.f32 %v6383_v13, %v6382_v51 }
 0x764   : > { %v10793_v17 = vpop.xlane.xlu1 %2345  ;;  %3915 = vrot.lane.b32.xlu1 %v3843_v14, %s7560_s21  ;;  %v12249_v14 = vld [vmem:[#allocation208_spill] sm:$0xff] }
 0x765   : > { %12246 = vst [vmem:[#allocation93_spill] sm:$0xff] %v10793_v17  ;;  %v10796_v1 = vpop.xlane.xlu0 %2342  ;;  %v3844_v11 = vmul.f32 %v7216_v2, %v6224_v59  ;;  %v6230_v17 = vadd.f32 %v12249_v14, %v10297_v42  ;;  %v7222_v59 = vpop.eup %7221  ;;  %v6679_v2 = vld [vmem:[%s11452_s3 + $0x38] sm:$0xff]  }
 0x766   : > { %12247 = vst [vmem:[#allocation197_spill] sm:$0xff] %v10796_v1  ;;  %2718 = vrot.lane.b32.xlu0 %v2643_v56, %s7561_s22  ;;  %v5046_v1 = vmul.f32 %v7220_v21, %v6381_v58  ;;  %v5047_v16 = vmul.f32 %v7222_v59, %v6384_v25  ;;  %6523 = vmatprep.subr.bf16.mxu1 %v6679_v2 }
 0x767   : > { %v3846_v47 = vmul.f32 %v7218_v29, %v6230_v17  ;;  %6475 = vmatprep.subr.bf16.mxu0 %v6679_v2  ;;  %6531 = vmatpush3.bf16.msra.mxu1 %v6679_v2 }
 0x768   : > { %v10802_v54 = vpop.xlane.xlu1 %3470  ;;  %3919 = vrot.lane.b32.xlu1 %v3845_v53, %s7560_s21  ;;  %6476 = vmatpush3.bf16.msra.mxu0 %v6679_v2  ;;  %v6385_v2 = vpop.f32.mrf.mxu0 }
 0x769   : > { %v10805_v43 = vpop.xlane.xlu0 %3467 }
 0x76a   : > { %3917 = vrot.lane.b32.xlu0 %v3844_v11, %s7560_s21 }
 0x76c   : > { %v10810_v63 = vpop.xlane.xlu1 %3542  ;;  %5118 = vrot.lane.b32.xlu1 %v5046_v1, %s7559_s8  ;;  %v6680_v1 = vld [vmem:[%s11452_s3 + $0x30] sm:$0xff]  }
 0x76d   : > { %v10813_v35 = vpop.xlane.xlu0 %3539  ;;  %6524 = vmatprep.subr.bf16.mxu1 %v6680_v1  ;;  %6477 = vmatprep.subr.bf16.mxu0 %v6680_v1 }
 0x76e   : > { %3921 = vrot.lane.b32.xlu0 %v3846_v47, %s7560_s21  ;;  %6532 = vmatpush3.bf16.msra.mxu1 %v6680_v1 }
 0x76f   : > { %6478 = vmatpush3.bf16.msra.mxu0 %v6680_v1 }
 0x770   : > { %v10816_v28 = vpop.xlane.xlu1 %3476 }
 0x771   : > { %v10818_v56 = vpop.xlane.xlu0 %3473 }
 0x772   : > { %5120 = vrot.lane.b32.xlu0 %v5047_v16, %s7559_s8 }
 0x774   : > { %v10821_v42 = vpop.xlane.xlu1 %3548 }
 0x775   : > { %v10829_v17 = vpop.xlane.xlu0 %3545 }
 0x778   : > { %v10831_v51 = vpop.xlane.xlu1 %4673 }
 0x779   : > { %12250 = vst [vmem:[#allocation46_spill] sm:$0xff] %v10831_v51  ;;  %v10833_v58 = vpop.xlane.xlu0 %4670 }
 0x77c   : > { %v10835_v53 = vpop.xlane.xlu1 %4745 }
 0x77d   : > { %12251 = vst [vmem:[#allocation39_spill] sm:$0xff] %v10835_v53  ;;  %v10837_v29 = vpop.xlane.xlu0 %4742  ;;  %v12262_v53 = vld [vmem:[#allocation125_spill] sm:$0xff] }
 0x77e   : > { %12252 = vst [vmem:[#allocation176_spill] sm:$0xff] %v10837_v29 }
 0x780   : > { %v10839_v11 = vpop.xlane.xlu1 %4679 }
 0x781   : > { %12253 = vst [vmem:[#allocation52_spill] sm:$0xff] %v10839_v11  ;;  %v10841_v21 = vpop.xlane.xlu0 %4676  ;;  %v12263_v11 = vld [vmem:[#allocation126_spill] sm:$0xff] }
 0x782   : > { %12254 = vst [vmem:[#allocation45_spill] sm:$0xff] %v10841_v21 }
 0x784   : > { %v10843_v13 = vpop.xlane.xlu1 %4751 }
 0x785   : > { %12255 = vst [vmem:[#allocation161_spill] sm:$0xff] %v10843_v13  ;;  %v10845_v14 = vpop.xlane.xlu0 %4748  ;;  %v6681_v13 = vld [vmem:[%s11452_s3 + $0x28] sm:$0xff]  }
 0x786   : > { %12256 = vst [vmem:[#allocation122_spill] sm:$0xff] %v10845_v14  ;;  %6525 = vmatprep.subr.bf16.mxu1 %v6681_v13  ;;  %6479 = vmatprep.subr.bf16.mxu0 %v6681_v13 }
 0x787   : > { %6533 = vmatpush3.bf16.msra.mxu1 %v6681_v13  ;;  %6480 = vmatpush3.bf16.msra.mxu0 %v6681_v13 }
 0x788   : > { %v10847_v25 = vpop.xlane.xlu1 %2279 }
 0x789   : > { %12257 = vst [vmem:[#allocation75_spill] sm:$0xff] %v10847_v25  ;;  %v10849_v47 = vpop.xlane.xlu0 %2276  ;;  %v6386_v25 = vpop.f32.mrf.mxu0 }
 0x78a   : > { %12258 = vst [vmem:[#allocation103_spill] sm:$0xff] %v10849_v47  ;;  %v12266_v47 = vld [vmem:[#allocation69_spill] sm:$0xff] }
 0x78c   : > { %v10851_v59 = vpop.xlane.xlu1 %2351 }
 0x78d   : > { %12259 = vst [vmem:[#allocation174_spill] sm:$0xff] %v10851_v59  ;;  %v10853_v16 = vpop.xlane.xlu0 %2348  ;;  %v12267_v59 = vld [vmem:[#allocation67_spill] sm:$0xff] }
 0x78e   : > { %12260 = vst [vmem:[#allocation80_spill] sm:$0xff] %v10853_v16 }
 0x790   : > { %v10855_v1 = vpop.xlane.xlu1 %2285  ;;  %1142 = vadd.xlane.f32.xlu1 %v12262_v53  ;;  %v6682_v53 = vld [vmem:[%s11452_s3 + $0x20] sm:$0xff]  }
 0x791   : > { %12261 = vst [vmem:[#allocation51_spill] sm:$0xff] %v10855_v1  ;;  %1145 = vadd.xlane.f32.xlu0 %v12263_v11  ;;  %v10859_v21 = vpop.xlane.xlu0 %2282  ;;  %v6388_v11 = vpop.f32.mrf.mxu0  ;;  %6526 = vmatprep.subr.bf16.mxu1 %v6682_v53 }
 0x792   : > { %12264 = vst [vmem:[#allocation90_spill] sm:$0xff] %v10859_v21  ;;  %6481 = vmatprep.subr.bf16.mxu0 %v6682_v53  ;;  %6534 = vmatpush3.bf16.msra.mxu1 %v6682_v53 }
 0x793   : > { %6482 = vmatpush3.bf16.msra.mxu0 %v6682_v53  ;;  %6527 = vmatprep.subr.bf16.mxu1 %v6683_v22  ;;  %v7224_v53 = vpop.eup %7223 }
 0x794   : > { %v10864_v14 = vpop.xlane.xlu1 %2357  ;;  %1217 = vadd.xlane.f32.xlu1 %v12266_v47  ;;  %v6389_v47 = vpop.f32.mrf.mxu0  ;;  %6483 = vmatprep.subr.bf16.mxu0 %v6683_v22 }
 0x795   : > { %12265 = vst [vmem:[#allocation60_spill] sm:$0xff] %v10864_v14  ;;  %1214 = vadd.xlane.f32.xlu0 %v12267_v59  ;;  %v10869_v1 = vpop.xlane.xlu0 %2354  ;;  %v6390_v13 = vadd.f32 %v6389_v47, %v6388_v11  ;;  %v6387_v47 = vadd.f32 %v6386_v25, %v6385_v2 }
 0x796   : > { %12268 = vst [vmem:[#allocation184_spill] sm:$0xff] %v10869_v1  ;;  %6535 = vmatpush3.bf16.msra.mxu1 %v6683_v22 }
 0x797   : > { %6484 = vmatpush3.bf16.msra.mxu0 %v6683_v22  ;;  %v6686_v22 = vld [vmem:[%s11452_s3] sm:$0xff]  }
 0x798   : > { %v10874_v21 = vpop.xlane.xlu1 %3482 }
 0x799   : > { %12269 = vst [vmem:[#allocation68_spill] sm:$0xff] %v10874_v21  ;;  %v10876_v14 = vpop.xlane.xlu0 %3479  ;;  %v6684_v21 = vld [vmem:[%s11452_s3 + $0x10] sm:$0xff]  }
 0x79a   : > { %12270 = vst [vmem:[#allocation185_spill] sm:$0xff] %v10876_v14  ;;  %6528 = vmatprep.subr.bf16.mxu1 %v6684_v21  ;;  %6485 = vmatprep.subr.bf16.mxu0 %v6684_v21 }
 0x79b   : > { %6536 = vmatpush3.bf16.msra.mxu1 %v6684_v21  ;;  %6486 = vmatpush3.bf16.msra.mxu0 %v6684_v21 }
 0x79c   : > { %v10882_v59 = vpop.xlane.xlu1 %3554 }
 0x79d   : > { %12271 = vst [vmem:[#allocation53_spill] sm:$0xff] %v10882_v59  ;;  %v10884_v1 = vpop.xlane.xlu0 %3551  ;;  %v5049_v59 = vmul.f32 %v7224_v53, %v6390_v13  ;;  %v7226_v13 = vpop.eup %7225 }
 0x79e   : > { %12272 = vst [vmem:[#allocation44_spill] sm:$0xff] %v10884_v1  ;;  %v6685_v1 = vld [vmem:[%s11452_s3 + $0x8] sm:$0xff]  }
 0x79f   : > { %6529 = vmatprep.subr.bf16.mxu1 %v6685_v1  ;;  %6487 = vmatprep.subr.bf16.mxu0 %v6685_v1 }
 0x7a0   : > { %v10889_v8 = vpop.xlane.xlu1 %3488  ;;  %6537 = vmatpush3.bf16.msra.mxu1 %v6685_v1  ;;  %6488 = vmatpush3.bf16.msra.mxu0 %v6685_v1 }
 0x7a1   : > { %12273 = vst [vmem:[#allocation41_spill] sm:$0xff] %v10889_v8  ;;  %v10891_v14 = vpop.xlane.xlu0 %3485  ;;  %v5048_v8 = vmul.f32 %v7226_v13, %v6387_v47  ;;  %6530 = vmatprep.subr.bf16.mxu1 %v6686_v22  ;;  %6489 = vmatprep.subr.bf16.mxu0 %v6686_v22 }
 0x7a2   : > { %12274 = vst [vmem:[#allocation78_spill] sm:$0xff] %v10891_v14 }
 0x7a4   : > { %v10896_v11 = vpop.xlane.xlu1 %3560  ;;  %6538 = vmatpush3.bf16.msra.mxu1 %v6686_v22  ;;  %6490 = vmatpush3.bf16.msra.mxu0 %v6686_v22 }
 0x7a5   : > { %12275 = vst [vmem:[#allocation120_spill] sm:$0xff] %v10896_v11  ;;  %v10898_v16 = vpop.xlane.xlu0 %3557  ;;  %5124 = vrot.lane.b32.xlu1 %v5049_v59, %s7559_s8 }
 0x7a6   : > { %12276 = vst [vmem:[#allocation48_spill] sm:$0xff] %v10898_v16  ;;  %v12285_v16 = vld [vmem:[#allocation86_spill] sm:$0xff] }
 0x7a8   : > { %v10904_v53 = vpop.xlane.xlu1 %4685 }
 0x7a9   : > { %12277 = vst [vmem:[#allocation28_spill] sm:$0xff] %v10904_v53  ;;  %v10906_v21 = vpop.xlane.xlu0 %4682 }
 0x7aa   : > { %12278 = vst [vmem:[#allocation63_spill] sm:$0xff] %v10906_v21 }
 0x7ab   : > { %5122 = vrot.lane.b32.xlu0 %v5048_v8, %s7559_s8 }
 0x7ac   : > { %v10909_v25 = vpop.xlane.xlu1 %4757 }
 0x7ad   : > { %12279 = vst [vmem:[#allocation108_spill] sm:$0xff] %v10909_v25  ;;  %v10911_v2 = vpop.xlane.xlu0 %4754 }
 0x7ae   : > { %12280 = vst [vmem:[#allocation36_spill] sm:$0xff] %v10911_v2 }
 0x7b0   : > { %v10913_v59 = vpop.xlane.xlu1 %4691 }
 0x7b1   : > { %12281 = vst [vmem:[#allocation124_spill] sm:$0xff] %v10913_v59  ;;  %v10915_v11 = vpop.xlane.xlu0 %4688 }
 0x7b2   : > { %12282 = vst [vmem:[#allocation168_spill] sm:$0xff] %v10915_v11 }
 0x7b4   : > { %v10917_v1 = vpop.xlane.xlu1 %4763 }
 0x7b5   : > { %12283 = vst [vmem:[#allocation156_spill] sm:$0xff] %v10917_v1  ;;  %v10919_v53 = vpop.xlane.xlu0 %4760 }
 0x7b6   : > { %12284 = vst [vmem:[#allocation147_spill] sm:$0xff] %v10919_v53 }
 0x7b8   : > { %v1170_v47 = vpop.xlane.xlu1 %1169 }
 0x7b9   : > { %7227 = vrcp.f32 %v1170_v47  ;;  %v1167_v13 = vpop.xlane.xlu0 %1166  ;;  %v12286_v47 = vld [vmem:[#allocation84_spill] sm:$0xff] }
 0x7ba   : > { %7229 = vrcp.f32 %v1167_v13 }
 0x7bc   : > { %v1176_v21 = vpop.xlane.xlu1 %1175 }
 0x7bd   : > { %7231 = vrcp.f32 %v1176_v21  ;;  %v1173_v8 = vpop.xlane.xlu0 %1172  ;;  %v12287_v21 = vld [vmem:[#allocation127_spill] sm:$0xff] }
 0x7be   : > { %7233 = vrcp.f32 %v1173_v8 }
 0x7c0   : > { %v1182_v22 = vpop.xlane.xlu1 %1181 }
 0x7c1   : > { %7235 = vrcp.f32 %v1182_v22  ;;  %v1179_v25 = vpop.xlane.xlu0 %1178 }
 0x7c2   : > { %7237 = vrcp.f32 %v1179_v25  ;;  %v12288_v25 = vld [vmem:[#allocation128_spill] sm:$0xff] }
 0x7c4   : > { %v1188_v2 = vpop.xlane.xlu1 %1187 }
 0x7c5   : > { %7239 = vrcp.f32 %v1188_v2  ;;  %v1185_v59 = vpop.xlane.xlu0 %1184 }
 0x7c6   : > { %v7228_v11 = vpop.eup %7227  ;;  %7241 = vrcp.f32 %v1185_v59  ;;  %v12289_v59 = vld [vmem:[#allocation89_spill] sm:$0xff] }
 0x7c7   : > { %v7230_v1 = vpop.eup %7229  ;;  %v1567_v53 = vmul.f32 %v7228_v11, %v12285_v16  ;;  %v12290_v16 = vld [vmem:[#allocation87_spill] sm:$0xff] }
 0x7c8   : > { %v1194_v14 = vpop.xlane.xlu1 %1193  ;;  %v1566_v51 = vmul.f32 %v7230_v1, %v12286_v47 }
 0x7c9   : > { %7243 = vrcp.f32 %v1194_v14  ;;  %v1191_v13 = vpop.xlane.xlu0 %1190  ;;  %1148 = vadd.xlane.f32.xlu1 %v12287_v21  ;;  %1599 = vst.msk [vmem:[#allocation4 + $0x48] sm:$0xff] %vm563_vm0, %v1567_v53  ;;  %v12291_v14 = vld [vmem:[#allocation20_spill] sm:$0xff]  ;;  %v12292_v53 = vld [vmem:[#allocation13_spill] sm:$0xff] }
 0x7ca   : > { %v7232_v8 = vpop.eup %7231  ;;  %7245 = vrcp.f32 %v1191_v13  ;;  %1151 = vadd.xlane.f32.xlu0 %v12288_v25  ;;  %1598 = vst.msk [vmem:[#allocation4 + $0x40] sm:$0xff] %vm563_vm0, %v1566_v51  ;;  %v12293_v51 = vld [vmem:[#allocation92_spill] sm:$0xff]  ;;  %v12294_v25 = vld [vmem:[#allocation91_spill] sm:$0xff] }
 0x7cb   : > { %v7234_v2 = vpop.eup %7233  ;;  %v1569_v22 = vmul.f32 %v7232_v8, %v12289_v59 }
 0x7cc   : > { %v1200_v29 = vpop.xlane.xlu1 %1199  ;;  %v1568_v11 = vmul.f32 %v7234_v2, %v12290_v16  ;;  %v12295_v16 = vld [vmem:[#allocation96_spill] sm:$0xff] }
 0x7cd   : > { %7247 = vrcp.f32 %v1200_v29  ;;  %v1197_v1 = vpop.xlane.xlu0 %1196  ;;  %1223 = vadd.xlane.f32.xlu1 %v12291_v14  ;;  %1601 = vst.msk [vmem:[#allocation4 + $0x58] sm:$0xff] %vm563_vm0, %v1569_v22 }
 0x7ce   : > { %v7236_v47 = vpop.eup %7235  ;;  %7249 = vrcp.f32 %v1197_v1  ;;  %1220 = vadd.xlane.f32.xlu0 %v12292_v53  ;;  %1600 = vst.msk [vmem:[#allocation4 + $0x50] sm:$0xff] %vm563_vm0, %v1568_v11 }
 0x7cf   : > { %v7238_v13 = vpop.eup %7237  ;;  %v1571_v21 = vmul.f32 %v7236_v47, %v12293_v51  ;;  %7251 = vrcp.f32 %v10656_v19  ;;  %v12296_v19 = vld [vmem:[#allocation94_spill] sm:$0xff]  ;;  %v12297_v51 = vld [vmem:[#allocation99_spill] sm:$0xff] }
 0x7d0   : > { %v1206_v8 = vpop.xlane.xlu1 %1205  ;;  %v1570_v2 = vmul.f32 %v7238_v13, %v12294_v25 }
 0x7d1   : > { %7253 = vrcp.f32 %v1206_v8  ;;  %v1203_v29 = vpop.xlane.xlu0 %1202  ;;  %1603 = vst.msk [vmem:[#allocation4 + $0x68] sm:$0xff] %vm563_vm0, %v1571_v21  ;;  %v12298_v8 = vld [vmem:[#allocation97_spill] sm:$0xff] }
 0x7d2   : > { %v7240_v59 = vpop.eup %7239  ;;  %7255 = vrcp.f32 %v1203_v29  ;;  %1602 = vst.msk [vmem:[#allocation4 + $0x60] sm:$0xff] %vm563_vm0, %v1570_v2 }
 0x7d3   : > { %v7242_v22 = vpop.eup %7241  ;;  %7257 = vrcp.f32 %v10654_v39  ;;  %v1573_v11 = vmul.f32 %v7240_v59, %v12295_v16  ;;  %v12299_v59 = vld [vmem:[#allocation102_spill] sm:$0xff] }
 0x7d4   : > { %7259 = vrcp.f32 %v10664_v10  ;;  %v1212_v1 = vpop.xlane.xlu1 %1211  ;;  %v1572_v14 = vmul.f32 %v7242_v22, %v12296_v19 }
 0x7d5   : > { %7261 = vrcp.f32 %v1212_v1  ;;  %v1209_v47 = vpop.xlane.xlu0 %1208  ;;  %1605 = vst.msk [vmem:[#allocation4 + $0x78] sm:$0xff] %vm563_vm0, %v1573_v11 }
 0x7d6   : > { %v7244_v53 = vpop.eup %7243  ;;  %7263 = vrcp.f32 %v1209_v47  ;;  %1604 = vst.msk [vmem:[#allocation4 + $0x70] sm:$0xff] %vm563_vm0, %v1572_v14  ;;  %v6391_v47 = vpop.f32.mrf.mxu0 }
 0x7d7   : > { %v7246_v13 = vpop.eup %7245  ;;  %v1575_v21 = vmul.f32 %v7244_v53, %v12297_v51  ;;  %7265 = vrcp.f32 %v10674_v30  ;;  %v12300_v30 = vld [vmem:[#allocation101_spill] sm:$0xff]  ;;  %v12301_v53 = vld [vmem:[#allocation106_spill] sm:$0xff] }
 0x7d8   : > { %v2715_v39 = vpop.permute.xlu1 %2714  ;;  %v1574_v10 = vmul.f32 %v7246_v13, %v12298_v8  ;;  %7267 = vrcp.f32 %v10662_v31  ;;  %v12303_v8 = vld [vmem:[#allocation104_spill] sm:$0xff] }
 0x7d9   : > { %2802 = vst.msk [vmem:[#allocation4 + $0x48] sm:$0xff] %vm2792_vm1, %v2715_v39  ;;  %v2713_v25 = vpop.permute.xlu0 %2712  ;;  %7269 = vrcp.f32 %v10670_v60 }
 0x7da   : > { %1607 = vst.msk [vmem:[#allocation4 + $0x88] sm:$0xff] %vm563_vm0, %v1575_v21  ;;  %v7248_v2 = vpop.eup %7247  ;;  %1606 = vst.msk [vmem:[#allocation4 + $0x80] sm:$0xff] %vm563_vm0, %v1574_v10  ;;  %7271 = vrcp.f32 %v10685_v50  ;;  %v12302_v21 = vld [vmem:[#allocation143_spill] sm:$0xff] }
 0x7db   : > { %2801 = vst.msk [vmem:[#allocation4 + $0x40] sm:$0xff] %vm2792_vm1, %v2713_v25  ;;  %v7250_v29 = vpop.eup %7249  ;;  %v1577_v22 = vmul.f32 %v7248_v2, %v12299_v59  ;;  %v12304_v59 = vld [vmem:[#allocation109_spill] sm:$0xff]  ;;  %7273 = vrcp.f32 %v10680_v24 }
 0x7dc   : > { %v2717_v16 = vpop.permute.xlu1 %2716  ;;  %v1576_v11 = vmul.f32 %v7250_v29, %v12300_v30  ;;  %v7252_v1 = vpop.eup %7251  ;;  %v12306_v30 = vld [vmem:[#allocation146_spill] sm:$0xff]  ;;  %7275 = vrcp.f32 %v10689_v34 }
 0x7dd   : > { %2803 = vst.msk [vmem:[#allocation4 + $0x50] sm:$0xff] %vm2792_vm1, %v2717_v16  ;;  %v2719_v19 = vpop.permute.xlu0 %2718  ;;  %v2646_v39 = vmul.f32 %v7252_v1, %v12302_v21  ;;  %v6392_v29 = vpop.f32.mrf.mxu0  ;;  %v12305_v16 = vld [vmem:[#allocation144_spill] sm:$0xff] }
 0x7de   : > { %1609 = vst.msk [vmem:[#allocation4 + $0x98] sm:$0xff] %vm563_vm0, %v1577_v22  ;;  %v7254_v14 = vpop.eup %7253  ;;  %2722 = vrot.lane.b32.xlu1 %v10677_v46, %s7561_s22  ;;  %1608 = vst.msk [vmem:[#allocation4 + $0x90] sm:$0xff] %vm563_vm0, %v1576_v11  ;;  %v6082_v11 = vadd.f32 %v12306_v30, %v12305_v16  ;;  %v6393_v21 = vadd.f32 %v6392_v29, %v6391_v47  ;;  %v12309_v29 = vld [vmem:[#allocation210_spill] sm:$0xff] }
 0x7df   : > { %2804 = vst.msk [vmem:[#allocation4 + $0x58] sm:$0xff] %vm2792_vm1, %v2719_v19  ;;  %v7256_v31 = vpop.eup %7255  ;;  %v1579_v60 = vmul.f32 %v7254_v14, %v12301_v53  ;;  %v12307_v14 = vld [vmem:[#allocation107_spill] sm:$0xff] }
 0x7e0   : > { %v7258_v13 = vpop.eup %7257  ;;  %v3916_v51 = vpop.permute.xlu1 %3915  ;;  %v1578_v10 = vmul.f32 %v7256_v31, %v12303_v8 }
 0x7e1   : > { %v7260_v25 = vpop.eup %7259  ;;  %4004 = vst.msk [vmem:[#allocation4 + $0x40] sm:$0xff] %vm3995_vm2, %v3916_v51  ;;  %v3918_v50 = vpop.permute.xlu0 %3917  ;;  %v2647_v51 = vmul.f32 %v7258_v13, %v6082_v11  ;;  %v12308_v13 = vld [vmem:[#allocation209_spill] sm:$0xff] }
 0x7e2   : > { %1611 = vst.msk [vmem:[#allocation4 + $0xa8] sm:$0xff] %vm563_vm0, %v1579_v60  ;;  %v7262_v46 = vpop.eup %7261  ;;  %2724 = vrot.lane.b32.xlu1 %v2646_v39, %s7561_s22  ;;  %1610 = vst.msk [vmem:[#allocation4 + $0xa0] sm:$0xff] %vm563_vm0, %v1578_v10  ;;  %v3847_v19 = vmul.f32 %v7260_v25, %v10305_v0 }
 0x7e3   : > { %4005 = vst.msk [vmem:[#allocation4 + $0x48] sm:$0xff] %vm3995_vm2, %v3918_v50  ;;  %v7264_v2 = vpop.eup %7263  ;;  %v1581_v22 = vmul.f32 %v7262_v46, %v12304_v59 }
 0x7e4   : > { %2720 = vrot.lane.b32.xlu0 %v10683_v45, %s7561_s22  ;;  %v3920_v1 = vpop.permute.xlu1 %3919  ;;  %v1580_v31 = vmul.f32 %v7264_v2, %v12307_v14  ;;  %v7266_v53 = vpop.eup %7265  ;;  %v12311_v14 = vld [vmem:[#allocation130_spill] sm:$0xff] }
 0x7e5   : > { %4006 = vst.msk [vmem:[#allocation4 + $0x50] sm:$0xff] %vm3995_vm2, %v3920_v1  ;;  %v3922_v60 = vpop.permute.xlu0 %3921  ;;  %v7268_v24 = vpop.eup %7267  ;;  %v3849_v39 = vmul.f32 %v7266_v53, %v10315_v27  ;;  %v12312_v53 = vld [vmem:[#allocation72_spill] sm:$0xff] }
 0x7e6   : > { %1613 = vst.msk [vmem:[#allocation4 + $0xb8] sm:$0xff] %vm563_vm0, %v1581_v22  ;;  %3923 = vrot.lane.b32.xlu1 %v3847_v19, %s7560_s21  ;;  %1612 = vst.msk [vmem:[#allocation4 + $0xb0] sm:$0xff] %vm563_vm0, %v1580_v31  ;;  %v6394_v45 = vpop.f32.mrf.mxu0  ;;  %v7270_v10 = vpop.eup %7269  ;;  %v3848_v25 = vmul.f32 %v7268_v24, %v12308_v13  ;;  %v12310_v19 = vld [vmem:[#allocation129_spill] sm:$0xff] }
 0x7e7   : > { %4007 = vst.msk [vmem:[#allocation4 + $0x58] sm:$0xff] %vm3995_vm2, %v3922_v60  ;;  %v7272_v50 = vpop.eup %7271  ;;  %v3850_v27 = vmul.f32 %v7270_v10, %v12309_v29  ;;  %v12313_v60 = vld [vmem:[#allocation71_spill] sm:$0xff] }
 0x7e8   : > { %2726 = vrot.lane.b32.xlu0 %v2647_v51, %s7561_s22  ;;  %v5119_v0 = vpop.permute.xlu1 %5118  ;;  %v6395_v46 = vpop.f32.mrf.mxu0  ;;  %v5050_v2 = vmul.f32 %v7272_v50, %v6393_v21 }
 0x7e9   : > { %5207 = vst.msk [vmem:[#allocation4 + $0x40] sm:$0xff] %vm5198_vm3, %v5119_v0  ;;  %v5121_v8 = vpop.permute.xlu0 %5120  ;;  %v6396_v47 = vadd.f32 %v6395_v46, %v6394_v45  ;;  %v7274_v22 = vpop.eup %7273 }
 0x7ea   : > { %5208 = vst.msk [vmem:[#allocation4 + $0x48] sm:$0xff] %vm5198_vm3, %v5121_v8  ;;  %3927 = vrot.lane.b32.xlu1 %v3849_v39, %s7560_s21  ;;  %v6397_v1 = vpop.f32.mrf.mxu0  ;;  %v7276_v34 = vpop.eup %7275 }
 0x7eb   : > { %v5051_v30 = vmul.f32 %v7274_v22, %v6396_v47 }
 0x7ec   : > { %3925 = vrot.lane.b32.xlu0 %v3848_v25, %s7560_s21  ;;  %v6398_v31 = vpop.f32.mrf.mxu0 }
 0x7ed   : > { %v6399_v46 = vadd.f32 %v6398_v31, %v6397_v1  ;;  %v12317_v31 = vld [vmem:[#allocation111_spill] sm:$0xff] }
 0x7ee   : > { %5126 = vrot.lane.b32.xlu1 %v5050_v2, %s7559_s8  ;;  %v6400_v24 = vpop.f32.mrf.mxu0 }
 0x7f0   : > { %3929 = vrot.lane.b32.xlu0 %v3850_v27, %s7560_s21  ;;  %v5239_v59 = vld [vmem:[#allocation4 + $0x40] sm:$0xff]  ;;  %v6401_v0 = vpop.f32.mrf.mxu0  ;;  %v12315_v27 = vld [vmem:[#allocation22_spill] sm:$0xff] }
 0x7f1   : > { %v5240_v16 = vld [vmem:[#allocation4 + $0x48] sm:$0xff]  ;;  %v6402_v8 = vadd.f32 %v6401_v0, %v6400_v24  ;;  %v12319_v24 = vld [vmem:[#allocation132_spill] sm:$0xff]  ;;  %v12321_v0 = vld [vmem:[#allocation74_spill] sm:$0xff] }
 0x7f2   : > { %v5267_v11 = vpack.c.bf16 %v5240_v16, %v5239_v59 }
 0x7f3   : > { %v5053_v25 = vmul.f32 %v7276_v34, %v6402_v8 }
 0x7f4   : > { %5128 = vrot.lane.b32.xlu0 %v5051_v30, %s7559_s8  ;;  %6499 = vmatprep.mubr.bf16.mxu1 %v5267_v11 }
 0x812   : > { %1154 = vadd.xlane.f32.xlu1 %v12310_v19 }
 0x813   : > { %1157 = vadd.xlane.f32.xlu0 %v12311_v14 }
 0x816   : > { %1229 = vadd.xlane.f32.xlu1 %v12312_v53  ;;  %v12316_v53 = vld [vmem:[#allocation112_spill] sm:$0xff] }
 0x817   : > { %1226 = vadd.xlane.f32.xlu0 %v12313_v60 }
 0x819   : > { %v1143_v51 = vpop.xlane.xlu1 %1142 }
 0x81a   : > { %7277 = vrcp.f32 %v1143_v51  ;;  %v1146_v45 = vpop.xlane.xlu0 %1145  ;;  %v12318_v51 = vld [vmem:[#allocation131_spill] sm:$0xff] }
 0x81b   : > { %7279 = vrcp.f32 %v1146_v45  ;;  %v11014_v45 = vpop.f32.mrf.mxu0 }
 0x81c   : > { %7281 = vrcp.f32 %v10691_v15  ;;  %v12314_v15 = vld [vmem:[#allocation15_spill] sm:$0xff] }
 0x81d   : > { %v1218_v21 = vpop.xlane.xlu1 %1217 }
 0x81e   : > { %7283 = vrcp.f32 %v1218_v21  ;;  %v1215_v39 = vpop.xlane.xlu0 %1214  ;;  %v12320_v21 = vld [vmem:[#allocation76_spill] sm:$0xff] }
 0x81f   : > { %7285 = vrcp.f32 %v1215_v39  ;;  %v11020_v39 = vpop.f32.mrf.mxu0 }
 0x820   : > { %7287 = vrcp.f32 %v10695_v36 }
 0x821   : > { %v5125_v10 = vpop.permute.xlu1 %5124  ;;  %7289 = vrcp.f32 %v10697_v6 }
 0x822   : > { %5210 = vst.msk [vmem:[#allocation4 + $0x58] sm:$0xff] %vm5198_vm3, %v5125_v10  ;;  %v5123_v13 = vpop.permute.xlu0 %5122  ;;  %7291 = vrcp.f32 %v10703_v33 }
 0x823   : > { %5209 = vst.msk [vmem:[#allocation4 + $0x50] sm:$0xff] %vm5198_vm3, %v5123_v13  ;;  %v11024_v13 = vpop.f32.mrf.mxu0 }
 0x827   : > { %v7278_v50 = vpop.eup %7277  ;;  %5132 = vrot.lane.b32.xlu1 %v5053_v25, %s7559_s8  ;;  %v11027_v25 = vpop.f32.mrf.mxu0 }
 0x828   : > { %v7280_v2 = vpop.eup %7279  ;;  %v1558_v47 = vmul.f32 %v7278_v50, %v12314_v15 }
 0x829   : > { %v5242_v29 = vld [vmem:[#allocation4 + $0x58] sm:$0xff]  ;;  %v1559_v59 = vmul.f32 %v7280_v2, %v12315_v27  ;;  %v7282_v22 = vpop.eup %7281 }
 0x82a   : > { %v5241_v16 = vld [vmem:[#allocation4 + $0x50] sm:$0xff]  ;;  %1590 = vst.msk [vmem:[#allocation4] sm:$0xff] %vm563_vm0, %v1558_v47  ;;  %v5052_v11 = vmul.f32 %v7282_v22, %v6399_v46  ;;  %v12322_v46 = vld [vmem:[#allocation149_spill] sm:$0xff]  ;;  %v12323_v2 = vld [vmem:[#allocation151_spill] sm:$0xff] }
 0x82b   : > { %v7284_v30 = vpop.eup %7283  ;;  %v5268_v19 = vpack.c.bf16 %v5242_v29, %v5241_v16  ;;  %1591 = vst.msk [vmem:[#allocation4 + $0x8] sm:$0xff] %vm563_vm0, %v1559_v59  ;;  %v12324_v16 = vld [vmem:[#allocation77_spill] sm:$0xff] }
 0x82c   : > { %v7286_v14 = vpop.eup %7285  ;;  %v1583_v1 = vmul.f32 %v7284_v30, %v12316_v53 }
 0x82d   : > { %5130 = vrot.lane.b32.xlu0 %v5052_v11, %s7559_s8  ;;  %6500 = vmatmul.mubr.bf16.vlgmr.msra.gmra.mxu1 %v5268_v19  ;;  %v1582_v60 = vmul.f32 %v7286_v14, %v12317_v31  ;;  %v7288_v33 = vpop.eup %7287  ;;  %v12325_v14 = vld [vmem:[#allocation153_spill] sm:$0xff] }
 0x82e   : > { %1615 = vst.msk [vmem:[#allocation4 + $0xc8] sm:$0xff] %vm563_vm0, %v1583_v1  ;;  %v7290_v15 = vpop.eup %7289  ;;  %v12326_v1 = vld [vmem:[#allocation79_spill] sm:$0xff] }
 0x82f   : > { %1614 = vst.msk [vmem:[#allocation4 + $0xc0] sm:$0xff] %vm563_vm0, %v1582_v60  ;;  %v7292_v27 = vpop.eup %7291 }
 0x830   : > { %v2650_v53 = vmul.f32 %v7292_v27, %v12325_v14 }
 0x84b   : > { %1160 = vadd.xlane.f32.xlu1 %v12318_v51  ;;  %v12327_v51 = vld [vmem:[#allocation148_spill] sm:$0xff] }
 0x84c   : > { %1163 = vadd.xlane.f32.xlu0 %v12319_v24  ;;  %v2648_v24 = vmul.f32 %v7290_v15, %v12327_v51  ;;  %v12336_v51 = vld [vmem:[#allocation157_spill] sm:$0xff] }
 0x84f   : > { %1235 = vadd.xlane.f32.xlu1 %v12320_v21 }
 0x850   : > { %1232 = vadd.xlane.f32.xlu0 %v12321_v0 }
 0x852   : > { %v1149_v8 = vpop.xlane.xlu1 %1148 }
 0x853   : > { %7293 = vrcp.f32 %v1149_v8  ;;  %v1152_v10 = vpop.xlane.xlu0 %1151  ;;  %v12328_v8 = vld [vmem:[#allocation116_spill] sm:$0xff] }
 0x854   : > { %7295 = vrcp.f32 %v1152_v10 }
 0x855   : > { %7297 = vrcp.f32 %v10701_v3  ;;  %v6088_v3 = vadd.f32 %v12323_v2, %v12322_v46  ;;  %v12332_v46 = vld [vmem:[#allocation114_spill] sm:$0xff] }
 0x856   : > { %7299 = vrcp.f32 %v10709_v48  ;;  %v1224_v36 = vpop.xlane.xlu1 %1223  ;;  %v11035_v48 = vpop.f32.mrf.mxu0 }
 0x857   : > { %7301 = vrcp.f32 %v1224_v36  ;;  %v1221_v34 = vpop.xlane.xlu0 %1220  ;;  %v2649_v29 = vmul.f32 %v7288_v33, %v6088_v3  ;;  %v12329_v36 = vld [vmem:[#allocation154_spill] sm:$0xff]  ;;  %v12331_v33 = vld [vmem:[#allocation211_spill] sm:$0xff] }
 0x858   : > { %7303 = vrcp.f32 %v1221_v34  ;;  %v6410_v22 = vpop.f32.mrf.mxu0  ;;  %v12330_v34 = vld [vmem:[#allocation155_spill] sm:$0xff] }
 0x859   : > { %7305 = vrcp.f32 %v10715_v9 }
 0x85a   : > { %v2723_v6 = vpop.permute.xlu1 %2722  ;;  %7307 = vrcp.f32 %v10707_v23  ;;  %v6412_v0 = vpop.f32.mrf.mxu0 }
 0x85b   : > { %2806 = vst.msk [vmem:[#allocation4 + $0x68] sm:$0xff] %vm2792_vm1, %v2723_v6  ;;  %v2721_v50 = vpop.permute.xlu0 %2720  ;;  %7309 = vrcp.f32 %v10713_v32  ;;  %v6094_v6 = vadd.f32 %v12330_v34, %v12329_v36  ;;  %v12339_v34 = vld [vmem:[#allocation160_spill] sm:$0xff] }
 0x85c   : > { %2805 = vst.msk [vmem:[#allocation4 + $0x60] sm:$0xff] %vm2792_vm1, %v2721_v50  ;;  %7311 = vrcp.f32 %v10721_v49 }
 0x85d   : > { %7313 = vrcp.f32 %v10727_v55 }
 0x85e   : > { %v2725_v47 = vpop.permute.xlu1 %2724  ;;  %7315 = vrcp.f32 %v10719_v4 }
 0x85f   : > { %2807 = vst.msk [vmem:[#allocation4 + $0x70] sm:$0xff] %vm2792_vm1, %v2725_v47  ;;  %v2727_v9 = vpop.permute.xlu0 %2726  ;;  %7317 = vrcp.f32 %v10733_v18  ;;  %v6413_v47 = vpop.f32.mrf.mxu0 }
 0x860   : > { %v7294_v59 = vpop.eup %7293  ;;  %2808 = vst.msk [vmem:[#allocation4 + $0x78] sm:$0xff] %vm2792_vm1, %v2727_v9  ;;  %2730 = vrot.lane.b32.xlu1 %v2649_v29, %s7561_s22  ;;  %7319 = vrcp.f32 %v10725_v61  ;;  %v6405_v29 = vadd.f32 %v11020_v39, %v11014_v45  ;;  %v12333_v9 = vld [vmem:[#allocation213_spill] sm:$0xff]  ;;  %v12334_v61 = vld [vmem:[#allocation212_spill] sm:$0xff]  ;;  %v6411_v39 = vadd.f32 %v6410_v22, %v11035_v48 }
 0x861   : > { %v7296_v23 = vpop.eup %7295  ;;  %v1560_v30 = vmul.f32 %v7294_v59, %v12324_v16  ;;  %7321 = vrcp.f32 %v10739_v5 }
 0x862   : > { %v7298_v11 = vpop.eup %7297  ;;  %v3924_v19 = vpop.permute.xlu1 %3923  ;;  %v1561_v32 = vmul.f32 %v7296_v23, %v12326_v1  ;;  %7323 = vrcp.f32 %v10731_v40  ;;  %v6408_v40 = vadd.f32 %v11027_v25, %v11024_v13 }
 0x863   : > { %v7300_v31 = vpop.eup %7299  ;;  %4008 = vst.msk [vmem:[#allocation4 + $0x60] sm:$0xff] %vm3995_vm2, %v3924_v19  ;;  %v3926_v60 = vpop.permute.xlu0 %3925  ;;  %v2651_v4 = vmul.f32 %v7298_v11, %v6094_v6  ;;  %7325 = vrcp.f32 %v10745_v41  ;;  %v12335_v19 = vld [vmem:[#allocation214_spill] sm:$0xff] }
 0x864   : > { %1592 = vst.msk [vmem:[#allocation4 + $0x10] sm:$0xff] %vm563_vm0, %v1560_v30  ;;  %v7302_v49 = vpop.eup %7301  ;;  %2732 = vrot.lane.b32.xlu1 %v2650_v53, %s7561_s22  ;;  %1593 = vst.msk [vmem:[#allocation4 + $0x18] sm:$0xff] %vm563_vm0, %v1561_v32  ;;  %v3851_v50 = vmul.f32 %v7300_v31, %v12331_v33  ;;  %v6415_v11 = vpop.f32.mrf.mxu0  ;;  %7327 = vrcp.f32 %v10737_v44 }
 0x865   : > { %4009 = vst.msk [vmem:[#allocation4 + $0x68] sm:$0xff] %vm3995_vm2, %v3926_v60  ;;  %v7304_v21 = vpop.eup %7303  ;;  %v1585_v10 = vmul.f32 %v7302_v49, %v12328_v8  ;;  %7329 = vrcp.f32 %v10752_v57  ;;  %v6414_v60 = vadd.f32 %v6413_v47, %v6412_v0  ;;  %v12337_v8 = vld [vmem:[#allocation158_spill] sm:$0xff] }
 0x866   : > { %2728 = vrot.lane.b32.xlu0 %v2648_v24, %s7561_s22  ;;  %v3928_v55 = vpop.permute.xlu1 %3927  ;;  %v1584_v2 = vmul.f32 %v7304_v21, %v12332_v46  ;;  %v7306_v3 = vpop.eup %7305  ;;  %7331 = vrcp.f32 %v10743_v62  ;;  %v12341_v46 = vld [vmem:[#allocation167_spill] sm:$0xff] }
 0x867   : > { %4010 = vst.msk [vmem:[#allocation4 + $0x70] sm:$0xff] %vm3995_vm2, %v3928_v55  ;;  %v3930_v15 = vpop.permute.xlu0 %3929  ;;  %v7308_v18 = vpop.eup %7307  ;;  %v3853_v59 = vmul.f32 %v7306_v3, %v12333_v9  ;;  %7333 = vrcp.f32 %v10750_v38  ;;  %v12342_v3 = vld [vmem:[#allocation215_spill] sm:$0xff]  ;;  %v12344_v9 = vld [vmem:[#allocation110_spill] sm:$0xff] }
 0x868   : > { %1617 = vst.msk [vmem:[#allocation4 + $0xd8] sm:$0xff] %vm563_vm0, %v1585_v10  ;;  %3931 = vrot.lane.b32.xlu1 %v3851_v50, %s7560_s21  ;;  %1616 = vst.msk [vmem:[#allocation4 + $0xd0] sm:$0xff] %vm563_vm0, %v1584_v2  ;;  %v7310_v16 = vpop.eup %7309  ;;  %v3852_v5 = vmul.f32 %v7308_v18, %v12334_v61  ;;  %v6416_v1 = vpop.f32.mrf.mxu0  ;;  %7335 = vrcp.f32 %v10758_v20  ;;  %v12338_v10 = vld [vmem:[#allocation159_spill] sm:$0xff]  ;;  %v12340_v50 = vld [vmem:[#allocation165_spill] sm:$0xff] }
 0x869   : > { %4011 = vst.msk [vmem:[#allocation4 + $0x78] sm:$0xff] %vm3995_vm2, %v3930_v15  ;;  %v7312_v30 = vpop.eup %7311  ;;  %v3854_v14 = vmul.f32 %v7310_v16, %v12335_v19  ;;  %v6100_v36 = vadd.f32 %v12338_v10, %v12337_v8  ;;  %7337 = vrcp.f32 %v10764_v37  ;;  %v6106_v2 = vadd.f32 %v12341_v46, %v12340_v50  ;;  %v12360_v50 = vld [vmem:[#allocation35_spill] sm:$0xff] }
 0x86a   : > { %2734 = vrot.lane.b32.xlu0 %v2651_v4, %s7561_s22  ;;  %v5127_v27 = vpop.permute.xlu1 %5126  ;;  %v5054_v45 = vmul.f32 %v7312_v30, %v6405_v29  ;;  %v7314_v53 = vpop.eup %7313  ;;  %7339 = vrcp.f32 %v10756_v26  ;;  %v6417_v26 = vadd.f32 %v6416_v1, %v6415_v11  ;;  %v12343_v29 = vld [vmem:[#allocation217_spill] sm:$0xff] }
 0x86b   : > { %5211 = vst.msk [vmem:[#allocation4 + $0x60] sm:$0xff] %vm5198_vm3, %v5127_v27  ;;  %v5129_v23 = vpop.permute.xlu0 %5128  ;;  %v7316_v32 = vpop.eup %7315  ;;  %v5056_v41 = vmul.f32 %v7314_v53, %v6411_v39  ;;  %7341 = vrcp.f32 %v10772_v12  ;;  %v12349_v53 = vld [vmem:[#allocation197_spill] sm:$0xff] }
 0x86c   : > { %5212 = vst.msk [vmem:[#allocation4 + $0x68] sm:$0xff] %vm5198_vm3, %v5129_v23  ;;  %3935 = vrot.lane.b32.xlu1 %v3853_v59, %s7560_s21  ;;  %v7318_v22 = vpop.eup %7317  ;;  %v5055_v44 = vmul.f32 %v7316_v32, %v6408_v40  ;;  %v6418_v25 = vpop.f32.mrf.mxu0  ;;  %7343 = vrcp.f32 %v10762_v52  ;;  %v12345_v59 = vld [vmem:[#allocation216_spill] sm:$0xff] }
 0x86d   : > { %v7320_v49 = vpop.eup %7319  ;;  %v2652_v57 = vmul.f32 %v7318_v22, %v12336_v51  ;;  %7345 = vrcp.f32 %v10779_v7  ;;  %v12347_v7 = vld [vmem:[#allocation175_spill] sm:$0xff] }
 0x86e   : > { %3933 = vrot.lane.b32.xlu0 %v3852_v5, %s7560_s21  ;;  %v7322_v24 = vpop.eup %7321  ;;  %v5057_v21 = vmul.f32 %v7320_v49, %v6414_v60  ;;  %v6419_v0 = vpop.f32.mrf.mxu0  ;;  %7347 = vrcp.f32 %v12344_v9  ;;  %v12346_v5 = vld [vmem:[#allocation105_spill] sm:$0xff] }
 0x86f   : > { %v7324_v62 = vpop.eup %7323  ;;  %v2654_v6 = vmul.f32 %v7322_v24, %v12339_v34  ;;  %7349 = vrcp.f32 %v12346_v5  ;;  %v6420_v11 = vadd.f32 %v6419_v0, %v6418_v25  ;;  %v12352_v25 = vld [vmem:[#allocation93_spill] sm:$0xff]  ;;  %v12357_v34 = vld [vmem:[#allocation171_spill] sm:$0xff] }
 0x870   : > { %5134 = vrot.lane.b32.xlu1 %v5054_v45, %s7559_s8  ;;  %v7326_v55 = vpop.eup %7325  ;;  %v2653_v38 = vmul.f32 %v7324_v62, %v6100_v36  ;;  %v6421_v20 = vpop.f32.mrf.mxu0  ;;  %7351 = vrcp.f32 %v12347_v7  ;;  %v12348_v45 = vld [vmem:[#allocation218_spill] sm:$0xff]  ;;  %v12354_v24 = vld [vmem:[#allocation113_spill] sm:$0xff] }
 0x871   : > { %v7328_v33 = vpop.eup %7327  ;;  %v3855_v15 = vmul.f32 %v7326_v55, %v12342_v3  ;;  %7353 = vrcp.f32 %v12349_v53  ;;  %v12355_v62 = vld [vmem:[#allocation169_spill] sm:$0xff]  ;;  %v12356_v36 = vld [vmem:[#allocation170_spill] sm:$0xff]  ;;  %v12358_v55 = vld [vmem:[#allocation24_spill] sm:$0xff] }
 0x872   : > { %3937 = vrot.lane.b32.xlu0 %v3854_v14, %s7560_s21  ;;  %v5243_v48 = vld [vmem:[#allocation4 + $0x60] sm:$0xff]  ;;  %v7330_v4 = vpop.eup %7329  ;;  %v2655_v37 = vmul.f32 %v7328_v33, %v6106_v2  ;;  %v6422_v47 = vpop.f32.mrf.mxu0 }
 0x873   : > { %v5244_v31 = vld [vmem:[#allocation4 + $0x68] sm:$0xff]  ;;  %v7332_v18 = vpop.eup %7331  ;;  %v3857_v27 = vmul.f32 %v7330_v4, %v12343_v29  ;;  %v6423_v30 = vadd.f32 %v6422_v47, %v6421_v20  ;;  %v12359_v20 = vld [vmem:[#allocation31_spill] sm:$0xff]  ;;  %v12361_v2 = vld [vmem:[#allocation172_spill] sm:$0xff] }
 0x874   : > { %5138 = vrot.lane.b32.xlu1 %v5056_v41, %s7559_s8  ;;  %v5269_v13 = vpack.c.bf16 %v5244_v31, %v5243_v48  ;;  %v7334_v12 = vpop.eup %7333  ;;  %v3856_v23 = vmul.f32 %v7332_v18, %v12345_v59  ;;  %v6424_v61 = vpop.f32.mrf.mxu0  ;;  %v12350_v41 = vld [vmem:[#allocation115_spill] sm:$0xff]  ;;  %v6046_v46 = vadd.f32 %v12360_v50, %v12359_v20  ;;  %v12362_v18 = vld [vmem:[#allocation180_spill] sm:$0xff]  ;;  %v12363_v47 = vld [vmem:[#allocation181_spill] sm:$0xff] }
 0x875   : > { %v7336_v16 = vpop.eup %7335  ;;  %v3858_v39 = vmul.f32 %v7334_v12, %v12348_v45  ;;  %7355 = vrcp.f32 %v12350_v41  ;;  %v12369_v45 = vld [vmem:[#allocation46_spill] sm:$0xff]  ;;  %v12371_v53 = vld [vmem:[#allocation204_spill] sm:$0xff]  ;;  %v12381_v50 = vld [vmem:[#allocation103_spill] sm:$0xff] }
 0x876   : > { %5136 = vrot.lane.b32.xlu0 %v5055_v44, %s7559_s8  ;;  %6503 = vmatprep.mubr.bf16.mxu1 %v5269_v13  ;;  %v5058_v52 = vmul.f32 %v7336_v16, %v6417_v26  ;;  %v7338_v40 = vpop.eup %7337  ;;  %v6425_v19 = vpop.f32.mrf.mxu0  ;;  %7357 = vrcp.f32 %v10805_v43  ;;  %v12351_v44 = vld [vmem:[#allocation83_spill] sm:$0xff]  ;;  %v6118_v26 = vadd.f32 %v12363_v47, %v12362_v18  ;;  %v12365_v16 = vld [vmem:[#allocation201_spill] sm:$0xff] }
 0x877   : > { %v7340_v14 = vpop.eup %7339  ;;  %v5060_v1 = vmul.f32 %v7338_v40, %v6423_v30  ;;  %v6426_v22 = vadd.f32 %v6425_v19, %v6424_v61  ;;  %7359 = vrcp.f32 %v12352_v25  ;;  %v12366_v61 = vld [vmem:[#allocation202_spill] sm:$0xff]  ;;  %v12374_v25 = vld [vmem:[#allocation205_spill] sm:$0xff] }
 0x878   : > { %2736 = vrot.lane.b32.xlu1 %v2652_v57, %s7561_s22  ;;  %v7342_v32 = vpop.eup %7341  ;;  %v5059_v48 = vmul.f32 %v7340_v14, %v6420_v11  ;;  %v12353_v57 = vld [vmem:[#allocation98_spill] sm:$0xff]  ;;  %7361 = vrcp.f32 %v10813_v35  ;;  %v6200_v5 = vadd.f32 %v12366_v61, %v12365_v16  ;;  %v12370_v14 = vld [vmem:[#allocation45_spill] sm:$0xff] }
 0x879   : > { %v7344_v31 = vpop.eup %7343  ;;  %v2632_v60 = vmul.f32 %v7342_v32, %v12351_v44  ;;  %7363 = vrcp.f32 %v10802_v54  ;;  %v12385_v47 = vld [vmem:[#allocation161_spill] sm:$0xff] }
 0x87a   : > { %5140 = vrot.lane.b32.xlu0 %v5057_v21, %s7559_s8  ;;  %v7346_v13 = vpop.eup %7345  ;;  %v5061_v49 = vmul.f32 %v7344_v31, %v6426_v22  ;;  %v6040_v21 = vadd.f32 %v12354_v24, %v12353_v57  ;;  %7365 = vrcp.f32 %v10818_v56  ;;  %v12372_v22 = vld [vmem:[#allocation39_spill] sm:$0xff]  ;;  %v12373_v31 = vld [vmem:[#allocation220_spill] sm:$0xff]  ;;  %v12376_v57 = vld [vmem:[#allocation122_spill] sm:$0xff] }
 0x87b   : > { %v7348_v51 = vpop.eup %7347  ;;  %v2656_v43 = vmul.f32 %v7346_v13, %v12355_v62  ;;  %7367 = vrcp.f32 %v10810_v63  ;;  %v12377_v24 = vld [vmem:[#allocation221_spill] sm:$0xff] }
 0x87c   : > { %2740 = vrot.lane.b32.xlu1 %v2654_v6, %s7561_s22  ;;  %v7350_v0 = vpop.eup %7349  ;;  %v2633_v8 = vmul.f32 %v7348_v51, %v6040_v21  ;;  %v6112_v6 = vadd.f32 %v12357_v34, %v12356_v36  ;;  %7369 = vrcp.f32 %v10829_v17  ;;  %v12364_v17 = vld [vmem:[#allocation200_spill] sm:$0xff]  ;;  %v12378_v62 = vld [vmem:[#allocation81_spill] sm:$0xff]  ;;  %v12379_v36 = vld [vmem:[#allocation82_spill] sm:$0xff] }
 0x87d   : > { %v7352_v10 = vpop.eup %7351  ;;  %v2634_v35 = vmul.f32 %v7350_v0, %v12358_v55  ;;  %7371 = vrcp.f32 %v10816_v28  ;;  %v6427_v28 = vpop.f32.mrf.mxu0  ;;  %v12380_v55 = vld [vmem:[#allocation52_spill] sm:$0xff] }
 0x87e   : > { %2738 = vrot.lane.b32.xlu0 %v2653_v38, %s7561_s22  ;;  %v7354_v38 = vpop.eup %7353  ;;  %v2657_v33 = vmul.f32 %v7352_v10, %v6112_v6 }
 0x87f   : > { %v2658_v56 = vmul.f32 %v7354_v38, %v12361_v2 }
 0x880   : > { %3939 = vrot.lane.b32.xlu1 %v3855_v15, %s7560_s21 }
 0x882   : > { %2742 = vrot.lane.b32.xlu0 %v2655_v37, %s7561_s22  ;;  %v7356_v54 = vpop.eup %7355 }
 0x883   : > { %v7358_v3 = vpop.eup %7357  ;;  %v2635_v63 = vmul.f32 %v7356_v54, %v6046_v46  ;;  %v12382_v46 = vld [vmem:[#allocation73_spill] sm:$0xff] }
 0x884   : > { %3943 = vrot.lane.b32.xlu1 %v3857_v27, %s7560_s21  ;;  %v7360_v37 = vpop.eup %7359  ;;  %v3835_v29 = vmul.f32 %v7358_v3, %v12364_v17 }
 0x885   : > { %v7362_v27 = vpop.eup %7361  ;;  %v2659_v59 = vmul.f32 %v7360_v37, %v6118_v26  ;;  %v12386_v26 = vld [vmem:[#allocation222_spill] sm:$0xff] }
 0x886   : > { %3941 = vrot.lane.b32.xlu0 %v3856_v23, %s7560_s21  ;;  %v7364_v23 = vpop.eup %7363 }
 0x887   : > { %v7366_v7 = vpop.eup %7365  ;;  %v3836_v40 = vmul.f32 %v7364_v23, %v6200_v5  ;;  %v12388_v23 = vld [vmem:[#allocation75_spill] sm:$0xff] }
 0x888   : > { %5142 = vrot.lane.b32.xlu1 %v5058_v52, %s7559_s8  ;;  %v12368_v52 = vld [vmem:[#allocation219_spill] sm:$0xff]  ;;  %v7368_v19 = vpop.eup %7367 }
 0x889   : > { %v3859_v30 = vmul.f32 %v7362_v27, %v12368_v52  ;;  %v7370_v32 = vpop.eup %7369  ;;  %v3860_v44 = vmul.f32 %v7368_v19, %v12373_v31  ;;  %v12391_v52 = vld [vmem:[#allocation194_spill] sm:$0xff] }
 0x88a   : > { %3945 = vrot.lane.b32.xlu0 %v3858_v39, %s7560_s21  ;;  %v3861_v21 = vmul.f32 %v7370_v32, %v12377_v24  ;;  %v12394_v32 = vld [vmem:[#allocation51_spill] sm:$0xff]  ;;  %v12399_v24 = vld [vmem:[#allocation37_spill] sm:$0xff] }
 0x88c   : > { %5146 = vrot.lane.b32.xlu1 %v5060_v1, %s7559_s8  ;;  %v3837_v1 = vmul.f32 %v7366_v7, %v12371_v53 }
 0x88e   : > { %5144 = vrot.lane.b32.xlu0 %v5059_v48, %s7559_s8  ;;  %v7372_v48 = vpop.eup %7371 }
 0x890   : > { %2696 = vrot.lane.b32.xlu1 %v2632_v60, %s7561_s22 }
 0x892   : > { %5148 = vrot.lane.b32.xlu0 %v5061_v49, %s7559_s8  ;;  %v12375_v49 = vld [vmem:[#allocation206_spill] sm:$0xff] }
 0x893   : > { %v6206_v51 = vadd.f32 %v12375_v49, %v12374_v25 }
 0x894   : > { %2744 = vrot.lane.b32.xlu1 %v2656_v43, %s7561_s22 }
 0x896   : > { %2698 = vrot.lane.b32.xlu0 %v2633_v8, %s7561_s22 }
 0x898   : > { %2700 = vrot.lane.b32.xlu1 %v2634_v35, %s7561_s22  ;;  %v3838_v35 = vmul.f32 %v7372_v48, %v6206_v51  ;;  %v12398_v51 = vld [vmem:[#allocation60_spill] sm:$0xff] }
 0x89a   : > { %2746 = vrot.lane.b32.xlu0 %v2657_v33, %s7561_s22 }
 0x89b   : > { %v1155_v15 = vpop.xlane.xlu1 %1154 }
 0x89c   : > { %7373 = vrcp.f32 %v1155_v15  ;;  %v1158_v4 = vpop.xlane.xlu0 %1157  ;;  %2748 = vrot.lane.b32.xlu1 %v2658_v56, %s7561_s22  ;;  %v12383_v56 = vld [vmem:[#allocation119_spill] sm:$0xff] }
 0x89d   : > { %7375 = vrcp.f32 %v1158_v4 }
 0x89e   : > { %7377 = vrcp.f32 %v10833_v58  ;;  %2702 = vrot.lane.b32.xlu0 %v2635_v63, %s7561_s22  ;;  %v12367_v58 = vld [vmem:[#allocation176_spill] sm:$0xff]  ;;  %v12384_v63 = vld [vmem:[#allocation117_spill] sm:$0xff] }
 0x89f   : > { %7379 = vrcp.f32 %v10821_v42  ;;  %v1230_v12 = vpop.xlane.xlu1 %1229  ;;  %v6428_v42 = vpop.f32.mrf.mxu0 }
 0x8a0   : > { %7381 = vrcp.f32 %v1230_v12  ;;  %v1227_v9 = vpop.xlane.xlu0 %1226  ;;  %3899 = vrot.lane.b32.xlu1 %v3835_v29, %s7560_s21  ;;  %v6429_v18 = vadd.f32 %v6428_v42, %v6427_v28  ;;  %v12387_v12 = vld [vmem:[#allocation80_spill] sm:$0xff]  ;;  %v12389_v28 = vld [vmem:[#allocation186_spill] sm:$0xff] }
 0x8a1   : > { %7383 = vrcp.f32 %v1227_v9  ;;  %v6430_v41 = vpop.f32.mrf.mxu0 }
 0x8a2   : > { %7385 = vrcp.f32 %v12367_v58  ;;  %2750 = vrot.lane.b32.xlu0 %v2659_v59, %s7561_s22  ;;  %v12390_v58 = vld [vmem:[#allocation90_spill] sm:$0xff] }
 0x8a3   : > { %v5133_v11 = vpop.permute.xlu1 %5132  ;;  %7387 = vrcp.f32 %v12369_v45  ;;  %v6431_v8 = vpop.f32.mrf.mxu0 }
 0x8a4   : > { %5214 = vst.msk [vmem:[#allocation4 + $0x78] sm:$0xff] %vm5198_vm3, %v5133_v11  ;;  %v5131_v39 = vpop.permute.xlu0 %5130  ;;  %3947 = vrot.lane.b32.xlu1 %v3859_v30, %s7560_s21  ;;  %7389 = vrcp.f32 %v12370_v14  ;;  %v6432_v5 = vadd.f32 %v6431_v8, %v6430_v41  ;;  %v12393_v14 = vld [vmem:[#allocation184_spill] sm:$0xff] }
 0x8a5   : > { %5213 = vst.msk [vmem:[#allocation4 + $0x70] sm:$0xff] %vm5198_vm3, %v5131_v39  ;;  %7391 = vrcp.f32 %v12372_v22  ;;  %v6433_v4 = vpop.f32.mrf.mxu0  ;;  %v12392_v39 = vld [vmem:[#allocation174_spill] sm:$0xff]  ;;  %v12395_v41 = vld [vmem:[#allocation40_spill] sm:$0xff] }
 0x8a6   : > { %3901 = vrot.lane.b32.xlu0 %v3836_v40, %s7560_s21  ;;  %7393 = vrcp.f32 %v12376_v57 }
 0x8a7   : > { %7395 = vrcp.f32 %v12380_v55  ;;  %v6434_v59 = vpop.f32.mrf.mxu0  ;;  %v12404_v55 = vld [vmem:[#allocation70_spill] sm:$0xff] }
 0x8a8   : > { %3903 = vrot.lane.b32.xlu1 %v3837_v1, %s7560_s21  ;;  %7397 = vrcp.f32 %v12381_v50  ;;  %v6435_v45 = vadd.f32 %v6434_v59, %v6433_v4  ;;  %v12416_v59 = vld [vmem:[#allocation63_spill] sm:$0xff] }
 0x8a9   : > { %v7374_v60 = vpop.eup %7373  ;;  %7399 = vrcp.f32 %v12385_v47  ;;  %v6436_v42 = vpop.f32.mrf.mxu0 }
 0x8aa   : > { %v7376_v13 = vpop.eup %7375  ;;  %3949 = vrot.lane.b32.xlu0 %v3860_v44, %s7560_s21  ;;  %v1562_v43 = vmul.f32 %v7374_v60, %v12378_v62  ;;  %7401 = vrcp.f32 %v12387_v12  ;;  %v12396_v44 = vld [vmem:[#allocation185_spill] sm:$0xff]  ;;  %v12397_v60 = vld [vmem:[#allocation38_spill] sm:$0xff]  ;;  %v12415_v12 = vld [vmem:[#allocation199_spill] sm:$0xff] }
 0x8ab   : > { %v7378_v0 = vpop.eup %7377  ;;  %v5246_v10 = vld [vmem:[#allocation4 + $0x78] sm:$0xff]  ;;  %v1563_v34 = vmul.f32 %v7376_v13, %v12379_v36  ;;  %7403 = vrcp.f32 %v12388_v23  ;;  %v6437_v1 = vpop.f32.mrf.mxu0  ;;  %v12403_v36 = vld [vmem:[#allocation68_spill] sm:$0xff]  ;;  %v12417_v23 = vld [vmem:[#allocation178_spill] sm:$0xff] }
 0x8ac   : > { %v7380_v6 = vpop.eup %7379  ;;  %3951 = vrot.lane.b32.xlu1 %v3861_v21, %s7560_s21  ;;  %v5245_v38 = vld [vmem:[#allocation4 + $0x70] sm:$0xff]  ;;  %1594 = vst.msk [vmem:[#allocation4 + $0x20] sm:$0xff] %vm563_vm0, %v1562_v43  ;;  %v5038_v2 = vmul.f32 %v7378_v0, %v12382_v46  ;;  %7405 = vrcp.f32 %v12390_v58  ;;  %v6438_v31 = vadd.f32 %v6437_v1, %v6436_v42  ;;  %v12400_v21 = vld [vmem:[#allocation23_spill] sm:$0xff]  ;;  %v12401_v43 = vld [vmem:[#allocation44_spill] sm:$0xff] }
 0x8ad   : > { %v7382_v33 = vpop.eup %7381  ;;  %v5270_v54 = vpack.c.bf16 %v5246_v10, %v5245_v38  ;;  %1595 = vst.msk [vmem:[#allocation4 + $0x28] sm:$0xff] %vm563_vm0, %v1563_v34  ;;  %v3862_v17 = vmul.f32 %v7380_v6, %v12386_v26  ;;  %7407 = vrcp.f32 %v12392_v39  ;;  %v6052_v62 = vadd.f32 %v12400_v21, %v12399_v24  ;;  %v12402_v0 = vld [vmem:[#allocation182_spill] sm:$0xff]  ;;  %v12408_v46 = vld [vmem:[#allocation53_spill] sm:$0xff] }
 0x8ae   : > { %v7384_v20 = vpop.eup %7383  ;;  %3905 = vrot.lane.b32.xlu0 %v3838_v35, %s7560_s21  ;;  %v1587_v3 = vmul.f32 %v7382_v33, %v12383_v56  ;;  %7409 = vrcp.f32 %v12393_v14  ;;  %v12405_v35 = vld [vmem:[#allocation183_spill] sm:$0xff]  ;;  %v12406_v33 = vld [vmem:[#allocation78_spill] sm:$0xff]  ;;  %v12413_v26 = vld [vmem:[#allocation41_spill] sm:$0xff] }
 0x8af   : > { %v7386_v15 = vpop.eup %7385  ;;  %6504 = vmatmul.mubr.bf16.gmra.mxu1 %v5270_v54  ;;  %v1586_v37 = vmul.f32 %v7384_v20, %v12384_v63  ;;  %7411 = vrcp.f32 %v12394_v32  ;;  %v6124_v38 = vadd.f32 %v12405_v35, %v12404_v55  ;;  %v12407_v54 = vld [vmem:[#allocation26_spill] sm:$0xff]  ;;  %v12411_v63 = vld [vmem:[#allocation48_spill] sm:$0xff] }
 0x8b0   : > { %5102 = vrot.lane.b32.xlu1 %v5038_v2, %s7559_s8  ;;  %1619 = vst.msk [vmem:[#allocation4 + $0xe8] sm:$0xff] %vm563_vm0, %v1587_v3  ;;  %v7388_v29 = vpop.eup %7387  ;;  %v5062_v27 = vmul.f32 %v7386_v15, %v6429_v18  ;;  %7413 = vrcp.f32 %v12396_v44  ;;  %v12409_v3 = vld [vmem:[#allocation42_spill] sm:$0xff]  ;;  %v12410_v15 = vld [vmem:[#allocation133_spill] sm:$0xff]  ;;  %v12423_v14 = vld [vmem:[#allocation28_spill] sm:$0xff] }
 0x8b1   : > { %1618 = vst.msk [vmem:[#allocation4 + $0xe0] sm:$0xff] %vm563_vm0, %v1586_v37  ;;  %v7390_v9 = vpop.eup %7389  ;;  %v5039_v16 = vmul.f32 %v7388_v29, %v12389_v28  ;;  %7415 = vrcp.f32 %v12398_v51  ;;  %v6058_v4 = vadd.f32 %v12410_v15, %v12409_v3  ;;  %v12412_v37 = vld [vmem:[#allocation95_spill] sm:$0xff] }
 0x8b2   : > { %3953 = vrot.lane.b32.xlu0 %v3862_v17, %s7560_s21  ;;  %v7392_v61 = vpop.eup %7391  ;;  %v5040_v30 = vmul.f32 %v7390_v9, %v12391_v52  ;;  %7417 = vrcp.f32 %v12401_v43  ;;  %v12428_v51 = vld [vmem:[#allocation187_spill] sm:$0xff] }
 0x8b3   : > { %v7394_v7 = vpop.eup %7393  ;;  %v5063_v11 = vmul.f32 %v7392_v61, %v6432_v5  ;;  %7419 = vrcp.f32 %v12403_v36  ;;  %v6439_v61 = vpop.f32.mrf.mxu0  ;;  %v12418_v5 = vld [vmem:[#allocation120_spill] sm:$0xff]  ;;  %v12430_v43 = vld [vmem:[#allocation27_spill] sm:$0xff] }
 0x8b4   : > { %5150 = vrot.lane.b32.xlu1 %v5062_v27, %s7559_s8  ;;  %v7396_v40 = vpop.eup %7395  ;;  %v5064_v19 = vmul.f32 %v7394_v7, %v6435_v45  ;;  %7421 = vrcp.f32 %v12406_v33  ;;  %v12414_v27 = vld [vmem:[#allocation145_spill] sm:$0xff]  ;;  %v12420_v7 = vld [vmem:[#allocation30_spill] sm:$0xff]  ;;  %v12422_v45 = vld [vmem:[#allocation223_spill] sm:$0xff] }
 0x8b5   : > { %v7398_v53 = vpop.eup %7397  ;;  %v5041_v48 = vmul.f32 %v7396_v40, %v12395_v41  ;;  %7423 = vrcp.f32 %v12408_v46  ;;  %v6130_v9 = vadd.f32 %v12415_v12, %v12414_v27  ;;  %v12435_v46 = vld [vmem:[#allocation192_spill] sm:$0xff] }
 0x8b6   : > { %5104 = vrot.lane.b32.xlu0 %v5039_v16, %s7559_s8  ;;  %v7400_v22 = vpop.eup %7399  ;;  %v2636_v13 = vmul.f32 %v7398_v53, %v12397_v60  ;;  %7425 = vrcp.f32 %v12411_v63  ;;  %v12424_v53 = vld [vmem:[#allocation168_spill] sm:$0xff] }
 0x8b7   : > { %v7402_v25 = vpop.eup %7401  ;;  %v5065_v49 = vmul.f32 %v7400_v22, %v6438_v31  ;;  %7427 = vrcp.f32 %v12413_v26  ;;  %v12425_v22 = vld [vmem:[#allocation49_spill] sm:$0xff]  ;;  %v12436_v63 = vld [vmem:[#allocation156_spill] sm:$0xff] }
 0x8b8   : > { %5106 = vrot.lane.b32.xlu1 %v5040_v30, %s7559_s8  ;;  %v7404_v57 = vpop.eup %7403  ;;  %v2660_v8 = vmul.f32 %v7402_v25, %v12402_v0  ;;  %7429 = vrcp.f32 %v12416_v59  ;;  %v12419_v30 = vld [vmem:[#allocation179_spill] sm:$0xff] }
 0x8b9   : > { %v7406_v10 = vpop.eup %7405  ;;  %v2637_v34 = vmul.f32 %v7404_v57, %v6052_v62  ;;  %7431 = vrcp.f32 %v12418_v5  ;;  %v6212_v42 = vadd.f32 %v12420_v7, %v12419_v30  ;;  %v12427_v25 = vld [vmem:[#allocation147_spill] sm:$0xff]  ;;  %v12439_v5 = vld [vmem:[#allocation29_spill] sm:$0xff] }
 0x8ba   : > { %5152 = vrot.lane.b32.xlu0 %v5063_v11, %s7559_s8  ;;  %v7408_v6 = vpop.eup %7407  ;;  %v2638_v20 = vmul.f32 %v7406_v10, %v12407_v54  ;;  %v12421_v11 = vld [vmem:[#allocation36_spill] sm:$0xff]  ;;  %v12429_v62 = vld [vmem:[#allocation55_spill] sm:$0xff]  ;;  %v12433_v54 = vld [vmem:[#allocation34_spill] sm:$0xff] }
 0x8bb   : > { %v7410_v50 = vpop.eup %7409  ;;  %v2661_v2 = vmul.f32 %v7408_v6, %v6124_v38  ;;  %7433 = vrcp.f32 %v12421_v11  ;;  %v6218_v0 = vadd.f32 %v12430_v43, %v12429_v62  ;;  %v12432_v6 = vld [vmem:[#allocation124_spill] sm:$0xff]  ;;  %v12440_v11 = vld [vmem:[#allocation195_spill] sm:$0xff] }
 0x8bc   : > { %5154 = vrot.lane.b32.xlu1 %v5064_v19, %s7559_s8  ;;  %v7412_v56 = vpop.eup %7411  ;;  %v2662_v18 = vmul.f32 %v7410_v50, %v12412_v37  ;;  %v6440_v19 = vpop.f32.mrf.mxu0  ;;  %7435 = vrcp.f32 %v12423_v14 }
 0x8bd   : > { %v7414_v47 = vpop.eup %7413  ;;  %v2639_v17 = vmul.f32 %v7412_v56, %v6058_v4  ;;  %7437 = vrcp.f32 %v12424_v53  ;;  %v6441_v4 = vadd.f32 %v6440_v19, %v6439_v61  ;;  %v12441_v19 = vld [vmem:[#allocation32_spill] sm:$0xff] }
 0x8be   : > { %5108 = vrot.lane.b32.xlu0 %v5041_v48, %s7559_s8  ;;  %v7416_v29 = vpop.eup %7415  ;;  %v3839_v28 = vmul.f32 %v7414_v47, %v12417_v23  ;;  %v6442_v60 = vpop.f32.mrf.mxu0 }
 0x8bf   : > { %v7418_v16 = vpop.eup %7417  ;;  %v2663_v58 = vmul.f32 %v7416_v29, %v6130_v9  ;;  %v12437_v9 = vld [vmem:[#allocation17_spill] sm:$0xff] }
 0x8c0   : > { %2704 = vrot.lane.b32.xlu1 %v2636_v13, %s7561_s22  ;;  %v7420_v52 = vpop.eup %7419  ;;  %v3863_v39 = vmul.f32 %v7418_v16, %v12422_v45  ;;  %v12426_v13 = vld [vmem:[#allocation108_spill] sm:$0xff]  ;;  %v12438_v16 = vld [vmem:[#allocation33_spill] sm:$0xff] }
 0x8c1   : > { %v7422_v40 = vpop.eup %7421  ;;  %v3840_v32 = vmul.f32 %v7420_v52, %v6212_v42 }
 0x8c2   : > { %5156 = vrot.lane.b32.xlu0 %v5065_v49, %s7559_s8  ;;  %v7424_v41 = vpop.eup %7423  ;;  %v3841_v31 = vmul.f32 %v7422_v40, %v12425_v22 }
 0x8c3   : > { %v7426_v44 = vpop.eup %7425  ;;  %v3864_v57 = vmul.f32 %v7424_v41, %v12428_v51  ;;  %v12442_v41 = vld [vmem:[#allocation19_spill] sm:$0xff] }
 0x8c4   : > { %2752 = vrot.lane.b32.xlu1 %v2660_v8, %s7561_s22  ;;  %v7428_v24 = vpop.eup %7427  ;;  %v12431_v8 = vld [vmem:[#allocation189_spill] sm:$0xff] }
 0x8c5   : > { %v3865_v10 = vmul.f32 %v7426_v44, %v12431_v8  ;;  %v7430_v36 = vpop.eup %7429  ;;  %v3842_v35 = vmul.f32 %v7428_v24, %v6218_v0 }
 0x8c6   : > { %2706 = vrot.lane.b32.xlu0 %v2637_v34, %s7561_s22  ;;  %v6443_v34 = vpop.f32.mrf.mxu0  ;;  %v7432_v38 = vpop.eup %7431 }
 0x8c7   : > { %v6444_v42 = vadd.f32 %v6443_v34, %v6442_v60 }
 0x8c8   : > { %2708 = vrot.lane.b32.xlu1 %v2638_v20, %s7561_s22  ;;  %v12434_v20 = vld [vmem:[#allocation196_spill] sm:$0xff]  ;;  %v7434_v56 = vpop.eup %7433  ;;  %v6445_v3 = vpop.f32.mrf.mxu0 }
 0x8c9   : > { %v6290_v50 = vadd.f32 %v12434_v20, %v12433_v54  ;;  %v7436_v15 = vpop.eup %7435  ;;  %v5066_v29 = vmul.f32 %v7434_v56, %v6441_v4 }
 0x8ca   : > { %2754 = vrot.lane.b32.xlu0 %v2661_v2, %s7561_s22  ;;  %v5042_v2 = vmul.f32 %v7430_v36, %v12435_v46  ;;  %v7438_v47 = vpop.eup %7437  ;;  %v6446_v12 = vpop.f32.mrf.mxu0  ;;  %v5043_v61 = vmul.f32 %v7436_v15, %v12438_v16 }
 0x8cb   : > { %v5044_v45 = vmul.f32 %v7438_v47, %v12440_v11  ;;  %v6447_v53 = vadd.f32 %v6446_v12, %v6445_v3 }
 0x8cc   : > { %2756 = vrot.lane.b32.xlu1 %v2662_v18, %s7561_s22  ;;  %v3866_v18 = vmul.f32 %v7432_v38, %v6290_v50  ;;  %v6448_v40 = vpop.f32.mrf.mxu0 }
 0x8ce   : > { %2710 = vrot.lane.b32.xlu0 %v2639_v17, %s7561_s22  ;;  %v6449_v60 = vpop.f32.mrf.mxu0 }
 0x8d0   : > { %3907 = vrot.lane.b32.xlu1 %v3839_v28, %s7560_s21 }
 0x8d2   : > { %2758 = vrot.lane.b32.xlu0 %v2663_v58, %s7561_s22  ;;  %s272_s22 = sand.u32 1, %s7541_s16  }
 0x8d4   : > { %v1161_v1 = vpop.xlane.xlu1 %1160  ;;  %3955 = vrot.lane.b32.xlu1 %v3863_v39, %s7560_s21 }
 0x8d5   : > { %7439 = vrcp.f32 %v1161_v1  ;;  %v1164_v48 = vpop.xlane.xlu0 %1163 }
 0x8d6   : > { %7441 = vrcp.f32 %v1164_v48  ;;  %3909 = vrot.lane.b32.xlu0 %v3840_v32, %s7560_s21 }
 0x8d7   : > { %7443 = vrcp.f32 %v12426_v13 }
 0x8d8   : > { %7445 = vrcp.f32 %v12427_v25  ;;  %v1236_v49 = vpop.xlane.xlu1 %1235  ;;  %3911 = vrot.lane.b32.xlu1 %v3841_v31, %s7560_s21  ;;  %v12443_v25 = vld [vmem:[#allocation88_spill] sm:$0xff] }
 0x8d9   : > { %7447 = vrcp.f32 %v1236_v49  ;;  %v1233_v21 = vpop.xlane.xlu0 %1232 }
 0x8da   : > { %7449 = vrcp.f32 %v1233_v21  ;;  %3957 = vrot.lane.b32.xlu0 %v3864_v57, %s7560_s21  ;;  %v6450_v21 = vadd.f32 %v6449_v60, %v6448_v40 }
 0x8db   : > { %7451 = vrcp.f32 %v12432_v6 }
 0x8dc   : > { %v2731_v55 = vpop.permute.xlu1 %2730  ;;  %3959 = vrot.lane.b32.xlu1 %v3865_v10, %s7560_s21  ;;  %7453 = vrcp.f32 %v12436_v63 }
 0x8dd   : > { %2810 = vst.msk [vmem:[#allocation4 + $0x88] sm:$0xff] %vm2792_vm1, %v2731_v55  ;;  %v2729_v33 = vpop.permute.xlu0 %2728 }
 0x8de   : > { %2809 = vst.msk [vmem:[#allocation4 + $0x80] sm:$0xff] %vm2792_vm1, %v2729_v33  ;;  %3913 = vrot.lane.b32.xlu0 %v3842_v35, %s7560_s21 }
 0x8e0   : > { %v2733_v37 = vpop.permute.xlu1 %2732  ;;  %5110 = vrot.lane.b32.xlu1 %v5042_v2, %s7559_s8 }
 0x8e1   : > { %2811 = vst.msk [vmem:[#allocation4 + $0x90] sm:$0xff] %vm2792_vm1, %v2733_v37  ;;  %v2735_v26 = vpop.permute.xlu0 %2734 }
 0x8e2   : > { %v7440_v17 = vpop.eup %7439  ;;  %2812 = vst.msk [vmem:[#allocation4 + $0x98] sm:$0xff] %vm2792_vm1, %v2735_v26  ;;  %3961 = vrot.lane.b32.xlu0 %v3866_v18, %s7560_s21  ;;  %s5675_s21 = sshll.u32 %s272_s22, 8 }
 0x8e3   : > { %v7442_v27 = vpop.eup %7441  ;;  %v1564_v59 = vmul.f32 %v7440_v17, %v12437_v9  ;;  %s11294_s30 = scalar_lea.vmem [#allocation5], %s5675_s21 }
 0x8e4   : > { %v7444_v23 = vpop.eup %7443  ;;  %v3932_v28 = vpop.permute.xlu1 %3931  ;;  %5158 = vrot.lane.b32.xlu1 %v5066_v29, %s7559_s8  ;;  %v1565_v58 = vmul.f32 %v7442_v27, %v12439_v5  ;;  %s5552_s5 = sshll.u32 %s11294_s30, 4  ;;  %s11398_s5 = int_to_ptr.vmem [resolvable:$true] %s5552_s5 }
 0x8e5   : > { %v7446_v52 = vpop.eup %7445  ;;  %4012 = vst.msk [vmem:[#allocation4 + $0x80] sm:$0xff] %vm3995_vm2, %v3932_v28  ;;  %v3934_v30 = vpop.permute.xlu0 %3933  ;;  %v5067_v32 = vmul.f32 %v7444_v23, %v6444_v42  ;;  %s7481_s10 = scalar_lea.vmem %s11398_s5, 4096  ;;  %p7488_p1 = scmp.lt.s32.totalorder %s11398_s5, %s7486_s12 }
 0x8e6   : > { %1596 = vst.msk [vmem:[#allocation4 + $0x30] sm:$0xff] %vm563_vm0, %v1564_v59  ;;  %v7448_v7 = vpop.eup %7447  ;;  %5112 = vrot.lane.b32.xlu0 %v5043_v61, %s7559_s8  ;;  %1597 = vst.msk [vmem:[#allocation4 + $0x38] sm:$0xff] %vm563_vm0, %v1565_v58  ;;  %v5068_v44 = vmul.f32 %v7446_v52, %v6447_v53  ;;  %p7482_p12 = scmp.ne.s32.totalorder %s11398_s5, %s7481_s10  ;;  %p7489_p2 = scmp.lt.s32.totalorder %s7487_s13, %s7481_s10 }
 0x8e7   : > { %4013 = vst.msk [vmem:[#allocation4 + $0x88] sm:$0xff] %vm3995_vm2, %v3934_v30  ;;  %v7450_v39 = vpop.eup %7449  ;;  %v1589_v14 = vmul.f32 %v7448_v7, %v12441_v19 }
 0x8e8   : > { %v3936_v1 = vpop.permute.xlu1 %3935  ;;  %5114 = vrot.lane.b32.xlu1 %v5044_v45, %s7559_s8  ;;  %v1588_v48 = vmul.f32 %v7450_v39, %v12442_v41  ;;  %v7452_v22 = vpop.eup %7451  ;;  %p7483_p13 = pnand %p7482_p12, %p7630_p4  ;;  %p7490_p3 = por %p7489_p2, %p7488_p1 }
 0x8e9   : > { %4014 = vst.msk [vmem:[#allocation4 + $0x90] sm:$0xff] %vm3995_vm2, %v3936_v1  ;;  %v3938_v31 = vpop.permute.xlu0 %3937  ;;  %v5045_v49 = vmul.f32 %v7452_v22, %v12443_v25  ;;  %v7454_v51 = vpop.eup %7453 }
 0x8ea   : > { %1621 = vst.msk [vmem:[#allocation4 + $0xf8] sm:$0xff] %vm563_vm0, %v1589_v14  ;;  %5160 = vrot.lane.b32.xlu0 %v5067_v32, %s7559_s8  ;;  %1620 = vst.msk [vmem:[#allocation4 + $0xf0] sm:$0xff] %vm563_vm0, %v1588_v48  ;;  %v5069_v0 = vmul.f32 %v7454_v51, %v6450_v21  ;;  %p7484_p0 = pneg %p7483_p13 }
 0x8eb   : > { %4015 = vst.msk [vmem:[#allocation4 + $0x98] sm:$0xff] %vm3995_vm2, %v3938_v31 }
 0x8ec   : > { %v5135_v13 = vpop.permute.xlu1 %5134  ;;  %5162 = vrot.lane.b32.xlu1 %v5068_v44, %s7559_s8  ;;  %p7491_p5 = pnand %p7490_p3, %p7484_p0 }
 0x8ed   : > { %5215 = vst.msk [vmem:[#allocation4 + $0x80] sm:$0xff] %vm5198_vm3, %v5135_v13  ;;  %v6501_v57 = vpop.f32.mrf.mxu1  ;;  %v5137_v24 = vpop.permute.xlu0 %5136 }
 0x8ee   : > { %5514 = vst [vmem:[%s11294_s30 + $0x50] sm:$0xff] %v6501_v57  ;;  %5216 = vst.msk [vmem:[#allocation4 + $0x88] sm:$0xff] %vm5198_vm3, %v5137_v24  ;;  %5116 = vrot.lane.b32.xlu0 %v5045_v49, %s7559_s8 }
 0x8ef   : > { %v5409_v62 = vpop.f32.mrf.mxu1 }
 0x8f0   : > { %5512 = vst [vmem:[%s11294_s30 + $0x40] sm:$0xff] %v5409_v62  ;;  %v5139_v43 = vpop.permute.xlu1 %5138 }
 0x8f1   : > { %5217 = vst.msk [vmem:[#allocation4 + $0x90] sm:$0xff] %vm5198_vm3, %v5139_v43  ;;  %v6502_v8 = vpop.f32.mrf.mxu1  ;;  %v5141_v10 = vpop.permute.xlu0 %5140 }
 0x8f2   : > { %5515 = vst [vmem:[%s11294_s30 + $0x58] sm:$0xff] %v6502_v8  ;;  %5218 = vst.msk [vmem:[#allocation4 + $0x98] sm:$0xff] %vm5198_vm3, %v5141_v10  ;;  %5164 = vrot.lane.b32.xlu0 %v5069_v0, %s7559_s8  ;;  %s5810_s8 = sshll.u32 %s7549_s18, 12  ;;  %s11404_s18 = scalar_lea.sflag [#allocation6], %s272_s22 }
 0x8f3   : > { %v5412_v36 = vpop.f32.mrf.mxu1  ;;  %s11396_s9 = scalar_lea.hbm %s11453_s4, %s5810_s8 }
 0x8f4   : > { %5513 = vst [vmem:[%s11294_s30 + $0x48] sm:$0xff] %v5412_v36  ;;  %v2737_v34 = vpop.permute.xlu1 %2736  ;;  %v5247_v6 = vld [vmem:[#allocation4 + $0x80] sm:$0xff] }
 0x8f5   : > { %2813 = vst.msk [vmem:[#allocation4 + $0xa0] sm:$0xff] %vm2792_vm1, %v2737_v34  ;;  %v2739_v55 = vpop.permute.xlu0 %2738  ;;  %v5248_v35 = vld [vmem:[#allocation4 + $0x88] sm:$0xff] }
 0x8f6   : > { %2814 = vst.msk [vmem:[#allocation4 + $0xa8] sm:$0xff] %vm2792_vm1, %v2739_v55  ;;  %v5271_v38 = vpack.c.bf16 %v5248_v35, %v5247_v6 }
 0x8f8   : > { %6507 = vmatprep.mubr.bf16.mxu1 %v5271_v38  ;;  %v2741_v33 = vpop.permute.xlu1 %2740  ;;  %v5249_v54 = vld [vmem:[#allocation4 + $0x90] sm:$0xff] }
 0x8f9   : > { %2815 = vst.msk [vmem:[#allocation4 + $0xb0] sm:$0xff] %vm2792_vm1, %v2741_v33  ;;  %v2743_v20 = vpop.permute.xlu0 %2742  ;;  %v5250_v50 = vld [vmem:[#allocation4 + $0x98] sm:$0xff] }
 0x8fa   : > { %2816 = vst.msk [vmem:[#allocation4 + $0xb8] sm:$0xff] %vm2792_vm1, %v2743_v20  ;;  %v5272_v46 = vpack.c.bf16 %v5250_v50, %v5249_v54 }
 0x8fc   : > { %6508 = vmatmul.mubr.bf16.gmra.mxu1 %v5272_v46  ;;  %v3940_v2 = vpop.permute.xlu1 %3939 }
 0x8fd   : > { %4016 = vst.msk [vmem:[#allocation4 + $0xa0] sm:$0xff] %vm3995_vm2, %v3940_v2  ;;  %v3942_v56 = vpop.permute.xlu0 %3941 }
 0x8fe   : > { %4017 = vst.msk [vmem:[#allocation4 + $0xa8] sm:$0xff] %vm3995_vm2, %v3942_v56 }
 0x900   : > { %v3944_v3 = vpop.permute.xlu1 %3943 }
 0x901   : > { %4018 = vst.msk [vmem:[#allocation4 + $0xb0] sm:$0xff] %vm3995_vm2, %v3944_v3  ;;  %v3946_v15 = vpop.permute.xlu0 %3945 }
 0x902   : > { %4019 = vst.msk [vmem:[#allocation4 + $0xb8] sm:$0xff] %vm3995_vm2, %v3946_v15 }
 0x904   : > { %v5143_v4 = vpop.permute.xlu1 %5142 }
 0x905   : > { %5219 = vst.msk [vmem:[#allocation4 + $0xa0] sm:$0xff] %vm5198_vm3, %v5143_v4  ;;  %v5145_v63 = vpop.permute.xlu0 %5144 }
 0x906   : > { %5220 = vst.msk [vmem:[#allocation4 + $0xa8] sm:$0xff] %vm5198_vm3, %v5145_v63 }
 0x908   : > { %v5147_v37 = vpop.permute.xlu1 %5146 }
 0x909   : > { %5221 = vst.msk [vmem:[#allocation4 + $0xb0] sm:$0xff] %vm5198_vm3, %v5147_v37  ;;  %v5149_v18 = vpop.permute.xlu0 %5148 }
 0x90a   : > { %5222 = vst.msk [vmem:[#allocation4 + $0xb8] sm:$0xff] %vm5198_vm3, %v5149_v18 }
 0x90c   : > { %v2697_v47 = vpop.permute.xlu1 %2696  ;;  %v5251_v26 = vld [vmem:[#allocation4 + $0xa0] sm:$0xff] }
 0x90d   : > { %2793 = vst.msk [vmem:[#allocation4] sm:$0xff] %vm2792_vm1, %v2697_v47  ;;  %v2699_v17 = vpop.permute.xlu0 %2698  ;;  %v5252_v29 = vld [vmem:[#allocation4 + $0xa8] sm:$0xff] }
 0x90e   : > { %2794 = vst.msk [vmem:[#allocation4 + $0x8] sm:$0xff] %vm2792_vm1, %v2699_v17  ;;  %v5273_v27 = vpack.c.bf16 %v5252_v29, %v5251_v26 }
 0x910   : > { %6511 = vmatprep.mubr.bf16.mxu1 %v5273_v27  ;;  %v2745_v12 = vpop.permute.xlu1 %2744  ;;  %v5253_v9 = vld [vmem:[#allocation4 + $0xb0] sm:$0xff] }
 0x911   : > { %2817 = vst.msk [vmem:[#allocation4 + $0xc0] sm:$0xff] %vm2792_vm1, %v2745_v12  ;;  %v2747_v59 = vpop.permute.xlu0 %2746  ;;  %v5254_v23 = vld [vmem:[#allocation4 + $0xb8] sm:$0xff] }
 0x912   : > { %2818 = vst.msk [vmem:[#allocation4 + $0xc8] sm:$0xff] %vm2792_vm1, %v2747_v59  ;;  %v5274_v28 = vpack.c.bf16 %v5254_v23, %v5253_v9 }
 0x914   : > { %6512 = vmatmul.mubr.bf16.gmra.mxu1 %v5274_v28  ;;  %v2701_v16 = vpop.permute.xlu1 %2700 }
 0x915   : > { %2795 = vst.msk [vmem:[#allocation4 + $0x10] sm:$0xff] %vm2792_vm1, %v2701_v16  ;;  %v2703_v61 = vpop.permute.xlu0 %2702 }
 0x916   : > { %2796 = vst.msk [vmem:[#allocation4 + $0x18] sm:$0xff] %vm2792_vm1, %v2703_v61 }
 0x918   : > { %v2749_v5 = vpop.permute.xlu1 %2748 }
 0x919   : > { %2819 = vst.msk [vmem:[#allocation4 + $0xd0] sm:$0xff] %vm2792_vm1, %v2749_v5  ;;  %v2751_v58 = vpop.permute.xlu0 %2750 }
 0x91a   : > { %2820 = vst.msk [vmem:[#allocation4 + $0xd8] sm:$0xff] %vm2792_vm1, %v2751_v58 }
 0x91c   : > { %v3900_v52 = vpop.permute.xlu1 %3899 }
 0x91d   : > { %3996 = vst.msk [vmem:[#allocation4] sm:$0xff] %vm3995_vm2, %v3900_v52  ;;  %v3902_v30 = vpop.permute.xlu0 %3901 }
 0x91e   : > { %3997 = vst.msk [vmem:[#allocation4 + $0x8] sm:$0xff] %vm3995_vm2, %v3902_v30 }
 0x920   : > { %v3948_v7 = vpop.permute.xlu1 %3947 }
 0x921   : > { %4020 = vst.msk [vmem:[#allocation4 + $0xc0] sm:$0xff] %vm3995_vm2, %v3948_v7  ;;  %v3950_v42 = vpop.permute.xlu0 %3949 }
 0x922   : > { %4021 = vst.msk [vmem:[#allocation4 + $0xc8] sm:$0xff] %vm3995_vm2, %v3950_v42 }
 0x924   : > { %v3904_v11 = vpop.permute.xlu1 %3903 }
 0x925   : > { %3998 = vst.msk [vmem:[#allocation4 + $0x10] sm:$0xff] %vm3995_vm2, %v3904_v11  ;;  %v3906_v45 = vpop.permute.xlu0 %3905 }
 0x926   : > { %3999 = vst.msk [vmem:[#allocation4 + $0x18] sm:$0xff] %vm3995_vm2, %v3906_v45 }
 0x928   : > { %v3952_v39 = vpop.permute.xlu1 %3951 }
 0x929   : > { %4022 = vst.msk [vmem:[#allocation4 + $0xd0] sm:$0xff] %vm3995_vm2, %v3952_v39  ;;  %v3954_v40 = vpop.permute.xlu0 %3953 }
 0x92a   : > { %4023 = vst.msk [vmem:[#allocation4 + $0xd8] sm:$0xff] %vm3995_vm2, %v3954_v40 }
 0x92c   : > { %v5103_v19 = vpop.permute.xlu1 %5102 }
 0x92d   : > { %5199 = vst.msk [vmem:[#allocation4] sm:$0xff] %vm5198_vm3, %v5103_v19  ;;  %v5105_v14 = vpop.permute.xlu0 %5104 }
 0x92e   : > { %5200 = vst.msk [vmem:[#allocation4 + $0x8] sm:$0xff] %vm5198_vm3, %v5105_v14 }
 0x930   : > { %v5151_v53 = vpop.permute.xlu1 %5150 }
 0x931   : > { %5223 = vst.msk [vmem:[#allocation4 + $0xc0] sm:$0xff] %vm5198_vm3, %v5151_v53  ;;  %v5153_v1 = vpop.permute.xlu0 %5152 }
 0x932   : > { %5224 = vst.msk [vmem:[#allocation4 + $0xc8] sm:$0xff] %vm5198_vm3, %v5153_v1 }
 0x934   : > { %v5107_v32 = vpop.permute.xlu1 %5106  ;;  %v5231_v41 = vld [vmem:[#allocation4] sm:$0xff] }
 0x935   : > { %5201 = vst.msk [vmem:[#allocation4 + $0x10] sm:$0xff] %vm5198_vm3, %v5107_v32  ;;  %v5109_v48 = vpop.permute.xlu0 %5108  ;;  %v5232_v22 = vld [vmem:[#allocation4 + $0x8] sm:$0xff] }
 0x936   : > { %5202 = vst.msk [vmem:[#allocation4 + $0x18] sm:$0xff] %vm5198_vm3, %v5109_v48  ;;  %v5263_v31 = vpack.c.bf16 %v5232_v22, %v5231_v41 }
 0x938   : > { %6491 = vmatprep.mubr.bf16.mxu0 %v5263_v31  ;;  %v5155_v44 = vpop.permute.xlu1 %5154  ;;  %v5255_v60 = vld [vmem:[#allocation4 + $0xc0] sm:$0xff] }
 0x939   : > { %5225 = vst.msk [vmem:[#allocation4 + $0xd0] sm:$0xff] %vm5198_vm3, %v5155_v44  ;;  %v5157_v13 = vpop.permute.xlu0 %5156  ;;  %v5256_v25 = vld [vmem:[#allocation4 + $0xc8] sm:$0xff] }
 0x93a   : > { %5226 = vst.msk [vmem:[#allocation4 + $0xd8] sm:$0xff] %vm5198_vm3, %v5157_v13  ;;  %v5275_v49 = vpack.c.bf16 %v5256_v25, %v5255_v60 }
 0x93c   : > { %6515 = vmatprep.mubr.bf16.mxu1 %v5275_v49  ;;  %v2705_v51 = vpop.permute.xlu1 %2704  ;;  %v5233_v57 = vld [vmem:[#allocation4 + $0x10] sm:$0xff] }
 0x93d   : > { %2797 = vst.msk [vmem:[#allocation4 + $0x20] sm:$0xff] %vm2792_vm1, %v2705_v51  ;;  %v2707_v24 = vpop.permute.xlu0 %2706  ;;  %v5234_v21 = vld [vmem:[#allocation4 + $0x18] sm:$0xff] }
 0x93e   : > { %2798 = vst.msk [vmem:[#allocation4 + $0x28] sm:$0xff] %vm2792_vm1, %v2707_v24  ;;  %v5264_v62 = vpack.c.bf16 %v5234_v21, %v5233_v57 }
 0x940   : > { %6492 = vmatmul.mubr.bf16.vlgmr.msra.gmra.mxu0 %v5264_v62  ;;  %v2753_v43 = vpop.permute.xlu1 %2752  ;;  %v5257_v0 = vld [vmem:[#allocation4 + $0xd0] sm:$0xff] }
 0x941   : > { %2821 = vst.msk [vmem:[#allocation4 + $0xe0] sm:$0xff] %vm2792_vm1, %v2753_v43  ;;  %v2755_v8 = vpop.permute.xlu0 %2754  ;;  %v5258_v10 = vld [vmem:[#allocation4 + $0xd8] sm:$0xff] }
 0x942   : > { %2822 = vst.msk [vmem:[#allocation4 + $0xe8] sm:$0xff] %vm2792_vm1, %v2755_v8  ;;  %v5276_v36 = vpack.c.bf16 %v5258_v10, %v5257_v0 }
 0x944   : > { %6516 = vmatmul.mubr.bf16.gmra.mxu1 %v5276_v36  ;;  %v2709_v34 = vpop.permute.xlu1 %2708 }
 0x945   : > { %2799 = vst.msk [vmem:[#allocation4 + $0x30] sm:$0xff] %vm2792_vm1, %v2709_v34  ;;  %v2711_v6 = vpop.permute.xlu0 %2710 }
 0x946   : > { %2800 = vst.msk [vmem:[#allocation4 + $0x38] sm:$0xff] %vm2792_vm1, %v2711_v6 }
 0x948   : > { %v2757_v55 = vpop.permute.xlu1 %2756 }
 0x949   : > { %2823 = vst.msk [vmem:[#allocation4 + $0xf0] sm:$0xff] %vm2792_vm1, %v2757_v55  ;;  %v2759_v35 = vpop.permute.xlu0 %2758 }
 0x94a   : > { %2824 = vst.msk [vmem:[#allocation4 + $0xf8] sm:$0xff] %vm2792_vm1, %v2759_v35 }
 0x94c   : > { %v3908_v38 = vpop.permute.xlu1 %3907 }
 0x94d   : > { %4000 = vst.msk [vmem:[#allocation4 + $0x20] sm:$0xff] %vm3995_vm2, %v3908_v38  ;;  %v3910_v33 = vpop.permute.xlu0 %3909 }
 0x94e   : > { %4001 = vst.msk [vmem:[#allocation4 + $0x28] sm:$0xff] %vm3995_vm2, %v3910_v33 }
 0x950   : > { %v3956_v54 = vpop.permute.xlu1 %3955 }
 0x951   : > { %4024 = vst.msk [vmem:[#allocation4 + $0xe0] sm:$0xff] %vm3995_vm2, %v3956_v54  ;;  %v3958_v20 = vpop.permute.xlu0 %3957 }
 0x952   : > { %4025 = vst.msk [vmem:[#allocation4 + $0xe8] sm:$0xff] %vm3995_vm2, %v3958_v20 }
 0x954   : > { %v3912_v50 = vpop.permute.xlu1 %3911 }
 0x955   : > { %4002 = vst.msk [vmem:[#allocation4 + $0x30] sm:$0xff] %vm3995_vm2, %v3912_v50  ;;  %v3914_v46 = vpop.permute.xlu0 %3913 }
 0x956   : > { %4003 = vst.msk [vmem:[#allocation4 + $0x38] sm:$0xff] %vm3995_vm2, %v3914_v46 }
 0x958   : > { %v3960_v2 = vpop.permute.xlu1 %3959 }
 0x959   : > { %4026 = vst.msk [vmem:[#allocation4 + $0xf0] sm:$0xff] %vm3995_vm2, %v3960_v2  ;;  %v3962_v56 = vpop.permute.xlu0 %3961 }
 0x95a   : > { %4027 = vst.msk [vmem:[#allocation4 + $0xf8] sm:$0xff] %vm3995_vm2, %v3962_v56 }
 0x95c   : > { %v5111_v3 = vpop.permute.xlu1 %5110 }
 0x95d   : > { %5203 = vst.msk [vmem:[#allocation4 + $0x20] sm:$0xff] %vm5198_vm3, %v5111_v3  ;;  %v5113_v15 = vpop.permute.xlu0 %5112 }
 0x95e   : > { %5204 = vst.msk [vmem:[#allocation4 + $0x28] sm:$0xff] %vm5198_vm3, %v5113_v15 }
 0x960   : > { %v5159_v4 = vpop.permute.xlu1 %5158 }
 0x961   : > { %5227 = vst.msk [vmem:[#allocation4 + $0xe0] sm:$0xff] %vm5198_vm3, %v5159_v4  ;;  %v5161_v63 = vpop.permute.xlu0 %5160 }
 0x962   : > { %5228 = vst.msk [vmem:[#allocation4 + $0xe8] sm:$0xff] %vm5198_vm3, %v5161_v63 }
 0x964   : > { %v5115_v37 = vpop.permute.xlu1 %5114  ;;  %v5235_v18 = vld [vmem:[#allocation4 + $0x20] sm:$0xff] }
 0x965   : > { %5205 = vst.msk [vmem:[#allocation4 + $0x30] sm:$0xff] %vm5198_vm3, %v5115_v37  ;;  %v5117_v47 = vpop.permute.xlu0 %5116  ;;  %v5236_v26 = vld [vmem:[#allocation4 + $0x28] sm:$0xff] }
 0x966   : > { %5206 = vst.msk [vmem:[#allocation4 + $0x38] sm:$0xff] %vm5198_vm3, %v5117_v47  ;;  %v5265_v17 = vpack.c.bf16 %v5236_v26, %v5235_v18 }
 0x968   : > { %6495 = vmatprep.mubr.bf16.mxu0 %v5265_v17  ;;  %v5163_v29 = vpop.permute.xlu1 %5162  ;;  %v5259_v27 = vld [vmem:[#allocation4 + $0xe0] sm:$0xff] }
 0x969   : > { %5229 = vst.msk [vmem:[#allocation4 + $0xf0] sm:$0xff] %vm5198_vm3, %v5163_v29  ;;  %v5165_v12 = vpop.permute.xlu0 %5164  ;;  %v5260_v9 = vld [vmem:[#allocation4 + $0xe8] sm:$0xff] }
 0x96a   : > { %5230 = vst.msk [vmem:[#allocation4 + $0xf8] sm:$0xff] %vm5198_vm3, %v5165_v12  ;;  %v5277_v59 = vpack.c.bf16 %v5260_v9, %v5259_v27 }
 0x96c   : > { %6519 = vmatprep.mubr.bf16.mxu1 %v5277_v59  ;;  %v5237_v23 = vld [vmem:[#allocation4 + $0x30] sm:$0xff] }
 0x96d   : > { %v5238_v28 = vld [vmem:[#allocation4 + $0x38] sm:$0xff] }
 0x96e   : > { %v5266_v16 = vpack.c.bf16 %v5238_v28, %v5237_v23 }
 0x96f   : > { %v6505_v61 = vpop.f32.mrf.mxu1 }
 0x970   : > { %5518 = vst [vmem:[%s11294_s30 + $0x70] sm:$0xff] %v6505_v61  ;;  %6496 = vmatmul.mubr.bf16.gmra.mxu0 %v5266_v16  ;;  %v5261_v5 = vld [vmem:[#allocation4 + $0xf0] sm:$0xff] }
 0x971   : > { %v5425_v58 = vpop.f32.mrf.mxu1  ;;  %v5262_v52 = vld [vmem:[#allocation4 + $0xf8] sm:$0xff] }
 0x972   : > { %5516 = vst [vmem:[%s11294_s30 + $0x60] sm:$0xff] %v5425_v58  ;;  %v5278_v30 = vpack.c.bf16 %v5262_v52, %v5261_v5 }
 0x973   : > { %v6506_v7 = vpop.f32.mrf.mxu1 }
 0x974   : > { %5519 = vst [vmem:[%s11294_s30 + $0x78] sm:$0xff] %v6506_v7  ;;  %6520 = vmatmul.mubr.bf16.gmra.mxu1 %v5278_v30 }
 0x975   : > { %v5428_v42 = vpop.f32.mrf.mxu1 }
 0x976   : > { %5517 = vst [vmem:[%s11294_s30 + $0x68] sm:$0xff] %v5428_v42 }
 0x9bc   : > { %v6509_v11 = vpop.f32.mrf.mxu1 }
 0x9bd   : > { %5522 = vst [vmem:[%s11294_s30 + $0x90] sm:$0xff] %v6509_v11 }
 0x9be   : > { %v5441_v45 = vpop.f32.mrf.mxu1 }
 0x9bf   : > { %5520 = vst [vmem:[%s11294_s30 + $0x80] sm:$0xff] %v5441_v45 }
 0x9c0   : > { %v6510_v39 = vpop.f32.mrf.mxu1 }
 0x9c1   : > { %5523 = vst [vmem:[%s11294_s30 + $0x98] sm:$0xff] %v6510_v39 }
 0x9c2   : > { %v5444_v40 = vpop.f32.mrf.mxu1 }
 0x9c3   : > { %5521 = vst [vmem:[%s11294_s30 + $0x88] sm:$0xff] %v5444_v40 }
 0x9d4   : > { %v6513_v19 = vpop.f32.mrf.mxu1 }
 0x9d5   : > { %5526 = vst [vmem:[%s11294_s30 + $0xb0] sm:$0xff] %v6513_v19 }
 0x9d6   : > { %v5457_v14 = vpop.f32.mrf.mxu1 }
 0x9d7   : > { %5524 = vst [vmem:[%s11294_s30 + $0xa0] sm:$0xff] %v5457_v14 }
 0x9d8   : > { %v6514_v53 = vpop.f32.mrf.mxu1 }
 0x9d9   : > { %5527 = vst [vmem:[%s11294_s30 + $0xb8] sm:$0xff] %v6514_v53 }
 0x9da   : > { %v5460_v1 = vpop.f32.mrf.mxu1 }
 0x9db   : > { %5525 = vst [vmem:[%s11294_s30 + $0xa8] sm:$0xff] %v5460_v1 }
 0xa00   : > { %v6493_v32 = vpop.f32.mrf.mxu0 }
 0xa01   : > { %5506 = vst [vmem:[%s11294_s30 + $0x10] sm:$0xff] %v6493_v32 }
 0xa02   : > { %v5377_v41 = vpop.f32.mrf.mxu0 }
 0xa03   : > { %5504 = vst [vmem:[%s11294_s30] sm:$0xff] %v5377_v41 }
 0xa04   : > { %v6494_v48 = vpop.f32.mrf.mxu0  ;;  %v6517_v22 = vpop.f32.mrf.mxu1 }
 0xa05   : > { %5507 = vst [vmem:[%s11294_s30 + $0x18] sm:$0xff] %v6494_v48  ;;  %5530 = vst [vmem:[%s11294_s30 + $0xd0] sm:$0xff] %v6517_v22 }
 0xa06   : > { %v5380_v31 = vpop.f32.mrf.mxu0  ;;  %v5473_v44 = vpop.f32.mrf.mxu1 }
 0xa07   : > { %5505 = vst [vmem:[%s11294_s30 + $0x8] sm:$0xff] %v5380_v31  ;;  %5528 = vst [vmem:[%s11294_s30 + $0xc0] sm:$0xff] %v5473_v44 }
 0xa08   : > { %v6518_v60 = vpop.f32.mrf.mxu1 }
 0xa09   : > { %5531 = vst [vmem:[%s11294_s30 + $0xd8] sm:$0xff] %v6518_v60 }
 0xa0a   : > { %v5476_v13 = vpop.f32.mrf.mxu1 }
 0xa0b   : > { %5529 = vst [vmem:[%s11294_s30 + $0xc8] sm:$0xff] %v5476_v13 }
 0xa30   : > { %v6497_v25 = vpop.f32.mrf.mxu0 }
 0xa31   : > { %5510 = vst [vmem:[%s11294_s30 + $0x30] sm:$0xff] %v6497_v25 }
 0xa32   : > { %v5393_v49 = vpop.f32.mrf.mxu0 }
 0xa33   : > { %5508 = vst [vmem:[%s11294_s30 + $0x20] sm:$0xff] %v5393_v49 }
 0xa34   : > { %v6498_v51 = vpop.f32.mrf.mxu0  ;;  %v6521_v57 = vpop.f32.mrf.mxu1 }
 0xa35   : > { %5511 = vst [vmem:[%s11294_s30 + $0x38] sm:$0xff] %v6498_v51  ;;  %5534 = vst [vmem:[%s11294_s30 + $0xf0] sm:$0xff] %v6521_v57 }
 0xa36   : > { %v5396_v24 = vpop.f32.mrf.mxu0  ;;  %v5489_v21 = vpop.f32.mrf.mxu1 }
 0xa37   : > { %5509 = vst [vmem:[%s11294_s30 + $0x28] sm:$0xff] %v5396_v24  ;;  %5532 = vst [vmem:[%s11294_s30 + $0xe0] sm:$0xff] %v5489_v21 }
 0xa38   : > { %v6522_v62 = vpop.f32.mrf.mxu1 }
 0xa39   : > { %5535 = vst [vmem:[%s11294_s30 + $0xf8] sm:$0xff] %v6522_v62 }
 0xa3a   : > { %v5492_v43 = vpop.f32.mrf.mxu1 }
 0xa3b   : > { %5533 = vst [vmem:[%s11294_s30 + $0xe8] sm:$0xff] %v5492_v43 }
 0xa3c   : > { %7494 = shalt.err (!%p7491_p5)
}
 0xa3d   : > { %s7495_s14 = scalar_lea.hbm %s11396_s9, 4096  ;;  %s7499_s29 = scalar_lea.hbm %s11453_s4, 8192 }
 0xa3e   : > { %p7496_p6 = scmp.ne.s32.totalorder %s11396_s9, %s7495_s14  ;;  %p7500_p10 = scmp.lt.s32.totalorder %s11396_s9, %s11453_s4 }
 0xa3f   : > { %p7501_p11 = scmp.lt.s32.totalorder %s7499_s29, %s7495_s14 }
 0xa40   : > { %p7497_p7 = pnand %p7496_p6, %p7630_p4 }
 0xa41   : > { %p7502_p12 = por %p7501_p11, %p7500_p10 }
 0xa42   : > { %p7498_p9 = pneg %p7497_p7 }
 0xa44   : > { %p7503_p13 = pnand %p7502_p12, %p7498_p9 }
 0xa46   : > { %7506 = shalt.err (!%p7503_p13)
}
 0xa47   : > { %s7563_s30 = smov 128   ;;  %s7564_s8 = smov 8  }
 0xa48   : > { %6571 = dma.vmem_to_hbm [thread:$0]  (%p7630_p4), %s11398_s5, 4096, %s11396_s9, %s11404_s18, %s7563_s30, %s7563_s30, %s7564_s8  }
 0xa49 PF: > { %p6577_p0 = scmp.ge.s32.totalorder %s7557_s20, 2  ;;  %s5567_s6 = sand.u32 1, %s7537_s15  }
 0xa4a   : > { %s5568_s7 = scalar_lea.sflag [#allocation6], %s5567_s6 }
 0xa4b   : > { %p6574_p1 = pnand %p6577_p0, %p7637_p8 }
 0xa4d   : > { %p6575_p2 = pneg %p6574_p1 }
 0xa4f   : > { %7532 = dma.done.wait (%p6575_p2), %s5568_s7, 4096  }
 0xa50   : > { %7534 = vsyncadd (%p6575_p2), %s5568_s7, 4294963200  ;;  %s17_s20 = sadd.s32 1, %s7557_s20   ;;  %s12444_s15 = smov %s7541_s16 }
 0xa51   : > { %p14_p3 = scmp.ge.s32.totalorder %s17_s20, 4   ;;  %s12445_s16 = smov %s7545_s17 }
 0xa52   : > { %s12446_s17 = smov %s7643_s28  ;;  %s12447_s18 = smov %s7553_s19 }
 0xa53   : > { %s12448_s19 = smov %s12450_s23  ;;  %16 = sbr.rel (!%p14_p3) target bundleno = 4 (0x4), region = 77 }
 0xa58   :  { %5573 = vsyncpa [#allocation6], 1 }
 0xa59   :  { %5575 = vsyncpa [#allocation6 + $0x1], 1 }

</bundles_post_ra>
